<compile_context>
chip_gen: v5e
topology: v5e:2x2
jax: 0.10.0
libtpu: 0.0.40
codegen_flags: <defaults>
</compile_context>

<pallas_src>
import functools

import jax
import jax.numpy as jnp
from jax.experimental import pallas as pl
from jax.experimental.pallas import tpu as pltpu

ENCODING_DIM = 4096
EMBEDDING_DIM = 300   # logical (PyTorch) width
HIDDEN_DIM = 400      # logical (PyTorch) width
EMB_P = 384           # lane-aligned padded embedding width (3 * 128)
HID_P = 512           # lane-aligned padded hidden width   (4 * 128)
VCHUNK = 512          # vocab chunk width for the in-kernel projection loop


def _round_up(x, m):
    return (x + m - 1) // m * m


# ----------------------------------------------------------------------------
# Kernel 1: encoder linear  relu(x @ w + b)  with K-reduction accumulator
# ----------------------------------------------------------------------------
def _encoder_kernel(x_ref, w_ref, b_ref, o_ref, acc_ref):
    k = pl.program_id(1)

    @pl.when(k == 0)
    def _():
        acc_ref[...] = jnp.zeros_like(acc_ref)

    acc_ref[...] += jnp.dot(x_ref[...], w_ref[...],
                            preferred_element_type=jnp.float32)

    @pl.when(k == pl.num_programs(1) - 1)
    def _():
        o_ref[...] = jnp.maximum(acc_ref[...] + b_ref[...], 0.0).astype(o_ref.dtype)


def encoder_linear(x, w, b, *, tn=2048, tk=1024):
    """relu(x @ w + b) with large weight tiles (amortizes per-grid-step cost)."""
    M, K = x.shape
    Kw, N = w.shape
    assert K == Kw
    tn = min(tn, N)
    tk = min(tk, K)
    assert N % tn == 0 and K % tk == 0
    return pl.pallas_call(
        _encoder_kernel,
        out_shape=jax.ShapeDtypeStruct((M, N), jnp.bfloat16),
        grid=(N // tn, K // tk),
        in_specs=[
            pl.BlockSpec((M, tk), lambda j, k: (0, k)),
            pl.BlockSpec((tk, tn), lambda j, k: (k, j)),
            pl.BlockSpec((1, tn), lambda j, k: (0, j)),
        ],
        out_specs=pl.BlockSpec((M, tn), lambda j, k: (0, j)),
        scratch_shapes=[pltpu.VMEM((M, tn), jnp.float32)],
        compiler_params=pltpu.CompilerParams(
            dimension_semantics=("parallel", "arbitrary"),
            vmem_limit_bytes=32 * 1024 * 1024),
    )(x, w, b.reshape(1, N))


# ----------------------------------------------------------------------------
# Kernel 2: fused greedy LSTM decoder — the entire time loop in one pallas_call
# ----------------------------------------------------------------------------
def _decoder_kernel(enc_ref, fw_ref, fb_ref, w_ref, b_ref, ow_ref, ob_ref,
                    emb_ref, logits_ref, xh_ref, c_ref, *, vocab):
    t = pl.program_id(0)
    bp = xh_ref.shape[0]
    ep = EMB_P
    hp = c_ref.shape[1]
    nj, _, vc = ow_ref.shape

    # --- t == 0: fold the 4096 -> EMB_P feature projection in, init state ----
    @pl.when(t == 0)
    def _():
        x0 = jnp.dot(enc_ref[...], fw_ref[...],
                     preferred_element_type=jnp.float32) + fb_ref[...]
        xh_ref[:, :ep] = x0.astype(xh_ref.dtype)
        xh_ref[:, ep:] = jnp.zeros((bp, hp), xh_ref.dtype)
        c_ref[...] = jnp.zeros_like(c_ref)

    # --- LSTM step: one (B, E+H) @ (E+H, 4H) matmul; gate math in f32 --------
    # PyTorch LSTM gate order: i, f, g, o.
    gates = jnp.dot(xh_ref[...], w_ref[...],
                    preferred_element_type=jnp.float32) + b_ref[...]
    i_g = jax.nn.sigmoid(gates[:, 0 * hp:1 * hp])
    f_g = jax.nn.sigmoid(gates[:, 1 * hp:2 * hp])
    g_g = jnp.tanh(gates[:, 2 * hp:3 * hp])
    o_g = jax.nn.sigmoid(gates[:, 3 * hp:4 * hp])
    c_new = f_g * c_ref[...] + i_g * g_g
    h_new = o_g * jnp.tanh(c_new)
    c_ref[...] = c_new
    h_b = h_new.astype(jnp.bfloat16)
    xh_ref[:, ep:] = h_b

    # --- chunked vocab projection + online argmax + embedding lookup ---------
    # Running carry: (row max over chunks seen so far, embedding of that token).
    def vocab_chunk(j, carry):
        run_max, x_next = carry
        chunk = jnp.dot(h_b, ow_ref[j],
                        preferred_element_type=jnp.float32) + ob_ref[j]
        logits_ref[j] = chunk.astype(logits_ref.dtype)      # lane-dense store
        col = jax.lax.broadcasted_iota(jnp.int32, (bp, vc), 1)
        masked = jnp.where(col + j * vc < vocab, chunk, -jnp.inf)
        loc_max = jnp.max(masked, axis=-1, keepdims=True)
        loc_arg = jnp.min(jnp.where(masked == loc_max, col, vc),
                          axis=-1, keepdims=True)            # first-hit argmax
        onehot = (col == loc_arg).astype(jnp.bfloat16)
        x_cand = jnp.dot(onehot, emb_ref[j],
                         preferred_element_type=jnp.float32)
        better = loc_max > run_max                           # earlier chunk wins ties
        return (jnp.where(better, loc_max, run_max),
                jnp.where(better, x_cand, x_next))

    init = (jnp.full((bp, 1), -jnp.inf, jnp.float32),
            jnp.zeros((bp, ep), jnp.float32))
    _, x_next = jax.lax.fori_loop(0, nj, vocab_chunk, init)
    xh_ref[:, :ep] = x_next.astype(xh_ref.dtype)             # next-step input


def fused_greedy_decode(enc, feat_w, feat_b, lstm_w, lstm_b, out_w3, out_b3,
                        embed3, *, T, vocab):
    bp = enc.shape[0]
    nj, _, vc = out_w3.shape
    const2 = lambda t: (0, 0)
    const3 = lambda t: (0, 0, 0)
    return pl.pallas_call(
        functools.partial(_decoder_kernel, vocab=vocab),
        out_shape=jax.ShapeDtypeStruct((T, nj, bp, vc), jnp.bfloat16),
        grid=(T,),
        in_specs=[
            # Constant index_maps: blocks are fetched once and stay VMEM-resident.
            pl.BlockSpec((bp, ENCODING_DIM), const2),
            pl.BlockSpec((ENCODING_DIM, EMB_P), const2),
            pl.BlockSpec((1, EMB_P), const2),
            pl.BlockSpec((EMB_P + HID_P, 4 * HID_P), const2),
            pl.BlockSpec((1, 4 * HID_P), const2),
            pl.BlockSpec((nj, HID_P, vc), const3),
            pl.BlockSpec((nj, 1, vc), const3),
            pl.BlockSpec((nj, vc, EMB_P), const3),
        ],
        out_specs=pl.BlockSpec((None, nj, bp, vc), lambda t: (t, 0, 0, 0)),
        scratch_shapes=[
            pltpu.VMEM((bp, EMB_P + HID_P), jnp.bfloat16),   # [x_t | h_t] bf16
            pltpu.VMEM((bp, HID_P), jnp.float32),            # c_t
        ],
        compiler_params=pltpu.CompilerParams(
            dimension_semantics=("arbitrary",),
            vmem_limit_bytes=48 * 1024 * 1024),
    )(enc, feat_w, feat_b, lstm_w, lstm_b, out_w3, out_b3, embed3)


# ----------------------------------------------------------------------------
# Parameters (logical PyTorch shapes, zero-padded to lane-aligned widths)
# ----------------------------------------------------------------------------
def init_params(key, vocab, image_shape, *, tk_enc=1024):
    _, C, H, W = image_shape
    in_feat = C * H * W
    k_pad = _round_up(in_feat, tk_enc)
    vocab_p = _round_up(vocab, VCHUNK)
    nj = vocab_p // VCHUNK
    ks = jax.random.split(key, 6)

    def w(k, shape, fan_in):
        return jax.random.normal(k, shape, jnp.float32) / jnp.sqrt(fan_in)

    # Logical (PyTorch-shaped) weights.
    enc_w = w(ks[0], (in_feat, ENCODING_DIM), in_feat)
    feat_w = w(ks[1], (ENCODING_DIM, EMBEDDING_DIM), ENCODING_DIM)
    embed = w(ks[2], (vocab, EMBEDDING_DIM), EMBEDDING_DIM)
    lstm_wx = w(ks[3], (EMBEDDING_DIM, 4 * HIDDEN_DIM), EMBEDDING_DIM)
    lstm_wh = w(ks[4], (HIDDEN_DIM, 4 * HIDDEN_DIM), HIDDEN_DIM)
    out_w = w(ks[5], (HIDDEN_DIM, vocab), HIDDEN_DIM)

    def pad2(a, r, c):
        return jnp.pad(a, ((0, r - a.shape[0]), (0, c - a.shape[1])))

    def pad_gate_cols(wg, h, hp):  # pad each of the 4 gate blocks to hp lanes
        k = wg.shape[0]
        return jnp.pad(wg.reshape(k, 4, h),
                       ((0, 0), (0, 0), (0, hp - h))).reshape(k, 4 * hp)

    wx_p = pad2(pad_gate_cols(lstm_wx, HIDDEN_DIM, HID_P), EMB_P, 4 * HID_P)
    wh_p = pad2(pad_gate_cols(lstm_wh, HIDDEN_DIM, HID_P), HID_P, 4 * HID_P)
    lstm_w = jnp.concatenate([wx_p, wh_p], axis=0)          # stacked [Wx; Wh]
    lstm_b = jnp.zeros((1, 4 * HID_P), jnp.float32)          # b_ih + b_hh (both 0)

    out_w_p = pad2(out_w, HID_P, vocab_p)                    # (HID_P, vocab_p)
    out_w3 = out_w_p.reshape(HID_P, nj, VCHUNK).transpose(1, 0, 2)   # (nj,H,VC)
    out_b3 = jnp.zeros((nj, 1, VCHUNK), jnp.float32)
    embed3 = pad2(embed, vocab_p, EMB_P).reshape(nj, VCHUNK, EMB_P)  # (nj,VC,E)

    return {
        "enc_w": pad2(enc_w, k_pad, ENCODING_DIM).astype(jnp.bfloat16),
        "enc_b": jnp.zeros((ENCODING_DIM,), jnp.float32),
        "feat_w": pad2(feat_w, ENCODING_DIM, EMB_P).astype(jnp.bfloat16),
        "feat_b": jnp.zeros((1, EMB_P), jnp.float32),
        "lstm_w": lstm_w.astype(jnp.bfloat16),
        "lstm_b": lstm_b,
        "out_w3": out_w3.astype(jnp.bfloat16),
        "out_b3": out_b3,
        "embed3": embed3.astype(jnp.bfloat16),
        "vocab": vocab,
        "vocab_p": vocab_p,
        "tk_enc": tk_enc,
    }


# ----------------------------------------------------------------------------
# Model forward (thin JAX glue around the two Pallas kernels)
# ----------------------------------------------------------------------------
def encoder_forward(params, images, *, tn=2048):
    B = images.shape[0]
    flat = images.reshape(B, -1).astype(jnp.bfloat16)        # NCHW flattened
    bp = _round_up(B, 16)                                    # bf16 sublane tile
    kp = params["enc_w"].shape[0]
    flat = jnp.pad(flat, ((0, bp - B), (0, kp - flat.shape[1])))
    return encoder_linear(flat, params["enc_w"], params["enc_b"],
                          tn=tn, tk=params["tk_enc"])        # (bp, 4096) bf16


def decoder_forward(params, encoded_images, lengths):
    T = int(max(lengths))
    return fused_greedy_decode(
        encoded_images, params["feat_w"], params["feat_b"],
        params["lstm_w"], params["lstm_b"],
        params["out_w3"], params["out_b3"], params["embed3"],
        T=T, vocab=params["vocab"])                          # (T, nj, bp, VC) bf16


def net_forward(params, input_batch):
    images, captions, lengths = input_batch
    del captions  # TODO(synk): greedy decode; captions not consumed (see header)
    B = images.shape[0]
    encoded_images = encoder_forward(params, images)
    logits = decoder_forward(params, encoded_images, lengths)
    T, nj, bp, vc = logits.shape
    # (T, nj, bp, vc) -> (B, T, vocab): chunk j, lane v maps to vocab id j*vc+v.
    out = jnp.transpose(logits, (2, 0, 1, 3)).reshape(bp, T, nj * vc)
    return out[:B, :, :params["vocab"]].astype(jnp.float32)


# ----------------------------------------------------------------------------
if __name__ == "__main__":
    B, C, HW = 2, 3, 16
    VOCAB = 128
    T = 8

    key = jax.random.PRNGKey(0)
    k_img, k_cap, k_param = jax.random.split(key, 3)

    images = jax.random.normal(k_img, (B, C, HW, HW), jnp.float32)
    captions = jax.random.randint(k_cap, (B, T), 0, VOCAB, dtype=jnp.int32)
    lengths = [T, 6]

    params = init_params(k_param, VOCAB, images.shape)

    out = net_forward(params, (images, captions, lengths))
    jax.block_until_ready(out)
    assert out.shape == (B, T, VOCAB)
    print("KERNEL_OK")
</pallas_src>

<mosaic_0001>
module attributes {stable_mosaic.version = 11 : i64} {
  func.func @_encoder_kernel(%arg0: i32, %arg1: i32, %arg2: memref<16x1024xbf16, #tpu.memory_space<vmem>>, %arg3: memref<1024x2048xbf16, #tpu.memory_space<vmem>>, %arg4: memref<1x2048xf32, #tpu.memory_space<vmem>>, %arg5: memref<16x2048xbf16, #tpu.memory_space<vmem>>, %arg6: memref<16x2048xf32, #tpu.memory_space<vmem>>) attributes {dimension_semantics = [#tpu.dimension_semantics<parallel>, #tpu.dimension_semantics<arbitrary>], iteration_bounds = array<i64: 2, 1>, scalar_prefetch = 0 : i64, scratch_operands = 1 : i64, tpu.core_type = #tpu.core_type<tc>, window_params = [{transform_indices = @transform_0, window_bounds = array<i64: 16, 1024>}, {transform_indices = @transform_1, window_bounds = array<i64: 1024, 2048>}, {transform_indices = @transform_2, window_bounds = array<i64: 1, 2048>}, {transform_indices = @transform_3, window_bounds = array<i64: 16, 2048>}]} {
    %c0_i32 = arith.constant 0 : i32
    %0 = arith.cmpi eq, %arg1, %c0_i32 : i32
    %1 = arith.extui %0 : i1 to i32
    %c0_i32_0 = arith.constant 0 : i32
    %2 = arith.cmpi ne, %1, %c0_i32_0 : i32
    scf.if %2 {
      %cst_10 = arith.constant 0.000000e+00 : f32
      %12 = vector.broadcast %cst_10 : f32 to vector<16x2048xf32>
      %c0_11 = arith.constant 0 : index
      %c0_12 = arith.constant 0 : index
      %13 = vector.load %arg6[%c0_11, %c0_12] : memref<16x2048xf32, #tpu.memory_space<vmem>>, vector<16x2048xf32>
      tpu.vector_store %arg6[%c0_11, %c0_12], %12 {strides = array<i32>} : memref<16x2048xf32, #tpu.memory_space<vmem>>, vector<16x2048xf32>,
    } else {
    }
    %c0 = arith.constant 0 : index
    %c0_1 = arith.constant 0 : index
    %3 = vector.load %arg6[%c0, %c0_1] : memref<16x2048xf32, #tpu.memory_space<vmem>>, vector<16x2048xf32>
    %c0_2 = arith.constant 0 : index
    %c0_3 = arith.constant 0 : index
    %4 = vector.load %arg2[%c0_2, %c0_3] : memref<16x1024xbf16, #tpu.memory_space<vmem>>, vector<16x1024xbf16>
    %c0_4 = arith.constant 0 : index
    %c0_5 = arith.constant 0 : index
    %5 = vector.load %arg3[%c0_4, %c0_5] : memref<1024x2048xbf16, #tpu.memory_space<vmem>>, vector<1024x2048xbf16>
    %cst = arith.constant dense<0.000000e+00> : vector<16x2048xf32>
    %6 = tpu.matmul %4, %5, %cst {dimension_numbers = #tpu.dot_dimension_numbers<[1], [0], [0], [1], [0, 0, 1, 1], [], []>} : vector<16x1024xbf16>, vector<1024x2048xbf16>, vector<16x2048xf32> -> vector<16x2048xf32>
    %7 = arith.addf %3, %6 : vector<16x2048xf32>
    %c0_6 = arith.constant 0 : index
    %c0_7 = arith.constant 0 : index
    %8 = vector.load %arg6[%c0_6, %c0_7] : memref<16x2048xf32, #tpu.memory_space<vmem>>, vector<16x2048xf32>
    tpu.vector_store %arg6[%c0_6, %c0_7], %7 {strides = array<i32>} : memref<16x2048xf32, #tpu.memory_space<vmem>>, vector<16x2048xf32>,
    %c0_i32_8 = arith.constant 0 : i32
    %9 = arith.cmpi eq, %arg1, %c0_i32_8 : i32
    %10 = arith.extui %9 : i1 to i32
    %c0_i32_9 = arith.constant 0 : i32
    %11 = arith.cmpi ne, %10, %c0_i32_9 : i32
    scf.if %11 {
      %c0_10 = arith.constant 0 : index
      %c0_11 = arith.constant 0 : index
      %12 = vector.load %arg6[%c0_10, %c0_11] : memref<16x2048xf32, #tpu.memory_space<vmem>>, vector<16x2048xf32>
      %c0_12 = arith.constant 0 : index
      %c0_13 = arith.constant 0 : index
      %13 = vector.load %arg4[%c0_12, %c0_13] : memref<1x2048xf32, #tpu.memory_space<vmem>>, vector<1x2048xf32>
      %14 = vector.broadcast %13 : vector<1x2048xf32> to vector<16x2048xf32>
      %15 = arith.addf %12, %14 : vector<16x2048xf32>
      %cst_14 = arith.constant 0.000000e+00 : f32
      %16 = vector.broadcast %cst_14 : f32 to vector<16x2048xf32>
      %17 = arith.maximumf %15, %16 : vector<16x2048xf32>
      %18 = arith.truncf %17 : vector<16x2048xf32> to vector<16x2048xbf16>
      %c0_15 = arith.constant 0 : index
      %c0_16 = arith.constant 0 : index
      %19 = vector.load %arg5[%c0_15, %c0_16] : memref<16x2048xbf16, #tpu.memory_space<vmem>>, vector<16x2048xbf16>
      tpu.vector_store %arg5[%c0_15, %c0_16], %18 {strides = array<i32>} : memref<16x2048xbf16, #tpu.memory_space<vmem>>, vector<16x2048xbf16>,
    } else {
    }
    return
  }
  func.func @transform_0(%arg0: i32, %arg1: i32) -> (i32, i32) {
    %c0_i32 = arith.constant 0 : i32
    %c0_i32_0 = arith.constant 0 : i32
    return %c0_i32, %arg1 : i32, i32
  }
  func.func @transform_1(%arg0: i32, %arg1: i32) -> (i32, i32) {
    %c0_i32 = arith.constant 0 : i32
    return %arg1, %arg0 : i32, i32
  }
  func.func @transform_2(%arg0: i32, %arg1: i32) -> (i32, i32) {
    %c0_i32 = arith.constant 0 : i32
    %c0_i32_0 = arith.constant 0 : i32
    return %c0_i32, %arg0 : i32, i32
  }
  func.func @transform_3(%arg0: i32, %arg1: i32) -> (i32, i32) {
    %c0_i32 = arith.constant 0 : i32
    %c0_i32_0 = arith.constant 0 : i32
    return %c0_i32, %arg0 : i32, i32
  }
}

</mosaic_0001>

<bundles_post_ra>
// kernel: tpu_custom_call.1
= control target key start
LH: loop header
LB: loop body
LE: loop exit
PB: predicated region body
PF: predicated region fallthrough
CT: control target
= control target key end

     0   :  { %s16985_s0 = inlined_call_operand.hbm [shape: bf16[16,1024], index: 0, kind: input, shape index: {}]   ;;  %s16986_s1 = inlined_call_operand.hbm [shape: bf16[1024,4096], index: 1, kind: input, shape index: {}]   ;;  %s16987_s2 = inlined_call_operand.hbm [shape: f32[1,4096], index: 2, kind: input, shape index: {}]   ;;  %s16988_s3 = inlined_call_operand.hbm [shape: bf16[16,4096], index: 3, kind: output, shape index: {}]  }
   0x1   :  { %16989 = sst [smem:[#allocation13_spill]] %s16985_s0 }
   0x2   :  { %16990 = sst [smem:[#allocation14_spill]] %s16986_s1 }
   0x3   :  { %8 = vsyncpa [#allocation4], 0 }
   0x4   :  { %9 = vsyncpa [#allocation7], 0 }
   0x5   :  { %11 = vsyncpa [#allocation7 + $0x1], 0 }
   0x6   :  { %12 = vsyncpa [#allocation5], 0 }
   0x7   :  { %14 = vsyncpa [#allocation5 + $0x1], 0  ;;  %s14171_s12 = smov 0   ;;  %s14173_s13 = smov 0  }
   0x8   :  { %s14175_s14 = smov 0   ;;  %s14177_s15 = smov 0  }
   0x9   :  { %s14179_s16 = smov 0   ;;  %s14181_s17 = smov 0  }
   0xa LB: > { %s32_s18 = sadd.s32 1, %s14136_s16  ;;  %s67_s19 = sadd.s32 1, %s14128_s14  ;;  %s14140_s17 = sphi %s14181_s17, %s20_s17   ;;  %s14136_s16 = sphi %s14179_s16, %s17003_s16   ;;  %s14132_s15 = sphi %s14177_s15, %s17002_s15   ;;  %s14128_s14 = sphi %s14175_s14, %s17001_s14   ;;  %s14124_s13 = sphi %s14173_s13, %s17000_s13   ;;  %s14120_s12 = sphi %s14171_s12, %s16999_s12  }
   0xb   : > { %p34_p0 = scmp.ge.s32.totalorder %s32_s18, 2  ;;  %p74_p1 = scmp.ne.s32.totalorder %s14128_s14, %s14124_s13 }
   0xc   : > { %p75_p2 = scmp.eq.s32.totalorder %s14140_s17, 0  ;;  %p8695_p3 = scmp.ge.s32.totalorder %s14140_s17, 2 }
   0xd   : > { %s17005_s18 = smov (%p34_p0, %s32_s18), 0  ;;  %p13899_p5 = scmp.lt.s32.totalorder %s14140_s17, 2 }
   0xe   : > { %p14212_p4 = por %p75_p2, %p74_p1  ;;  %s63_s21 = ssub.s32 %s14136_s16, %s17005_s18 }
   0xf   : > { %s173_s22 = sand.u32 1, %s14140_s17   ;;  %p65_p6 = scmp.eq.s32.totalorder %s63_s21, 0 }
  0x10   : > { %s175_s23 = sand.u32 1, %s14128_s14   ;;  %s12839_s24 = sshll.u32 %s14136_s16, 6 }
  0x11   : > { %s14223_s25 = scalar_select %p65_p6, %s14128_s14, %s67_s19  }
  0x12   : > { %s8696_s26 = sshll.u32 %s175_s23, 13  ;;  %s16992_s1 = sld [smem:[#allocation14_spill]] }
  0x13   : > { %s177_s4 = scalar_lea.vmem [#allocation6], %s8696_s26  ;;  %p14234_p7 = pnand %p13899_p5, %p14212_p4 }
  0x14   : > { %s188_s5 = sshll.u32 %s177_s4, 4  ;;  %s14238_s7 = scalar_lea.sflag [#allocation7], %s173_s22  ;;  %s189_s5 = int_to_ptr.vmem [resolvable:$true] %s188_s5 }
  0x15   : > { %s14142_s8 = smov 2048   ;;  %s14143_s9 = smov 1024  }
  0x16   : > { %s14144_s10 = smov 64   ;;  %s14244_s11 = sadd.s32 4294967295, %s14140_s17  }
  0x17   : > { %s8692_s19 = sadd.s32 4294967294, %s14140_s17   ;;  %p80_p8 = scmp.ne.s32.totalorder %s14124_s13, %s14120_s12 }
  0x18   : > { %s185_s29 = scalar_lea.hbm %s16992_s1, %s12839_s24  ;;  %p81_p9 = scmp.eq.s32.totalorder %s14244_s11, 0 }
  0x19   : > { %s186_s30 = sshll.u32 %s185_s29, 4  ;;  %p130_p10 = scmp.eq.s32.totalorder %s14244_s11, 1  ;;  %s187_s30 = int_to_ptr.hbm [resolvable:$true] %s186_s30 }
  0x1a   : > { %13890 = dma.hbm_to_vmem [thread:$0]  (!%p14234_p7), %s187_s30, 131072, %s189_s5, %s14238_s7, %s14142_s8, %s14143_s9, %s14144_s10  }
  0x1b   : > { %p136_p11 = scmp.eq.s32.totalorder %s8692_s19, 1  ;;  %p14253_p12 = por %p81_p9, %p80_p8 }
  0x1c   : > { %p8693_p13 = scmp.ge.s32.totalorder %s14140_s17, 1  ;;  %p14261_p0 = por %p130_p10, %p74_p1 }
  0x1d   : > { %p14265_p2 = por %p136_p11, %p80_p8  ;;  %p143_p4 = scmp.lt.s32.totalorder %s14140_s17, 3 }
  0x1e   : > { %s16997_s0 = sld [smem:[#allocation13_spill]]  ;;  %s14145_s29 = smov [#allocation3]  }
  0x1f   : > { %p14273_p5 = pnand %p8693_p13, %p143_p4  ;;  %s159_s30 = sshll.u32 %s14145_s29, 4  ;;  %s160_s30 = int_to_ptr.vmem [resolvable:$true] %s159_s30 }
  0x20   : > { %s8699_s4 = sshll.u32 %s175_s23, 4  ;;  %s8700_s5 = sshll.u32 %s14136_s16, 4 }
  0x21   : > { %p13883_p1 = pneg %p14273_p5  ;;  %s202_s8 = scalar_lea.vmem [#allocation8], %s8699_s4 }
  0x22   : > { %s210_s9 = sshll.u32 %s202_s8, 4  ;;  %s206_s24 = scalar_lea.hbm %s16987_s2, %s8700_s5  ;;  %s211_s9 = int_to_ptr.vmem [resolvable:$true] %s210_s9 }
  0x23   : > { %p13884_p6 = pnand %p13883_p1, %p81_p9  ;;  %s14146_s26 = smov 512  }
  0x24   : > { %s157_s27 = sshll.u32 %s16997_s0, 4  ;;  %s14147_s0 = smov 32   ;;  %s158_s27 = int_to_ptr.hbm [resolvable:$true] %s157_s27 }
  0x25   : > { %13886 = dma.hbm_to_vmem [thread:$0]  (!%p13884_p6), %s158_s27, 1024, %s160_s30, [#allocation4], %s14146_s26, %s14146_s26, %s14147_s0  }
  0x26   : > { %s208_s1 = sshll.u32 %s206_s24, 4  ;;  %219 = sbr.rel (%p14273_p5) target bundleno = 1771 (0x6eb), region = 32  ;;  %s209_s1 = int_to_ptr.hbm [resolvable:$true] %s208_s1 }
  0x27   : > { %13893 = dma.hbm_to_vmem [thread:$0]  (!%p14234_p7), %s209_s1, 256, %s211_s9, %s14238_s7  }
  0x2b   : > { %14107 = dma.done.wait (%p81_p9), [#allocation4], 1024  }
  0x2c   : > { %14109 = vsyncadd (%p81_p9), [#allocation4], 4294966272  ;;  %s226_s23 = sand.u32 1, %s14244_s11   ;;  %s14298_s29 = sand.u32 1, %s14124_s13  }
  0x2d   : > { %s8703_s0 = sshll.u32 %s14298_s29, 13  ;;  %s227_s27 = scalar_lea.sflag [#allocation7], %s226_s23 }
  0x2e   : > { %s14301_s6 = scalar_lea.vmem [#allocation6], %s8703_s0 }
  0x2f   : > { %14111 = dma.done.wait (%p14253_p12), %s227_s27, 131328  }
  0x30   : > { %14113 = vsyncadd (%p14253_p12), %s227_s27, 4294835968  ;;  %v9188_v0 = vld [vmem:[%s14301_s6 + $0x380] sm:$0xf]  ;;  %s8704_s1 = sshll.u32 %s14298_s29, 4  ;;  %s8705_s11 = sshll.u32 %s14298_s29, 7 }
  0x31   : > { %v12968_v1 = vld [vmem:[%s14301_s6 + $0x3bc] sm:$0xf0]  ;;  %s14945_s7 = scalar_lea.vmem [#allocation8], %s8704_s1  ;;  %s15004_s20 = scalar_lea.vmem [#allocation9], %s8705_s11 }
  0x32   : > { %v9700_v2 = vld [vmem:[%s14301_s6 + $0x780] sm:$0xf]  ;;  %v9189_v3 = vor.u32 %v12968_v1, %v9188_v0  ;;  %s13872_s28 = sshll.u32 %s14132_s15, 6  ;;  %s8570_s8 = sshll.u32 %s15004_s20, 4  ;;  %s8571_s8 = int_to_ptr.vmem [resolvable:$true] %s8570_s8 }
  0x33   : > { %v13096_v4 = vld [vmem:[%s14301_s6 + $0x7bc] sm:$0xf0]  ;;  %s8569_s5 = scalar_lea.hbm %s16988_s3, %s13872_s28  ;;  %s8558_s15 = scalar_lea.sflag [#allocation5], %s14298_s29 }
  0x34   : > { %v10212_v5 = vld [vmem:[%s14301_s6 + $0xb80] sm:$0xf]  ;;  %v9701_v7 = vor.u32 %v13096_v4, %v9700_v2  ;;  %6534 = vmatpush.bf16.msra.mxu0 %v9189_v3  ;;  %s8572_s9 = sshll.u32 %s8569_s5, 4  ;;  %s14074_s23 = scalar_lea.hbm %s16988_s3, 256  ;;  %s8573_s9 = int_to_ptr.hbm [resolvable:$true] %s8572_s9 }
  0x35   : > { %v13224_v6 = vld [vmem:[%s14301_s6 + $0xbbc] sm:$0xf0]  ;;  %s14068_s10 = sshra.s32 %s8573_s9, 4  ;;  %s14069_s10 = int_to_ptr.hbm [resolvable:$true] %s14068_s10 }
  0x36   : > { %v10213_v8 = vor.u32 %v13224_v6, %v10212_v5  ;;  %v10724_v9 = vld [vmem:[%s14301_s6 + $0xf80] sm:$0xf]  ;;  %6548 = vmatpush.bf16.msra.mxu1 %v9701_v7  ;;  %s14070_s19 = scalar_lea.hbm %s14069_s10, 128  ;;  %p14075_p10 = scmp.lt.s32.totalorder %s14069_s10, %s16988_s3 }
  0x37   : > { %v13352_v10 = vld [vmem:[%s14301_s6 + $0xfbc] sm:$0xf0]  ;;  %p14071_p7 = scmp.ne.s32.totalorder %s14069_s10, %s14070_s19  ;;  %p14076_p11 = scmp.lt.s32.totalorder %s14074_s23, %s14070_s19 }
  0x38   : > { %v9124_v11 = vld [vmem:[%s14301_s6 + $0x300] sm:$0xf]  ;;  %v10725_v12 = vor.u32 %v13352_v10, %v10724_v9  ;;  %6562 = vmatpush.bf16.msra.mxu2 %v10213_v8 }
  0x39   : > { %v12952_v13 = vld [vmem:[%s14301_s6 + $0x33c] sm:$0xf0]  ;;  %p14072_p8 = pnand %p14071_p7, %p14261_p0  ;;  %p14077_p12 = por %p14076_p11, %p14075_p10 }
  0x3a   : > { %v9636_v14 = vld [vmem:[%s14301_s6 + $0x700] sm:$0xf]  ;;  %v9125_v16 = vor.u32 %v12952_v13, %v9124_v11  ;;  %6576 = vmatpush.bf16.msra.mxu3 %v10725_v12 }
  0x3b   : > { %v13080_v15 = vld [vmem:[%s14301_s6 + $0x73c] sm:$0xf0]  ;;  %p14073_p9 = pneg %p14072_p8 }
  0x3c   : > { %v9637_v17 = vor.u32 %v13080_v15, %v9636_v14  ;;  %v10148_v18 = vld [vmem:[%s14301_s6 + $0xb00] sm:$0xf]  ;;  %6535 = vmatpush.bf16.msra.mxu0 %v9125_v16 }
  0x3d   : > { %v13208_v19 = vld [vmem:[%s14301_s6 + $0xb3c] sm:$0xf0]  ;;  %p14078_p13 = pnand %p14077_p12, %p14073_p9 }
  0x3e   : > { %v10660_v20 = vld [vmem:[%s14301_s6 + $0xf00] sm:$0xf]  ;;  %v10149_v21 = vor.u32 %v13208_v19, %v10148_v18  ;;  %6549 = vmatpush.bf16.msra.mxu1 %v9637_v17 }
  0x3f   : > { %v13336_v22 = vld [vmem:[%s14301_s6 + $0xf3c] sm:$0xf0] }
  0x40   : > { %v9060_v23 = vld [vmem:[%s14301_s6 + $0x280] sm:$0xf]  ;;  %v10661_v25 = vor.u32 %v13336_v22, %v10660_v20  ;;  %6563 = vmatpush.bf16.msra.mxu2 %v10149_v21 }
  0x41   : > { %v12936_v24 = vld [vmem:[%s14301_s6 + $0x2bc] sm:$0xf0] }
  0x42   : > { %v9572_v26 = vld [vmem:[%s14301_s6 + $0x680] sm:$0xf]  ;;  %v9061_v29 = vor.u32 %v12936_v24, %v9060_v23  ;;  %6577 = vmatpush.bf16.msra.mxu3 %v10661_v25 }
  0x43   : > { %v13064_v27 = vld [vmem:[%s14301_s6 + $0x6bc] sm:$0xf0] }
  0x44   : > { %v10084_v28 = vld [vmem:[%s14301_s6 + $0xa80] sm:$0xf]  ;;  %v9573_v33 = vor.u32 %v13064_v27, %v9572_v26  ;;  %6536 = vmatpush.bf16.msra.mxu0 %v9061_v29 }
  0x45   : > { %v13192_v30 = vld [vmem:[%s14301_s6 + $0xabc] sm:$0xf0] }
  0x46   : > { %v10596_v31 = vld [vmem:[%s14301_s6 + $0xe80] sm:$0xf]  ;;  %v10085_v34 = vor.u32 %v13192_v30, %v10084_v28  ;;  %6550 = vmatpush.bf16.msra.mxu1 %v9573_v33 }
  0x47   : > { %v13320_v32 = vld [vmem:[%s14301_s6 + $0xebc] sm:$0xf0] }
  0x48   : > { %v8996_v35 = vld [vmem:[%s14301_s6 + $0x200] sm:$0xf]  ;;  %v10597_v38 = vor.u32 %v13320_v32, %v10596_v31  ;;  %6564 = vmatpush.bf16.msra.mxu2 %v10085_v34 }
  0x49   : > { %v12920_v36 = vld [vmem:[%s14301_s6 + $0x23c] sm:$0xf0] }
  0x4a   : > { %v9508_v37 = vld [vmem:[%s14301_s6 + $0x600] sm:$0xf]  ;;  %v8997_v44 = vor.u32 %v12920_v36, %v8996_v35  ;;  %6578 = vmatpush.bf16.msra.mxu3 %v10597_v38 }
  0x4b   : > { %v13048_v39 = vld [vmem:[%s14301_s6 + $0x63c] sm:$0xf0] }
  0x4c   : > { %v10020_v40 = vld [vmem:[%s14301_s6 + $0xa00] sm:$0xf]  ;;  %v9509_v45 = vor.u32 %v13048_v39, %v9508_v37  ;;  %6537 = vmatpush.bf16.msra.mxu0 %v8997_v44 }
  0x4d   : > { %v13176_v41 = vld [vmem:[%s14301_s6 + $0xa3c] sm:$0xf0] }
  0x4e   : > { %v10532_v42 = vld [vmem:[%s14301_s6 + $0xe00] sm:$0xf]  ;;  %v10021_v46 = vor.u32 %v13176_v41, %v10020_v40  ;;  %6551 = vmatpush.bf16.msra.mxu1 %v9509_v45 }
  0x4f   : > { %v13304_v43 = vld [vmem:[%s14301_s6 + $0xe3c] sm:$0xf0] }
  0x50   : > { %v8932_v47 = vld [vmem:[%s14301_s6 + $0x180] sm:$0xf]  ;;  %v10533_v50 = vor.u32 %v13304_v43, %v10532_v42  ;;  %6565 = vmatpush.bf16.msra.mxu2 %v10021_v46 }
  0x51   : > { %v12904_v48 = vld [vmem:[%s14301_s6 + $0x1bc] sm:$0xf0] }
  0x52   : > { %v9444_v49 = vld [vmem:[%s14301_s6 + $0x580] sm:$0xf]  ;;  %v8933_v56 = vor.u32 %v12904_v48, %v8932_v47  ;;  %6579 = vmatpush.bf16.msra.mxu3 %v10533_v50 }
  0x53   : > { %v13032_v51 = vld [vmem:[%s14301_s6 + $0x5bc] sm:$0xf0] }
  0x54   : > { %v9956_v52 = vld [vmem:[%s14301_s6 + $0x980] sm:$0xf]  ;;  %v9445_v57 = vor.u32 %v13032_v51, %v9444_v49  ;;  %6538 = vmatpush.bf16.msra.mxu0 %v8933_v56 }
  0x55   : > { %v13160_v53 = vld [vmem:[%s14301_s6 + $0x9bc] sm:$0xf0] }
  0x56   : > { %v10468_v54 = vld [vmem:[%s14301_s6 + $0xd80] sm:$0xf]  ;;  %v9957_v58 = vor.u32 %v13160_v53, %v9956_v52  ;;  %6552 = vmatpush.bf16.msra.mxu1 %v9445_v57 }
  0x57   : > { %v13288_v55 = vld [vmem:[%s14301_s6 + $0xdbc] sm:$0xf0] }
  0x58   : > { %v8868_v59 = vld [vmem:[%s14301_s6 + $0x100] sm:$0xf]  ;;  %v10469_v62 = vor.u32 %v13288_v55, %v10468_v54  ;;  %6566 = vmatpush.bf16.msra.mxu2 %v9957_v58  ;;  %v8716_v54 = vld [vmem:[#allocation3 + $0x8] sm:$0xf] }
  0x59   : > { %v12888_v60 = vld [vmem:[%s14301_s6 + $0x13c] sm:$0xf0] }
  0x5a   : > { %v9380_v61 = vld [vmem:[%s14301_s6 + $0x500] sm:$0xf]  ;;  %v8869_v4 = vor.u32 %v12888_v60, %v8868_v59  ;;  %6580 = vmatpush.bf16.msra.mxu3 %v10469_v62  ;;  %v12845_v59 = vld [vmem:[#allocation3 + $0x24] sm:$0xf0] }
  0x5b   : > { %v13016_v63 = vld [vmem:[%s14301_s6 + $0x53c] sm:$0xf0] }
  0x5c   : > { %v9892_v0 = vld [vmem:[%s14301_s6 + $0x900] sm:$0xf]  ;;  %v9381_v5 = vor.u32 %v13016_v63, %v9380_v61  ;;  %6539 = vmatpush.bf16.msra.mxu0 %v8869_v4 }
  0x5d   : > { %v13144_v1 = vld [vmem:[%s14301_s6 + $0x93c] sm:$0xf0] }
  0x5e   : > { %v10404_v2 = vld [vmem:[%s14301_s6 + $0xd00] sm:$0xf]  ;;  %v9893_v6 = vor.u32 %v13144_v1, %v9892_v0  ;;  %6553 = vmatpush.bf16.msra.mxu1 %v9381_v5  ;;  %v14394_v1 = vor.u32 %v12845_v59, %v8716_v54 }
  0x5f   : > { %v13272_v3 = vld [vmem:[%s14301_s6 + $0xd3c] sm:$0xf0] }
  0x60   : > { %v8804_v7 = vld [vmem:[%s14301_s6 + $0x80] sm:$0xf]  ;;  %v10405_v10 = vor.u32 %v13272_v3, %v10404_v2  ;;  %6567 = vmatpush.bf16.msra.mxu2 %v9893_v6  ;;  %v12840_v6 = vld [vmem:[#allocation3 + $0x4] sm:$0xf] }
  0x61   : > { %v12872_v8 = vld [vmem:[%s14301_s6 + $0xbc] sm:$0xf0] }
  0x62   : > { %v9316_v9 = vld [vmem:[%s14301_s6 + $0x480] sm:$0xf]  ;;  %v8805_v16 = vor.u32 %v12872_v8, %v8804_v7  ;;  %6581 = vmatpush.bf16.msra.mxu3 %v10405_v10  ;;  %v8710_v7 = vld [vmem:[#allocation3 + $0x20] sm:$0xf0]  ;;  %v12841_v8 = vld [vmem:[#allocation3 + $0xc] sm:$0xf] }
  0x63   : > { %v13000_v11 = vld [vmem:[%s14301_s6 + $0x4bc] sm:$0xf0]  ;;  %v14401_v10 = vor.u32 %v12840_v6, %v8710_v7 }
  0x64   : > { %v9828_v12 = vld [vmem:[%s14301_s6 + $0x880] sm:$0xf]  ;;  %v9317_v19 = vor.u32 %v13000_v11, %v9316_v9  ;;  %6540 = vmatpush.bf16.msra.mxu0 %v8805_v16  ;;  %v8718_v11 = vld [vmem:[#allocation3 + $0x28] sm:$0xf0] }
  0x65   : > { %v13128_v13 = vld [vmem:[%s14301_s6 + $0x8bc] sm:$0xf0] }
  0x66   : > { %v10340_v14 = vld [vmem:[%s14301_s6 + $0xc80] sm:$0xf]  ;;  %v9829_v20 = vor.u32 %v13128_v13, %v9828_v12  ;;  %6554 = vmatpush.bf16.msra.mxu1 %v9317_v19 }
  0x67   : > { %v13256_v15 = vld [vmem:[%s14301_s6 + $0xcbc] sm:$0xf0] }
  0x68   : > { %v8740_v17 = vld [vmem:[%s14301_s6] sm:$0xf]  ;;  %v10341_v24 = vor.u32 %v13256_v15, %v10340_v14  ;;  %6568 = vmatpush.bf16.msra.mxu2 %v9829_v20 }
  0x69   : > { %v12856_v18 = vld [vmem:[%s14301_s6 + $0x3c] sm:$0xf0] }
  0x6a   : > { %v9252_v21 = vld [vmem:[%s14301_s6 + $0x400] sm:$0xf]  ;;  %v8741_v31 = vor.u32 %v12856_v18, %v8740_v17  ;;  %6582 = vmatpush.bf16.msra.mxu3 %v10341_v24  ;;  %v14406_v17 = vor.u32 %v12841_v8, %v8718_v11 }
  0x6b   : > { %v12984_v22 = vld [vmem:[%s14301_s6 + $0x43c] sm:$0xf0] }
  0x6c   : > { %v9764_v23 = vld [vmem:[%s14301_s6 + $0x800] sm:$0xf]  ;;  %v9253_v35 = vor.u32 %v12984_v22, %v9252_v21  ;;  %6541 = vmatpush.bf16.msra.mxu0 %v8741_v31 }
  0x6d   : > { %v13112_v25 = vld [vmem:[%s14301_s6 + $0x83c] sm:$0xf0] }
  0x6e   : > { %v10276_v26 = vld [vmem:[%s14301_s6 + $0xc00] sm:$0xf]  ;;  %v9765_v36 = vor.u32 %v13112_v25, %v9764_v23  ;;  %6555 = vmatpush.bf16.msra.mxu1 %v9253_v35 }
  0x6f   : > { %v13240_v27 = vld [vmem:[%s14301_s6 + $0xc3c] sm:$0xf0] }
  0x70   : > { %v11236_v28 = vld [vmem:[%s14301_s6 + $0x1380] sm:$0xf]  ;;  %v10277_v39 = vor.u32 %v13240_v27, %v10276_v26  ;;  %6569 = vmatpush.bf16.msra.mxu2 %v9765_v36 }
  0x71   : > { %v13480_v29 = vld [vmem:[%s14301_s6 + $0x13bc] sm:$0xf0]  ;;  %6556 = vmatmul.bf16.vlgmr.msra.gmra.mxu1 %v14401_v10 }
  0x72   : > { %v11748_v30 = vld [vmem:[%s14301_s6 + $0x1780] sm:$0xf]  ;;  %v11237_v40 = vor.u32 %v13480_v29, %v11236_v28  ;;  %6583 = vmatpush.bf16.msra.mxu3 %v10277_v39 }
  0x73   : > { %v13608_v32 = vld [vmem:[%s14301_s6 + $0x17bc] sm:$0xf0]  ;;  %6570 = vmatmul.bf16.vlgmr.msra.gmra.mxu2 %v14394_v1 }
  0x74   : > { %v12260_v33 = vld [vmem:[%s14301_s6 + $0x1b80] sm:$0xf]  ;;  %v11749_v43 = vor.u32 %v13608_v32, %v11748_v30  ;;  %6590 = vmatpush.bf16.msrb.mxu0 %v11237_v40 }
  0x75   : > { %v13736_v34 = vld [vmem:[%s14301_s6 + $0x1bbc] sm:$0xf0]  ;;  %6584 = vmatmul.bf16.vlgmr.msra.gmra.mxu3 %v14406_v17 }
  0x76   : > { %v12772_v37 = vld [vmem:[%s14301_s6 + $0x1f80] sm:$0xf]  ;;  %v12261_v44 = vor.u32 %v13736_v34, %v12260_v33  ;;  %6604 = vmatpush.bf16.msrb.mxu1 %v11749_v43 }
  0x77   : > { %v13864_v38 = vld [vmem:[%s14301_s6 + $0x1fbc] sm:$0xf0] }
  0x78   : > { %v11172_v41 = vld [vmem:[%s14301_s6 + $0x1300] sm:$0xf]  ;;  %v12773_v48 = vor.u32 %v13864_v38, %v12772_v37  ;;  %6618 = vmatpush.bf16.msrb.mxu2 %v12261_v44 }
  0x79   : > { %v13464_v42 = vld [vmem:[%s14301_s6 + $0x133c] sm:$0xf0] }
  0x7a   : > { %v11684_v45 = vld [vmem:[%s14301_s6 + $0x1700] sm:$0xf]  ;;  %v11173_v55 = vor.u32 %v13464_v42, %v11172_v41  ;;  %6632 = vmatpush.bf16.msrb.mxu3 %v12773_v48 }
  0x7b   : > { %v13592_v46 = vld [vmem:[%s14301_s6 + $0x173c] sm:$0xf0] }
  0x7c   : > { %v12196_v47 = vld [vmem:[%s14301_s6 + $0x1b00] sm:$0xf]  ;;  %v11685_v60 = vor.u32 %v13592_v46, %v11684_v45  ;;  %6591 = vmatpush.bf16.msrb.mxu0 %v11173_v55 }
  0x7d   : > { %v13720_v49 = vld [vmem:[%s14301_s6 + $0x1b3c] sm:$0xf0] }
  0x7e   : > { %v12708_v50 = vld [vmem:[%s14301_s6 + $0x1f00] sm:$0xf]  ;;  %v12197_v61 = vor.u32 %v13720_v49, %v12196_v47  ;;  %6605 = vmatpush.bf16.msrb.mxu1 %v11685_v60 }
  0x7f   : > { %v13848_v51 = vld [vmem:[%s14301_s6 + $0x1f3c] sm:$0xf0] }
  0x80   : > { %v8708_v52 = vld [vmem:[#allocation3] sm:$0xf]  ;;  %v12709_v2 = vor.u32 %v13848_v51, %v12708_v50  ;;  %6619 = vmatpush.bf16.msrb.mxu2 %v12197_v61 }
  0x81   : > { %v12844_v53 = vld [vmem:[#allocation3 + $0x1c] sm:$0xf0] }
  0x82   : > { %v11108_v56 = vld [vmem:[%s14301_s6 + $0x1280] sm:$0xf]  ;;  %v14389_v58 = vor.u32 %v12844_v53, %v8708_v52  ;;  %6633 = vmatpush.bf16.msrb.mxu3 %v12709_v2 }
  0x83   : > { %v13448_v57 = vld [vmem:[%s14301_s6 + $0x12bc] sm:$0xf0] }
  0x84   : > { %v11620_v62 = vld [vmem:[%s14301_s6 + $0x1680] sm:$0xf]  ;;  %6542 = vmatmul.bf16.vlgmr.msra.gmra.mxu0 %v14389_v58  ;;  %v11109_v9 = vor.u32 %v13448_v57, %v11108_v56 }
  0x85   : > { %v13576_v63 = vld [vmem:[%s14301_s6 + $0x16bc] sm:$0xf0] }
  0x86   : > { %v12132_v0 = vld [vmem:[%s14301_s6 + $0x1a80] sm:$0xf]  ;;  %v11621_v12 = vor.u32 %v13576_v63, %v11620_v62  ;;  %6592 = vmatpush.bf16.msrb.mxu0 %v11109_v9  ;;  %v12960_v9 = vld [vmem:[%s14301_s6 + $0x384] sm:$0xf] }
  0x87   : > { %v13704_v3 = vld [vmem:[%s14301_s6 + $0x1abc] sm:$0xf0] }
  0x88   : > { %v12644_v4 = vld [vmem:[%s14301_s6 + $0x1e80] sm:$0xf]  ;;  %v12133_v13 = vor.u32 %v13704_v3, %v12132_v0  ;;  %6606 = vmatpush.bf16.msrb.mxu1 %v11621_v12  ;;  %v9190_v12 = vld [vmem:[%s14301_s6 + $0x3c0] sm:$0xf0] }
  0x89   : > { %v13832_v5 = vld [vmem:[%s14301_s6 + $0x1ebc] sm:$0xf0] }
  0x8a   : > { %v11044_v14 = vld [vmem:[%s14301_s6 + $0x1200] sm:$0xf]  ;;  %v12645_v18 = vor.u32 %v13832_v5, %v12644_v4  ;;  %6620 = vmatpush.bf16.msrb.mxu2 %v12133_v13  ;;  %v13088_v13 = vld [vmem:[%s14301_s6 + $0x784] sm:$0xf] }
  0x8b   : > { %v13432_v15 = vld [vmem:[%s14301_s6 + $0x123c] sm:$0xf0] }
  0x8c   : > { %v11556_v16 = vld [vmem:[%s14301_s6 + $0x1600] sm:$0xf]  ;;  %v11045_v24 = vor.u32 %v13432_v15, %v11044_v14  ;;  %6634 = vmatpush.bf16.msrb.mxu3 %v12645_v18  ;;  %v9702_v14 = vld [vmem:[%s14301_s6 + $0x7c0] sm:$0xf0] }
  0x8d   : > { %v13560_v19 = vld [vmem:[%s14301_s6 + $0x163c] sm:$0xf0]  ;;  %v13216_v15 = vld [vmem:[%s14301_s6 + $0xb84] sm:$0xf] }
  0x8e   : > { %v12068_v20 = vld [vmem:[%s14301_s6 + $0x1a00] sm:$0xf]  ;;  %v11557_v25 = vor.u32 %v13560_v19, %v11556_v16  ;;  %6593 = vmatpush.bf16.msrb.mxu0 %v11045_v24  ;;  %v10214_v16 = vld [vmem:[%s14301_s6 + $0xbc0] sm:$0xf0] }
  0x8f   : > { %v13688_v21 = vld [vmem:[%s14301_s6 + $0x1a3c] sm:$0xf0]  ;;  %v13344_v18 = vld [vmem:[%s14301_s6 + $0xf84] sm:$0xf] }
  0x90   : > { %v12580_v22 = vld [vmem:[%s14301_s6 + $0x1e00] sm:$0xf]  ;;  %v12069_v26 = vor.u32 %v13688_v21, %v12068_v20  ;;  %6607 = vmatpush.bf16.msrb.mxu1 %v11557_v25  ;;  %v10726_v20 = vld [vmem:[%s14301_s6 + $0xfc0] sm:$0xf0]  ;;  %v8724_v21 = vld [vmem:[#allocation3 + $0x10] sm:$0xf] }
  0x91   : > { %v13816_v23 = vld [vmem:[%s14301_s6 + $0x1e3c] sm:$0xf0]  ;;  %v8732_v25 = vld [vmem:[#allocation3 + $0x18] sm:$0xf] }
  0x92   : > { %v10980_v27 = vld [vmem:[%s14301_s6 + $0x1180] sm:$0xf]  ;;  %v12581_v30 = vor.u32 %v13816_v23, %v12580_v22  ;;  %6621 = vmatpush.bf16.msrb.mxu2 %v12069_v26  ;;  %v12846_v22 = vld [vmem:[#allocation3 + $0x2c] sm:$0xf0]  ;;  %v12847_v26 = vld [vmem:[#allocation3 + $0x34] sm:$0xf0] }
  0x93   : > { %v13416_v28 = vld [vmem:[%s14301_s6 + $0x11bc] sm:$0xf0] }
  0x94   : > { %v11492_v29 = vld [vmem:[%s14301_s6 + $0x1580] sm:$0xf]  ;;  %v10981_v36 = vor.u32 %v13416_v28, %v10980_v27  ;;  %6635 = vmatpush.bf16.msrb.mxu3 %v12581_v30  ;;  %v12842_v27 = vld [vmem:[#allocation3 + $0x14] sm:$0xf] }
  0x95   : > { %v13544_v31 = vld [vmem:[%s14301_s6 + $0x15bc] sm:$0xf0]  ;;  %v8726_v30 = vld [vmem:[#allocation3 + $0x30] sm:$0xf0] }
  0x96   : > { %v12004_v32 = vld [vmem:[%s14301_s6 + $0x1980] sm:$0xf]  ;;  %v11493_v37 = vor.u32 %v13544_v31, %v11492_v29  ;;  %6594 = vmatpush.bf16.msrb.mxu0 %v10981_v36  ;;  %v9193_v29 = vor.u32 %v12960_v9, %v9190_v12  ;;  %v12843_v31 = vld [vmem:[#allocation3 + $0x1c] sm:$0xf]  ;;  %v9126_v36 = vld [vmem:[%s14301_s6 + $0x340] sm:$0xf0] }
  0x97   : > { %v13672_v33 = vld [vmem:[%s14301_s6 + $0x19bc] sm:$0xf0]  ;;  %v10534_v9 = vld [vmem:[%s14301_s6 + $0xe40] sm:$0xf0] }
  0x98   : > { %v12516_v34 = vld [vmem:[%s14301_s6 + $0x1d80] sm:$0xf]  ;;  %v12005_v38 = vor.u32 %v13672_v33, %v12004_v32  ;;  %6608 = vmatpush.bf16.msrb.mxu1 %v11493_v37  ;;  %v8734_v32 = vld [vmem:[#allocation3 + $0x38] sm:$0xf0]  ;;  %v9705_v33 = vor.u32 %v13088_v13, %v9702_v14  ;;  %v13072_v37 = vld [vmem:[%s14301_s6 + $0x704] sm:$0xf] }
  0x99   : > { %v13800_v35 = vld [vmem:[%s14301_s6 + $0x1dbc] sm:$0xf0]  ;;  %v12896_v14 = vld [vmem:[%s14301_s6 + $0x184] sm:$0xf] }
  0x9a   : > { %v10916_v39 = vld [vmem:[%s14301_s6 + $0x1100] sm:$0xf]  ;;  %v12517_v42 = vor.u32 %v13800_v35, %v12516_v34  ;;  %6622 = vmatpush.bf16.msrb.mxu2 %v12005_v38  ;;  %v10217_v34 = vor.u32 %v13216_v15, %v10214_v16  ;;  %v12944_v35 = vld [vmem:[%s14301_s6 + $0x304] sm:$0xf]  ;;  %v10729_v38 = vor.u32 %v13344_v18, %v10726_v20 }
  0x9b   : > { %v13400_v40 = vld [vmem:[%s14301_s6 + $0x113c] sm:$0xf0]  ;;  %v8934_v15 = vld [vmem:[%s14301_s6 + $0x1c0] sm:$0xf0] }
  0x9c   : > { %v11428_v41 = vld [vmem:[%s14301_s6 + $0x1500] sm:$0xf]  ;;  %v10917_v48 = vor.u32 %v13400_v40, %v10916_v39  ;;  %6636 = vmatpush.bf16.msrb.mxu3 %v12517_v42  ;;  %v14458_v39 = vor.u32 %v12846_v22, %v8724_v21  ;;  %v9638_v40 = vld [vmem:[%s14301_s6 + $0x740] sm:$0xf0] }
  0x9d   : > { %v13528_v43 = vld [vmem:[%s14301_s6 + $0x153c] sm:$0xf0]  ;;  %v10150_v42 = vld [vmem:[%s14301_s6 + $0xb40] sm:$0xf0] }
  0x9e   : > { %v11940_v44 = vld [vmem:[%s14301_s6 + $0x1900] sm:$0xf]  ;;  %v11429_v50 = vor.u32 %v13528_v43, %v11428_v41  ;;  %6595 = vmatpush.bf16.msrb.mxu0 %v10917_v48  ;;  %v13200_v41 = vld [vmem:[%s14301_s6 + $0xb04] sm:$0xf]  ;;  %v14463_v43 = vor.u32 %v12847_v26, %v8732_v25  ;;  %v9129_v48 = vor.u32 %v12944_v35, %v9126_v36 }
  0x9f   : > { %v13656_v45 = vld [vmem:[%s14301_s6 + $0x193c] sm:$0xf0]  ;;  %v13024_v16 = vld [vmem:[%s14301_s6 + $0x584] sm:$0xf] }
  0xa0   : > { %v12452_v46 = vld [vmem:[%s14301_s6 + $0x1d00] sm:$0xf]  ;;  %v11941_v51 = vor.u32 %v13656_v45, %v11940_v44  ;;  %6609 = vmatpush.bf16.msrb.mxu1 %v11429_v50  ;;  %v14465_v44 = vor.u32 %v12842_v27, %v8726_v30  ;;  %v13328_v45 = vld [vmem:[%s14301_s6 + $0xf04] sm:$0xf]  ;;  %v10153_v50 = vor.u32 %v13200_v41, %v10150_v42 }
  0xa1   : > { %v13784_v47 = vld [vmem:[%s14301_s6 + $0x1d3c] sm:$0xf0]  ;;  %v13152_v20 = vld [vmem:[%s14301_s6 + $0x984] sm:$0xf] }
  0xa2   : > { %v10852_v49 = vld [vmem:[%s14301_s6 + $0x1080] sm:$0xf]  ;;  %v12453_v55 = vor.u32 %v13784_v47, %v12452_v46  ;;  %6623 = vmatpush.bf16.msrb.mxu2 %v11941_v51  ;;  %v10662_v46 = vld [vmem:[%s14301_s6 + $0xf40] sm:$0xf0]  ;;  %v14469_v47 = vor.u32 %v12843_v31, %v8734_v32 }
  0xa3   : > { %v13384_v52 = vld [vmem:[%s14301_s6 + $0x10bc] sm:$0xf0]  ;;  %v12928_v51 = vld [vmem:[%s14301_s6 + $0x284] sm:$0xf] }
  0xa4   : > { %v11364_v53 = vld [vmem:[%s14301_s6 + $0x1480] sm:$0xf]  ;;  %v10853_v63 = vor.u32 %v13384_v52, %v10852_v49  ;;  %6637 = vmatpush.bf16.msrb.mxu3 %v12453_v55  ;;  %v9641_v49 = vor.u32 %v13072_v37, %v9638_v40  ;;  %v9062_v52 = vld [vmem:[%s14301_s6 + $0x2c0] sm:$0xf0] }
  0xa5   : > { %v13512_v54 = vld [vmem:[%s14301_s6 + $0x14bc] sm:$0xf0]  ;;  %v9574_v55 = vld [vmem:[%s14301_s6 + $0x6c0] sm:$0xf0] }
  0xa6   : > { %v11876_v56 = vld [vmem:[%s14301_s6 + $0x1880] sm:$0xf]  ;;  %v11365_v5 = vor.u32 %v13512_v54, %v11364_v53  ;;  %6596 = vmatpush.bf16.msrb.mxu0 %v10853_v63  ;;  %v13056_v53 = vld [vmem:[%s14301_s6 + $0x684] sm:$0xf]  ;;  %v10665_v54 = vor.u32 %v13328_v45, %v10662_v46 }
  0xa7   : > { %v13640_v57 = vld [vmem:[%s14301_s6 + $0x18bc] sm:$0xf0]  ;;  %v9958_v21 = vld [vmem:[%s14301_s6 + $0x9c0] sm:$0xf0] }
  0xa8   : > { %v12388_v59 = vld [vmem:[%s14301_s6 + $0x1c80] sm:$0xf]  ;;  %v11877_v6 = vor.u32 %v13640_v57, %v11876_v56  ;;  %6610 = vmatpush.bf16.msrb.mxu1 %v11365_v5  ;;  %v13184_v56 = vld [vmem:[%s14301_s6 + $0xa84] sm:$0xf]  ;;  %v9961_v26 = vor.u32 %v13152_v20, %v9958_v21 }
  0xa9   : > { %v13768_v60 = vld [vmem:[%s14301_s6 + $0x1cbc] sm:$0xf0]  ;;  %v10086_v57 = vld [vmem:[%s14301_s6 + $0xac0] sm:$0xf0] }
  0xaa   : > { %v10788_v61 = vld [vmem:[%s14301_s6 + $0x1000] sm:$0xf]  ;;  %v12389_v11 = vor.u32 %v13768_v60, %v12388_v59  ;;  %6624 = vmatpush.bf16.msrb.mxu2 %v11877_v6  ;;  %v13312_v59 = vld [vmem:[%s14301_s6 + $0xe84] sm:$0xf]  ;;  %v10089_v63 = vor.u32 %v13184_v56, %v10086_v57 }
  0xab   : > { %v13368_v62 = vld [vmem:[%s14301_s6 + $0x103c] sm:$0xf0]  ;;  %v10598_v60 = vld [vmem:[%s14301_s6 + $0xec0] sm:$0xf0] }
  0xac   : > { %v11300_v0 = vld [vmem:[%s14301_s6 + $0x1400] sm:$0xf]  ;;  %v10789_v19 = vor.u32 %v13368_v62, %v10788_v61  ;;  %6638 = vmatpush.bf16.msrb.mxu3 %v12389_v11  ;;  %v9065_v61 = vor.u32 %v12928_v51, %v9062_v52  ;;  %v9577_v62 = vor.u32 %v13056_v53, %v9574_v55  ;;  %v9510_v5 = vld [vmem:[%s14301_s6 + $0x640] sm:$0xf0] }
  0xad   : > { %v13496_v2 = vld [vmem:[%s14301_s6 + $0x143c] sm:$0xf0]  ;;  %v13168_v6 = vld [vmem:[%s14301_s6 + $0xa04] sm:$0xf] }
  0xae   : > { %v11812_v3 = vld [vmem:[%s14301_s6 + $0x1800] sm:$0xf]  ;;  %v11301_v23 = vor.u32 %v13496_v2, %v11300_v0  ;;  %6597 = vmatpush.bf16.msrb.mxu0 %v10789_v19  ;;  %v12912_v0 = vld [vmem:[%s14301_s6 + $0x204] sm:$0xf] }
  0xaf   : > { %v13624_v4 = vld [vmem:[%s14301_s6 + $0x183c] sm:$0xf0]  ;;  %v8998_v2 = vld [vmem:[%s14301_s6 + $0x240] sm:$0xf0] }
  0xb0   : > { %v12324_v7 = vld [vmem:[%s14301_s6 + $0x1c00] sm:$0xf]  ;;  %v11813_v24 = vor.u32 %v13624_v4, %v11812_v3  ;;  %6611 = vmatpush.bf16.msrb.mxu1 %v11301_v23  ;;  %v13040_v3 = vld [vmem:[%s14301_s6 + $0x604] sm:$0xf]  ;;  %v10601_v4 = vor.u32 %v13312_v59, %v10598_v60  ;;  %v9001_v11 = vor.u32 %v12912_v0, %v8998_v2 }
  0xb1   : > { %v13752_v8 = vld [vmem:[%s14301_s6 + $0x1c3c] sm:$0xf0]  ;;  %6598 = vmatmul.bf16.vlgmr.msrb.gmra.mxu0 %v14458_v39  ;;  %v9513_v12 = vor.u32 %v13040_v3, %v9510_v5  ;;  %v9446_v19 = vld [vmem:[%s14301_s6 + $0x5c0] sm:$0xf0] }
  0xb2   : > { %v12325_v28 = vor.u32 %v13752_v8, %v12324_v7  ;;  %6625 = vmatpush.bf16.msrb.mxu2 %v11813_v24  ;;  %6646 = vmatpush.bf16.msra.mxu0 %v9193_v29  ;;  %v10022_v7 = vld [vmem:[%s14301_s6 + $0xa40] sm:$0xf0]  ;;  %v8937_v24 = vor.u32 %v12896_v14, %v8934_v15  ;;  %v9449_v25 = vor.u32 %v13024_v16, %v9446_v19 }
  0xb3   : > { %6612 = vmatmul.bf16.vlgmr.msrb.gmra.mxu1 %v14465_v44  ;;  %v13296_v8 = vld [vmem:[%s14301_s6 + $0xe04] sm:$0xf]  ;;  %v10025_v13 = vor.u32 %v13168_v6, %v10022_v7 }
  0xb4   : > { %6639 = vmatpush.bf16.msrb.mxu3 %v12325_v28  ;;  %6660 = vmatpush.bf16.msra.mxu1 %v9705_v33  ;;  %v10537_v18 = vor.u32 %v13296_v8, %v10534_v9  ;;  %v13280_v22 = vld [vmem:[%s14301_s6 + $0xd84] sm:$0xf] }
  0xb5   : > { %6626 = vmatmul.bf16.vlgmr.msrb.gmra.mxu2 %v14463_v43  ;;  %v10470_v23 = vld [vmem:[%s14301_s6 + $0xdc0] sm:$0xf0] }
  0xb6   : > { %6674 = vmatpush.bf16.msra.mxu2 %v10217_v34  ;;  %6647 = vmatpush.bf16.msra.mxu0 %v9129_v48  ;;  %v12880_v27 = vld [vmem:[%s14301_s6 + $0x104] sm:$0xf]  ;;  %v10473_v30 = vor.u32 %v13280_v22, %v10470_v23 }
  0xb7   : > { %6640 = vmatmul.bf16.vlgmr.msrb.gmra.mxu3 %v14469_v47  ;;  %v8870_v28 = vld [vmem:[%s14301_s6 + $0x140] sm:$0xf0] }
  0xb8   : > { %6688 = vmatpush.bf16.msra.mxu3 %v10729_v38  ;;  %6661 = vmatpush.bf16.msra.mxu1 %v9641_v49  ;;  %v13008_v29 = vld [vmem:[%s14301_s6 + $0x504] sm:$0xf]  ;;  %v8873_v36 = vor.u32 %v12880_v27, %v8870_v28 }
  0xb9   : > { %v9382_v31 = vld [vmem:[%s14301_s6 + $0x540] sm:$0xf0] }
  0xba   : > { %6675 = vmatpush.bf16.msra.mxu2 %v10153_v50  ;;  %6648 = vmatpush.bf16.msra.mxu0 %v9065_v61  ;;  %v13136_v32 = vld [vmem:[%s14301_s6 + $0x904] sm:$0xf]  ;;  %v9385_v37 = vor.u32 %v13008_v29, %v9382_v31 }
  0xbb   : > { %v9894_v33 = vld [vmem:[%s14301_s6 + $0x940] sm:$0xf0] }
  0xbc   : > { %6689 = vmatpush.bf16.msra.mxu3 %v10665_v54  ;;  %6662 = vmatpush.bf16.msra.mxu1 %v9577_v62  ;;  %v13264_v34 = vld [vmem:[%s14301_s6 + $0xd04] sm:$0xf]  ;;  %v9897_v38 = vor.u32 %v13136_v32, %v9894_v33 }
  0xbd   : > { %v10406_v35 = vld [vmem:[%s14301_s6 + $0xd40] sm:$0xf0] }
  0xbe   : > { %6676 = vmatpush.bf16.msra.mxu2 %v10089_v63  ;;  %6649 = vmatpush.bf16.msra.mxu0 %v9001_v11  ;;  %v12864_v40 = vld [vmem:[%s14301_s6 + $0x84] sm:$0xf]  ;;  %v10409_v45 = vor.u32 %v13264_v34, %v10406_v35 }
  0xbf   : > { %v8806_v41 = vld [vmem:[%s14301_s6 + $0xc0] sm:$0xf0] }
  0xc0   : > { %6690 = vmatpush.bf16.msra.mxu3 %v10601_v4  ;;  %6663 = vmatpush.bf16.msra.mxu1 %v9513_v12  ;;  %v12992_v42 = vld [vmem:[%s14301_s6 + $0x484] sm:$0xf]  ;;  %v8809_v52 = vor.u32 %v12864_v40, %v8806_v41 }
  0xc1   : > { %v9318_v46 = vld [vmem:[%s14301_s6 + $0x4c0] sm:$0xf0] }
  0xc2   : > { %6677 = vmatpush.bf16.msra.mxu2 %v10025_v13  ;;  %6650 = vmatpush.bf16.msra.mxu0 %v8937_v24  ;;  %v13120_v48 = vld [vmem:[%s14301_s6 + $0x884] sm:$0xf]  ;;  %v9321_v55 = vor.u32 %v12992_v42, %v9318_v46 }
  0xc3   : > { %v9830_v49 = vld [vmem:[%s14301_s6 + $0x8c0] sm:$0xf0] }
  0xc4   : > { %6691 = vmatpush.bf16.msra.mxu3 %v10537_v18  ;;  %6664 = vmatpush.bf16.msra.mxu1 %v9449_v25  ;;  %v13248_v50 = vld [vmem:[%s14301_s6 + $0xc84] sm:$0xf]  ;;  %v9833_v56 = vor.u32 %v13120_v48, %v9830_v49 }
  0xc5   : > { %v10342_v51 = vld [vmem:[%s14301_s6 + $0xcc0] sm:$0xf0] }
  0xc6   : > { %6678 = vmatpush.bf16.msra.mxu2 %v9961_v26  ;;  %6651 = vmatpush.bf16.msra.mxu0 %v8873_v36  ;;  %v12848_v53 = vld [vmem:[%s14301_s6 + $0x4] sm:$0xf]  ;;  %v10345_v61 = vor.u32 %v13248_v50, %v10342_v51 }
  0xc7   : > { %v8742_v54 = vld [vmem:[%s14301_s6 + $0x40] sm:$0xf0] }
  0xc8   : > { %6692 = vmatpush.bf16.msra.mxu3 %v10473_v30  ;;  %6665 = vmatpush.bf16.msra.mxu1 %v9385_v37  ;;  %v12976_v57 = vld [vmem:[%s14301_s6 + $0x404] sm:$0xf]  ;;  %v8745_v5 = vor.u32 %v12848_v53, %v8742_v54 }
  0xc9   : > { %v9254_v59 = vld [vmem:[%s14301_s6 + $0x440] sm:$0xf0] }
  0xca   : > { %6679 = vmatpush.bf16.msra.mxu2 %v9897_v38  ;;  %v13104_v60 = vld [vmem:[%s14301_s6 + $0x804] sm:$0xf]  ;;  %6652 = vmatpush.bf16.msra.mxu0 %v8809_v52  ;;  %v9257_v9 = vor.u32 %v12976_v57, %v9254_v59 }
  0xcb   : > { %v9766_v62 = vld [vmem:[%s14301_s6 + $0x840] sm:$0xf0] }
  0xcc   : > { %6693 = vmatpush.bf16.msra.mxu3 %v10409_v45  ;;  %v13232_v63 = vld [vmem:[%s14301_s6 + $0xc04] sm:$0xf]  ;;  %6666 = vmatpush.bf16.msra.mxu1 %v9321_v55  ;;  %v9769_v11 = vor.u32 %v13104_v60, %v9766_v62 }
  0xcd   : > { %v10278_v0 = vld [vmem:[%s14301_s6 + $0xc40] sm:$0xf0] }
  0xce   : > { %v13472_v2 = vld [vmem:[%s14301_s6 + $0x1384] sm:$0xf]  ;;  %6680 = vmatpush.bf16.msra.mxu2 %v9833_v56  ;;  %v10281_v14 = vor.u32 %v13232_v63, %v10278_v0  ;;  %6653 = vmatpush.bf16.msra.mxu0 %v8745_v5 }
  0xcf   : > { %v11238_v3 = vld [vmem:[%s14301_s6 + $0x13c0] sm:$0xf0] }
  0xd0   : > { %v13600_v4 = vld [vmem:[%s14301_s6 + $0x1784] sm:$0xf]  ;;  %6694 = vmatpush.bf16.msra.mxu3 %v10345_v61  ;;  %v11241_v15 = vor.u32 %v13472_v2, %v11238_v3  ;;  %6667 = vmatpush.bf16.msra.mxu1 %v9257_v9 }
  0xd1   : > { %v11750_v6 = vld [vmem:[%s14301_s6 + $0x17c0] sm:$0xf0]  ;;  %6654 = vmatmul.bf16.vlgmr.msra.gmra.mxu0 %v14389_v58 }
  0xd2   : > { %v13728_v7 = vld [vmem:[%s14301_s6 + $0x1b84] sm:$0xf]  ;;  %v11753_v16 = vor.u32 %v13600_v4, %v11750_v6  ;;  %6681 = vmatpush.bf16.msra.mxu2 %v9769_v11  ;;  %6702 = vmatpush.bf16.msrb.mxu0 %v11241_v15 }
  0xd3   : > { %v12262_v8 = vld [vmem:[%s14301_s6 + $0x1bc0] sm:$0xf0]  ;;  %6668 = vmatmul.bf16.vlgmr.msra.gmra.mxu1 %v14401_v10 }
  0xd4   : > { %v13856_v12 = vld [vmem:[%s14301_s6 + $0x1f84] sm:$0xf]  ;;  %v12265_v18 = vor.u32 %v13728_v7, %v12262_v8  ;;  %6695 = vmatpush.bf16.msra.mxu3 %v10281_v14  ;;  %6716 = vmatpush.bf16.msrb.mxu1 %v11753_v16 }
  0xd5   : > { %v12774_v13 = vld [vmem:[%s14301_s6 + $0x1fc0] sm:$0xf0]  ;;  %6682 = vmatmul.bf16.vlgmr.msra.gmra.mxu2 %v14394_v1 }
  0xd6   : > { %v13456_v19 = vld [vmem:[%s14301_s6 + $0x1304] sm:$0xf]  ;;  %v12777_v22 = vor.u32 %v13856_v12, %v12774_v13  ;;  %6730 = vmatpush.bf16.msrb.mxu2 %v12265_v18 }
  0xd7   : > { %v11174_v20 = vld [vmem:[%s14301_s6 + $0x1340] sm:$0xf0]  ;;  %6696 = vmatmul.bf16.vlgmr.msra.gmra.mxu3 %v14406_v17 }
  0xd8   : > { %v13584_v21 = vld [vmem:[%s14301_s6 + $0x1704] sm:$0xf]  ;;  %v11177_v28 = vor.u32 %v13456_v19, %v11174_v20  ;;  %6744 = vmatpush.bf16.msrb.mxu3 %v12777_v22 }
  0xd9   : > { %v11686_v23 = vld [vmem:[%s14301_s6 + $0x1740] sm:$0xf0] }
  0xda   : > { %v13712_v24 = vld [vmem:[%s14301_s6 + $0x1b04] sm:$0xf]  ;;  %v11689_v29 = vor.u32 %v13584_v21, %v11686_v23  ;;  %6703 = vmatpush.bf16.msrb.mxu0 %v11177_v28 }
  0xdb   : > { %v12198_v25 = vld [vmem:[%s14301_s6 + $0x1b40] sm:$0xf0] }
  0xdc   : > { %v13840_v26 = vld [vmem:[%s14301_s6 + $0x1f04] sm:$0xf]  ;;  %v12201_v30 = vor.u32 %v13712_v24, %v12198_v25  ;;  %6717 = vmatpush.bf16.msrb.mxu1 %v11689_v29 }
  0xdd   : > { %v12710_v27 = vld [vmem:[%s14301_s6 + $0x1f40] sm:$0xf0] }
  0xde   : > { %v13440_v31 = vld [vmem:[%s14301_s6 + $0x1284] sm:$0xf]  ;;  %v12713_v34 = vor.u32 %v13840_v26, %v12710_v27  ;;  %6731 = vmatpush.bf16.msrb.mxu2 %v12201_v30 }
  0xdf   : > { %v11110_v32 = vld [vmem:[%s14301_s6 + $0x12c0] sm:$0xf0] }
  0xe0   : > { %v13568_v33 = vld [vmem:[%s14301_s6 + $0x1684] sm:$0xf]  ;;  %v11113_v41 = vor.u32 %v13440_v31, %v11110_v32  ;;  %6745 = vmatpush.bf16.msrb.mxu3 %v12713_v34 }
  0xe1   : > { %v11622_v35 = vld [vmem:[%s14301_s6 + $0x16c0] sm:$0xf0] }
  0xe2   : > { %v13696_v36 = vld [vmem:[%s14301_s6 + $0x1a84] sm:$0xf]  ;;  %v11625_v42 = vor.u32 %v13568_v33, %v11622_v35  ;;  %6704 = vmatpush.bf16.msrb.mxu0 %v11113_v41 }
  0xe3   : > { %v12134_v37 = vld [vmem:[%s14301_s6 + $0x1ac0] sm:$0xf0] }
  0xe4   : > { %v13824_v38 = vld [vmem:[%s14301_s6 + $0x1e84] sm:$0xf]  ;;  %v12137_v45 = vor.u32 %v13696_v36, %v12134_v37  ;;  %6718 = vmatpush.bf16.msrb.mxu1 %v11625_v42 }
  0xe5   : > { %v12646_v40 = vld [vmem:[%s14301_s6 + $0x1ec0] sm:$0xf0] }
  0xe6   : > { %v13424_v46 = vld [vmem:[%s14301_s6 + $0x1204] sm:$0xf]  ;;  %v12649_v50 = vor.u32 %v13824_v38, %v12646_v40  ;;  %6732 = vmatpush.bf16.msrb.mxu2 %v12137_v45 }
  0xe7   : > { %v11046_v48 = vld [vmem:[%s14301_s6 + $0x1240] sm:$0xf0] }
  0xe8   : > { %v13552_v49 = vld [vmem:[%s14301_s6 + $0x1604] sm:$0xf]  ;;  %v11049_v56 = vor.u32 %v13424_v46, %v11046_v48  ;;  %6746 = vmatpush.bf16.msrb.mxu3 %v12649_v50  ;;  %v9196_v48 = vld [vmem:[%s14301_s6 + $0x388] sm:$0xf] }
  0xe9   : > { %v11558_v51 = vld [vmem:[%s14301_s6 + $0x1640] sm:$0xf0]  ;;  %v9708_v50 = vld [vmem:[%s14301_s6 + $0x788] sm:$0xf] }
  0xea   : > { %v13680_v52 = vld [vmem:[%s14301_s6 + $0x1a04] sm:$0xf]  ;;  %v11561_v57 = vor.u32 %v13552_v49, %v11558_v51  ;;  %6705 = vmatpush.bf16.msrb.mxu0 %v11049_v56  ;;  %v12969_v49 = vld [vmem:[%s14301_s6 + $0x3c4] sm:$0xf0] }
  0xeb   : > { %v12070_v53 = vld [vmem:[%s14301_s6 + $0x1a40] sm:$0xf0] }
  0xec   : > { %v13808_v54 = vld [vmem:[%s14301_s6 + $0x1e04] sm:$0xf]  ;;  %v12073_v59 = vor.u32 %v13680_v52, %v12070_v53  ;;  %6719 = vmatpush.bf16.msrb.mxu1 %v11561_v57  ;;  %v13097_v52 = vld [vmem:[%s14301_s6 + $0x7c4] sm:$0xf0] }
  0xed   : > { %v12582_v55 = vld [vmem:[%s14301_s6 + $0x1e40] sm:$0xf0]  ;;  %v10220_v53 = vld [vmem:[%s14301_s6 + $0xb88] sm:$0xf] }
  0xee   : > { %v13408_v60 = vld [vmem:[%s14301_s6 + $0x1184] sm:$0xf]  ;;  %v12585_v63 = vor.u32 %v13808_v54, %v12582_v55  ;;  %6733 = vmatpush.bf16.msrb.mxu2 %v12073_v59  ;;  %v13225_v54 = vld [vmem:[%s14301_s6 + $0xbc4] sm:$0xf0] }
  0xef   : > { %v10982_v61 = vld [vmem:[%s14301_s6 + $0x11c0] sm:$0xf0]  ;;  %v10732_v57 = vld [vmem:[%s14301_s6 + $0xf88] sm:$0xf] }
  0xf0   : > { %v13536_v62 = vld [vmem:[%s14301_s6 + $0x1584] sm:$0xf]  ;;  %v10985_v6 = vor.u32 %v13408_v60, %v10982_v61  ;;  %6747 = vmatpush.bf16.msrb.mxu3 %v12585_v63  ;;  %v13353_v59 = vld [vmem:[%s14301_s6 + $0xfc4] sm:$0xf0]  ;;  %v9197_v61 = vor.u32 %v12969_v49, %v9196_v48  ;;  %v10221_v63 = vor.u32 %v13225_v54, %v10220_v53 }
  0xf1   : > { %v11494_v0 = vld [vmem:[%s14301_s6 + $0x15c0] sm:$0xf0]  ;;  %v9964_v48 = vld [vmem:[%s14301_s6 + $0x988] sm:$0xf] }
  0xf2   : > { %v13664_v2 = vld [vmem:[%s14301_s6 + $0x1984] sm:$0xf]  ;;  %v11497_v7 = vor.u32 %v13536_v62, %v11494_v0  ;;  %6706 = vmatpush.bf16.msrb.mxu0 %v10985_v6  ;;  %v9709_v62 = vor.u32 %v13097_v52, %v9708_v50  ;;  %v9132_v0 = vld [vmem:[%s14301_s6 + $0x308] sm:$0xf] }
  0xf3   : > { %v12006_v3 = vld [vmem:[%s14301_s6 + $0x19c0] sm:$0xf0]  ;;  %v10156_v6 = vld [vmem:[%s14301_s6 + $0xb08] sm:$0xf] }
  0xf4   : > { %v13792_v4 = vld [vmem:[%s14301_s6 + $0x1d84] sm:$0xf]  ;;  %v12009_v8 = vor.u32 %v13664_v2, %v12006_v3  ;;  %6720 = vmatpush.bf16.msrb.mxu1 %v11497_v7  ;;  %v12953_v2 = vld [vmem:[%s14301_s6 + $0x344] sm:$0xf0] }
  0xf5   : > { %v12518_v5 = vld [vmem:[%s14301_s6 + $0x1dc0] sm:$0xf0]  ;;  %v9644_v3 = vld [vmem:[%s14301_s6 + $0x708] sm:$0xf] }
  0xf6   : > { %v13392_v9 = vld [vmem:[%s14301_s6 + $0x1104] sm:$0xf]  ;;  %v12521_v13 = vor.u32 %v13792_v4, %v12518_v5  ;;  %6734 = vmatpush.bf16.msrb.mxu2 %v12009_v8  ;;  %v10733_v4 = vor.u32 %v13353_v59, %v10732_v57  ;;  %v13081_v5 = vld [vmem:[%s14301_s6 + $0x744] sm:$0xf0] }
  0xf7   : > { %v10918_v11 = vld [vmem:[%s14301_s6 + $0x1140] sm:$0xf0]  ;;  %v13209_v7 = vld [vmem:[%s14301_s6 + $0xb44] sm:$0xf0] }
  0xf8   : > { %v13520_v12 = vld [vmem:[%s14301_s6 + $0x1504] sm:$0xf]  ;;  %v10921_v20 = vor.u32 %v13392_v9, %v10918_v11  ;;  %6748 = vmatpush.bf16.msrb.mxu3 %v12521_v13  ;;  %v10668_v8 = vld [vmem:[%s14301_s6 + $0xf08] sm:$0xf]  ;;  %v9133_v11 = vor.u32 %v12953_v2, %v9132_v0  ;;  %v10157_v13 = vor.u32 %v13209_v7, %v10156_v6 }
  0xf9   : > { %v11430_v14 = vld [vmem:[%s14301_s6 + $0x1540] sm:$0xf0]  ;;  %v13337_v9 = vld [vmem:[%s14301_s6 + $0xf44] sm:$0xf0] }
  0xfa   : > { %v13648_v15 = vld [vmem:[%s14301_s6 + $0x1904] sm:$0xf]  ;;  %v11433_v21 = vor.u32 %v13520_v12, %v11430_v14  ;;  %6707 = vmatpush.bf16.msrb.mxu0 %v10921_v20  ;;  %v9645_v12 = vor.u32 %v13081_v5, %v9644_v3  ;;  %v9068_v14 = vld [vmem:[%s14301_s6 + $0x288] sm:$0xf] }
  0xfb   : > { %v11942_v16 = vld [vmem:[%s14301_s6 + $0x1940] sm:$0xf0]  ;;  %v10092_v20 = vld [vmem:[%s14301_s6 + $0xa88] sm:$0xf] }
  0xfc   : > { %v13776_v18 = vld [vmem:[%s14301_s6 + $0x1d04] sm:$0xf]  ;;  %v11945_v22 = vor.u32 %v13648_v15, %v11942_v16  ;;  %6721 = vmatpush.bf16.msrb.mxu1 %v11433_v21  ;;  %v12937_v15 = vld [vmem:[%s14301_s6 + $0x2c4] sm:$0xf0] }
  0xfd   : > { %v12454_v19 = vld [vmem:[%s14301_s6 + $0x1d40] sm:$0xf0]  ;;  %v9580_v16 = vld [vmem:[%s14301_s6 + $0x688] sm:$0xf] }
  0xfe   : > { %v13376_v23 = vld [vmem:[%s14301_s6 + $0x1084] sm:$0xf]  ;;  %v12457_v26 = vor.u32 %v13776_v18, %v12454_v19  ;;  %6735 = vmatpush.bf16.msrb.mxu2 %v11945_v22  ;;  %v10669_v18 = vor.u32 %v13337_v9, %v10668_v8  ;;  %v13065_v19 = vld [vmem:[%s14301_s6 + $0x6c4] sm:$0xf0] }
  0xff   : > { %v10854_v24 = vld [vmem:[%s14301_s6 + $0x10c0] sm:$0xf0]  ;;  %v13193_v21 = vld [vmem:[%s14301_s6 + $0xac4] sm:$0xf0] }
 0x100   : > { %v13504_v25 = vld [vmem:[%s14301_s6 + $0x1484] sm:$0xf]  ;;  %v10857_v32 = vor.u32 %v13376_v23, %v10854_v24  ;;  %6749 = vmatpush.bf16.msrb.mxu3 %v12457_v26  ;;  %v10604_v22 = vld [vmem:[%s14301_s6 + $0xe88] sm:$0xf]  ;;  %v9069_v24 = vor.u32 %v12937_v15, %v9068_v14  ;;  %v10093_v26 = vor.u32 %v13193_v21, %v10092_v20 }
 0x101   : > { %v11366_v27 = vld [vmem:[%s14301_s6 + $0x14c0] sm:$0xf0]  ;;  %v13321_v23 = vld [vmem:[%s14301_s6 + $0xec4] sm:$0xf0] }
 0x102   : > { %v13632_v28 = vld [vmem:[%s14301_s6 + $0x1884] sm:$0xf]  ;;  %v11369_v35 = vor.u32 %v13504_v25, %v11366_v27  ;;  %6708 = vmatpush.bf16.msrb.mxu0 %v10857_v32  ;;  %v9581_v25 = vor.u32 %v13065_v19, %v9580_v16  ;;  %v9004_v27 = vld [vmem:[%s14301_s6 + $0x208] sm:$0xf] }
 0x103   : > { %v11878_v29 = vld [vmem:[%s14301_s6 + $0x18c0] sm:$0xf0]  ;;  %v10028_v32 = vld [vmem:[%s14301_s6 + $0xa08] sm:$0xf] }
 0x104   : > { %v13760_v30 = vld [vmem:[%s14301_s6 + $0x1c84] sm:$0xf]  ;;  %v11881_v36 = vor.u32 %v13632_v28, %v11878_v29  ;;  %6722 = vmatpush.bf16.msrb.mxu1 %v11369_v35  ;;  %v12921_v28 = vld [vmem:[%s14301_s6 + $0x244] sm:$0xf0] }
 0x105   : > { %v12390_v31 = vld [vmem:[%s14301_s6 + $0x1cc0] sm:$0xf0]  ;;  %v9516_v29 = vld [vmem:[%s14301_s6 + $0x608] sm:$0xf] }
 0x106   : > { %v13360_v33 = vld [vmem:[%s14301_s6 + $0x1004] sm:$0xf]  ;;  %v12393_v41 = vor.u32 %v13760_v30, %v12390_v31  ;;  %6736 = vmatpush.bf16.msrb.mxu2 %v11881_v36  ;;  %v10605_v30 = vor.u32 %v13321_v23, %v10604_v22  ;;  %v13049_v31 = vld [vmem:[%s14301_s6 + $0x644] sm:$0xf0]  ;;  %v9005_v36 = vor.u32 %v12921_v28, %v9004_v27 }
 0x107   : > { %v10790_v34 = vld [vmem:[%s14301_s6 + $0x1040] sm:$0xf0]  ;;  %v13305_v35 = vld [vmem:[%s14301_s6 + $0xe44] sm:$0xf0] }
 0x108   : > { %v13488_v37 = vld [vmem:[%s14301_s6 + $0x1404] sm:$0xf]  ;;  %v10793_v51 = vor.u32 %v13360_v33, %v10790_v34  ;;  %6750 = vmatpush.bf16.msrb.mxu3 %v12393_v41  ;;  %v13177_v33 = vld [vmem:[%s14301_s6 + $0xa44] sm:$0xf0] }
 0x109   : > { %v11302_v38 = vld [vmem:[%s14301_s6 + $0x1440] sm:$0xf0]  ;;  %v10540_v34 = vld [vmem:[%s14301_s6 + $0xe08] sm:$0xf] }
 0x10a   : > { %v13616_v40 = vld [vmem:[%s14301_s6 + $0x1804] sm:$0xf]  ;;  %v11305_v55 = vor.u32 %v13488_v37, %v11302_v38  ;;  %6709 = vmatpush.bf16.msrb.mxu0 %v10793_v51  ;;  %v9517_v37 = vor.u32 %v13049_v31, %v9516_v29  ;;  %v10029_v38 = vor.u32 %v13177_v33, %v10028_v32  ;;  %v12905_v41 = vld [vmem:[%s14301_s6 + $0x1c4] sm:$0xf0] }
 0x10b   : > { %v11814_v42 = vld [vmem:[%s14301_s6 + $0x1840] sm:$0xf0]  ;;  %v13161_v49 = vld [vmem:[%s14301_s6 + $0x9c4] sm:$0xf0] }
 0x10c   : > { %v13744_v45 = vld [vmem:[%s14301_s6 + $0x1c04] sm:$0xf]  ;;  %v11817_v56 = vor.u32 %v13616_v40, %v11814_v42  ;;  %6723 = vmatpush.bf16.msrb.mxu1 %v11305_v55  ;;  %v8940_v40 = vld [vmem:[%s14301_s6 + $0x188] sm:$0xf]  ;;  %v9965_v54 = vor.u32 %v13161_v49, %v9964_v48 }
 0x10d   : > { %v12326_v46 = vld [vmem:[%s14301_s6 + $0x1c40] sm:$0xf0]  ;;  %6710 = vmatmul.bf16.vlgmr.msrb.gmra.mxu0 %v14458_v39  ;;  %v9452_v42 = vld [vmem:[%s14301_s6 + $0x588] sm:$0xf]  ;;  %v8941_v52 = vor.u32 %v12905_v41, %v8940_v40 }
 0x10e   : > { %v12329_v60 = vor.u32 %v13744_v45, %v12326_v46  ;;  %6737 = vmatpush.bf16.msrb.mxu2 %v11817_v56  ;;  %6758 = vmatpush.bf16.msra.mxu0 %v9197_v61  ;;  %v10541_v45 = vor.u32 %v13305_v35, %v10540_v34  ;;  %v13033_v46 = vld [vmem:[%s14301_s6 + $0x5c4] sm:$0xf0] }
 0x10f   : > { %6724 = vmatmul.bf16.vlgmr.msrb.gmra.mxu1 %v14465_v44  ;;  %v10476_v50 = vld [vmem:[%s14301_s6 + $0xd88] sm:$0xf]  ;;  %v9453_v53 = vor.u32 %v13033_v46, %v9452_v42 }
 0x110   : > { %6751 = vmatpush.bf16.msrb.mxu3 %v12329_v60  ;;  %6772 = vmatpush.bf16.msra.mxu1 %v9709_v62  ;;  %v13289_v51 = vld [vmem:[%s14301_s6 + $0xdc4] sm:$0xf0] }
 0x111   : > { %6738 = vmatmul.bf16.vlgmr.msrb.gmra.mxu2 %v14463_v43  ;;  %v8876_v55 = vld [vmem:[%s14301_s6 + $0x108] sm:$0xf]  ;;  %v10477_v59 = vor.u32 %v13289_v51, %v10476_v50 }
 0x112   : > { %6786 = vmatpush.bf16.msra.mxu2 %v10221_v63  ;;  %6759 = vmatpush.bf16.msra.mxu0 %v9133_v11  ;;  %v12889_v56 = vld [vmem:[%s14301_s6 + $0x144] sm:$0xf0] }
 0x113   : > { %6752 = vmatmul.bf16.vlgmr.msrb.gmra.mxu3 %v14469_v47  ;;  %v9388_v57 = vld [vmem:[%s14301_s6 + $0x508] sm:$0xf]  ;;  %v8877_v2 = vor.u32 %v12889_v56, %v8876_v55 }
 0x114   : > { %6800 = vmatpush.bf16.msra.mxu3 %v10733_v4  ;;  %6773 = vmatpush.bf16.msra.mxu1 %v9645_v12  ;;  %v13017_v60 = vld [vmem:[%s14301_s6 + $0x544] sm:$0xf0] }
 0x115   : > { %v9900_v61 = vld [vmem:[%s14301_s6 + $0x908] sm:$0xf]  ;;  %v9389_v3 = vor.u32 %v13017_v60, %v9388_v57 }
 0x116   : > { %6787 = vmatpush.bf16.msra.mxu2 %v10157_v13  ;;  %6760 = vmatpush.bf16.msra.mxu0 %v9069_v24  ;;  %v13145_v62 = vld [vmem:[%s14301_s6 + $0x944] sm:$0xf0] }
 0x117   : > { %v10412_v63 = vld [vmem:[%s14301_s6 + $0xd08] sm:$0xf]  ;;  %v9901_v4 = vor.u32 %v13145_v62, %v9900_v61 }
 0x118   : > { %6801 = vmatpush.bf16.msra.mxu3 %v10669_v18  ;;  %6774 = vmatpush.bf16.msra.mxu1 %v9581_v25  ;;  %v13273_v0 = vld [vmem:[%s14301_s6 + $0xd44] sm:$0xf0] }
 0x119   : > { %v8812_v5 = vld [vmem:[%s14301_s6 + $0x88] sm:$0xf]  ;;  %v10413_v8 = vor.u32 %v13273_v0, %v10412_v63 }
 0x11a   : > { %6788 = vmatpush.bf16.msra.mxu2 %v10093_v26  ;;  %6761 = vmatpush.bf16.msra.mxu0 %v9005_v36  ;;  %v12873_v6 = vld [vmem:[%s14301_s6 + $0xc4] sm:$0xf0] }
 0x11b   : > { %v9324_v7 = vld [vmem:[%s14301_s6 + $0x488] sm:$0xf]  ;;  %v8813_v15 = vor.u32 %v12873_v6, %v8812_v5 }
 0x11c   : > { %6802 = vmatpush.bf16.msra.mxu3 %v10605_v30  ;;  %6775 = vmatpush.bf16.msra.mxu1 %v9517_v37  ;;  %v13001_v9 = vld [vmem:[%s14301_s6 + $0x4c4] sm:$0xf0] }
 0x11d   : > { %v9836_v11 = vld [vmem:[%s14301_s6 + $0x888] sm:$0xf]  ;;  %v9325_v19 = vor.u32 %v13001_v9, %v9324_v7 }
 0x11e   : > { %6789 = vmatpush.bf16.msra.mxu2 %v10029_v38  ;;  %6762 = vmatpush.bf16.msra.mxu0 %v8941_v52  ;;  %v13129_v12 = vld [vmem:[%s14301_s6 + $0x8c4] sm:$0xf0] }
 0x11f   : > { %v10348_v13 = vld [vmem:[%s14301_s6 + $0xc88] sm:$0xf]  ;;  %v9837_v20 = vor.u32 %v13129_v12, %v9836_v11 }
 0x120   : > { %6803 = vmatpush.bf16.msra.mxu3 %v10541_v45  ;;  %6776 = vmatpush.bf16.msra.mxu1 %v9453_v53  ;;  %v13257_v14 = vld [vmem:[%s14301_s6 + $0xcc4] sm:$0xf0] }
 0x121   : > { %v8748_v16 = vld [vmem:[%s14301_s6 + $0x8] sm:$0xf]  ;;  %v10349_v24 = vor.u32 %v13257_v14, %v10348_v13 }
 0x122   : > { %6790 = vmatpush.bf16.msra.mxu2 %v9965_v54  ;;  %6763 = vmatpush.bf16.msra.mxu0 %v8877_v2  ;;  %v12857_v18 = vld [vmem:[%s14301_s6 + $0x44] sm:$0xf0] }
 0x123   : > { %v9260_v21 = vld [vmem:[%s14301_s6 + $0x408] sm:$0xf]  ;;  %v8749_v31 = vor.u32 %v12857_v18, %v8748_v16 }
 0x124   : > { %6804 = vmatpush.bf16.msra.mxu3 %v10477_v59  ;;  %6777 = vmatpush.bf16.msra.mxu1 %v9389_v3  ;;  %v12985_v22 = vld [vmem:[%s14301_s6 + $0x444] sm:$0xf0] }
 0x125   : > { %v9772_v23 = vld [vmem:[%s14301_s6 + $0x808] sm:$0xf]  ;;  %v9261_v35 = vor.u32 %v12985_v22, %v9260_v21 }
 0x126   : > { %6791 = vmatpush.bf16.msra.mxu2 %v9901_v4  ;;  %v13113_v25 = vld [vmem:[%s14301_s6 + $0x844] sm:$0xf0]  ;;  %6764 = vmatpush.bf16.msra.mxu0 %v8813_v15 }
 0x127   : > { %v10284_v26 = vld [vmem:[%s14301_s6 + $0xc08] sm:$0xf]  ;;  %v9773_v36 = vor.u32 %v13113_v25, %v9772_v23 }
 0x128   : > { %6805 = vmatpush.bf16.msra.mxu3 %v10413_v8  ;;  %v13241_v27 = vld [vmem:[%s14301_s6 + $0xc44] sm:$0xf0]  ;;  %6778 = vmatpush.bf16.msra.mxu1 %v9325_v19 }
 0x129   : > { %v11244_v28 = vld [vmem:[%s14301_s6 + $0x1388] sm:$0xf]  ;;  %v10285_v40 = vor.u32 %v13241_v27, %v10284_v26 }
 0x12a   : > { %v13481_v29 = vld [vmem:[%s14301_s6 + $0x13c4] sm:$0xf0]  ;;  %6792 = vmatpush.bf16.msra.mxu2 %v9837_v20  ;;  %6765 = vmatpush.bf16.msra.mxu0 %v8749_v31 }
 0x12b   : > { %v11756_v30 = vld [vmem:[%s14301_s6 + $0x1788] sm:$0xf]  ;;  %v11245_v41 = vor.u32 %v13481_v29, %v11244_v28 }
 0x12c   : > { %v13609_v32 = vld [vmem:[%s14301_s6 + $0x17c4] sm:$0xf0]  ;;  %6806 = vmatpush.bf16.msra.mxu3 %v10349_v24  ;;  %6779 = vmatpush.bf16.msra.mxu1 %v9261_v35 }
 0x12d   : > { %v12268_v33 = vld [vmem:[%s14301_s6 + $0x1b88] sm:$0xf]  ;;  %v11757_v42 = vor.u32 %v13609_v32, %v11756_v30  ;;  %6766 = vmatmul.bf16.vlgmr.msra.gmra.mxu0 %v14389_v58 }
 0x12e   : > { %v13737_v34 = vld [vmem:[%s14301_s6 + $0x1bc4] sm:$0xf0]  ;;  %6793 = vmatpush.bf16.msra.mxu2 %v9773_v36  ;;  %6814 = vmatpush.bf16.msrb.mxu0 %v11245_v41 }
 0x12f   : > { %v12780_v37 = vld [vmem:[%s14301_s6 + $0x1f88] sm:$0xf]  ;;  %v12269_v45 = vor.u32 %v13737_v34, %v12268_v33  ;;  %6780 = vmatmul.bf16.vlgmr.msra.gmra.mxu1 %v14401_v10 }
 0x130   : > { %v13865_v38 = vld [vmem:[%s14301_s6 + $0x1fc4] sm:$0xf0]  ;;  %6807 = vmatpush.bf16.msra.mxu3 %v10285_v40  ;;  %6828 = vmatpush.bf16.msrb.mxu1 %v11757_v42 }
 0x131   : > { %v11180_v46 = vld [vmem:[%s14301_s6 + $0x1308] sm:$0xf]  ;;  %v12781_v50 = vor.u32 %v13865_v38, %v12780_v37  ;;  %6794 = vmatmul.bf16.vlgmr.msra.gmra.mxu2 %v14394_v1 }
 0x132   : > { %v13465_v48 = vld [vmem:[%s14301_s6 + $0x1344] sm:$0xf0]  ;;  %6842 = vmatpush.bf16.msrb.mxu2 %v12269_v45 }
 0x133   : > { %v11692_v49 = vld [vmem:[%s14301_s6 + $0x1708] sm:$0xf]  ;;  %v11181_v56 = vor.u32 %v13465_v48, %v11180_v46  ;;  %6808 = vmatmul.bf16.vlgmr.msra.gmra.mxu3 %v14406_v17 }
 0x134   : > { %v13593_v51 = vld [vmem:[%s14301_s6 + $0x1744] sm:$0xf0]  ;;  %6856 = vmatpush.bf16.msrb.mxu3 %v12781_v50 }
 0x135   : > { %v12204_v52 = vld [vmem:[%s14301_s6 + $0x1b08] sm:$0xf]  ;;  %v11693_v57 = vor.u32 %v13593_v51, %v11692_v49  ;;  %6815 = vmatpush.bf16.msrb.mxu0 %v11181_v56 }
 0x136   : > { %v13721_v53 = vld [vmem:[%s14301_s6 + $0x1b44] sm:$0xf0] }
 0x137   : > { %v12716_v54 = vld [vmem:[%s14301_s6 + $0x1f08] sm:$0xf]  ;;  %v12205_v59 = vor.u32 %v13721_v53, %v12204_v52  ;;  %6829 = vmatpush.bf16.msrb.mxu1 %v11693_v57 }
 0x138   : > { %v13849_v55 = vld [vmem:[%s14301_s6 + $0x1f44] sm:$0xf0] }
 0x139   : > { %v11116_v60 = vld [vmem:[%s14301_s6 + $0x1288] sm:$0xf]  ;;  %v12717_v63 = vor.u32 %v13849_v55, %v12716_v54  ;;  %6843 = vmatpush.bf16.msrb.mxu2 %v12205_v59 }
 0x13a   : > { %v13449_v61 = vld [vmem:[%s14301_s6 + $0x12c4] sm:$0xf0] }
 0x13b   : > { %v11628_v62 = vld [vmem:[%s14301_s6 + $0x1688] sm:$0xf]  ;;  %v11117_v6 = vor.u32 %v13449_v61, %v11116_v60  ;;  %6857 = vmatpush.bf16.msrb.mxu3 %v12717_v63 }
 0x13c   : > { %v13577_v0 = vld [vmem:[%s14301_s6 + $0x16c4] sm:$0xf0] }
 0x13d   : > { %v12140_v2 = vld [vmem:[%s14301_s6 + $0x1a88] sm:$0xf]  ;;  %v11629_v7 = vor.u32 %v13577_v0, %v11628_v62  ;;  %6816 = vmatpush.bf16.msrb.mxu0 %v11117_v6 }
 0x13e   : > { %v13705_v3 = vld [vmem:[%s14301_s6 + $0x1ac4] sm:$0xf0] }
 0x13f   : > { %v12652_v4 = vld [vmem:[%s14301_s6 + $0x1e88] sm:$0xf]  ;;  %v12141_v8 = vor.u32 %v13705_v3, %v12140_v2  ;;  %6830 = vmatpush.bf16.msrb.mxu1 %v11629_v7 }
 0x140   : > { %v13833_v5 = vld [vmem:[%s14301_s6 + $0x1ec4] sm:$0xf0] }
 0x141   : > { %v11052_v9 = vld [vmem:[%s14301_s6 + $0x1208] sm:$0xf]  ;;  %v12653_v13 = vor.u32 %v13833_v5, %v12652_v4  ;;  %6844 = vmatpush.bf16.msrb.mxu2 %v12141_v8 }
 0x142   : > { %v13433_v11 = vld [vmem:[%s14301_s6 + $0x1244] sm:$0xf0] }
 0x143   : > { %v11564_v12 = vld [vmem:[%s14301_s6 + $0x1608] sm:$0xf]  ;;  %v11053_v20 = vor.u32 %v13433_v11, %v11052_v9  ;;  %6858 = vmatpush.bf16.msrb.mxu3 %v12653_v13  ;;  %v12961_v11 = vld [vmem:[%s14301_s6 + $0x38c] sm:$0xf] }
 0x144   : > { %v13561_v14 = vld [vmem:[%s14301_s6 + $0x1644] sm:$0xf0]  ;;  %v13089_v13 = vld [vmem:[%s14301_s6 + $0x78c] sm:$0xf] }
 0x145   : > { %v12076_v15 = vld [vmem:[%s14301_s6 + $0x1a08] sm:$0xf]  ;;  %v11565_v21 = vor.u32 %v13561_v14, %v11564_v12  ;;  %6817 = vmatpush.bf16.msrb.mxu0 %v11053_v20  ;;  %v9198_v12 = vld [vmem:[%s14301_s6 + $0x3c8] sm:$0xf0] }
 0x146   : > { %v13689_v16 = vld [vmem:[%s14301_s6 + $0x1a44] sm:$0xf0] }
 0x147   : > { %v12588_v18 = vld [vmem:[%s14301_s6 + $0x1e08] sm:$0xf]  ;;  %v12077_v22 = vor.u32 %v13689_v16, %v12076_v15  ;;  %6831 = vmatpush.bf16.msrb.mxu1 %v11565_v21  ;;  %v9710_v15 = vld [vmem:[%s14301_s6 + $0x7c8] sm:$0xf0] }
 0x148   : > { %v13817_v19 = vld [vmem:[%s14301_s6 + $0x1e44] sm:$0xf0]  ;;  %v13217_v16 = vld [vmem:[%s14301_s6 + $0xb8c] sm:$0xf] }
 0x149   : > { %v10988_v23 = vld [vmem:[%s14301_s6 + $0x1188] sm:$0xf]  ;;  %v12589_v26 = vor.u32 %v13817_v19, %v12588_v18  ;;  %6845 = vmatpush.bf16.msrb.mxu2 %v12077_v22  ;;  %v10222_v18 = vld [vmem:[%s14301_s6 + $0xbc8] sm:$0xf0] }
 0x14a   : > { %v13417_v24 = vld [vmem:[%s14301_s6 + $0x11c4] sm:$0xf0]  ;;  %v13345_v21 = vld [vmem:[%s14301_s6 + $0xf8c] sm:$0xf] }
 0x14b   : > { %v11500_v25 = vld [vmem:[%s14301_s6 + $0x1588] sm:$0xf]  ;;  %v10989_v32 = vor.u32 %v13417_v24, %v10988_v23  ;;  %6859 = vmatpush.bf16.msrb.mxu3 %v12589_v26  ;;  %v10734_v22 = vld [vmem:[%s14301_s6 + $0xfc8] sm:$0xf0]  ;;  %v9201_v24 = vor.u32 %v12961_v11, %v9198_v12  ;;  %v10225_v26 = vor.u32 %v13217_v16, %v10222_v18 }
 0x14c   : > { %v13545_v27 = vld [vmem:[%s14301_s6 + $0x15c4] sm:$0xf0]  ;;  %v9454_v12 = vld [vmem:[%s14301_s6 + $0x5c8] sm:$0xf0] }
 0x14d   : > { %v12012_v28 = vld [vmem:[%s14301_s6 + $0x1988] sm:$0xf]  ;;  %v11501_v33 = vor.u32 %v13545_v27, %v11500_v25  ;;  %6818 = vmatpush.bf16.msrb.mxu0 %v10989_v32  ;;  %v9713_v25 = vor.u32 %v13089_v13, %v9710_v15  ;;  %v12945_v27 = vld [vmem:[%s14301_s6 + $0x30c] sm:$0xf] }
 0x14e   : > { %v13673_v29 = vld [vmem:[%s14301_s6 + $0x19c4] sm:$0xf0]  ;;  %v13201_v32 = vld [vmem:[%s14301_s6 + $0xb0c] sm:$0xf] }
 0x14f   : > { %v12524_v30 = vld [vmem:[%s14301_s6 + $0x1d88] sm:$0xf]  ;;  %v12013_v34 = vor.u32 %v13673_v29, %v12012_v28  ;;  %6832 = vmatpush.bf16.msrb.mxu1 %v11501_v33  ;;  %v9134_v28 = vld [vmem:[%s14301_s6 + $0x348] sm:$0xf0] }
 0x150   : > { %v13801_v31 = vld [vmem:[%s14301_s6 + $0x1dc4] sm:$0xf0]  ;;  %v13073_v29 = vld [vmem:[%s14301_s6 + $0x70c] sm:$0xf] }
 0x151   : > { %v10924_v35 = vld [vmem:[%s14301_s6 + $0x1108] sm:$0xf]  ;;  %v12525_v38 = vor.u32 %v13801_v31, %v12524_v30  ;;  %6846 = vmatpush.bf16.msrb.mxu2 %v12013_v34  ;;  %v10737_v30 = vor.u32 %v13345_v21, %v10734_v22  ;;  %v9646_v31 = vld [vmem:[%s14301_s6 + $0x748] sm:$0xf0] }
 0x152   : > { %v13401_v36 = vld [vmem:[%s14301_s6 + $0x1144] sm:$0xf0]  ;;  %v10158_v33 = vld [vmem:[%s14301_s6 + $0xb48] sm:$0xf0] }
 0x153   : > { %v11436_v37 = vld [vmem:[%s14301_s6 + $0x1508] sm:$0xf]  ;;  %v10925_v48 = vor.u32 %v13401_v36, %v10924_v35  ;;  %6860 = vmatpush.bf16.msrb.mxu3 %v12525_v38  ;;  %v13329_v34 = vld [vmem:[%s14301_s6 + $0xf0c] sm:$0xf]  ;;  %v9137_v36 = vor.u32 %v12945_v27, %v9134_v28  ;;  %v10161_v38 = vor.u32 %v13201_v32, %v10158_v33  ;;  %v14785_v32 = vpop.f32.mrf.mxu3 }
 0x154   : > { %v13529_v40 = vld [vmem:[%s14301_s6 + $0x1544] sm:$0xf0]  ;;  %v10670_v35 = vld [vmem:[%s14301_s6 + $0xf48] sm:$0xf0] }
 0x155   : > { %v11948_v41 = vld [vmem:[%s14301_s6 + $0x1908] sm:$0xf]  ;;  %v11437_v49 = vor.u32 %v13529_v40, %v11436_v37  ;;  %6819 = vmatpush.bf16.msrb.mxu0 %v10925_v48  ;;  %v9649_v37 = vor.u32 %v13073_v29, %v9646_v31  ;;  %v12929_v40 = vld [vmem:[%s14301_s6 + $0x28c] sm:$0xf] }
 0x156   : > { %v13657_v42 = vld [vmem:[%s14301_s6 + $0x1944] sm:$0xf0]  ;;  %v13185_v48 = vld [vmem:[%s14301_s6 + $0xa8c] sm:$0xf] }
 0x157   : > { %v12460_v45 = vld [vmem:[%s14301_s6 + $0x1d08] sm:$0xf]  ;;  %v11949_v50 = vor.u32 %v13657_v42, %v11948_v41  ;;  %6833 = vmatpush.bf16.msrb.mxu1 %v11437_v49  ;;  %v9070_v41 = vld [vmem:[%s14301_s6 + $0x2c8] sm:$0xf0] }
 0x158   : > { %v13785_v46 = vld [vmem:[%s14301_s6 + $0x1d44] sm:$0xf0]  ;;  %v13057_v42 = vld [vmem:[%s14301_s6 + $0x68c] sm:$0xf] }
 0x159   : > { %v10860_v51 = vld [vmem:[%s14301_s6 + $0x1088] sm:$0xf]  ;;  %v12461_v54 = vor.u32 %v13785_v46, %v12460_v45  ;;  %6847 = vmatpush.bf16.msrb.mxu2 %v11949_v50  ;;  %v10673_v45 = vor.u32 %v13329_v34, %v10670_v35  ;;  %v9582_v46 = vld [vmem:[%s14301_s6 + $0x6c8] sm:$0xf0] }
 0x15a   : > { %v13385_v52 = vld [vmem:[%s14301_s6 + $0x10c4] sm:$0xf0]  ;;  %v10094_v49 = vld [vmem:[%s14301_s6 + $0xac8] sm:$0xf0] }
 0x15b   : > { %v11372_v53 = vld [vmem:[%s14301_s6 + $0x1488] sm:$0xf]  ;;  %v10861_v61 = vor.u32 %v13385_v52, %v10860_v51  ;;  %6861 = vmatpush.bf16.msrb.mxu3 %v12461_v54  ;;  %v13313_v50 = vld [vmem:[%s14301_s6 + $0xe8c] sm:$0xf]  ;;  %v9073_v52 = vor.u32 %v12929_v40, %v9070_v41  ;;  %v10097_v54 = vor.u32 %v13185_v48, %v10094_v49 }
 0x15c   : > { %v13513_v55 = vld [vmem:[%s14301_s6 + $0x14c4] sm:$0xf0]  ;;  %v10606_v51 = vld [vmem:[%s14301_s6 + $0xec8] sm:$0xf0] }
 0x15d   : > { %v11884_v56 = vld [vmem:[%s14301_s6 + $0x1888] sm:$0xf]  ;;  %v11373_v0 = vor.u32 %v13513_v55, %v11372_v53  ;;  %6820 = vmatpush.bf16.msrb.mxu0 %v10861_v61  ;;  %v9585_v53 = vor.u32 %v13057_v42, %v9582_v46  ;;  %v12913_v55 = vld [vmem:[%s14301_s6 + $0x20c] sm:$0xf] }
 0x15e   : > { %v13641_v57 = vld [vmem:[%s14301_s6 + $0x18c4] sm:$0xf0]  ;;  %v13169_v61 = vld [vmem:[%s14301_s6 + $0xa0c] sm:$0xf] }
 0x15f   : > { %v12396_v59 = vld [vmem:[%s14301_s6 + $0x1c88] sm:$0xf]  ;;  %v11885_v2 = vor.u32 %v13641_v57, %v11884_v56  ;;  %6834 = vmatpush.bf16.msrb.mxu1 %v11373_v0  ;;  %v9006_v56 = vld [vmem:[%s14301_s6 + $0x248] sm:$0xf0] }
 0x160   : > { %v13769_v60 = vld [vmem:[%s14301_s6 + $0x1cc4] sm:$0xf0]  ;;  %v13041_v57 = vld [vmem:[%s14301_s6 + $0x60c] sm:$0xf] }
 0x161   : > { %v10796_v62 = vld [vmem:[%s14301_s6 + $0x1008] sm:$0xf]  ;;  %v12397_v6 = vor.u32 %v13769_v60, %v12396_v59  ;;  %6848 = vmatpush.bf16.msrb.mxu2 %v11885_v2  ;;  %v10609_v59 = vor.u32 %v13313_v50, %v10606_v51  ;;  %v9518_v60 = vld [vmem:[%s14301_s6 + $0x648] sm:$0xf0]  ;;  %v9009_v2 = vor.u32 %v12913_v55, %v9006_v56 }
 0x162   : > { %v13369_v63 = vld [vmem:[%s14301_s6 + $0x1044] sm:$0xf0]  ;;  %v10542_v0 = vld [vmem:[%s14301_s6 + $0xe48] sm:$0xf0] }
 0x163   : > { %v11308_v3 = vld [vmem:[%s14301_s6 + $0x1408] sm:$0xf]  ;;  %v10797_v14 = vor.u32 %v13369_v63, %v10796_v62  ;;  %6862 = vmatpush.bf16.msrb.mxu3 %v12397_v6  ;;  %v10030_v62 = vld [vmem:[%s14301_s6 + $0xa48] sm:$0xf0] }
 0x164   : > { %v13497_v4 = vld [vmem:[%s14301_s6 + $0x1444] sm:$0xf0]  ;;  %v13297_v63 = vld [vmem:[%s14301_s6 + $0xe0c] sm:$0xf] }
 0x165   : > { %v11820_v5 = vld [vmem:[%s14301_s6 + $0x1808] sm:$0xf]  ;;  %v11309_v19 = vor.u32 %v13497_v4, %v11308_v3  ;;  %6821 = vmatpush.bf16.msrb.mxu0 %v10797_v14  ;;  %v14763_v3 = vpop.f32.mrf.mxu0  ;;  %v9521_v4 = vor.u32 %v13041_v57, %v9518_v60  ;;  %v12897_v6 = vld [vmem:[%s14301_s6 + $0x18c] sm:$0xf]  ;;  %v10545_v11 = vor.u32 %v13297_v63, %v10542_v0 }
 0x166   : > { %v13625_v7 = vld [vmem:[%s14301_s6 + $0x1844] sm:$0xf0]  ;;  %v13153_v13 = vld [vmem:[%s14301_s6 + $0x98c] sm:$0xf] }
 0x167   : > { %v12332_v8 = vld [vmem:[%s14301_s6 + $0x1c08] sm:$0xf]  ;;  %v11821_v20 = vor.u32 %v13625_v7, %v11820_v5  ;;  %6835 = vmatpush.bf16.msrb.mxu1 %v11309_v19  ;;  %v10033_v5 = vor.u32 %v13169_v61, %v10030_v62  ;;  %v8942_v7 = vld [vmem:[%s14301_s6 + $0x1c8] sm:$0xf0] }
 0x168   : > { %v13753_v9 = vld [vmem:[%s14301_s6 + $0x1c44] sm:$0xf0]  ;;  %6822 = vmatmul.bf16.vlgmr.msrb.gmra.mxu0 %v14458_v39  ;;  %v9966_v14 = vld [vmem:[%s14301_s6 + $0x9c8] sm:$0xf0]  ;;  %v8945_v18 = vor.u32 %v12897_v6, %v8942_v7 }
 0x169   : > { %v12333_v23 = vor.u32 %v13753_v9, %v12332_v8  ;;  %6849 = vmatpush.bf16.msrb.mxu2 %v11821_v20  ;;  %6870 = vmatpush.bf16.msra.mxu0 %v9201_v24  ;;  %v13025_v8 = vld [vmem:[%s14301_s6 + $0x58c] sm:$0xf]  ;;  %v14768_v9 = vpop.f32.mrf.mxu1  ;;  %v9969_v20 = vor.u32 %v13153_v13, %v9966_v14 }
 0x16a   : > { %6836 = vmatmul.bf16.vlgmr.msrb.gmra.mxu1 %v14465_v44  ;;  %v13281_v15 = vld [vmem:[%s14301_s6 + $0xd8c] sm:$0xf]  ;;  %v9457_v19 = vor.u32 %v13025_v8, %v9454_v12 }
 0x16b   : > { %6863 = vmatpush.bf16.msrb.mxu3 %v12333_v23  ;;  %6884 = vmatpush.bf16.msra.mxu1 %v9713_v25  ;;  %v10478_v16 = vld [vmem:[%s14301_s6 + $0xdc8] sm:$0xf0] }
 0x16c   : > { %6850 = vmatmul.bf16.vlgmr.msrb.gmra.mxu2 %v14463_v43  ;;  %v12881_v21 = vld [vmem:[%s14301_s6 + $0x10c] sm:$0xf]  ;;  %v10481_v24 = vor.u32 %v13281_v15, %v10478_v16 }
 0x16d   : > { %6898 = vmatpush.bf16.msra.mxu2 %v10225_v26  ;;  %6871 = vmatpush.bf16.msra.mxu0 %v9137_v36  ;;  %v8878_v22 = vld [vmem:[%s14301_s6 + $0x148] sm:$0xf0] }
 0x16e   : > { %6864 = vmatmul.bf16.vlgmr.msrb.gmra.mxu3 %v14469_v47  ;;  %v13009_v23 = vld [vmem:[%s14301_s6 + $0x50c] sm:$0xf]  ;;  %v8881_v31 = vor.u32 %v12881_v21, %v8878_v22 }
 0x16f   : > { %6912 = vmatpush.bf16.msra.mxu3 %v10737_v30  ;;  %6885 = vmatpush.bf16.msra.mxu1 %v9649_v37  ;;  %v9390_v25 = vld [vmem:[%s14301_s6 + $0x548] sm:$0xf0]  ;;  %v14783_v30 = vpop.f32.mrf.mxu2 }
 0x170   : > { %v13137_v26 = vld [vmem:[%s14301_s6 + $0x90c] sm:$0xf]  ;;  %v9393_v33 = vor.u32 %v13009_v23, %v9390_v25 }
 0x171   : > { %6899 = vmatpush.bf16.msra.mxu2 %v10161_v38  ;;  %6872 = vmatpush.bf16.msra.mxu0 %v9073_v52  ;;  %v9902_v27 = vld [vmem:[%s14301_s6 + $0x948] sm:$0xf0]  ;;  %v14797_v49 = vpop.f32.mrf.mxu1 }
 0x172   : > { %v13265_v28 = vld [vmem:[%s14301_s6 + $0xd0c] sm:$0xf]  ;;  %v9905_v34 = vor.u32 %v13137_v26, %v9902_v27 }
 0x173   : > { %6913 = vmatpush.bf16.msra.mxu3 %v10673_v45  ;;  %6886 = vmatpush.bf16.msra.mxu1 %v9585_v53  ;;  %v10414_v29 = vld [vmem:[%s14301_s6 + $0xd48] sm:$0xf0]  ;;  %v14793_v45 = vpop.f32.mrf.mxu0 }
 0x174   : > { %v12865_v35 = vld [vmem:[%s14301_s6 + $0x8c] sm:$0xf]  ;;  %v10417_v38 = vor.u32 %v13265_v28, %v10414_v29 }
 0x175   : > { %6900 = vmatpush.bf16.msra.mxu2 %v10097_v54  ;;  %6873 = vmatpush.bf16.msra.mxu0 %v9009_v2  ;;  %v8814_v36 = vld [vmem:[%s14301_s6 + $0xc8] sm:$0xf0] }
 0x176   : > { %v12993_v37 = vld [vmem:[%s14301_s6 + $0x48c] sm:$0xf]  ;;  %v8817_v50 = vor.u32 %v12865_v35, %v8814_v36 }
 0x177   : > { %6914 = vmatpush.bf16.msra.mxu3 %v10609_v59  ;;  %6887 = vmatpush.bf16.msra.mxu1 %v9521_v4  ;;  %v9326_v40 = vld [vmem:[%s14301_s6 + $0x4c8] sm:$0xf0]  ;;  %v14815_v14 = vpop.f32.mrf.mxu2 }
 0x178   : > { %v13121_v41 = vld [vmem:[%s14301_s6 + $0x88c] sm:$0xf]  ;;  %v9329_v53 = vor.u32 %v12993_v37, %v9326_v40 }
 0x179   : > { %6901 = vmatpush.bf16.msra.mxu2 %v10033_v5  ;;  %6874 = vmatpush.bf16.msra.mxu0 %v8945_v18  ;;  %v9838_v42 = vld [vmem:[%s14301_s6 + $0x8c8] sm:$0xf0]  ;;  %v14817_v18 = vpop.f32.mrf.mxu3 }
 0x17a   : > { %v13249_v46 = vld [vmem:[%s14301_s6 + $0xc8c] sm:$0xf]  ;;  %v9841_v54 = vor.u32 %v13121_v41, %v9838_v42 }
 0x17b   : > { %6915 = vmatpush.bf16.msra.mxu3 %v10545_v11  ;;  %6888 = vmatpush.bf16.msra.mxu1 %v9457_v19  ;;  %v10350_v48 = vld [vmem:[%s14301_s6 + $0xcc8] sm:$0xf0]  ;;  %v14825_v28 = vpop.f32.mrf.mxu0 }
 0x17c   : > { %v12849_v51 = vld [vmem:[%s14301_s6 + $0xc] sm:$0xf]  ;;  %v10353_v59 = vor.u32 %v13249_v46, %v10350_v48 }
 0x17d   : > { %6902 = vmatpush.bf16.msra.mxu2 %v9969_v20  ;;  %6875 = vmatpush.bf16.msra.mxu0 %v8881_v31  ;;  %v8750_v52 = vld [vmem:[%s14301_s6 + $0x48] sm:$0xf0] }
 0x17e   : > { %v12977_v55 = vld [vmem:[%s14301_s6 + $0x40c] sm:$0xf]  ;;  %v8753_v4 = vor.u32 %v12849_v51, %v8750_v52 }
 0x17f   : > { %6916 = vmatpush.bf16.msra.mxu3 %v10481_v24  ;;  %6889 = vmatpush.bf16.msra.mxu1 %v9393_v33  ;;  %v9262_v56 = vld [vmem:[%s14301_s6 + $0x448] sm:$0xf0]  ;;  %v14829_v33 = vpop.f32.mrf.mxu1 }
 0x180   : > { %v13105_v57 = vld [vmem:[%s14301_s6 + $0x80c] sm:$0xf]  ;;  %v9265_v8 = vor.u32 %v12977_v55, %v9262_v56 }
 0x181   : > { %6903 = vmatpush.bf16.msra.mxu2 %v9905_v34  ;;  %v9774_v60 = vld [vmem:[%s14301_s6 + $0x848] sm:$0xf0]  ;;  %6876 = vmatpush.bf16.msra.mxu0 %v8817_v50 }
 0x182   : > { %v13233_v61 = vld [vmem:[%s14301_s6 + $0xc0c] sm:$0xf]  ;;  %v9777_v11 = vor.u32 %v13105_v57, %v9774_v60 }
 0x183   : > { %6917 = vmatpush.bf16.msra.mxu3 %v10417_v38  ;;  %v10286_v62 = vld [vmem:[%s14301_s6 + $0xc48] sm:$0xf0]  ;;  %6890 = vmatpush.bf16.msra.mxu1 %v9329_v53 }
 0x184   : > { %v13473_v63 = vld [vmem:[%s14301_s6 + $0x138c] sm:$0xf]  ;;  %v10289_v15 = vor.u32 %v13233_v61, %v10286_v62 }
 0x185   : > { %v11246_v0 = vld [vmem:[%s14301_s6 + $0x13c8] sm:$0xf0]  ;;  %6904 = vmatpush.bf16.msra.mxu2 %v9841_v54  ;;  %6877 = vmatpush.bf16.msra.mxu0 %v8753_v4 }
 0x186   : > { %v13601_v2 = vld [vmem:[%s14301_s6 + $0x178c] sm:$0xf]  ;;  %v11249_v16 = vor.u32 %v13473_v63, %v11246_v0  ;;  %v14851_v0 = vpop.f32.mrf.mxu3 }
 0x187   : > { %v11758_v5 = vld [vmem:[%s14301_s6 + $0x17c8] sm:$0xf0]  ;;  %6918 = vmatpush.bf16.msra.mxu3 %v10353_v59  ;;  %6891 = vmatpush.bf16.msra.mxu1 %v9265_v8  ;;  %v14846_v59 = vpop.f32.mrf.mxu2 }
 0x188   : > { %v13729_v6 = vld [vmem:[%s14301_s6 + $0x1b8c] sm:$0xf]  ;;  %v11761_v19 = vor.u32 %v13601_v2, %v11758_v5  ;;  %6878 = vmatmul.bf16.vlgmr.msra.gmra.mxu0 %v14389_v58 }
 0x189   : > { %v12270_v7 = vld [vmem:[%s14301_s6 + $0x1bc8] sm:$0xf0]  ;;  %6905 = vmatpush.bf16.msra.mxu2 %v9777_v11  ;;  %6926 = vmatpush.bf16.msrb.mxu0 %v11249_v16 }
 0x18a   : > { %v13857_v12 = vld [vmem:[%s14301_s6 + $0x1f8c] sm:$0xf]  ;;  %v12273_v20 = vor.u32 %v13729_v6, %v12270_v7  ;;  %6892 = vmatmul.bf16.vlgmr.msra.gmra.mxu1 %v14401_v10  ;;  %v14855_v6 = vpop.f32.mrf.mxu0 }
 0x18b   : > { %v12782_v13 = vld [vmem:[%s14301_s6 + $0x1fc8] sm:$0xf0]  ;;  %6919 = vmatpush.bf16.msra.mxu3 %v10289_v15  ;;  %6940 = vmatpush.bf16.msrb.mxu1 %v11761_v19  ;;  %v14860_v15 = vpop.f32.mrf.mxu1 }
 0x18c   : > { %v13457_v21 = vld [vmem:[%s14301_s6 + $0x130c] sm:$0xf]  ;;  %v12785_v24 = vor.u32 %v13857_v12, %v12782_v13  ;;  %6906 = vmatmul.bf16.vlgmr.msra.gmra.mxu2 %v14394_v1 }
 0x18d   : > { %v11182_v22 = vld [vmem:[%s14301_s6 + $0x1348] sm:$0xf0]  ;;  %6954 = vmatpush.bf16.msrb.mxu2 %v12273_v20 }
 0x18e   : > { %v13585_v23 = vld [vmem:[%s14301_s6 + $0x170c] sm:$0xf]  ;;  %v11185_v34 = vor.u32 %v13457_v21, %v11182_v22  ;;  %6920 = vmatmul.bf16.vlgmr.msra.gmra.mxu3 %v14406_v17 }
 0x18f   : > { %v11694_v25 = vld [vmem:[%s14301_s6 + $0x1748] sm:$0xf0]  ;;  %6968 = vmatpush.bf16.msrb.mxu3 %v12785_v24 }
 0x190   : > { %v13713_v26 = vld [vmem:[%s14301_s6 + $0x1b0c] sm:$0xf]  ;;  %v11697_v35 = vor.u32 %v13585_v23, %v11694_v25  ;;  %6927 = vmatpush.bf16.msrb.mxu0 %v11185_v34 }
 0x191   : > { %v12206_v27 = vld [vmem:[%s14301_s6 + $0x1b48] sm:$0xf0] }
 0x192   : > { %v13841_v29 = vld [vmem:[%s14301_s6 + $0x1f0c] sm:$0xf]  ;;  %v12209_v36 = vor.u32 %v13713_v26, %v12206_v27  ;;  %6941 = vmatpush.bf16.msrb.mxu1 %v11697_v35 }
 0x193   : > { %v12718_v31 = vld [vmem:[%s14301_s6 + $0x1f48] sm:$0xf0] }
 0x194   : > { %v13441_v37 = vld [vmem:[%s14301_s6 + $0x128c] sm:$0xf]  ;;  %v12721_v41 = vor.u32 %v13841_v29, %v12718_v31  ;;  %6955 = vmatpush.bf16.msrb.mxu2 %v12209_v36 }
 0x195   : > { %v11118_v38 = vld [vmem:[%s14301_s6 + $0x12c8] sm:$0xf0] }
 0x196   : > { %v13569_v40 = vld [vmem:[%s14301_s6 + $0x168c] sm:$0xf]  ;;  %v11121_v52 = vor.u32 %v13441_v37, %v11118_v38  ;;  %6969 = vmatpush.bf16.msrb.mxu3 %v12721_v41  ;;  %v14875_v41 = vpop.f32.mrf.mxu2 }
 0x197   : > { %v11630_v42 = vld [vmem:[%s14301_s6 + $0x16c8] sm:$0xf0] }
 0x198   : > { %v13697_v46 = vld [vmem:[%s14301_s6 + $0x1a8c] sm:$0xf]  ;;  %v11633_v53 = vor.u32 %v13569_v40, %v11630_v42  ;;  %6928 = vmatpush.bf16.msrb.mxu0 %v11121_v52  ;;  %v6655_v52 = vpop.f32.mrf.mxu0 }
 0x199   : > { %v12142_v48 = vld [vmem:[%s14301_s6 + $0x1ac8] sm:$0xf0] }
 0x19a   : > { %v13825_v50 = vld [vmem:[%s14301_s6 + $0x1e8c] sm:$0xf]  ;;  %v12145_v54 = vor.u32 %v13697_v46, %v12142_v48  ;;  %6942 = vmatpush.bf16.msrb.mxu1 %v11633_v53  ;;  %v6558_v46 = vadd.f32 %v14768_v9, %v14763_v3  ;;  %v14879_v48 = vpop.f32.mrf.mxu3 }
 0x19b   : > { %v12654_v51 = vld [vmem:[%s14301_s6 + $0x1ec8] sm:$0xf0] }
 0x19c   : > { %v13425_v55 = vld [vmem:[%s14301_s6 + $0x120c] sm:$0xf]  ;;  %v12657_v60 = vor.u32 %v13825_v50, %v12654_v51  ;;  %6956 = vmatpush.bf16.msrb.mxu2 %v12145_v54 }
 0x19d   : > { %v11054_v56 = vld [vmem:[%s14301_s6 + $0x1248] sm:$0xf0] }
 0x19e   : > { %v13553_v57 = vld [vmem:[%s14301_s6 + $0x160c] sm:$0xf]  ;;  %v11057_v5 = vor.u32 %v13425_v55, %v11054_v56  ;;  %6970 = vmatpush.bf16.msrb.mxu3 %v12657_v60  ;;  %v6669_v60 = vpop.f32.mrf.mxu1 }
 0x19f   : > { %v11566_v61 = vld [vmem:[%s14301_s6 + $0x1648] sm:$0xf0] }
 0x1a0   : > { %v13681_v62 = vld [vmem:[%s14301_s6 + $0x1a0c] sm:$0xf]  ;;  %v11569_v7 = vor.u32 %v13553_v57, %v11566_v61  ;;  %6929 = vmatpush.bf16.msrb.mxu0 %v11057_v5  ;;  %v6572_v5 = vadd.f32 %v14783_v30, %v6558_v46  ;;  %v9716_v30 = vld [vmem:[%s14301_s6 + $0x790] sm:$0xf] }
 0x1a1   : > { %v12078_v63 = vld [vmem:[%s14301_s6 + $0x1a48] sm:$0xf0] }
 0x1a2   : > { %v13809_v2 = vld [vmem:[%s14301_s6 + $0x1e0c] sm:$0xf]  ;;  %v12081_v8 = vor.u32 %v13681_v62, %v12078_v63  ;;  %6943 = vmatpush.bf16.msrb.mxu1 %v11569_v7 }
 0x1a3   : > { %v12590_v4 = vld [vmem:[%s14301_s6 + $0x1e48] sm:$0xf0] }
 0x1a4   : > { %v13409_v11 = vld [vmem:[%s14301_s6 + $0x118c] sm:$0xf]  ;;  %v12593_v16 = vor.u32 %v13809_v2, %v12590_v4  ;;  %6957 = vmatpush.bf16.msrb.mxu2 %v12081_v8 }
 0x1a5   : > { %v10990_v12 = vld [vmem:[%s14301_s6 + $0x11c8] sm:$0xf0] }
 0x1a6   : > { %v13537_v13 = vld [vmem:[%s14301_s6 + $0x158c] sm:$0xf]  ;;  %v10993_v24 = vor.u32 %v13409_v11, %v10990_v12  ;;  %6971 = vmatpush.bf16.msrb.mxu3 %v12593_v16 }
 0x1a7   : > { %v11502_v19 = vld [vmem:[%s14301_s6 + $0x15c8] sm:$0xf0] }
 0x1a8   : > { %v13665_v20 = vld [vmem:[%s14301_s6 + $0x198c] sm:$0xf]  ;;  %v11505_v25 = vor.u32 %v13537_v13, %v11502_v19  ;;  %6930 = vmatpush.bf16.msrb.mxu0 %v10993_v24 }
 0x1a9   : > { %v12014_v21 = vld [vmem:[%s14301_s6 + $0x19c8] sm:$0xf0] }
 0x1aa   : > { %v13793_v22 = vld [vmem:[%s14301_s6 + $0x1d8c] sm:$0xf]  ;;  %v12017_v26 = vor.u32 %v13665_v20, %v12014_v21  ;;  %6944 = vmatpush.bf16.msrb.mxu1 %v11505_v25  ;;  %v13098_v25 = vld [vmem:[%s14301_s6 + $0x7cc] sm:$0xf0] }
 0x1ab   : > { %v12526_v23 = vld [vmem:[%s14301_s6 + $0x1dc8] sm:$0xf0] }
 0x1ac   : > { %v13393_v27 = vld [vmem:[%s14301_s6 + $0x110c] sm:$0xf]  ;;  %v12529_v34 = vor.u32 %v13793_v22, %v12526_v23  ;;  %6958 = vmatpush.bf16.msrb.mxu2 %v12017_v26  ;;  %v9204_v22 = vld [vmem:[%s14301_s6 + $0x390] sm:$0xf] }
 0x1ad   : > { %v10926_v29 = vld [vmem:[%s14301_s6 + $0x1148] sm:$0xf0]  ;;  %v12970_v23 = vld [vmem:[%s14301_s6 + $0x3cc] sm:$0xf0] }
 0x1ae   : > { %v13521_v31 = vld [vmem:[%s14301_s6 + $0x150c] sm:$0xf]  ;;  %v10929_v42 = vor.u32 %v13393_v27, %v10926_v29  ;;  %6972 = vmatpush.bf16.msrb.mxu3 %v12529_v34  ;;  %v10228_v26 = vld [vmem:[%s14301_s6 + $0xb90] sm:$0xf]  ;;  %v6683_v29 = vpop.f32.mrf.mxu2  ;;  %v9205_v46 = vor.u32 %v12970_v23, %v9204_v22 }
 0x1af   : > { %v11438_v35 = vld [vmem:[%s14301_s6 + $0x1548] sm:$0xf0]  ;;  %v13226_v27 = vld [vmem:[%s14301_s6 + $0xbcc] sm:$0xf0] }
 0x1b0   : > { %v13649_v36 = vld [vmem:[%s14301_s6 + $0x190c] sm:$0xf]  ;;  %v11441_v50 = vor.u32 %v13521_v31, %v11438_v35  ;;  %6931 = vmatpush.bf16.msrb.mxu0 %v10929_v42  ;;  %v6586_v31 = vadd.f32 %v14785_v32, %v6572_v5  ;;  %v10229_v32 = vor.u32 %v13226_v27, %v10228_v26  ;;  %v9012_v26 = vld [vmem:[%s14301_s6 + $0x210] sm:$0xf] }
 0x1b1   : > { %v11950_v37 = vld [vmem:[%s14301_s6 + $0x1948] sm:$0xf0]  ;;  %v12922_v27 = vld [vmem:[%s14301_s6 + $0x24c] sm:$0xf0] }
 0x1b2   : > { %v13777_v38 = vld [vmem:[%s14301_s6 + $0x1d0c] sm:$0xf]  ;;  %v11953_v51 = vor.u32 %v13649_v36, %v11950_v37  ;;  %6945 = vmatpush.bf16.msrb.mxu1 %v11441_v50  ;;  %v10740_v36 = vld [vmem:[%s14301_s6 + $0xf90] sm:$0xf]  ;;  %v9717_v50 = vor.u32 %v13098_v25, %v9716_v30 }
 0x1b3   : > { %v12462_v40 = vld [vmem:[%s14301_s6 + $0x1d48] sm:$0xf0]  ;;  %v13354_v37 = vld [vmem:[%s14301_s6 + $0xfcc] sm:$0xf0] }
 0x1b4   : > { %v13377_v53 = vld [vmem:[%s14301_s6 + $0x108c] sm:$0xf]  ;;  %v12465_v56 = vor.u32 %v13777_v38, %v12462_v40  ;;  %6959 = vmatpush.bf16.msrb.mxu2 %v11953_v51  ;;  %v6697_v38 = vpop.f32.mrf.mxu3  ;;  %v6670_v40 = vadd.f32 %v6669_v60, %v6655_v52  ;;  %v6657_v51 = vpop.f32.mrf.mxu0  ;;  %v6600_v52 = vadd.f32 %v14825_v28, %v6586_v31  ;;  %v10676_v60 = vld [vmem:[%s14301_s6 + $0xf10] sm:$0xf] }
 0x1b5   : > { %v10862_v54 = vld [vmem:[%s14301_s6 + $0x10c8] sm:$0xf0]  ;;  %v13050_v31 = vld [vmem:[%s14301_s6 + $0x64c] sm:$0xf0] }
 0x1b6   : > { %v13505_v55 = vld [vmem:[%s14301_s6 + $0x148c] sm:$0xf]  ;;  %v10865_v63 = vor.u32 %v13377_v53, %v10862_v54  ;;  %6973 = vmatpush.bf16.msrb.mxu3 %v12465_v56  ;;  %v9140_v53 = vld [vmem:[%s14301_s6 + $0x310] sm:$0xf]  ;;  %v10741_v56 = vor.u32 %v13354_v37, %v10740_v36 }
 0x1b7   : > { %v11374_v57 = vld [vmem:[%s14301_s6 + $0x14c8] sm:$0xf0]  ;;  %v12954_v54 = vld [vmem:[%s14301_s6 + $0x34c] sm:$0xf0] }
 0x1b8   : > { %v13633_v3 = vld [vmem:[%s14301_s6 + $0x188c] sm:$0xf]  ;;  %v11377_v7 = vor.u32 %v13505_v55, %v11374_v57  ;;  %6932 = vmatpush.bf16.msrb.mxu0 %v10865_v63  ;;  %v9652_v55 = vld [vmem:[%s14301_s6 + $0x710] sm:$0xf]  ;;  %v6560_v63 = vadd.f32 %v14797_v49, %v14793_v45 }
 0x1b9   : > { %v11886_v9 = vld [vmem:[%s14301_s6 + $0x18c8] sm:$0xf0]  ;;  %v13082_v57 = vld [vmem:[%s14301_s6 + $0x74c] sm:$0xf0] }
 0x1ba   : > { %v13761_v61 = vld [vmem:[%s14301_s6 + $0x1c8c] sm:$0xf]  ;;  %v11889_v8 = vor.u32 %v13633_v3, %v11886_v9  ;;  %6946 = vmatpush.bf16.msrb.mxu1 %v11377_v7  ;;  %v10164_v3 = vld [vmem:[%s14301_s6 + $0xb10] sm:$0xf]  ;;  %v9653_v28 = vor.u32 %v13082_v57, %v9652_v55 }
 0x1bb   : > { %v12398_v62 = vld [vmem:[%s14301_s6 + $0x1cc8] sm:$0xf0]  ;;  %v13210_v9 = vld [vmem:[%s14301_s6 + $0xb4c] sm:$0xf0] }
 0x1bc   : > { %v13361_v2 = vld [vmem:[%s14301_s6 + $0x100c] sm:$0xf]  ;;  %v12401_v16 = vor.u32 %v13761_v61, %v12398_v62  ;;  %6960 = vmatpush.bf16.msrb.mxu2 %v11889_v8  ;;  %v6671_v61 = vpop.f32.mrf.mxu1  ;;  %v13338_v62 = vld [vmem:[%s14301_s6 + $0xf4c] sm:$0xf0]  ;;  %v10165_v5 = vor.u32 %v13210_v9, %v10164_v3  ;;  %v6699_v25 = vpop.f32.mrf.mxu3 }
 0x1bd   : > { %v10798_v4 = vld [vmem:[%s14301_s6 + $0x1048] sm:$0xf0]  ;;  %v9076_v7 = vld [vmem:[%s14301_s6 + $0x290] sm:$0xf]  ;;  %v10677_v45 = vor.u32 %v13338_v62, %v10676_v60  ;;  %v6672_v37 = vadd.f32 %v6671_v61, %v6657_v51 }
 0x1be   : > { %v13489_v11 = vld [vmem:[%s14301_s6 + $0x140c] sm:$0xf]  ;;  %v10801_v24 = vor.u32 %v13361_v2, %v10798_v4  ;;  %6974 = vmatpush.bf16.msrb.mxu3 %v12401_v16  ;;  %v6684_v2 = vadd.f32 %v6683_v29, %v6670_v40  ;;  %v9141_v4 = vor.u32 %v12954_v54, %v9140_v53  ;;  %v12938_v8 = vld [vmem:[%s14301_s6 + $0x2cc] sm:$0xf0]  ;;  %v6614_v16 = vadd.f32 %v14829_v33, %v6600_v52  ;;  %v6685_v33 = vpop.f32.mrf.mxu2 }
 0x1bf   : > { %v11310_v12 = vld [vmem:[%s14301_s6 + $0x1448] sm:$0xf0]  ;;  %v13066_v49 = vld [vmem:[%s14301_s6 + $0x6cc] sm:$0xf0]  ;;  %v9077_v23 = vor.u32 %v12938_v8, %v9076_v7 }
 0x1c0   : > { %v13617_v13 = vld [vmem:[%s14301_s6 + $0x180c] sm:$0xf]  ;;  %v11313_v34 = vor.u32 %v13489_v11, %v11310_v12  ;;  %6933 = vmatpush.bf16.msrb.mxu0 %v10801_v24  ;;  %v9588_v11 = vld [vmem:[%s14301_s6 + $0x690] sm:$0xf]  ;;  %v6698_v22 = vadd.f32 %v6697_v38, %v6684_v2  ;;  %v6628_v36 = vadd.f32 %v14846_v59, %v6614_v16  ;;  %v6711_v38 = vpop.f32.mrf.mxu0 }
 0x1c1   : > { %v11822_v19 = vld [vmem:[%s14301_s6 + $0x1848] sm:$0xf0]  ;;  %v10100_v12 = vld [vmem:[%s14301_s6 + $0xa90] sm:$0xf]  ;;  %v9589_v30 = vor.u32 %v13066_v49, %v9588_v11 }
 0x1c2   : > { %v13745_v20 = vld [vmem:[%s14301_s6 + $0x1c0c] sm:$0xf]  ;;  %v11825_v35 = vor.u32 %v13617_v13, %v11822_v19  ;;  %6947 = vmatpush.bf16.msrb.mxu1 %v11313_v34  ;;  %v13194_v13 = vld [vmem:[%s14301_s6 + $0xacc] sm:$0xf0]  ;;  %v6712_v59 = vadd.f32 %v6711_v38, %v6698_v22  ;;  %v6642_v60 = vadd.f32 %v14851_v0, %v6628_v36 }
 0x1c3   : > { %v12334_v21 = vld [vmem:[%s14301_s6 + $0x1c48] sm:$0xf0]  ;;  %6934 = vmatmul.bf16.vlgmr.msrb.gmra.mxu0 %v14458_v39  ;;  %v10612_v19 = vld [vmem:[%s14301_s6 + $0xe90] sm:$0xf]  ;;  %v10101_v24 = vor.u32 %v13194_v13, %v10100_v12 }
 0x1c4   : > { %v12337_v42 = vor.u32 %v13745_v20, %v12334_v21  ;;  %6961 = vmatpush.bf16.msrb.mxu2 %v11825_v35  ;;  %6982 = vmatpush.bf16.msra.mxu0 %v9205_v46  ;;  %v13322_v20 = vld [vmem:[%s14301_s6 + $0xecc] sm:$0xf0]  ;;  %v6574_v21 = vadd.f32 %v14815_v14, %v6560_v63  ;;  %v6725_v51 = vpop.f32.mrf.mxu1  ;;  %v6686_v63 = vadd.f32 %v6685_v33, %v6672_v37  ;;  %v6753_v33 = vpop.f32.mrf.mxu3 }
 0x1c5   : > { %6948 = vmatmul.bf16.vlgmr.msrb.gmra.mxu1 %v14465_v44  ;;  %v9524_v14 = vld [vmem:[%s14301_s6 + $0x610] sm:$0xf]  ;;  %v10613_v29 = vor.u32 %v13322_v20, %v10612_v19  ;;  %v6726_v2 = vadd.f32 %v6725_v51, %v6712_v59 }
 0x1c6   : > { %6975 = vmatpush.bf16.msrb.mxu3 %v12337_v42  ;;  %6996 = vmatpush.bf16.msra.mxu1 %v9717_v50  ;;  %v10036_v34 = vld [vmem:[%s14301_s6 + $0xa10] sm:$0xf]  ;;  %v6588_v46 = vadd.f32 %v14817_v18, %v6574_v21  ;;  %v9525_v53 = vor.u32 %v13050_v31, %v9524_v14  ;;  %v6739_v13 = vpop.f32.mrf.mxu2  ;;  %v6700_v21 = vadd.f32 %v6699_v25, %v6686_v63 }
 0x1c7   : > { %6962 = vmatmul.bf16.vlgmr.msrb.gmra.mxu2 %v14463_v43  ;;  %v13178_v35 = vld [vmem:[%s14301_s6 + $0xa4c] sm:$0xf0]  ;;  %v6740_v22 = vadd.f32 %v6739_v13, %v6726_v2 }
 0x1c8   : > { %7010 = vmatpush.bf16.msra.mxu2 %v10229_v32  ;;  %6983 = vmatpush.bf16.msra.mxu0 %v9141_v4  ;;  %v10548_v40 = vld [vmem:[%s14301_s6 + $0xe10] sm:$0xf]  ;;  %v9013_v32 = vor.u32 %v12922_v27, %v9012_v26  ;;  %v10037_v54 = vor.u32 %v13178_v35, %v10036_v34  ;;  %v6602_v57 = vadd.f32 %v14855_v6, %v6588_v46 }
 0x1c9   : > { %6976 = vmatmul.bf16.vlgmr.msrb.gmra.mxu3 %v14469_v47  ;;  %v13306_v42 = vld [vmem:[%s14301_s6 + $0xe4c] sm:$0xf0] }
 0x1ca   : > { %7024 = vmatpush.bf16.msra.mxu3 %v10741_v56  ;;  %6997 = vmatpush.bf16.msra.mxu1 %v9653_v28  ;;  %v14948_v50 = vld [vmem:[%s14945_s7] sm:$0xff]  ;;  %v10549_v3 = vor.u32 %v13306_v42, %v10548_v40  ;;  %v6616_v49 = vadd.f32 %v14860_v15, %v6602_v57 }
 0x1cb   : > { %v8948_v18 = vld [vmem:[%s14301_s6 + $0x190] sm:$0xf]  ;;  %v8429_v62 = vperm.slane %v14948_v50, 0 }
 0x1cc   : > { %7011 = vmatpush.bf16.msra.mxu2 %v10165_v5  ;;  %6984 = vmatpush.bf16.msra.mxu0 %v9077_v23  ;;  %v12906_v55 = vld [vmem:[%s14301_s6 + $0x1cc] sm:$0xf0]  ;;  %v6713_v23 = vpop.f32.mrf.mxu0  ;;  %v6630_v26 = vadd.f32 %v14875_v41, %v6616_v49  ;;  %v6727_v37 = vpop.f32.mrf.mxu1 }
 0x1cd   : > { %v9460_v56 = vld [vmem:[%s14301_s6 + $0x590] sm:$0xf]  ;;  %v8949_v6 = vor.u32 %v12906_v55, %v8948_v18  ;;  %v8461_v20 = vadd.f32 %v8429_v62, %v6642_v60  ;;  %v6714_v25 = vadd.f32 %v6713_v23, %v6700_v21 }
 0x1ce   : > { %7025 = vmatpush.bf16.msra.mxu3 %v10677_v45  ;;  %6998 = vmatpush.bf16.msra.mxu1 %v9589_v30  ;;  %v13034_v9 = vld [vmem:[%s14301_s6 + $0x5cc] sm:$0xf0]  ;;  %v8430_v30 = vperm.slane %v14948_v50, 1  ;;  %v6741_v63 = vpop.f32.mrf.mxu2 }
 0x1cf   : > { %v9972_v61 = vld [vmem:[%s14301_s6 + $0x990] sm:$0xf]  ;;  %v9461_v7 = vor.u32 %v13034_v9, %v9460_v56  ;;  %v8493_v46 = vmax.f32 %v8461_v20, 0.0 }
 0x1d0   : > { %7012 = vmatpush.bf16.msra.mxu2 %v10101_v24  ;;  %v13162_v52 = vld [vmem:[%s14301_s6 + $0x9cc] sm:$0xf0]  ;;  %6985 = vmatpush.bf16.msra.mxu0 %v9013_v32 }
 0x1d1   : > { %v10484_v4 = vld [vmem:[%s14301_s6 + $0xd90] sm:$0xf]  ;;  %v9973_v8 = vor.u32 %v13162_v52, %v9972_v61 }
 0x1d2   : > { %7026 = vmatpush.bf16.msra.mxu3 %v10613_v29  ;;  %v13290_v28 = vld [vmem:[%s14301_s6 + $0xdcc] sm:$0xf0]  ;;  %6999 = vmatpush.bf16.msra.mxu1 %v9525_v53  ;;  %v6754_v29 = vadd.f32 %v6753_v33, %v6740_v22  ;;  %v6644_v53 = vadd.f32 %v14879_v48, %v6630_v26 }
 0x1d3   : > { %v8884_v5 = vld [vmem:[%s14301_s6 + $0x110] sm:$0xf]  ;;  %v10485_v12 = vor.u32 %v13290_v28, %v10484_v4 }
 0x1d4   : > { %7013 = vmatpush.bf16.msra.mxu2 %v10037_v54  ;;  %v12890_v11 = vld [vmem:[%s14301_s6 + $0x14c] sm:$0xf0]  ;;  %6986 = vmatpush.bf16.msra.mxu0 %v8949_v6  ;;  %v8462_v59 = vadd.f32 %v8430_v30, %v6754_v29 }
 0x1d5   : > { %v9396_v45 = vld [vmem:[%s14301_s6 + $0x510] sm:$0xf]  ;;  %v8885_v27 = vor.u32 %v12890_v11, %v8884_v5 }
 0x1d6   : > { %v13018_v0 = vld [vmem:[%s14301_s6 + $0x54c] sm:$0xf0]  ;;  %7027 = vmatpush.bf16.msra.mxu3 %v10549_v3  ;;  %7000 = vmatpush.bf16.msra.mxu1 %v9461_v7  ;;  %v8494_v57 = vmax.f32 %v8462_v59, 0.0  ;;  %v6728_v3 = vadd.f32 %v6727_v37, %v6714_v25  ;;  %v6755_v7 = vpop.f32.mrf.mxu3 }
 0x1d7   : > { %v9908_v16 = vld [vmem:[%s14301_s6 + $0x910] sm:$0xf]  ;;  %v9397_v14 = vor.u32 %v13018_v0, %v9396_v45  ;;  %v8477_v0 = vadd.f32 %v8429_v62, %v6644_v53 }
 0x1d8   : > { %v13146_v19 = vld [vmem:[%s14301_s6 + $0x94c] sm:$0xf0]  ;;  %7014 = vmatpush.bf16.msra.mxu2 %v9973_v8  ;;  %6987 = vmatpush.bf16.msra.mxu0 %v8885_v27  ;;  %v8525_v6 = vpack.c.bf16 %v8494_v57, %v8493_v46  ;;  %v6742_v5 = vadd.f32 %v6741_v63, %v6728_v3 }
 0x1d9   : > { %v10420_v24 = vld [vmem:[%s14301_s6 + $0xd10] sm:$0xf]  ;;  %v9909_v31 = vor.u32 %v13146_v19, %v9908_v16 }
 0x1da   : > { %v13274_v15 = vld [vmem:[%s14301_s6 + $0xd4c] sm:$0xf0]  ;;  %7028 = vmatpush.bf16.msra.mxu3 %v10485_v12  ;;  %7001 = vmatpush.bf16.msra.mxu1 %v9397_v14  ;;  %8541 = vst [vmem:[%s15004_s20] sm:$0xff] %v8525_v6  ;;  %v6756_v19 = vadd.f32 %v6755_v7, %v6742_v5 }
 0x1db   : > { %v8820_v34 = vld [vmem:[%s14301_s6 + $0x90] sm:$0xf]  ;;  %v10421_v41 = vor.u32 %v13274_v15, %v10420_v24 }
 0x1dc   : > { %v12874_v35 = vld [vmem:[%s14301_s6 + $0xcc] sm:$0xf0]  ;;  %7015 = vmatpush.bf16.msra.mxu2 %v9909_v31  ;;  %v8478_v24 = vadd.f32 %v8430_v30, %v6756_v19 }
 0x1dd   : > { %v9332_v36 = vld [vmem:[%s14301_s6 + $0x490] sm:$0xf]  ;;  %v8821_v54 = vor.u32 %v12874_v35, %v8820_v34 }
 0x1de   : > { %v13002_v38 = vld [vmem:[%s14301_s6 + $0x4cc] sm:$0xf0]  ;;  %7029 = vmatpush.bf16.msra.mxu3 %v10421_v41  ;;  %v8510_v41 = vmax.f32 %v8478_v24, 0.0 }
 0x1df   : > { %v9844_v40 = vld [vmem:[%s14301_s6 + $0x890] sm:$0xf]  ;;  %v9333_v9 = vor.u32 %v13002_v38, %v9332_v36  ;;  %6988 = vmatpush.bf16.msra.mxu0 %v8821_v54  ;;  %v8509_v36 = vmax.f32 %v8477_v0, 0.0 }
 0x1e0   : > { %v13130_v42 = vld [vmem:[%s14301_s6 + $0x8cc] sm:$0xf0] }
 0x1e1   : > { %v10356_v32 = vld [vmem:[%s14301_s6 + $0xc90] sm:$0xf]  ;;  %v9845_v61 = vor.u32 %v13130_v42, %v9844_v40  ;;  %7002 = vmatpush.bf16.msra.mxu1 %v9333_v9  ;;  %v8533_v38 = vpack.c.bf16 %v8510_v41, %v8509_v36 }
 0x1e2   : > { %v13258_v51 = vld [vmem:[%s14301_s6 + $0xccc] sm:$0xf0] }
 0x1e3   : > { %v8756_v18 = vld [vmem:[%s14301_s6 + $0x10] sm:$0xf]  ;;  %v10357_v48 = vor.u32 %v13258_v51, %v10356_v32  ;;  %7016 = vmatpush.bf16.msra.mxu2 %v9845_v61  ;;  %8549 = vst [vmem:[%s15004_s20 + $0x40] sm:$0xff] %v8533_v38 }
 0x1e4   : > { %v12858_v55 = vld [vmem:[%s14301_s6 + $0x4c] sm:$0xf0] }
 0x1e5   : > { %v9268_v56 = vld [vmem:[%s14301_s6 + $0x410] sm:$0xf]  ;;  %v8757_v49 = vor.u32 %v12858_v55, %v8756_v18  ;;  %7030 = vmatpush.bf16.msra.mxu3 %v10357_v48 }
 0x1e6   : > { %v12986_v52 = vld [vmem:[%s14301_s6 + $0x44c] sm:$0xf0] }
 0x1e7   : > { %v9780_v60 = vld [vmem:[%s14301_s6 + $0x810] sm:$0xf]  ;;  %v9269_v20 = vor.u32 %v12986_v52, %v9268_v56  ;;  %6989 = vmatpush.bf16.msra.mxu0 %v8757_v49 }
 0x1e8   : > { %v13114_v2 = vld [vmem:[%s14301_s6 + $0x84c] sm:$0xf0] }
 0x1e9   : > { %v10292_v4 = vld [vmem:[%s14301_s6 + $0xc10] sm:$0xf]  ;;  %v9781_v62 = vor.u32 %v13114_v2, %v9780_v60  ;;  %7003 = vmatpush.bf16.msra.mxu1 %v9269_v20 }
 0x1ea   : > { %v13242_v28 = vld [vmem:[%s14301_s6 + $0xc4c] sm:$0xf0]  ;;  %6990 = vmatmul.bf16.vlgmr.msra.gmra.mxu0 %v14389_v58 }
 0x1eb   : > { %v11252_v8 = vld [vmem:[%s14301_s6 + $0x1390] sm:$0xf]  ;;  %v10293_v23 = vor.u32 %v13242_v28, %v10292_v4  ;;  %7017 = vmatpush.bf16.msra.mxu2 %v9781_v62 }
 0x1ec   : > { %v13482_v11 = vld [vmem:[%s14301_s6 + $0x13cc] sm:$0xf0]  ;;  %7004 = vmatmul.bf16.vlgmr.msra.gmra.mxu1 %v14401_v10 }
 0x1ed   : > { %v11764_v45 = vld [vmem:[%s14301_s6 + $0x1790] sm:$0xf]  ;;  %v11253_v33 = vor.u32 %v13482_v11, %v11252_v8  ;;  %7031 = vmatpush.bf16.msra.mxu3 %v10293_v23 }
 0x1ee   : > { %v13610_v12 = vld [vmem:[%s14301_s6 + $0x17cc] sm:$0xf0]  ;;  %7018 = vmatmul.bf16.vlgmr.msra.gmra.mxu2 %v14394_v1 }
 0x1ef   : > { %v12276_v13 = vld [vmem:[%s14301_s6 + $0x1b90] sm:$0xf]  ;;  %v11765_v15 = vor.u32 %v13610_v12, %v11764_v45  ;;  %7038 = vmatpush.bf16.msrb.mxu0 %v11253_v33 }
 0x1f0   : > { %v13738_v16 = vld [vmem:[%s14301_s6 + $0x1bcc] sm:$0xf0]  ;;  %7032 = vmatmul.bf16.vlgmr.msra.gmra.mxu3 %v14406_v17 }
 0x1f1   : > { %v12788_v21 = vld [vmem:[%s14301_s6 + $0x1f90] sm:$0xf]  ;;  %v12277_v26 = vor.u32 %v13738_v16, %v12276_v13  ;;  %7052 = vmatpush.bf16.msrb.mxu1 %v11765_v15 }
 0x1f2   : > { %v13866_v22 = vld [vmem:[%s14301_s6 + $0x1fcc] sm:$0xf0] }
 0x1f3   : > { %v11188_v27 = vld [vmem:[%s14301_s6 + $0x1310] sm:$0xf]  ;;  %v12789_v29 = vor.u32 %v13866_v22, %v12788_v21  ;;  %7066 = vmatpush.bf16.msrb.mxu2 %v12277_v26 }
 0x1f4   : > { %v13466_v14 = vld [vmem:[%s14301_s6 + $0x134c] sm:$0xf0] }
 0x1f5   : > { %v11700_v25 = vld [vmem:[%s14301_s6 + $0x1710] sm:$0xf]  ;;  %v11189_v37 = vor.u32 %v13466_v14, %v11188_v27  ;;  %7080 = vmatpush.bf16.msrb.mxu3 %v12789_v29 }
 0x1f6   : > { %v13594_v31 = vld [vmem:[%s14301_s6 + $0x174c] sm:$0xf0] }
 0x1f7   : > { %v12212_v34 = vld [vmem:[%s14301_s6 + $0x1b10] sm:$0xf]  ;;  %v11701_v40 = vor.u32 %v13594_v31, %v11700_v25  ;;  %7039 = vmatpush.bf16.msrb.mxu0 %v11189_v37 }
 0x1f8   : > { %v13722_v35 = vld [vmem:[%s14301_s6 + $0x1b4c] sm:$0xf0] }
 0x1f9   : > { %v12724_v50 = vld [vmem:[%s14301_s6 + $0x1f10] sm:$0xf]  ;;  %v12213_v42 = vor.u32 %v13722_v35, %v12212_v34  ;;  %7053 = vmatpush.bf16.msrb.mxu1 %v11701_v40 }
 0x1fa   : > { %v13850_v30 = vld [vmem:[%s14301_s6 + $0x1f4c] sm:$0xf0] }
 0x1fb   : > { %v11124_v46 = vld [vmem:[%s14301_s6 + $0x1290] sm:$0xf]  ;;  %v12725_v51 = vor.u32 %v13850_v30, %v12724_v50  ;;  %7067 = vmatpush.bf16.msrb.mxu2 %v12213_v42 }
 0x1fc   : > { %v13450_v59 = vld [vmem:[%s14301_s6 + $0x12cc] sm:$0xf0] }
 0x1fd   : > { %v11636_v32 = vld [vmem:[%s14301_s6 + $0x1690] sm:$0xf]  ;;  %v11125_v57 = vor.u32 %v13450_v59, %v11124_v46  ;;  %7081 = vmatpush.bf16.msrb.mxu3 %v12725_v51 }
 0x1fe   : > { %v13578_v53 = vld [vmem:[%s14301_s6 + $0x16cc] sm:$0xf0] }
 0x1ff   : > { %v12148_v54 = vld [vmem:[%s14301_s6 + $0x1a90] sm:$0xf]  ;;  %v11637_v3 = vor.u32 %v13578_v53, %v11636_v32  ;;  %7040 = vmatpush.bf16.msrb.mxu0 %v11125_v57 }
 0x200   : > { %v13706_v18 = vld [vmem:[%s14301_s6 + $0x1acc] sm:$0xf0] }
 0x201   : > { %v12660_v55 = vld [vmem:[%s14301_s6 + $0x1e90] sm:$0xf]  ;;  %v12149_v9 = vor.u32 %v13706_v18, %v12148_v54  ;;  %7054 = vmatpush.bf16.msrb.mxu1 %v11637_v3 }
 0x202   : > { %v13834_v56 = vld [vmem:[%s14301_s6 + $0x1ecc] sm:$0xf0] }
 0x203   : > { %v11060_v61 = vld [vmem:[%s14301_s6 + $0x1210] sm:$0xf]  ;;  %v12661_v48 = vor.u32 %v13834_v56, %v12660_v55  ;;  %7068 = vmatpush.bf16.msrb.mxu2 %v12149_v9 }
 0x204   : > { %v13434_v52 = vld [vmem:[%s14301_s6 + $0x124c] sm:$0xf0] }
 0x205   : > { %v11572_v60 = vld [vmem:[%s14301_s6 + $0x1610] sm:$0xf]  ;;  %v11061_v5 = vor.u32 %v13434_v52, %v11060_v61  ;;  %7082 = vmatpush.bf16.msrb.mxu3 %v12661_v48  ;;  %v12962_v52 = vld [vmem:[%s14301_s6 + $0x394] sm:$0xf] }
 0x206   : > { %v13562_v63 = vld [vmem:[%s14301_s6 + $0x164c] sm:$0xf0]  ;;  %v13090_v48 = vld [vmem:[%s14301_s6 + $0x794] sm:$0xf] }
 0x207   : > { %v12084_v2 = vld [vmem:[%s14301_s6 + $0x1a10] sm:$0xf]  ;;  %v11573_v7 = vor.u32 %v13562_v63, %v11572_v60  ;;  %7041 = vmatpush.bf16.msrb.mxu0 %v11061_v5  ;;  %v9206_v60 = vld [vmem:[%s14301_s6 + $0x3d0] sm:$0xf0] }
 0x208   : > { %v13690_v4 = vld [vmem:[%s14301_s6 + $0x1a4c] sm:$0xf0] }
 0x209   : > { %v12596_v28 = vld [vmem:[%s14301_s6 + $0x1e10] sm:$0xf]  ;;  %v12085_v8 = vor.u32 %v13690_v4, %v12084_v2  ;;  %7055 = vmatpush.bf16.msrb.mxu1 %v11573_v7  ;;  %v9718_v2 = vld [vmem:[%s14301_s6 + $0x7d0] sm:$0xf0] }
 0x20a   : > { %v13818_v6 = vld [vmem:[%s14301_s6 + $0x1e4c] sm:$0xf0]  ;;  %v13218_v4 = vld [vmem:[%s14301_s6 + $0xb94] sm:$0xf] }
 0x20b   : > { %v10996_v11 = vld [vmem:[%s14301_s6 + $0x1190] sm:$0xf]  ;;  %v12597_v49 = vor.u32 %v13818_v6, %v12596_v28  ;;  %7069 = vmatpush.bf16.msrb.mxu2 %v12085_v8  ;;  %v10230_v28 = vld [vmem:[%s14301_s6 + $0xbd0] sm:$0xf0] }
 0x20c   : > { %v13418_v45 = vld [vmem:[%s14301_s6 + $0x11cc] sm:$0xf0]  ;;  %v13346_v7 = vld [vmem:[%s14301_s6 + $0xf94] sm:$0xf] }
 0x20d   : > { %v11508_v0 = vld [vmem:[%s14301_s6 + $0x1590] sm:$0xf]  ;;  %v10997_v62 = vor.u32 %v13418_v45, %v10996_v11  ;;  %7083 = vmatpush.bf16.msrb.mxu3 %v12597_v49  ;;  %v10742_v8 = vld [vmem:[%s14301_s6 + $0xfd0] sm:$0xf0]  ;;  %v9209_v45 = vor.u32 %v12962_v52, %v9206_v60  ;;  %v10233_v49 = vor.u32 %v13218_v4, %v10230_v28 }
 0x20e   : > { %v13546_v12 = vld [vmem:[%s14301_s6 + $0x15cc] sm:$0xf0]  ;;  %v9462_v60 = vld [vmem:[%s14301_s6 + $0x5d0] sm:$0xf0] }
 0x20f   : > { %v12020_v13 = vld [vmem:[%s14301_s6 + $0x1990] sm:$0xf]  ;;  %v11509_v21 = vor.u32 %v13546_v12, %v11508_v0  ;;  %7042 = vmatpush.bf16.msrb.mxu0 %v10997_v62  ;;  %v9721_v0 = vor.u32 %v13090_v48, %v9718_v2  ;;  %v12946_v12 = vld [vmem:[%s14301_s6 + $0x314] sm:$0xf] }
 0x210   : > { %v13674_v16 = vld [vmem:[%s14301_s6 + $0x19cc] sm:$0xf0]  ;;  %v13202_v62 = vld [vmem:[%s14301_s6 + $0xb14] sm:$0xf] }
 0x211   : > { %v12532_v19 = vld [vmem:[%s14301_s6 + $0x1d90] sm:$0xf]  ;;  %v12021_v22 = vor.u32 %v13674_v16, %v12020_v13  ;;  %7056 = vmatpush.bf16.msrb.mxu1 %v11509_v21  ;;  %v9142_v13 = vld [vmem:[%s14301_s6 + $0x350] sm:$0xf0] }
 0x212   : > { %v13802_v20 = vld [vmem:[%s14301_s6 + $0x1dcc] sm:$0xf0]  ;;  %v13074_v16 = vld [vmem:[%s14301_s6 + $0x714] sm:$0xf] }
 0x213   : > { %v10932_v23 = vld [vmem:[%s14301_s6 + $0x1110] sm:$0xf]  ;;  %v12533_v15 = vor.u32 %v13802_v20, %v12532_v19  ;;  %7070 = vmatpush.bf16.msrb.mxu2 %v12021_v22  ;;  %v10745_v19 = vor.u32 %v13346_v7, %v10742_v8  ;;  %v9654_v20 = vld [vmem:[%s14301_s6 + $0x750] sm:$0xf0] }
 0x214   : > { %v13402_v33 = vld [vmem:[%s14301_s6 + $0x114c] sm:$0xf0]  ;;  %v10166_v21 = vld [vmem:[%s14301_s6 + $0xb50] sm:$0xf0] }
 0x215   : > { %v11444_v24 = vld [vmem:[%s14301_s6 + $0x1510] sm:$0xf]  ;;  %v10933_v31 = vor.u32 %v13402_v33, %v10932_v23  ;;  %7084 = vmatpush.bf16.msrb.mxu3 %v12533_v15  ;;  %v13330_v22 = vld [vmem:[%s14301_s6 + $0xf14] sm:$0xf]  ;;  %v9145_v33 = vor.u32 %v12946_v12, %v9142_v13  ;;  %v10169_v15 = vor.u32 %v13202_v62, %v10166_v21  ;;  %v15130_v62 = vpop.f32.mrf.mxu3 }
 0x216   : > { %v13530_v26 = vld [vmem:[%s14301_s6 + $0x154c] sm:$0xf0]  ;;  %v10678_v23 = vld [vmem:[%s14301_s6 + $0xf50] sm:$0xf0] }
 0x217   : > { %v11956_v27 = vld [vmem:[%s14301_s6 + $0x1910] sm:$0xf]  ;;  %v11445_v34 = vor.u32 %v13530_v26, %v11444_v24  ;;  %7043 = vmatpush.bf16.msrb.mxu0 %v10933_v31  ;;  %v9657_v24 = vor.u32 %v13074_v16, %v9654_v20  ;;  %v12930_v26 = vld [vmem:[%s14301_s6 + $0x294] sm:$0xf] }
 0x218   : > { %v13658_v14 = vld [vmem:[%s14301_s6 + $0x194c] sm:$0xf0]  ;;  %v13186_v31 = vld [vmem:[%s14301_s6 + $0xa94] sm:$0xf] }
 0x219   : > { %v12468_v25 = vld [vmem:[%s14301_s6 + $0x1d10] sm:$0xf]  ;;  %v11957_v35 = vor.u32 %v13658_v14, %v11956_v27  ;;  %7057 = vmatpush.bf16.msrb.mxu1 %v11445_v34  ;;  %v9078_v27 = vld [vmem:[%s14301_s6 + $0x2d0] sm:$0xf0] }
 0x21a   : > { %v13786_v29 = vld [vmem:[%s14301_s6 + $0x1d4c] sm:$0xf0]  ;;  %v13058_v14 = vld [vmem:[%s14301_s6 + $0x694] sm:$0xf] }
 0x21b   : > { %v10868_v36 = vld [vmem:[%s14301_s6 + $0x1090] sm:$0xf]  ;;  %v12469_v30 = vor.u32 %v13786_v29, %v12468_v25  ;;  %7071 = vmatpush.bf16.msrb.mxu2 %v11957_v35  ;;  %v10681_v25 = vor.u32 %v13330_v22, %v10678_v23  ;;  %v9590_v29 = vld [vmem:[%s14301_s6 + $0x6d0] sm:$0xf0] }
 0x21c   : > { %v13386_v41 = vld [vmem:[%s14301_s6 + $0x10cc] sm:$0xf0]  ;;  %v10102_v34 = vld [vmem:[%s14301_s6 + $0xad0] sm:$0xf0] }
 0x21d   : > { %v11380_v50 = vld [vmem:[%s14301_s6 + $0x1490] sm:$0xf]  ;;  %v10869_v59 = vor.u32 %v13386_v41, %v10868_v36  ;;  %7085 = vmatpush.bf16.msrb.mxu3 %v12469_v30  ;;  %v13314_v35 = vld [vmem:[%s14301_s6 + $0xe94] sm:$0xf]  ;;  %v9081_v41 = vor.u32 %v12930_v26, %v9078_v27  ;;  %v10105_v30 = vor.u32 %v13186_v31, %v10102_v34 }
 0x21e   : > { %v13514_v37 = vld [vmem:[%s14301_s6 + $0x14cc] sm:$0xf0]  ;;  %v10614_v36 = vld [vmem:[%s14301_s6 + $0xed0] sm:$0xf0] }
 0x21f   : > { %v11892_v38 = vld [vmem:[%s14301_s6 + $0x1890] sm:$0xf]  ;;  %v11381_v53 = vor.u32 %v13514_v37, %v11380_v50  ;;  %7044 = vmatpush.bf16.msrb.mxu0 %v10869_v59  ;;  %v9593_v50 = vor.u32 %v13058_v14, %v9590_v29  ;;  %v12914_v37 = vld [vmem:[%s14301_s6 + $0x214] sm:$0xf] }
 0x220   : > { %v13642_v40 = vld [vmem:[%s14301_s6 + $0x18cc] sm:$0xf0]  ;;  %v13170_v59 = vld [vmem:[%s14301_s6 + $0xa14] sm:$0xf] }
 0x221   : > { %v12404_v42 = vld [vmem:[%s14301_s6 + $0x1c90] sm:$0xf]  ;;  %v11893_v54 = vor.u32 %v13642_v40, %v11892_v38  ;;  %7058 = vmatpush.bf16.msrb.mxu1 %v11381_v53  ;;  %v9014_v38 = vld [vmem:[%s14301_s6 + $0x250] sm:$0xf0] }
 0x222   : > { %v13770_v46 = vld [vmem:[%s14301_s6 + $0x1ccc] sm:$0xf0]  ;;  %v13042_v40 = vld [vmem:[%s14301_s6 + $0x614] sm:$0xf] }
 0x223   : > { %v10804_v32 = vld [vmem:[%s14301_s6 + $0x1010] sm:$0xf]  ;;  %v12405_v57 = vor.u32 %v13770_v46, %v12404_v42  ;;  %7072 = vmatpush.bf16.msrb.mxu2 %v11893_v54  ;;  %v10617_v42 = vor.u32 %v13314_v35, %v10614_v36  ;;  %v9526_v46 = vld [vmem:[%s14301_s6 + $0x650] sm:$0xf0]  ;;  %v9017_v54 = vor.u32 %v12914_v37, %v9014_v38 }
 0x224   : > { %v13370_v51 = vld [vmem:[%s14301_s6 + $0x104c] sm:$0xf0]  ;;  %v10550_v53 = vld [vmem:[%s14301_s6 + $0xe50] sm:$0xf0] }
 0x225   : > { %v11316_v18 = vld [vmem:[%s14301_s6 + $0x1410] sm:$0xf]  ;;  %v10805_v63 = vor.u32 %v13370_v51, %v10804_v32  ;;  %7086 = vmatpush.bf16.msrb.mxu3 %v12405_v57  ;;  %v10038_v32 = vld [vmem:[%s14301_s6 + $0xa50] sm:$0xf0] }
 0x226   : > { %v13498_v55 = vld [vmem:[%s14301_s6 + $0x144c] sm:$0xf0]  ;;  %v13298_v51 = vld [vmem:[%s14301_s6 + $0xe14] sm:$0xf] }
 0x227   : > { %v11828_v56 = vld [vmem:[%s14301_s6 + $0x1810] sm:$0xf]  ;;  %v11317_v6 = vor.u32 %v13498_v55, %v11316_v18  ;;  %7045 = vmatpush.bf16.msrb.mxu0 %v10805_v63  ;;  %v15108_v18 = vpop.f32.mrf.mxu0  ;;  %v9529_v55 = vor.u32 %v13042_v40, %v9526_v46  ;;  %v12898_v57 = vld [vmem:[%s14301_s6 + $0x194] sm:$0xf]  ;;  %v10553_v52 = vor.u32 %v13298_v51, %v10550_v53 }
 0x228   : > { %v13626_v3 = vld [vmem:[%s14301_s6 + $0x184c] sm:$0xf0]  ;;  %v13154_v48 = vld [vmem:[%s14301_s6 + $0x994] sm:$0xf] }
 0x229   : > { %v12340_v9 = vld [vmem:[%s14301_s6 + $0x1c10] sm:$0xf]  ;;  %v11829_v5 = vor.u32 %v13626_v3, %v11828_v56  ;;  %7059 = vmatpush.bf16.msrb.mxu1 %v11317_v6  ;;  %v10041_v56 = vor.u32 %v13170_v59, %v10038_v32  ;;  %v8950_v3 = vld [vmem:[%s14301_s6 + $0x1d0] sm:$0xf0] }
 0x22a   : > { %v13754_v61 = vld [vmem:[%s14301_s6 + $0x1c4c] sm:$0xf0]  ;;  %7046 = vmatmul.bf16.vlgmr.msrb.gmra.mxu0 %v14458_v39  ;;  %v9974_v63 = vld [vmem:[%s14301_s6 + $0x9d0] sm:$0xf0]  ;;  %v8953_v28 = vor.u32 %v12898_v57, %v8950_v3 }
 0x22b   : > { %v12341_v11 = vor.u32 %v13754_v61, %v12340_v9  ;;  %7073 = vmatpush.bf16.msrb.mxu2 %v11829_v5  ;;  %7094 = vmatpush.bf16.msra.mxu0 %v9209_v45  ;;  %v13026_v9 = vld [vmem:[%s14301_s6 + $0x594] sm:$0xf]  ;;  %v15113_v61 = vpop.f32.mrf.mxu1  ;;  %v9977_v5 = vor.u32 %v13154_v48, %v9974_v63 }
 0x22c   : > { %7060 = vmatmul.bf16.vlgmr.msrb.gmra.mxu1 %v14465_v44  ;;  %v13282_v2 = vld [vmem:[%s14301_s6 + $0xd94] sm:$0xf]  ;;  %v9465_v6 = vor.u32 %v13026_v9, %v9462_v60 }
 0x22d   : > { %7087 = vmatpush.bf16.msrb.mxu3 %v12341_v11  ;;  %7108 = vmatpush.bf16.msra.mxu1 %v9721_v0  ;;  %v10486_v4 = vld [vmem:[%s14301_s6 + $0xdd0] sm:$0xf0] }
 0x22e   : > { %7074 = vmatmul.bf16.vlgmr.msrb.gmra.mxu2 %v14463_v43  ;;  %v12882_v7 = vld [vmem:[%s14301_s6 + $0x114] sm:$0xf]  ;;  %v10489_v45 = vor.u32 %v13282_v2, %v10486_v4 }
 0x22f   : > { %7122 = vmatpush.bf16.msra.mxu2 %v10233_v49  ;;  %7095 = vmatpush.bf16.msra.mxu0 %v9145_v33  ;;  %v8886_v8 = vld [vmem:[%s14301_s6 + $0x150] sm:$0xf0] }
 0x230   : > { %7088 = vmatmul.bf16.vlgmr.msrb.gmra.mxu3 %v14469_v47  ;;  %v13010_v11 = vld [vmem:[%s14301_s6 + $0x514] sm:$0xf]  ;;  %v8889_v20 = vor.u32 %v12882_v7, %v8886_v8 }
 0x231   : > { %7136 = vmatpush.bf16.msra.mxu3 %v10745_v19  ;;  %7109 = vmatpush.bf16.msra.mxu1 %v9657_v24  ;;  %v9398_v0 = vld [vmem:[%s14301_s6 + $0x550] sm:$0xf0]  ;;  %v15128_v19 = vpop.f32.mrf.mxu2 }
 0x232   : > { %v13138_v49 = vld [vmem:[%s14301_s6 + $0x914] sm:$0xf]  ;;  %v9401_v21 = vor.u32 %v13010_v11, %v9398_v0 }
 0x233   : > { %7123 = vmatpush.bf16.msra.mxu2 %v10169_v15  ;;  %7096 = vmatpush.bf16.msra.mxu0 %v9081_v41  ;;  %v9910_v12 = vld [vmem:[%s14301_s6 + $0x950] sm:$0xf0]  ;;  %v15142_v34 = vpop.f32.mrf.mxu1 }
 0x234   : > { %v13266_v13 = vld [vmem:[%s14301_s6 + $0xd14] sm:$0xf]  ;;  %v9913_v22 = vor.u32 %v13138_v49, %v9910_v12 }
 0x235   : > { %7137 = vmatpush.bf16.msra.mxu3 %v10681_v25  ;;  %7110 = vmatpush.bf16.msra.mxu1 %v9593_v50  ;;  %v10422_v16 = vld [vmem:[%s14301_s6 + $0xd50] sm:$0xf0]  ;;  %v15138_v25 = vpop.f32.mrf.mxu0 }
 0x236   : > { %v12866_v23 = vld [vmem:[%s14301_s6 + $0x94] sm:$0xf]  ;;  %v10425_v15 = vor.u32 %v13266_v13, %v10422_v16 }
 0x237   : > { %7124 = vmatpush.bf16.msra.mxu2 %v10105_v30  ;;  %7097 = vmatpush.bf16.msra.mxu0 %v9017_v54  ;;  %v8822_v33 = vld [vmem:[%s14301_s6 + $0xd0] sm:$0xf0] }
 0x238   : > { %v12994_v24 = vld [vmem:[%s14301_s6 + $0x494] sm:$0xf]  ;;  %v8825_v35 = vor.u32 %v12866_v23, %v8822_v33 }
 0x239   : > { %7138 = vmatpush.bf16.msra.mxu3 %v10617_v42  ;;  %7111 = vmatpush.bf16.msra.mxu1 %v9529_v55  ;;  %v9334_v26 = vld [vmem:[%s14301_s6 + $0x4d0] sm:$0xf0]  ;;  %v15160_v63 = vpop.f32.mrf.mxu2 }
 0x23a   : > { %v13122_v27 = vld [vmem:[%s14301_s6 + $0x894] sm:$0xf]  ;;  %v9337_v50 = vor.u32 %v12994_v24, %v9334_v26 }
 0x23b   : > { %7125 = vmatpush.bf16.msra.mxu2 %v10041_v56  ;;  %7098 = vmatpush.bf16.msra.mxu0 %v8953_v28  ;;  %v9846_v14 = vld [vmem:[%s14301_s6 + $0x8d0] sm:$0xf0]  ;;  %v15162_v28 = vpop.f32.mrf.mxu3 }
 0x23c   : > { %v13250_v29 = vld [vmem:[%s14301_s6 + $0xc94] sm:$0xf]  ;;  %v9849_v30 = vor.u32 %v13122_v27, %v9846_v14 }
 0x23d   : > { %7139 = vmatpush.bf16.msra.mxu3 %v10553_v52  ;;  %7112 = vmatpush.bf16.msra.mxu1 %v9465_v6  ;;  %v10358_v31 = vld [vmem:[%s14301_s6 + $0xcd0] sm:$0xf0]  ;;  %v15170_v13 = vpop.f32.mrf.mxu0 }
 0x23e   : > { %v12850_v36 = vld [vmem:[%s14301_s6 + $0x14] sm:$0xf]  ;;  %v10361_v42 = vor.u32 %v13250_v29, %v10358_v31 }
 0x23f   : > { %7126 = vmatpush.bf16.msra.mxu2 %v9977_v5  ;;  %7099 = vmatpush.bf16.msra.mxu0 %v8889_v20  ;;  %v8758_v41 = vld [vmem:[%s14301_s6 + $0x50] sm:$0xf0] }
 0x240   : > { %v12978_v37 = vld [vmem:[%s14301_s6 + $0x414] sm:$0xf]  ;;  %v8761_v55 = vor.u32 %v12850_v36, %v8758_v41 }
 0x241   : > { %7140 = vmatpush.bf16.msra.mxu3 %v10489_v45  ;;  %7113 = vmatpush.bf16.msra.mxu1 %v9401_v21  ;;  %v9270_v38 = vld [vmem:[%s14301_s6 + $0x450] sm:$0xf0]  ;;  %v15174_v21 = vpop.f32.mrf.mxu1 }
 0x242   : > { %v13106_v40 = vld [vmem:[%s14301_s6 + $0x814] sm:$0xf]  ;;  %v9273_v9 = vor.u32 %v12978_v37, %v9270_v38 }
 0x243   : > { %7127 = vmatpush.bf16.msra.mxu2 %v9913_v22  ;;  %v9782_v46 = vld [vmem:[%s14301_s6 + $0x850] sm:$0xf0]  ;;  %7100 = vmatpush.bf16.msra.mxu0 %v8825_v35 }
 0x244   : > { %v13234_v59 = vld [vmem:[%s14301_s6 + $0xc14] sm:$0xf]  ;;  %v9785_v52 = vor.u32 %v13106_v40, %v9782_v46 }
 0x245   : > { %7141 = vmatpush.bf16.msra.mxu3 %v10425_v15  ;;  %v10294_v32 = vld [vmem:[%s14301_s6 + $0xc50] sm:$0xf0]  ;;  %7114 = vmatpush.bf16.msra.mxu1 %v9337_v50 }
 0x246   : > { %v13474_v51 = vld [vmem:[%s14301_s6 + $0x1394] sm:$0xf]  ;;  %v10297_v2 = vor.u32 %v13234_v59, %v10294_v32 }
 0x247   : > { %v11254_v53 = vld [vmem:[%s14301_s6 + $0x13d0] sm:$0xf0]  ;;  %7128 = vmatpush.bf16.msra.mxu2 %v9849_v30  ;;  %7101 = vmatpush.bf16.msra.mxu0 %v8761_v55 }
 0x248   : > { %v13602_v54 = vld [vmem:[%s14301_s6 + $0x1794] sm:$0xf]  ;;  %v11257_v4 = vor.u32 %v13474_v51, %v11254_v53  ;;  %v15196_v53 = vpop.f32.mrf.mxu3 }
 0x249   : > { %v11766_v56 = vld [vmem:[%s14301_s6 + $0x17d0] sm:$0xf0]  ;;  %7142 = vmatpush.bf16.msra.mxu3 %v10361_v42  ;;  %7115 = vmatpush.bf16.msra.mxu1 %v9273_v9  ;;  %v15191_v42 = vpop.f32.mrf.mxu2 }
 0x24a   : > { %v13730_v57 = vld [vmem:[%s14301_s6 + $0x1b94] sm:$0xf]  ;;  %v11769_v6 = vor.u32 %v13602_v54, %v11766_v56  ;;  %7102 = vmatmul.bf16.vlgmr.msra.gmra.mxu0 %v14389_v58 }
 0x24b   : > { %v12278_v3 = vld [vmem:[%s14301_s6 + $0x1bd0] sm:$0xf0]  ;;  %7129 = vmatpush.bf16.msra.mxu2 %v9785_v52  ;;  %7150 = vmatpush.bf16.msrb.mxu0 %v11257_v4 }
 0x24c   : > { %v13858_v60 = vld [vmem:[%s14301_s6 + $0x1f94] sm:$0xf]  ;;  %v12281_v5 = vor.u32 %v13730_v57, %v12278_v3  ;;  %7116 = vmatmul.bf16.vlgmr.msra.gmra.mxu1 %v14401_v10  ;;  %v15200_v57 = vpop.f32.mrf.mxu0 }
 0x24d   : > { %v12790_v48 = vld [vmem:[%s14301_s6 + $0x1fd0] sm:$0xf0]  ;;  %7143 = vmatpush.bf16.msra.mxu3 %v10297_v2  ;;  %7164 = vmatpush.bf16.msrb.mxu1 %v11769_v6  ;;  %v15205_v2 = vpop.f32.mrf.mxu1 }
 0x24e   : > { %v13458_v7 = vld [vmem:[%s14301_s6 + $0x1314] sm:$0xf]  ;;  %v12793_v45 = vor.u32 %v13858_v60, %v12790_v48  ;;  %7130 = vmatmul.bf16.vlgmr.msra.gmra.mxu2 %v14394_v1 }
 0x24f   : > { %v11190_v8 = vld [vmem:[%s14301_s6 + $0x1350] sm:$0xf0]  ;;  %7178 = vmatpush.bf16.msrb.mxu2 %v12281_v5 }
 0x250   : > { %v13586_v11 = vld [vmem:[%s14301_s6 + $0x1714] sm:$0xf]  ;;  %v11193_v22 = vor.u32 %v13458_v7, %v11190_v8  ;;  %7144 = vmatmul.bf16.vlgmr.msra.gmra.mxu3 %v14406_v17 }
 0x251   : > { %v11702_v0 = vld [vmem:[%s14301_s6 + $0x1750] sm:$0xf0]  ;;  %7192 = vmatpush.bf16.msrb.mxu3 %v12793_v45 }
 0x252   : > { %v13714_v49 = vld [vmem:[%s14301_s6 + $0x1b14] sm:$0xf]  ;;  %v11705_v23 = vor.u32 %v13586_v11, %v11702_v0  ;;  %7151 = vmatpush.bf16.msrb.mxu0 %v11193_v22 }
 0x253   : > { %v12214_v12 = vld [vmem:[%s14301_s6 + $0x1b50] sm:$0xf0] }
 0x254   : > { %v13842_v16 = vld [vmem:[%s14301_s6 + $0x1f14] sm:$0xf]  ;;  %v12217_v33 = vor.u32 %v13714_v49, %v12214_v12  ;;  %7165 = vmatpush.bf16.msrb.mxu1 %v11705_v23 }
 0x255   : > { %v12726_v20 = vld [vmem:[%s14301_s6 + $0x1f50] sm:$0xf0] }
 0x256   : > { %v13442_v24 = vld [vmem:[%s14301_s6 + $0x1294] sm:$0xf]  ;;  %v12729_v27 = vor.u32 %v13842_v16, %v12726_v20  ;;  %7179 = vmatpush.bf16.msrb.mxu2 %v12217_v33 }
 0x257   : > { %v11126_v15 = vld [vmem:[%s14301_s6 + $0x12d0] sm:$0xf0] }
 0x258   : > { %v13570_v26 = vld [vmem:[%s14301_s6 + $0x1694] sm:$0xf]  ;;  %v11129_v41 = vor.u32 %v13442_v24, %v11126_v15  ;;  %7193 = vmatpush.bf16.msrb.mxu3 %v12729_v27  ;;  %v15220_v27 = vpop.f32.mrf.mxu2 }
 0x259   : > { %v11638_v14 = vld [vmem:[%s14301_s6 + $0x16d0] sm:$0xf0] }
 0x25a   : > { %v13698_v29 = vld [vmem:[%s14301_s6 + $0x1a94] sm:$0xf]  ;;  %v11641_v50 = vor.u32 %v13570_v26, %v11638_v14  ;;  %7152 = vmatpush.bf16.msrb.mxu0 %v11129_v41  ;;  %v6879_v41 = vpop.f32.mrf.mxu0 }
 0x25b   : > { %v12150_v31 = vld [vmem:[%s14301_s6 + $0x1ad0] sm:$0xf0] }
 0x25c   : > { %v13826_v35 = vld [vmem:[%s14301_s6 + $0x1e94] sm:$0xf]  ;;  %v12153_v30 = vor.u32 %v13698_v29, %v12150_v31  ;;  %7166 = vmatpush.bf16.msrb.mxu1 %v11641_v50  ;;  %v6782_v29 = vadd.f32 %v15113_v61, %v15108_v18  ;;  %v15224_v31 = vpop.f32.mrf.mxu3 }
 0x25d   : > { %v12662_v36 = vld [vmem:[%s14301_s6 + $0x1ed0] sm:$0xf0] }
 0x25e   : > { %v13426_v37 = vld [vmem:[%s14301_s6 + $0x1214] sm:$0xf]  ;;  %v12665_v46 = vor.u32 %v13826_v35, %v12662_v36  ;;  %7180 = vmatpush.bf16.msrb.mxu2 %v12153_v30 }
 0x25f   : > { %v11062_v38 = vld [vmem:[%s14301_s6 + $0x1250] sm:$0xf0] }
 0x260   : > { %v13554_v40 = vld [vmem:[%s14301_s6 + $0x1614] sm:$0xf]  ;;  %v11065_v56 = vor.u32 %v13426_v37, %v11062_v38  ;;  %7194 = vmatpush.bf16.msrb.mxu3 %v12665_v46  ;;  %v6893_v46 = vpop.f32.mrf.mxu1 }
 0x261   : > { %v11574_v59 = vld [vmem:[%s14301_s6 + $0x1650] sm:$0xf0] }
 0x262   : > { %v13682_v32 = vld [vmem:[%s14301_s6 + $0x1a14] sm:$0xf]  ;;  %v11577_v3 = vor.u32 %v13554_v40, %v11574_v59  ;;  %7153 = vmatpush.bf16.msrb.mxu0 %v11065_v56  ;;  %v6796_v56 = vadd.f32 %v15128_v19, %v6782_v29  ;;  %v9724_v19 = vld [vmem:[%s14301_s6 + $0x798] sm:$0xf] }
 0x263   : > { %v12086_v51 = vld [vmem:[%s14301_s6 + $0x1a50] sm:$0xf0] }
 0x264   : > { %v13810_v54 = vld [vmem:[%s14301_s6 + $0x1e14] sm:$0xf]  ;;  %v12089_v9 = vor.u32 %v13682_v32, %v12086_v51  ;;  %7167 = vmatpush.bf16.msrb.mxu1 %v11577_v3 }
 0x265   : > { %v12598_v55 = vld [vmem:[%s14301_s6 + $0x1e50] sm:$0xf0] }
 0x266   : > { %v13410_v52 = vld [vmem:[%s14301_s6 + $0x1194] sm:$0xf]  ;;  %v12601_v4 = vor.u32 %v13810_v54, %v12598_v55  ;;  %7181 = vmatpush.bf16.msrb.mxu2 %v12089_v9 }
 0x267   : > { %v10998_v60 = vld [vmem:[%s14301_s6 + $0x11d0] sm:$0xf0] }
 0x268   : > { %v13538_v48 = vld [vmem:[%s14301_s6 + $0x1594] sm:$0xf]  ;;  %v11001_v45 = vor.u32 %v13410_v52, %v10998_v60  ;;  %7195 = vmatpush.bf16.msrb.mxu3 %v12601_v4 }
 0x269   : > { %v11510_v6 = vld [vmem:[%s14301_s6 + $0x15d0] sm:$0xf0] }
 0x26a   : > { %v13666_v5 = vld [vmem:[%s14301_s6 + $0x1994] sm:$0xf]  ;;  %v11513_v0 = vor.u32 %v13538_v48, %v11510_v6  ;;  %7154 = vmatpush.bf16.msrb.mxu0 %v11001_v45 }
 0x26b   : > { %v12022_v7 = vld [vmem:[%s14301_s6 + $0x19d0] sm:$0xf0] }
 0x26c   : > { %v13794_v8 = vld [vmem:[%s14301_s6 + $0x1d94] sm:$0xf]  ;;  %v12025_v49 = vor.u32 %v13666_v5, %v12022_v7  ;;  %7168 = vmatpush.bf16.msrb.mxu1 %v11513_v0  ;;  %v13099_v0 = vld [vmem:[%s14301_s6 + $0x7d4] sm:$0xf0] }
 0x26d   : > { %v12534_v11 = vld [vmem:[%s14301_s6 + $0x1dd0] sm:$0xf0] }
 0x26e   : > { %v13394_v12 = vld [vmem:[%s14301_s6 + $0x1114] sm:$0xf]  ;;  %v12537_v22 = vor.u32 %v13794_v8, %v12534_v11  ;;  %7182 = vmatpush.bf16.msrb.mxu2 %v12025_v49  ;;  %v9212_v8 = vld [vmem:[%s14301_s6 + $0x398] sm:$0xf] }
 0x26f   : > { %v10934_v16 = vld [vmem:[%s14301_s6 + $0x1150] sm:$0xf0]  ;;  %v12971_v11 = vld [vmem:[%s14301_s6 + $0x3d4] sm:$0xf0] }
 0x270   : > { %v13522_v20 = vld [vmem:[%s14301_s6 + $0x1514] sm:$0xf]  ;;  %v10937_v14 = vor.u32 %v13394_v12, %v10934_v16  ;;  %7196 = vmatpush.bf16.msrb.mxu3 %v12537_v22  ;;  %v10236_v49 = vld [vmem:[%s14301_s6 + $0xb98] sm:$0xf]  ;;  %v6907_v16 = vpop.f32.mrf.mxu2  ;;  %v9213_v29 = vor.u32 %v12971_v11, %v9212_v8 }
 0x271   : > { %v11446_v23 = vld [vmem:[%s14301_s6 + $0x1550] sm:$0xf0]  ;;  %v13227_v12 = vld [vmem:[%s14301_s6 + $0xbd4] sm:$0xf0] }
 0x272   : > { %v13650_v33 = vld [vmem:[%s14301_s6 + $0x1914] sm:$0xf]  ;;  %v11449_v35 = vor.u32 %v13522_v20, %v11446_v23  ;;  %7155 = vmatpush.bf16.msrb.mxu0 %v10937_v14  ;;  %v6810_v20 = vadd.f32 %v15130_v62, %v6796_v56  ;;  %v10237_v62 = vor.u32 %v13227_v12, %v10236_v49  ;;  %v9020_v49 = vld [vmem:[%s14301_s6 + $0x218] sm:$0xf] }
 0x273   : > { %v11958_v24 = vld [vmem:[%s14301_s6 + $0x1950] sm:$0xf0]  ;;  %v12923_v12 = vld [vmem:[%s14301_s6 + $0x254] sm:$0xf0] }
 0x274   : > { %v13778_v15 = vld [vmem:[%s14301_s6 + $0x1d14] sm:$0xf]  ;;  %v11961_v36 = vor.u32 %v13650_v33, %v11958_v24  ;;  %7169 = vmatpush.bf16.msrb.mxu1 %v11449_v35  ;;  %v10748_v33 = vld [vmem:[%s14301_s6 + $0xf98] sm:$0xf]  ;;  %v9725_v35 = vor.u32 %v13099_v0, %v9724_v19 }
 0x275   : > { %v12470_v26 = vld [vmem:[%s14301_s6 + $0x1d50] sm:$0xf0]  ;;  %v13355_v24 = vld [vmem:[%s14301_s6 + $0xfd4] sm:$0xf0] }
 0x276   : > { %v13378_v50 = vld [vmem:[%s14301_s6 + $0x1094] sm:$0xf]  ;;  %v12473_v38 = vor.u32 %v13778_v15, %v12470_v26  ;;  %7183 = vmatpush.bf16.msrb.mxu2 %v11961_v36  ;;  %v6921_v15 = vpop.f32.mrf.mxu3  ;;  %v6894_v26 = vadd.f32 %v6893_v46, %v6879_v41  ;;  %v6881_v36 = vpop.f32.mrf.mxu0  ;;  %v6824_v41 = vadd.f32 %v15170_v13, %v6810_v20  ;;  %v10684_v46 = vld [vmem:[%s14301_s6 + $0xf18] sm:$0xf] }
 0x277   : > { %v10870_v30 = vld [vmem:[%s14301_s6 + $0x10d0] sm:$0xf0]  ;;  %v13051_v20 = vld [vmem:[%s14301_s6 + $0x654] sm:$0xf0] }
 0x278   : > { %v13506_v37 = vld [vmem:[%s14301_s6 + $0x1494] sm:$0xf]  ;;  %v10873_v51 = vor.u32 %v13378_v50, %v10870_v30  ;;  %7197 = vmatpush.bf16.msrb.mxu3 %v12473_v38  ;;  %v9148_v50 = vld [vmem:[%s14301_s6 + $0x318] sm:$0xf]  ;;  %v10749_v38 = vor.u32 %v13355_v24, %v10748_v33 }
 0x279   : > { %v11382_v40 = vld [vmem:[%s14301_s6 + $0x14d0] sm:$0xf0]  ;;  %v12955_v30 = vld [vmem:[%s14301_s6 + $0x354] sm:$0xf0] }
 0x27a   : > { %v13634_v18 = vld [vmem:[%s14301_s6 + $0x1894] sm:$0xf]  ;;  %v11385_v3 = vor.u32 %v13506_v37, %v11382_v40  ;;  %7156 = vmatpush.bf16.msrb.mxu0 %v10873_v51  ;;  %v9660_v37 = vld [vmem:[%s14301_s6 + $0x718] sm:$0xf]  ;;  %v6784_v51 = vadd.f32 %v15142_v34, %v15138_v25 }
 0x27b   : > { %v11894_v61 = vld [vmem:[%s14301_s6 + $0x18d0] sm:$0xf0]  ;;  %v13083_v40 = vld [vmem:[%s14301_s6 + $0x754] sm:$0xf0] }
 0x27c   : > { %v13762_v59 = vld [vmem:[%s14301_s6 + $0x1c94] sm:$0xf]  ;;  %v11897_v9 = vor.u32 %v13634_v18, %v11894_v61  ;;  %7170 = vmatpush.bf16.msrb.mxu1 %v11385_v3  ;;  %v10172_v18 = vld [vmem:[%s14301_s6 + $0xb18] sm:$0xf]  ;;  %v9661_v13 = vor.u32 %v13083_v40, %v9660_v37 }
 0x27d   : > { %v12406_v32 = vld [vmem:[%s14301_s6 + $0x1cd0] sm:$0xf0]  ;;  %v13211_v61 = vld [vmem:[%s14301_s6 + $0xb54] sm:$0xf0] }
 0x27e   : > { %v13362_v54 = vld [vmem:[%s14301_s6 + $0x1014] sm:$0xf]  ;;  %v12409_v4 = vor.u32 %v13762_v59, %v12406_v32  ;;  %7184 = vmatpush.bf16.msrb.mxu2 %v11897_v9  ;;  %v6895_v59 = vpop.f32.mrf.mxu1  ;;  %v13339_v32 = vld [vmem:[%s14301_s6 + $0xf54] sm:$0xf0]  ;;  %v10173_v56 = vor.u32 %v13211_v61, %v10172_v18  ;;  %v6923_v0 = vpop.f32.mrf.mxu3 }
 0x27f   : > { %v10806_v55 = vld [vmem:[%s14301_s6 + $0x1050] sm:$0xf0]  ;;  %v9084_v3 = vld [vmem:[%s14301_s6 + $0x298] sm:$0xf]  ;;  %v6896_v24 = vadd.f32 %v6895_v59, %v6881_v36 }
 0x280   : > { %v13490_v52 = vld [vmem:[%s14301_s6 + $0x1414] sm:$0xf]  ;;  %v10809_v45 = vor.u32 %v13362_v54, %v10806_v55  ;;  %7198 = vmatpush.bf16.msrb.mxu3 %v12409_v4  ;;  %v6908_v54 = vadd.f32 %v6907_v16, %v6894_v26  ;;  %v9149_v55 = vor.u32 %v12955_v30, %v9148_v50  ;;  %v12939_v9 = vld [vmem:[%s14301_s6 + $0x2d4] sm:$0xf0]  ;;  %v6838_v4 = vadd.f32 %v15174_v21, %v6824_v41  ;;  %v6909_v21 = vpop.f32.mrf.mxu2 }
 0x281   : > { %v11318_v60 = vld [vmem:[%s14301_s6 + $0x1450] sm:$0xf0]  ;;  %v13067_v25 = vld [vmem:[%s14301_s6 + $0x6d4] sm:$0xf0]  ;;  %v9085_v11 = vor.u32 %v12939_v9, %v9084_v3 }
 0x282   : > { %v13618_v48 = vld [vmem:[%s14301_s6 + $0x1814] sm:$0xf]  ;;  %v11321_v22 = vor.u32 %v13490_v52, %v11318_v60  ;;  %7157 = vmatpush.bf16.msrb.mxu0 %v10809_v45  ;;  %v9596_v52 = vld [vmem:[%s14301_s6 + $0x698] sm:$0xf]  ;;  %v10685_v60 = vor.u32 %v13339_v32, %v10684_v46  ;;  %v6922_v8 = vadd.f32 %v6921_v15, %v6908_v54  ;;  %v6852_v33 = vadd.f32 %v15191_v42, %v6838_v4  ;;  %v6935_v15 = vpop.f32.mrf.mxu0 }
 0x283   : > { %v11830_v6 = vld [vmem:[%s14301_s6 + $0x1850] sm:$0xf0]  ;;  %v10108_v34 = vld [vmem:[%s14301_s6 + $0xa98] sm:$0xf]  ;;  %v9597_v19 = vor.u32 %v13067_v25, %v9596_v52 }
 0x284   : > { %v13746_v5 = vld [vmem:[%s14301_s6 + $0x1c14] sm:$0xf]  ;;  %v11833_v23 = vor.u32 %v13618_v48, %v11830_v6  ;;  %7171 = vmatpush.bf16.msrb.mxu1 %v11321_v22  ;;  %v13195_v48 = vld [vmem:[%s14301_s6 + $0xad4] sm:$0xf0]  ;;  %v6866_v41 = vadd.f32 %v15196_v53, %v6852_v33 }
 0x285   : > { %v12342_v7 = vld [vmem:[%s14301_s6 + $0x1c50] sm:$0xf0]  ;;  %7158 = vmatmul.bf16.vlgmr.msrb.gmra.mxu0 %v14458_v39  ;;  %v10620_v6 = vld [vmem:[%s14301_s6 + $0xe98] sm:$0xf]  ;;  %v10109_v45 = vor.u32 %v13195_v48, %v10108_v34 }
 0x286   : > { %v12345_v14 = vor.u32 %v13746_v5, %v12342_v7  ;;  %7185 = vmatpush.bf16.msrb.mxu2 %v11833_v23  ;;  %7206 = vmatpush.bf16.msra.mxu0 %v9213_v29  ;;  %v13323_v5 = vld [vmem:[%s14301_s6 + $0xed4] sm:$0xf0]  ;;  %v6798_v7 = vadd.f32 %v15160_v63, %v6784_v51  ;;  %v6949_v50 = vpop.f32.mrf.mxu1  ;;  %v15296_v46 = vld [vmem:[%s14945_s7] sm:$0xff]  ;;  %v6910_v51 = vadd.f32 %v6909_v21, %v6896_v24  ;;  %v6977_v21 = vpop.f32.mrf.mxu3 }
 0x287   : > { %7172 = vmatmul.bf16.vlgmr.msrb.gmra.mxu1 %v14465_v44  ;;  %v9532_v16 = vld [vmem:[%s14301_s6 + $0x618] sm:$0xf]  ;;  %v10621_v63 = vor.u32 %v13323_v5, %v10620_v6  ;;  %v8431_v32 = vperm.slane %v15296_v46, 2 }
 0x288   : > { %7199 = vmatpush.bf16.msrb.mxu3 %v12345_v14  ;;  %7220 = vmatpush.bf16.msra.mxu1 %v9725_v35  ;;  %v10044_v22 = vld [vmem:[%s14301_s6 + $0xa18] sm:$0xf]  ;;  %v6812_v29 = vadd.f32 %v15162_v28, %v6798_v7  ;;  %v6936_v35 = vadd.f32 %v6935_v15, %v6922_v8  ;;  %v9533_v30 = vor.u32 %v13051_v20, %v9532_v16  ;;  %v6963_v48 = vpop.f32.mrf.mxu2 }
 0x289   : > { %7186 = vmatmul.bf16.vlgmr.msrb.gmra.mxu2 %v14463_v43  ;;  %v13179_v23 = vld [vmem:[%s14301_s6 + $0xa54] sm:$0xf0]  ;;  %v8463_v5 = vadd.f32 %v8431_v32, %v6866_v41  ;;  %v6924_v7 = vadd.f32 %v6923_v0, %v6910_v51 }
 0x28a   : > { %7234 = vmatpush.bf16.msra.mxu2 %v10237_v62  ;;  %7207 = vmatpush.bf16.msra.mxu0 %v9149_v55  ;;  %v10556_v26 = vld [vmem:[%s14301_s6 + $0xe18] sm:$0xf]  ;;  %v9021_v62 = vor.u32 %v12923_v12, %v9020_v49  ;;  %v10045_v42 = vor.u32 %v13179_v23, %v10044_v22  ;;  %v6826_v40 = vadd.f32 %v15200_v57, %v6812_v29 }
 0x28b   : > { %7200 = vmatmul.bf16.vlgmr.msrb.gmra.mxu3 %v14469_v47  ;;  %v13307_v14 = vld [vmem:[%s14301_s6 + $0xe54] sm:$0xf0]  ;;  %v6950_v54 = vadd.f32 %v6949_v50, %v6936_v35  ;;  %v8495_v29 = vmax.f32 %v8463_v5, 0.0 }
 0x28c   : > { %7248 = vmatpush.bf16.msra.mxu3 %v10749_v38  ;;  %7221 = vmatpush.bf16.msra.mxu1 %v9661_v13  ;;  %v8956_v36 = vld [vmem:[%s14301_s6 + $0x198] sm:$0xf]  ;;  %v10557_v28 = vor.u32 %v13307_v14, %v10556_v26  ;;  %v6840_v25 = vadd.f32 %v15205_v2, %v6826_v40 }
 0x28d   : > { %v12907_v37 = vld [vmem:[%s14301_s6 + $0x1d4] sm:$0xf0]  ;;  %v6964_v8 = vadd.f32 %v6963_v48, %v6950_v54 }
 0x28e   : > { %7235 = vmatpush.bf16.msra.mxu2 %v10173_v56  ;;  %7208 = vmatpush.bf16.msra.mxu0 %v9085_v11  ;;  %v9468_v38 = vld [vmem:[%s14301_s6 + $0x598] sm:$0xf]  ;;  %v8957_v57 = vor.u32 %v12907_v37, %v8956_v36  ;;  %v6937_v11 = vpop.f32.mrf.mxu0  ;;  %v6854_v2 = vadd.f32 %v15220_v27, %v6840_v25  ;;  %v6951_v24 = vpop.f32.mrf.mxu1 }
 0x28f   : > { %v13035_v18 = vld [vmem:[%s14301_s6 + $0x5d4] sm:$0xf0]  ;;  %v6938_v0 = vadd.f32 %v6937_v11, %v6924_v7 }
 0x290   : > { %7249 = vmatpush.bf16.msra.mxu3 %v10685_v60  ;;  %7222 = vmatpush.bf16.msra.mxu1 %v9597_v19  ;;  %v9980_v61 = vld [vmem:[%s14301_s6 + $0x998] sm:$0xf]  ;;  %v9469_v3 = vor.u32 %v13035_v18, %v9468_v38  ;;  %v8432_v19 = vperm.slane %v15296_v46, 3  ;;  %v6965_v51 = vpop.f32.mrf.mxu2 }
 0x291   : > { %v13163_v59 = vld [vmem:[%s14301_s6 + $0x9d4] sm:$0xf0] }
 0x292   : > { %7236 = vmatpush.bf16.msra.mxu2 %v10109_v45  ;;  %v10492_v55 = vld [vmem:[%s14301_s6 + $0xd98] sm:$0xf]  ;;  %7209 = vmatpush.bf16.msra.mxu0 %v9021_v62  ;;  %v9981_v9 = vor.u32 %v13163_v59, %v9980_v61 }
 0x293   : > { %v13291_v13 = vld [vmem:[%s14301_s6 + $0xdd4] sm:$0xf0] }
 0x294   : > { %7250 = vmatpush.bf16.msra.mxu3 %v10621_v63  ;;  %v8892_v56 = vld [vmem:[%s14301_s6 + $0x118] sm:$0xf]  ;;  %7223 = vmatpush.bf16.msra.mxu1 %v9533_v30  ;;  %v10493_v34 = vor.u32 %v13291_v13, %v10492_v55  ;;  %v6978_v63 = vadd.f32 %v6977_v21, %v6964_v8  ;;  %v6868_v30 = vadd.f32 %v15224_v31, %v6854_v2 }
 0x295   : > { %v12891_v53 = vld [vmem:[%s14301_s6 + $0x154] sm:$0xf0] }
 0x296   : > { %7237 = vmatpush.bf16.msra.mxu2 %v10045_v42  ;;  %v9404_v52 = vld [vmem:[%s14301_s6 + $0x518] sm:$0xf]  ;;  %7210 = vmatpush.bf16.msra.mxu0 %v8957_v57  ;;  %v8893_v12 = vor.u32 %v12891_v53, %v8892_v56  ;;  %v8464_v35 = vadd.f32 %v8432_v19, %v6978_v63 }
 0x297   : > { %v13019_v60 = vld [vmem:[%s14301_s6 + $0x554] sm:$0xf0] }
 0x298   : > { %7251 = vmatpush.bf16.msra.mxu3 %v10557_v28  ;;  %v9916_v4 = vld [vmem:[%s14301_s6 + $0x918] sm:$0xf]  ;;  %v9405_v16 = vor.u32 %v13019_v60, %v9404_v52  ;;  %7224 = vmatpush.bf16.msra.mxu1 %v9469_v3  ;;  %v8496_v40 = vmax.f32 %v8464_v35, 0.0  ;;  %v6952_v28 = vadd.f32 %v6951_v24, %v6938_v0  ;;  %v6979_v3 = vpop.f32.mrf.mxu3  ;;  %v8479_v60 = vadd.f32 %v8431_v32, %v6868_v30 }
 0x299   : > { %v13147_v6 = vld [vmem:[%s14301_s6 + $0x954] sm:$0xf0] }
 0x29a   : > { %v10428_v45 = vld [vmem:[%s14301_s6 + $0xd18] sm:$0xf]  ;;  %7238 = vmatpush.bf16.msra.mxu2 %v9981_v9  ;;  %v9917_v20 = vor.u32 %v13147_v6, %v9916_v4  ;;  %7211 = vmatpush.bf16.msra.mxu0 %v8893_v12  ;;  %v8526_v57 = vpack.c.bf16 %v8496_v40, %v8495_v29  ;;  %v6966_v56 = vadd.f32 %v6965_v51, %v6952_v28 }
 0x29b   : > { %v13275_v49 = vld [vmem:[%s14301_s6 + $0xd54] sm:$0xf0] }
 0x29c   : > { %v8828_v22 = vld [vmem:[%s14301_s6 + $0x98] sm:$0xf]  ;;  %7252 = vmatpush.bf16.msra.mxu3 %v10493_v34  ;;  %v10429_v27 = vor.u32 %v13275_v49, %v10428_v45  ;;  %7225 = vmatpush.bf16.msra.mxu1 %v9405_v16  ;;  %8542 = vst [vmem:[%s15004_s20 + $0x8] sm:$0xff] %v8526_v57  ;;  %v6980_v6 = vadd.f32 %v6979_v3, %v6966_v56 }
 0x29d   : > { %v12875_v23 = vld [vmem:[%s14301_s6 + $0xd4] sm:$0xf0] }
 0x29e   : > { %v9340_v33 = vld [vmem:[%s14301_s6 + $0x498] sm:$0xf]  ;;  %v8829_v42 = vor.u32 %v12875_v23, %v8828_v22  ;;  %7239 = vmatpush.bf16.msra.mxu2 %v9917_v20  ;;  %v8480_v45 = vadd.f32 %v8432_v19, %v6980_v6 }
 0x29f   : > { %v13003_v15 = vld [vmem:[%s14301_s6 + $0x4d4] sm:$0xf0] }
 0x2a0   : > { %v9852_v26 = vld [vmem:[%s14301_s6 + $0x898] sm:$0xf]  ;;  %v9341_v18 = vor.u32 %v13003_v15, %v9340_v33  ;;  %7253 = vmatpush.bf16.msra.mxu3 %v10429_v27  ;;  %7212 = vmatpush.bf16.msra.mxu0 %v8829_v42  ;;  %v8511_v33 = vmax.f32 %v8479_v60, 0.0  ;;  %v8512_v27 = vmax.f32 %v8480_v45, 0.0 }
 0x2a1   : > { %v13131_v14 = vld [vmem:[%s14301_s6 + $0x8d4] sm:$0xf0] }
 0x2a2   : > { %v10364_v62 = vld [vmem:[%s14301_s6 + $0xc98] sm:$0xf]  ;;  %v9853_v61 = vor.u32 %v13131_v14, %v9852_v26  ;;  %7226 = vmatpush.bf16.msra.mxu1 %v9341_v18  ;;  %v8534_v15 = vpack.c.bf16 %v8512_v27, %v8511_v33 }
 0x2a3   : > { %v13259_v50 = vld [vmem:[%s14301_s6 + $0xcd4] sm:$0xf0] }
 0x2a4   : > { %v8764_v36 = vld [vmem:[%s14301_s6 + $0x18] sm:$0xf]  ;;  %v10365_v31 = vor.u32 %v13259_v50, %v10364_v62  ;;  %7240 = vmatpush.bf16.msra.mxu2 %v9853_v61  ;;  %8550 = vst [vmem:[%s15004_s20 + $0x48] sm:$0xff] %v8534_v15 }
 0x2a5   : > { %v12859_v37 = vld [vmem:[%s14301_s6 + $0x54] sm:$0xf0] }
 0x2a6   : > { %v9276_v38 = vld [vmem:[%s14301_s6 + $0x418] sm:$0xf]  ;;  %v8765_v25 = vor.u32 %v12859_v37, %v8764_v36  ;;  %7254 = vmatpush.bf16.msra.mxu3 %v10365_v31 }
 0x2a7   : > { %v12987_v59 = vld [vmem:[%s14301_s6 + $0x454] sm:$0xf0] }
 0x2a8   : > { %v9788_v41 = vld [vmem:[%s14301_s6 + $0x818] sm:$0xf]  ;;  %v9277_v5 = vor.u32 %v12987_v59, %v9276_v38  ;;  %7213 = vmatpush.bf16.msra.mxu0 %v8765_v25 }
 0x2a9   : > { %v13115_v54 = vld [vmem:[%s14301_s6 + $0x854] sm:$0xf0] }
 0x2aa   : > { %v10300_v55 = vld [vmem:[%s14301_s6 + $0xc18] sm:$0xf]  ;;  %v9789_v7 = vor.u32 %v13115_v54, %v9788_v41  ;;  %7227 = vmatpush.bf16.msra.mxu1 %v9277_v5 }
 0x2ab   : > { %v13243_v13 = vld [vmem:[%s14301_s6 + $0xc54] sm:$0xf0]  ;;  %7214 = vmatmul.bf16.vlgmr.msra.gmra.mxu0 %v14389_v58 }
 0x2ac   : > { %v11260_v9 = vld [vmem:[%s14301_s6 + $0x1398] sm:$0xf]  ;;  %v10301_v32 = vor.u32 %v13243_v13, %v10300_v55  ;;  %7241 = vmatpush.bf16.msra.mxu2 %v9789_v7 }
 0x2ad   : > { %v13483_v53 = vld [vmem:[%s14301_s6 + $0x13d4] sm:$0xf0]  ;;  %7228 = vmatmul.bf16.vlgmr.msra.gmra.mxu1 %v14401_v10 }
 0x2ae   : > { %v11772_v52 = vld [vmem:[%s14301_s6 + $0x1798] sm:$0xf]  ;;  %v11261_v21 = vor.u32 %v13483_v53, %v11260_v9  ;;  %7255 = vmatpush.bf16.msra.mxu3 %v10301_v32 }
 0x2af   : > { %v13611_v34 = vld [vmem:[%s14301_s6 + $0x17d4] sm:$0xf0]  ;;  %7242 = vmatmul.bf16.vlgmr.msra.gmra.mxu2 %v14394_v1 }
 0x2b0   : > { %v12284_v48 = vld [vmem:[%s14301_s6 + $0x1b98] sm:$0xf]  ;;  %v11773_v49 = vor.u32 %v13611_v34, %v11772_v52  ;;  %7262 = vmatpush.bf16.msrb.mxu0 %v11261_v21 }
 0x2b1   : > { %v13739_v4 = vld [vmem:[%s14301_s6 + $0x1bd4] sm:$0xf0]  ;;  %7256 = vmatmul.bf16.vlgmr.msra.gmra.mxu3 %v14406_v17 }
 0x2b2   : > { %v12796_v8 = vld [vmem:[%s14301_s6 + $0x1f98] sm:$0xf]  ;;  %v12285_v2 = vor.u32 %v13739_v4, %v12284_v48  ;;  %7276 = vmatpush.bf16.msrb.mxu1 %v11773_v49 }
 0x2b3   : > { %v13867_v11 = vld [vmem:[%s14301_s6 + $0x1fd4] sm:$0xf0] }
 0x2b4   : > { %v11196_v12 = vld [vmem:[%s14301_s6 + $0x1318] sm:$0xf]  ;;  %v12797_v63 = vor.u32 %v13867_v11, %v12796_v8  ;;  %7290 = vmatpush.bf16.msrb.mxu2 %v12285_v2 }
 0x2b5   : > { %v13467_v16 = vld [vmem:[%s14301_s6 + $0x1354] sm:$0xf0] }
 0x2b6   : > { %v11708_v0 = vld [vmem:[%s14301_s6 + $0x1718] sm:$0xf]  ;;  %v11197_v24 = vor.u32 %v13467_v16, %v11196_v12  ;;  %7304 = vmatpush.bf16.msrb.mxu3 %v12797_v63 }
 0x2b7   : > { %v13595_v20 = vld [vmem:[%s14301_s6 + $0x1754] sm:$0xf0] }
 0x2b8   : > { %v12220_v22 = vld [vmem:[%s14301_s6 + $0x1b18] sm:$0xf]  ;;  %v11709_v26 = vor.u32 %v13595_v20, %v11708_v0  ;;  %7263 = vmatpush.bf16.msrb.mxu0 %v11197_v24 }
 0x2b9   : > { %v13723_v23 = vld [vmem:[%s14301_s6 + $0x1b54] sm:$0xf0] }
 0x2ba   : > { %v12732_v46 = vld [vmem:[%s14301_s6 + $0x1f18] sm:$0xf]  ;;  %v12221_v14 = vor.u32 %v13723_v23, %v12220_v22  ;;  %7277 = vmatpush.bf16.msrb.mxu1 %v11709_v26 }
 0x2bb   : > { %v13851_v19 = vld [vmem:[%s14301_s6 + $0x1f54] sm:$0xf0] }
 0x2bc   : > { %v11132_v29 = vld [vmem:[%s14301_s6 + $0x1298] sm:$0xf]  ;;  %v12733_v50 = vor.u32 %v13851_v19, %v12732_v46  ;;  %7291 = vmatpush.bf16.msrb.mxu2 %v12221_v14 }
 0x2bd   : > { %v13451_v35 = vld [vmem:[%s14301_s6 + $0x12d4] sm:$0xf0] }
 0x2be   : > { %v11644_v62 = vld [vmem:[%s14301_s6 + $0x1698] sm:$0xf]  ;;  %v11133_v40 = vor.u32 %v13451_v35, %v11132_v29  ;;  %7305 = vmatpush.bf16.msrb.mxu3 %v12733_v50 }
 0x2bf   : > { %v13579_v30 = vld [vmem:[%s14301_s6 + $0x16d4] sm:$0xf0] }
 0x2c0   : > { %v12156_v42 = vld [vmem:[%s14301_s6 + $0x1a98] sm:$0xf]  ;;  %v11645_v28 = vor.u32 %v13579_v30, %v11644_v62  ;;  %7264 = vmatpush.bf16.msrb.mxu0 %v11133_v40 }
 0x2c1   : > { %v13707_v36 = vld [vmem:[%s14301_s6 + $0x1ad4] sm:$0xf0] }
 0x2c2   : > { %v12668_v37 = vld [vmem:[%s14301_s6 + $0x1e98] sm:$0xf]  ;;  %v12157_v18 = vor.u32 %v13707_v36, %v12156_v42  ;;  %7278 = vmatpush.bf16.msrb.mxu1 %v11645_v28 }
 0x2c3   : > { %v13835_v38 = vld [vmem:[%s14301_s6 + $0x1ed4] sm:$0xf0] }
 0x2c4   : > { %v11068_v61 = vld [vmem:[%s14301_s6 + $0x1218] sm:$0xf]  ;;  %v12669_v31 = vor.u32 %v13835_v38, %v12668_v37  ;;  %7292 = vmatpush.bf16.msrb.mxu2 %v12157_v18 }
 0x2c5   : > { %v13435_v59 = vld [vmem:[%s14301_s6 + $0x1254] sm:$0xf0] }
 0x2c6   : > { %v11580_v41 = vld [vmem:[%s14301_s6 + $0x1618] sm:$0xf]  ;;  %v11069_v56 = vor.u32 %v13435_v59, %v11068_v61  ;;  %7306 = vmatpush.bf16.msrb.mxu3 %v12669_v31  ;;  %v12963_v59 = vld [vmem:[%s14301_s6 + $0x39c] sm:$0xf] }
 0x2c7   : > { %v13563_v51 = vld [vmem:[%s14301_s6 + $0x1654] sm:$0xf0]  ;;  %v13091_v31 = vld [vmem:[%s14301_s6 + $0x79c] sm:$0xf] }
 0x2c8   : > { %v12092_v54 = vld [vmem:[%s14301_s6 + $0x1a18] sm:$0xf]  ;;  %v11581_v3 = vor.u32 %v13563_v51, %v11580_v41  ;;  %7265 = vmatpush.bf16.msrb.mxu0 %v11069_v56  ;;  %v9214_v41 = vld [vmem:[%s14301_s6 + $0x3d8] sm:$0xf0] }
 0x2c9   : > { %v13691_v55 = vld [vmem:[%s14301_s6 + $0x1a54] sm:$0xf0] }
 0x2ca   : > { %v12604_v13 = vld [vmem:[%s14301_s6 + $0x1e18] sm:$0xf]  ;;  %v12093_v9 = vor.u32 %v13691_v55, %v12092_v54  ;;  %7279 = vmatpush.bf16.msrb.mxu1 %v11581_v3  ;;  %v9726_v54 = vld [vmem:[%s14301_s6 + $0x7d8] sm:$0xf0] }
 0x2cb   : > { %v13819_v57 = vld [vmem:[%s14301_s6 + $0x1e54] sm:$0xf0]  ;;  %v13219_v55 = vld [vmem:[%s14301_s6 + $0xb9c] sm:$0xf] }
 0x2cc   : > { %v11004_v53 = vld [vmem:[%s14301_s6 + $0x1198] sm:$0xf]  ;;  %v12605_v25 = vor.u32 %v13819_v57, %v12604_v13  ;;  %7293 = vmatpush.bf16.msrb.mxu2 %v12093_v9  ;;  %v10238_v13 = vld [vmem:[%s14301_s6 + $0xbd8] sm:$0xf0] }
 0x2cd   : > { %v13419_v52 = vld [vmem:[%s14301_s6 + $0x11d4] sm:$0xf0]  ;;  %v13347_v3 = vld [vmem:[%s14301_s6 + $0xf9c] sm:$0xf] }
 0x2ce   : > { %v11516_v60 = vld [vmem:[%s14301_s6 + $0x1598] sm:$0xf]  ;;  %v11005_v7 = vor.u32 %v13419_v52, %v11004_v53  ;;  %7307 = vmatpush.bf16.msrb.mxu3 %v12605_v25  ;;  %v10750_v9 = vld [vmem:[%s14301_s6 + $0xfd8] sm:$0xf0]  ;;  %v9217_v52 = vor.u32 %v12963_v59, %v9214_v41  ;;  %v10241_v25 = vor.u32 %v13219_v55, %v10238_v13 }
 0x2cf   : > { %v13547_v34 = vld [vmem:[%s14301_s6 + $0x15d4] sm:$0xf0]  ;;  %v9470_v41 = vld [vmem:[%s14301_s6 + $0x5d8] sm:$0xf0] }
 0x2d0   : > { %v12028_v48 = vld [vmem:[%s14301_s6 + $0x1998] sm:$0xf]  ;;  %v11517_v8 = vor.u32 %v13547_v34, %v11516_v60  ;;  %7266 = vmatpush.bf16.msrb.mxu0 %v11005_v7  ;;  %v9729_v60 = vor.u32 %v13091_v31, %v9726_v54  ;;  %v12947_v34 = vld [vmem:[%s14301_s6 + $0x31c] sm:$0xf] }
 0x2d1   : > { %v13675_v4 = vld [vmem:[%s14301_s6 + $0x19d4] sm:$0xf0]  ;;  %v13203_v7 = vld [vmem:[%s14301_s6 + $0xb1c] sm:$0xf] }
 0x2d2   : > { %v12540_v6 = vld [vmem:[%s14301_s6 + $0x1d98] sm:$0xf]  ;;  %v12029_v11 = vor.u32 %v13675_v4, %v12028_v48  ;;  %7280 = vmatpush.bf16.msrb.mxu1 %v11517_v8  ;;  %v9150_v48 = vld [vmem:[%s14301_s6 + $0x358] sm:$0xf0] }
 0x2d3   : > { %v13803_v5 = vld [vmem:[%s14301_s6 + $0x1dd4] sm:$0xf0]  ;;  %v13075_v4 = vld [vmem:[%s14301_s6 + $0x71c] sm:$0xf] }
 0x2d4   : > { %v10940_v32 = vld [vmem:[%s14301_s6 + $0x1118] sm:$0xf]  ;;  %v12541_v49 = vor.u32 %v13803_v5, %v12540_v6  ;;  %7294 = vmatpush.bf16.msrb.mxu2 %v12029_v11  ;;  %v10753_v6 = vor.u32 %v13347_v3, %v10750_v9  ;;  %v9662_v5 = vld [vmem:[%s14301_s6 + $0x758] sm:$0xf0] }
 0x2d5   : > { %v13403_v21 = vld [vmem:[%s14301_s6 + $0x1154] sm:$0xf0]  ;;  %v10174_v8 = vld [vmem:[%s14301_s6 + $0xb58] sm:$0xf0] }
 0x2d6   : > { %v11452_v45 = vld [vmem:[%s14301_s6 + $0x1518] sm:$0xf]  ;;  %v10941_v20 = vor.u32 %v13403_v21, %v10940_v32  ;;  %7308 = vmatpush.bf16.msrb.mxu3 %v12541_v49  ;;  %v13331_v11 = vld [vmem:[%s14301_s6 + $0xf1c] sm:$0xf]  ;;  %v9153_v21 = vor.u32 %v12947_v34, %v9150_v48  ;;  %v10177_v49 = vor.u32 %v13203_v7, %v10174_v8  ;;  %v15465_v7 = vpop.f32.mrf.mxu3 }
 0x2d7   : > { %v13531_v2 = vld [vmem:[%s14301_s6 + $0x1554] sm:$0xf0]  ;;  %v10686_v32 = vld [vmem:[%s14301_s6 + $0xf58] sm:$0xf0] }
 0x2d8   : > { %v11964_v12 = vld [vmem:[%s14301_s6 + $0x1918] sm:$0xf]  ;;  %v11453_v22 = vor.u32 %v13531_v2, %v11452_v45  ;;  %7267 = vmatpush.bf16.msrb.mxu0 %v10941_v20  ;;  %v9665_v45 = vor.u32 %v13075_v4, %v9662_v5  ;;  %v12931_v2 = vld [vmem:[%s14301_s6 + $0x29c] sm:$0xf] }
 0x2d9   : > { %v13659_v16 = vld [vmem:[%s14301_s6 + $0x1954] sm:$0xf0]  ;;  %v13187_v20 = vld [vmem:[%s14301_s6 + $0xa9c] sm:$0xf] }
 0x2da   : > { %v12476_v0 = vld [vmem:[%s14301_s6 + $0x1d18] sm:$0xf]  ;;  %v11965_v23 = vor.u32 %v13659_v16, %v11964_v12  ;;  %7281 = vmatpush.bf16.msrb.mxu1 %v11453_v22  ;;  %v9086_v12 = vld [vmem:[%s14301_s6 + $0x2d8] sm:$0xf0] }
 0x2db   : > { %v13787_v63 = vld [vmem:[%s14301_s6 + $0x1d54] sm:$0xf0]  ;;  %v13059_v16 = vld [vmem:[%s14301_s6 + $0x69c] sm:$0xf] }
 0x2dc   : > { %v10876_v33 = vld [vmem:[%s14301_s6 + $0x1098] sm:$0xf]  ;;  %v12477_v19 = vor.u32 %v13787_v63, %v12476_v0  ;;  %7295 = vmatpush.bf16.msrb.mxu2 %v11965_v23  ;;  %v10689_v0 = vor.u32 %v13331_v11, %v10686_v32  ;;  %v9598_v63 = vld [vmem:[%s14301_s6 + $0x6d8] sm:$0xf0] }
 0x2dd   : > { %v13387_v27 = vld [vmem:[%s14301_s6 + $0x10d4] sm:$0xf0]  ;;  %v10110_v22 = vld [vmem:[%s14301_s6 + $0xad8] sm:$0xf0] }
 0x2de   : > { %v11388_v46 = vld [vmem:[%s14301_s6 + $0x1498] sm:$0xf]  ;;  %v10877_v35 = vor.u32 %v13387_v27, %v10876_v33  ;;  %7309 = vmatpush.bf16.msrb.mxu3 %v12477_v19  ;;  %v13315_v23 = vld [vmem:[%s14301_s6 + $0xe9c] sm:$0xf]  ;;  %v9089_v27 = vor.u32 %v12931_v2, %v9086_v12  ;;  %v10113_v19 = vor.u32 %v13187_v20, %v10110_v22 }
 0x2df   : > { %v13515_v24 = vld [vmem:[%s14301_s6 + $0x14d4] sm:$0xf0]  ;;  %v10622_v33 = vld [vmem:[%s14301_s6 + $0xed8] sm:$0xf0] }
 0x2e0   : > { %v11900_v15 = vld [vmem:[%s14301_s6 + $0x1898] sm:$0xf]  ;;  %v11389_v30 = vor.u32 %v13515_v24, %v11388_v46  ;;  %7268 = vmatpush.bf16.msrb.mxu0 %v10877_v35  ;;  %v9601_v46 = vor.u32 %v13059_v16, %v9598_v63  ;;  %v12915_v24 = vld [vmem:[%s14301_s6 + $0x21c] sm:$0xf] }
 0x2e1   : > { %v13643_v26 = vld [vmem:[%s14301_s6 + $0x18d4] sm:$0xf0]  ;;  %v13171_v35 = vld [vmem:[%s14301_s6 + $0xa1c] sm:$0xf] }
 0x2e2   : > { %v12412_v14 = vld [vmem:[%s14301_s6 + $0x1c98] sm:$0xf]  ;;  %v11901_v42 = vor.u32 %v13643_v26, %v11900_v15  ;;  %7282 = vmatpush.bf16.msrb.mxu1 %v11389_v30  ;;  %v9022_v15 = vld [vmem:[%s14301_s6 + $0x258] sm:$0xf0] }
 0x2e3   : > { %v13771_v29 = vld [vmem:[%s14301_s6 + $0x1cd4] sm:$0xf0]  ;;  %v13043_v26 = vld [vmem:[%s14301_s6 + $0x61c] sm:$0xf] }
 0x2e4   : > { %v10812_v62 = vld [vmem:[%s14301_s6 + $0x1018] sm:$0xf]  ;;  %v12413_v40 = vor.u32 %v13771_v29, %v12412_v14  ;;  %7296 = vmatpush.bf16.msrb.mxu2 %v11901_v42  ;;  %v10625_v14 = vor.u32 %v13315_v23, %v10622_v33  ;;  %v9534_v29 = vld [vmem:[%s14301_s6 + $0x658] sm:$0xf0]  ;;  %v9025_v42 = vor.u32 %v12915_v24, %v9022_v15 }
 0x2e5   : > { %v13371_v50 = vld [vmem:[%s14301_s6 + $0x1054] sm:$0xf0]  ;;  %v10558_v30 = vld [vmem:[%s14301_s6 + $0xe58] sm:$0xf0] }
 0x2e6   : > { %v11324_v36 = vld [vmem:[%s14301_s6 + $0x1418] sm:$0xf]  ;;  %v10813_v51 = vor.u32 %v13371_v50, %v10812_v62  ;;  %7310 = vmatpush.bf16.msrb.mxu3 %v12413_v40  ;;  %v10046_v62 = vld [vmem:[%s14301_s6 + $0xa58] sm:$0xf0] }
 0x2e7   : > { %v13499_v37 = vld [vmem:[%s14301_s6 + $0x1454] sm:$0xf0]  ;;  %v13299_v50 = vld [vmem:[%s14301_s6 + $0xe1c] sm:$0xf] }
 0x2e8   : > { %v11836_v38 = vld [vmem:[%s14301_s6 + $0x1818] sm:$0xf]  ;;  %v11325_v57 = vor.u32 %v13499_v37, %v11324_v36  ;;  %7269 = vmatpush.bf16.msrb.mxu0 %v10813_v51  ;;  %v15443_v36 = vpop.f32.mrf.mxu0  ;;  %v9537_v37 = vor.u32 %v13043_v26, %v9534_v29  ;;  %v12899_v40 = vld [vmem:[%s14301_s6 + $0x19c] sm:$0xf]  ;;  %v10561_v59 = vor.u32 %v13299_v50, %v10558_v30 }
 0x2e9   : > { %v13627_v28 = vld [vmem:[%s14301_s6 + $0x1854] sm:$0xf0]  ;;  %v13155_v31 = vld [vmem:[%s14301_s6 + $0x99c] sm:$0xf] }
 0x2ea   : > { %v12348_v18 = vld [vmem:[%s14301_s6 + $0x1c18] sm:$0xf]  ;;  %v11837_v56 = vor.u32 %v13627_v28, %v11836_v38  ;;  %7283 = vmatpush.bf16.msrb.mxu1 %v11325_v57  ;;  %v10049_v38 = vor.u32 %v13171_v35, %v10046_v62  ;;  %v8958_v28 = vld [vmem:[%s14301_s6 + $0x1d8] sm:$0xf0] }
 0x2eb   : > { %v13755_v61 = vld [vmem:[%s14301_s6 + $0x1c54] sm:$0xf0]  ;;  %7270 = vmatmul.bf16.vlgmr.msrb.gmra.mxu0 %v14458_v39  ;;  %v9982_v51 = vld [vmem:[%s14301_s6 + $0x9d8] sm:$0xf0]  ;;  %v8961_v13 = vor.u32 %v12899_v40, %v8958_v28 }
 0x2ec   : > { %v12349_v53 = vor.u32 %v13755_v61, %v12348_v18  ;;  %7297 = vmatpush.bf16.msrb.mxu2 %v11837_v56  ;;  %7318 = vmatpush.bf16.msra.mxu0 %v9217_v52  ;;  %v13027_v18 = vld [vmem:[%s14301_s6 + $0x59c] sm:$0xf]  ;;  %v15448_v61 = vpop.f32.mrf.mxu1  ;;  %v9985_v56 = vor.u32 %v13155_v31, %v9982_v51 }
 0x2ed   : > { %7284 = vmatmul.bf16.vlgmr.msrb.gmra.mxu1 %v14465_v44  ;;  %v13283_v54 = vld [vmem:[%s14301_s6 + $0xd9c] sm:$0xf]  ;;  %v9473_v57 = vor.u32 %v13027_v18, %v9470_v41 }
 0x2ee   : > { %7311 = vmatpush.bf16.msrb.mxu3 %v12349_v53  ;;  %7332 = vmatpush.bf16.msra.mxu1 %v9729_v60  ;;  %v10494_v55 = vld [vmem:[%s14301_s6 + $0xdd8] sm:$0xf0] }
 0x2ef   : > { %7298 = vmatmul.bf16.vlgmr.msrb.gmra.mxu2 %v14463_v43  ;;  %v12883_v3 = vld [vmem:[%s14301_s6 + $0x11c] sm:$0xf]  ;;  %v10497_v52 = vor.u32 %v13283_v54, %v10494_v55 }
 0x2f0   : > { %7346 = vmatpush.bf16.msra.mxu2 %v10241_v25  ;;  %7319 = vmatpush.bf16.msra.mxu0 %v9153_v21  ;;  %v8894_v9 = vld [vmem:[%s14301_s6 + $0x158] sm:$0xf0] }
 0x2f1   : > { %7312 = vmatmul.bf16.vlgmr.msrb.gmra.mxu3 %v14469_v47  ;;  %v13011_v53 = vld [vmem:[%s14301_s6 + $0x51c] sm:$0xf]  ;;  %v8897_v5 = vor.u32 %v12883_v3, %v8894_v9 }
 0x2f2   : > { %7360 = vmatpush.bf16.msra.mxu3 %v10753_v6  ;;  %7333 = vmatpush.bf16.msra.mxu1 %v9665_v45  ;;  %v9406_v60 = vld [vmem:[%s14301_s6 + $0x558] sm:$0xf0]  ;;  %v15463_v6 = vpop.f32.mrf.mxu2 }
 0x2f3   : > { %v13139_v25 = vld [vmem:[%s14301_s6 + $0x91c] sm:$0xf]  ;;  %v9409_v8 = vor.u32 %v13011_v53, %v9406_v60 }
 0x2f4   : > { %7347 = vmatpush.bf16.msra.mxu2 %v10177_v49  ;;  %7320 = vmatpush.bf16.msra.mxu0 %v9089_v27  ;;  %v9918_v34 = vld [vmem:[%s14301_s6 + $0x958] sm:$0xf0]  ;;  %v15477_v22 = vpop.f32.mrf.mxu1 }
 0x2f5   : > { %v13267_v48 = vld [vmem:[%s14301_s6 + $0xd1c] sm:$0xf]  ;;  %v9921_v11 = vor.u32 %v13139_v25, %v9918_v34 }
 0x2f6   : > { %7361 = vmatpush.bf16.msra.mxu3 %v10689_v0  ;;  %7334 = vmatpush.bf16.msra.mxu1 %v9601_v46  ;;  %v10430_v4 = vld [vmem:[%s14301_s6 + $0xd58] sm:$0xf0]  ;;  %v15473_v0 = vpop.f32.mrf.mxu0 }
 0x2f7   : > { %v12867_v32 = vld [vmem:[%s14301_s6 + $0x9c] sm:$0xf]  ;;  %v10433_v49 = vor.u32 %v13267_v48, %v10430_v4 }
 0x2f8   : > { %7348 = vmatpush.bf16.msra.mxu2 %v10113_v19  ;;  %7321 = vmatpush.bf16.msra.mxu0 %v9025_v42  ;;  %v8830_v21 = vld [vmem:[%s14301_s6 + $0xd8] sm:$0xf0] }
 0x2f9   : > { %v12995_v45 = vld [vmem:[%s14301_s6 + $0x49c] sm:$0xf]  ;;  %v8833_v23 = vor.u32 %v12867_v32, %v8830_v21 }
 0x2fa   : > { %7362 = vmatpush.bf16.msra.mxu3 %v10625_v14  ;;  %7335 = vmatpush.bf16.msra.mxu1 %v9537_v37  ;;  %v9342_v2 = vld [vmem:[%s14301_s6 + $0x4d8] sm:$0xf0]  ;;  %v15495_v51 = vpop.f32.mrf.mxu2 }
 0x2fb   : > { %v13123_v12 = vld [vmem:[%s14301_s6 + $0x89c] sm:$0xf]  ;;  %v9345_v46 = vor.u32 %v12995_v45, %v9342_v2 }
 0x2fc   : > { %7349 = vmatpush.bf16.msra.mxu2 %v10049_v38  ;;  %7322 = vmatpush.bf16.msra.mxu0 %v8961_v13  ;;  %v9854_v16 = vld [vmem:[%s14301_s6 + $0x8d8] sm:$0xf0]  ;;  %v15497_v13 = vpop.f32.mrf.mxu3 }
 0x2fd   : > { %v13251_v63 = vld [vmem:[%s14301_s6 + $0xc9c] sm:$0xf]  ;;  %v9857_v19 = vor.u32 %v13123_v12, %v9854_v16 }
 0x2fe   : > { %7363 = vmatpush.bf16.msra.mxu3 %v10561_v59  ;;  %7336 = vmatpush.bf16.msra.mxu1 %v9473_v57  ;;  %v10366_v20 = vld [vmem:[%s14301_s6 + $0xcd8] sm:$0xf0]  ;;  %v15505_v48 = vpop.f32.mrf.mxu0 }
 0x2ff   : > { %v12851_v33 = vld [vmem:[%s14301_s6 + $0x1c] sm:$0xf]  ;;  %v10369_v14 = vor.u32 %v13251_v63, %v10366_v20 }
 0x300   : > { %7350 = vmatpush.bf16.msra.mxu2 %v9985_v56  ;;  %7323 = vmatpush.bf16.msra.mxu0 %v8897_v5  ;;  %v8766_v27 = vld [vmem:[%s14301_s6 + $0x58] sm:$0xf0] }
 0x301   : > { %v12979_v24 = vld [vmem:[%s14301_s6 + $0x41c] sm:$0xf]  ;;  %v8769_v37 = vor.u32 %v12851_v33, %v8766_v27 }
 0x302   : > { %7364 = vmatpush.bf16.msra.mxu3 %v10497_v52  ;;  %7337 = vmatpush.bf16.msra.mxu1 %v9409_v8  ;;  %v9278_v15 = vld [vmem:[%s14301_s6 + $0x458] sm:$0xf0]  ;;  %v15509_v8 = vpop.f32.mrf.mxu1 }
 0x303   : > { %v13107_v26 = vld [vmem:[%s14301_s6 + $0x81c] sm:$0xf]  ;;  %v9281_v18 = vor.u32 %v12979_v24, %v9278_v15 }
 0x304   : > { %7351 = vmatpush.bf16.msra.mxu2 %v9921_v11  ;;  %v9790_v29 = vld [vmem:[%s14301_s6 + $0x858] sm:$0xf0]  ;;  %7324 = vmatpush.bf16.msra.mxu0 %v8833_v23 }
 0x305   : > { %v13235_v35 = vld [vmem:[%s14301_s6 + $0xc1c] sm:$0xf]  ;;  %v9793_v59 = vor.u32 %v13107_v26, %v9790_v29 }
 0x306   : > { %7365 = vmatpush.bf16.msra.mxu3 %v10433_v49  ;;  %v10302_v62 = vld [vmem:[%s14301_s6 + $0xc58] sm:$0xf0]  ;;  %7338 = vmatpush.bf16.msra.mxu1 %v9345_v46 }
 0x307   : > { %v13475_v50 = vld [vmem:[%s14301_s6 + $0x139c] sm:$0xf]  ;;  %v10305_v54 = vor.u32 %v13235_v35, %v10302_v62 }
 0x308   : > { %v11262_v30 = vld [vmem:[%s14301_s6 + $0x13d8] sm:$0xf0]  ;;  %7352 = vmatpush.bf16.msra.mxu2 %v9857_v19  ;;  %7325 = vmatpush.bf16.msra.mxu0 %v8769_v37 }
 0x309   : > { %v13603_v42 = vld [vmem:[%s14301_s6 + $0x179c] sm:$0xf]  ;;  %v11265_v55 = vor.u32 %v13475_v50, %v11262_v30  ;;  %v15531_v30 = vpop.f32.mrf.mxu3 }
 0x30a   : > { %v11774_v38 = vld [vmem:[%s14301_s6 + $0x17d8] sm:$0xf0]  ;;  %7366 = vmatpush.bf16.msra.mxu3 %v10369_v14  ;;  %7339 = vmatpush.bf16.msra.mxu1 %v9281_v18  ;;  %v15526_v14 = vpop.f32.mrf.mxu2 }
 0x30b   : > { %v13731_v40 = vld [vmem:[%s14301_s6 + $0x1b9c] sm:$0xf]  ;;  %v11777_v57 = vor.u32 %v13603_v42, %v11774_v38  ;;  %7326 = vmatmul.bf16.vlgmr.msra.gmra.mxu0 %v14389_v58 }
 0x30c   : > { %v12286_v28 = vld [vmem:[%s14301_s6 + $0x1bd8] sm:$0xf0]  ;;  %7353 = vmatpush.bf16.msra.mxu2 %v9793_v59  ;;  %7374 = vmatpush.bf16.msrb.mxu0 %v11265_v55 }
 0x30d   : > { %v13859_v41 = vld [vmem:[%s14301_s6 + $0x1f9c] sm:$0xf]  ;;  %v12289_v56 = vor.u32 %v13731_v40, %v12286_v28  ;;  %7340 = vmatmul.bf16.vlgmr.msra.gmra.mxu1 %v14401_v10  ;;  %v15535_v40 = vpop.f32.mrf.mxu0 }
 0x30e   : > { %v12798_v31 = vld [vmem:[%s14301_s6 + $0x1fd8] sm:$0xf0]  ;;  %7367 = vmatpush.bf16.msra.mxu3 %v10305_v54  ;;  %7388 = vmatpush.bf16.msrb.mxu1 %v11777_v57  ;;  %v15540_v54 = vpop.f32.mrf.mxu1 }
 0x30f   : > { %v13459_v3 = vld [vmem:[%s14301_s6 + $0x131c] sm:$0xf]  ;;  %v12801_v52 = vor.u32 %v13859_v41, %v12798_v31  ;;  %7354 = vmatmul.bf16.vlgmr.msra.gmra.mxu2 %v14394_v1 }
 0x310   : > { %v11198_v9 = vld [vmem:[%s14301_s6 + $0x1358] sm:$0xf0]  ;;  %7402 = vmatpush.bf16.msrb.mxu2 %v12289_v56 }
 0x311   : > { %v13587_v53 = vld [vmem:[%s14301_s6 + $0x171c] sm:$0xf]  ;;  %v11201_v11 = vor.u32 %v13459_v3, %v11198_v9  ;;  %7368 = vmatmul.bf16.vlgmr.msra.gmra.mxu3 %v14406_v17 }
 0x312   : > { %v11710_v60 = vld [vmem:[%s14301_s6 + $0x1758] sm:$0xf0]  ;;  %7416 = vmatpush.bf16.msrb.mxu3 %v12801_v52 }
 0x313   : > { %v13715_v25 = vld [vmem:[%s14301_s6 + $0x1b1c] sm:$0xf]  ;;  %v11713_v32 = vor.u32 %v13587_v53, %v11710_v60  ;;  %7375 = vmatpush.bf16.msrb.mxu0 %v11201_v11 }
 0x314   : > { %v12222_v34 = vld [vmem:[%s14301_s6 + $0x1b58] sm:$0xf0] }
 0x315   : > { %v13843_v4 = vld [vmem:[%s14301_s6 + $0x1f1c] sm:$0xf]  ;;  %v12225_v21 = vor.u32 %v13715_v25, %v12222_v34  ;;  %7389 = vmatpush.bf16.msrb.mxu1 %v11713_v32 }
 0x316   : > { %v12734_v5 = vld [vmem:[%s14301_s6 + $0x1f58] sm:$0xf0] }
 0x317   : > { %v13443_v45 = vld [vmem:[%s14301_s6 + $0x129c] sm:$0xf]  ;;  %v12737_v12 = vor.u32 %v13843_v4, %v12734_v5  ;;  %7403 = vmatpush.bf16.msrb.mxu2 %v12225_v21 }
 0x318   : > { %v11134_v49 = vld [vmem:[%s14301_s6 + $0x12d8] sm:$0xf0] }
 0x319   : > { %v13571_v2 = vld [vmem:[%s14301_s6 + $0x169c] sm:$0xf]  ;;  %v11137_v27 = vor.u32 %v13443_v45, %v11134_v49  ;;  %7417 = vmatpush.bf16.msrb.mxu3 %v12737_v12  ;;  %v15555_v12 = vpop.f32.mrf.mxu2 }
 0x31a   : > { %v11646_v16 = vld [vmem:[%s14301_s6 + $0x16d8] sm:$0xf0] }
 0x31b   : > { %v13699_v63 = vld [vmem:[%s14301_s6 + $0x1a9c] sm:$0xf]  ;;  %v11649_v46 = vor.u32 %v13571_v2, %v11646_v16  ;;  %7376 = vmatpush.bf16.msrb.mxu0 %v11137_v27  ;;  %v7103_v27 = vpop.f32.mrf.mxu0 }
 0x31c   : > { %v12158_v20 = vld [vmem:[%s14301_s6 + $0x1ad8] sm:$0xf0] }
 0x31d   : > { %v13827_v23 = vld [vmem:[%s14301_s6 + $0x1e9c] sm:$0xf]  ;;  %v12161_v19 = vor.u32 %v13699_v63, %v12158_v20  ;;  %7390 = vmatpush.bf16.msrb.mxu1 %v11649_v46  ;;  %v7006_v63 = vadd.f32 %v15448_v61, %v15443_v36  ;;  %v15559_v20 = vpop.f32.mrf.mxu3 }
 0x31e   : > { %v12670_v33 = vld [vmem:[%s14301_s6 + $0x1ed8] sm:$0xf0] }
 0x31f   : > { %v13427_v24 = vld [vmem:[%s14301_s6 + $0x121c] sm:$0xf]  ;;  %v12673_v29 = vor.u32 %v13827_v23, %v12670_v33  ;;  %7404 = vmatpush.bf16.msrb.mxu2 %v12161_v19 }
 0x320   : > { %v11070_v15 = vld [vmem:[%s14301_s6 + $0x1258] sm:$0xf0] }
 0x321   : > { %v13555_v26 = vld [vmem:[%s14301_s6 + $0x161c] sm:$0xf]  ;;  %v11073_v38 = vor.u32 %v13427_v24, %v11070_v15  ;;  %7418 = vmatpush.bf16.msrb.mxu3 %v12673_v29  ;;  %v7117_v29 = vpop.f32.mrf.mxu1 }
 0x322   : > { %v11582_v35 = vld [vmem:[%s14301_s6 + $0x1658] sm:$0xf0] }
 0x323   : > { %v13683_v62 = vld [vmem:[%s14301_s6 + $0x1a1c] sm:$0xf]  ;;  %v11585_v28 = vor.u32 %v13555_v26, %v11582_v35  ;;  %7377 = vmatpush.bf16.msrb.mxu0 %v11073_v38  ;;  %v7020_v38 = vadd.f32 %v15463_v6, %v7006_v63  ;;  %v9732_v6 = vld [vmem:[%s14301_s6 + $0x7a0] sm:$0xf] }
 0x324   : > { %v12094_v50 = vld [vmem:[%s14301_s6 + $0x1a58] sm:$0xf0] }
 0x325   : > { %v13811_v42 = vld [vmem:[%s14301_s6 + $0x1e1c] sm:$0xf]  ;;  %v12097_v18 = vor.u32 %v13683_v62, %v12094_v50  ;;  %7391 = vmatpush.bf16.msrb.mxu1 %v11585_v28 }
 0x326   : > { %v12606_v37 = vld [vmem:[%s14301_s6 + $0x1e58] sm:$0xf0] }
 0x327   : > { %v13411_v59 = vld [vmem:[%s14301_s6 + $0x119c] sm:$0xf]  ;;  %v12609_v55 = vor.u32 %v13811_v42, %v12606_v37  ;;  %7405 = vmatpush.bf16.msrb.mxu2 %v12097_v18 }
 0x328   : > { %v11006_v41 = vld [vmem:[%s14301_s6 + $0x11d8] sm:$0xf0] }
 0x329   : > { %v13539_v31 = vld [vmem:[%s14301_s6 + $0x159c] sm:$0xf]  ;;  %v11009_v52 = vor.u32 %v13411_v59, %v11006_v41  ;;  %7419 = vmatpush.bf16.msrb.mxu3 %v12609_v55 }
 0x32a   : > { %v11518_v57 = vld [vmem:[%s14301_s6 + $0x15d8] sm:$0xf0] }
 0x32b   : > { %v13667_v56 = vld [vmem:[%s14301_s6 + $0x199c] sm:$0xf]  ;;  %v11521_v60 = vor.u32 %v13539_v31, %v11518_v57  ;;  %7378 = vmatpush.bf16.msrb.mxu0 %v11009_v52 }
 0x32c   : > { %v12030_v3 = vld [vmem:[%s14301_s6 + $0x19d8] sm:$0xf0] }
 0x32d   : > { %v13795_v9 = vld [vmem:[%s14301_s6 + $0x1d9c] sm:$0xf]  ;;  %v12033_v25 = vor.u32 %v13667_v56, %v12030_v3  ;;  %7392 = vmatpush.bf16.msrb.mxu1 %v11521_v60  ;;  %v13100_v60 = vld [vmem:[%s14301_s6 + $0x7dc] sm:$0xf0] }
 0x32e   : > { %v12542_v53 = vld [vmem:[%s14301_s6 + $0x1dd8] sm:$0xf0] }
 0x32f   : > { %v13395_v34 = vld [vmem:[%s14301_s6 + $0x111c] sm:$0xf]  ;;  %v12545_v11 = vor.u32 %v13795_v9, %v12542_v53  ;;  %7406 = vmatpush.bf16.msrb.mxu2 %v12033_v25  ;;  %v9220_v9 = vld [vmem:[%s14301_s6 + $0x3a0] sm:$0xf] }
 0x330   : > { %v10942_v4 = vld [vmem:[%s14301_s6 + $0x1158] sm:$0xf0]  ;;  %v12972_v53 = vld [vmem:[%s14301_s6 + $0x3dc] sm:$0xf0] }
 0x331   : > { %v13523_v5 = vld [vmem:[%s14301_s6 + $0x151c] sm:$0xf]  ;;  %v10945_v16 = vor.u32 %v13395_v34, %v10942_v4  ;;  %7420 = vmatpush.bf16.msrb.mxu3 %v12545_v11  ;;  %v10244_v25 = vld [vmem:[%s14301_s6 + $0xba0] sm:$0xf]  ;;  %v7131_v4 = vpop.f32.mrf.mxu2  ;;  %v9221_v63 = vor.u32 %v12972_v53, %v9220_v9 }
 0x332   : > { %v11454_v32 = vld [vmem:[%s14301_s6 + $0x1558] sm:$0xf0]  ;;  %v13228_v34 = vld [vmem:[%s14301_s6 + $0xbdc] sm:$0xf0] }
 0x333   : > { %v13651_v21 = vld [vmem:[%s14301_s6 + $0x191c] sm:$0xf]  ;;  %v11457_v23 = vor.u32 %v13523_v5, %v11454_v32  ;;  %7379 = vmatpush.bf16.msrb.mxu0 %v10945_v16  ;;  %v7034_v5 = vadd.f32 %v15465_v7, %v7020_v38  ;;  %v10245_v7 = vor.u32 %v13228_v34, %v10244_v25  ;;  %v9028_v25 = vld [vmem:[%s14301_s6 + $0x220] sm:$0xf] }
 0x334   : > { %v11966_v45 = vld [vmem:[%s14301_s6 + $0x1958] sm:$0xf0]  ;;  %v12924_v34 = vld [vmem:[%s14301_s6 + $0x25c] sm:$0xf0] }
 0x335   : > { %v13779_v49 = vld [vmem:[%s14301_s6 + $0x1d1c] sm:$0xf]  ;;  %v11969_v33 = vor.u32 %v13651_v21, %v11966_v45  ;;  %7393 = vmatpush.bf16.msrb.mxu1 %v11457_v23  ;;  %v10756_v21 = vld [vmem:[%s14301_s6 + $0xfa0] sm:$0xf]  ;;  %v9733_v23 = vor.u32 %v13100_v60, %v9732_v6 }
 0x336   : > { %v12478_v2 = vld [vmem:[%s14301_s6 + $0x1d58] sm:$0xf0]  ;;  %v13356_v45 = vld [vmem:[%s14301_s6 + $0xfdc] sm:$0xf0] }
 0x337   : > { %v13379_v46 = vld [vmem:[%s14301_s6 + $0x109c] sm:$0xf]  ;;  %v12481_v15 = vor.u32 %v13779_v49, %v12478_v2  ;;  %7407 = vmatpush.bf16.msrb.mxu2 %v11969_v33  ;;  %v7145_v49 = vpop.f32.mrf.mxu3  ;;  %v7118_v2 = vadd.f32 %v7117_v29, %v7103_v27  ;;  %v7105_v33 = vpop.f32.mrf.mxu0  ;;  %v7048_v27 = vadd.f32 %v15505_v48, %v7034_v5  ;;  %v10692_v29 = vld [vmem:[%s14301_s6 + $0xf20] sm:$0xf] }
 0x338   : > { %v10878_v19 = vld [vmem:[%s14301_s6 + $0x10d8] sm:$0xf0]  ;;  %v13052_v5 = vld [vmem:[%s14301_s6 + $0x65c] sm:$0xf0] }
 0x339   : > { %v13507_v24 = vld [vmem:[%s14301_s6 + $0x149c] sm:$0xf]  ;;  %v10881_v50 = vor.u32 %v13379_v46, %v10878_v19  ;;  %7421 = vmatpush.bf16.msrb.mxu3 %v12481_v15  ;;  %v9156_v46 = vld [vmem:[%s14301_s6 + $0x320] sm:$0xf]  ;;  %v10757_v15 = vor.u32 %v13356_v45, %v10756_v21 }
 0x33a   : > { %v11390_v26 = vld [vmem:[%s14301_s6 + $0x14d8] sm:$0xf0]  ;;  %v12956_v19 = vld [vmem:[%s14301_s6 + $0x35c] sm:$0xf0] }
 0x33b   : > { %v13635_v36 = vld [vmem:[%s14301_s6 + $0x189c] sm:$0xf]  ;;  %v11393_v28 = vor.u32 %v13507_v24, %v11390_v26  ;;  %7380 = vmatpush.bf16.msrb.mxu0 %v10881_v50  ;;  %v9668_v24 = vld [vmem:[%s14301_s6 + $0x720] sm:$0xf]  ;;  %v7008_v50 = vadd.f32 %v15477_v22, %v15473_v0 }
 0x33c   : > { %v11902_v61 = vld [vmem:[%s14301_s6 + $0x18d8] sm:$0xf0]  ;;  %v13084_v26 = vld [vmem:[%s14301_s6 + $0x75c] sm:$0xf0] }
 0x33d   : > { %v13763_v35 = vld [vmem:[%s14301_s6 + $0x1c9c] sm:$0xf]  ;;  %v11905_v18 = vor.u32 %v13635_v36, %v11902_v61  ;;  %7394 = vmatpush.bf16.msrb.mxu1 %v11393_v28  ;;  %v10180_v36 = vld [vmem:[%s14301_s6 + $0xb20] sm:$0xf]  ;;  %v9669_v48 = vor.u32 %v13084_v26, %v9668_v24 }
 0x33e   : > { %v12414_v62 = vld [vmem:[%s14301_s6 + $0x1cd8] sm:$0xf0]  ;;  %v13212_v61 = vld [vmem:[%s14301_s6 + $0xb5c] sm:$0xf0] }
 0x33f   : > { %v13363_v42 = vld [vmem:[%s14301_s6 + $0x101c] sm:$0xf]  ;;  %v12417_v55 = vor.u32 %v13763_v35, %v12414_v62  ;;  %7408 = vmatpush.bf16.msrb.mxu2 %v11905_v18  ;;  %v7119_v35 = vpop.f32.mrf.mxu1  ;;  %v13340_v62 = vld [vmem:[%s14301_s6 + $0xf5c] sm:$0xf0]  ;;  %v10181_v38 = vor.u32 %v13212_v61, %v10180_v36  ;;  %v7147_v60 = vpop.f32.mrf.mxu3 }
 0x340   : > { %v10814_v37 = vld [vmem:[%s14301_s6 + $0x1058] sm:$0xf0]  ;;  %v9092_v28 = vld [vmem:[%s14301_s6 + $0x2a0] sm:$0xf]  ;;  %v7120_v45 = vadd.f32 %v7119_v35, %v7105_v33 }
 0x341   : > { %v13491_v59 = vld [vmem:[%s14301_s6 + $0x141c] sm:$0xf]  ;;  %v10817_v52 = vor.u32 %v13363_v42, %v10814_v37  ;;  %7422 = vmatpush.bf16.msrb.mxu3 %v12417_v55  ;;  %v7132_v42 = vadd.f32 %v7131_v4, %v7118_v2  ;;  %v9157_v37 = vor.u32 %v12956_v19, %v9156_v46  ;;  %v12940_v18 = vld [vmem:[%s14301_s6 + $0x2dc] sm:$0xf0]  ;;  %v7062_v55 = vadd.f32 %v15509_v8, %v7048_v27  ;;  %v7133_v8 = vpop.f32.mrf.mxu2 }
 0x342   : > { %v11326_v41 = vld [vmem:[%s14301_s6 + $0x1458] sm:$0xf0]  ;;  %v13068_v0 = vld [vmem:[%s14301_s6 + $0x6dc] sm:$0xf0]  ;;  %v9093_v53 = vor.u32 %v12940_v18, %v9092_v28 }
 0x343   : > { %v13619_v31 = vld [vmem:[%s14301_s6 + $0x181c] sm:$0xf]  ;;  %v11329_v11 = vor.u32 %v13491_v59, %v11326_v41  ;;  %7381 = vmatpush.bf16.msrb.mxu0 %v10817_v52  ;;  %v9604_v59 = vld [vmem:[%s14301_s6 + $0x6a0] sm:$0xf]  ;;  %v10693_v41 = vor.u32 %v13340_v62, %v10692_v29  ;;  %v7146_v9 = vadd.f32 %v7145_v49, %v7132_v42  ;;  %v7076_v21 = vadd.f32 %v15526_v14, %v7062_v55  ;;  %v7159_v49 = vpop.f32.mrf.mxu0 }
 0x344   : > { %v11838_v57 = vld [vmem:[%s14301_s6 + $0x1858] sm:$0xf0]  ;;  %v10116_v22 = vld [vmem:[%s14301_s6 + $0xaa0] sm:$0xf]  ;;  %v9605_v6 = vor.u32 %v13068_v0, %v9604_v59 }
 0x345   : > { %v13747_v56 = vld [vmem:[%s14301_s6 + $0x1c1c] sm:$0xf]  ;;  %v11841_v32 = vor.u32 %v13619_v31, %v11838_v57  ;;  %7395 = vmatpush.bf16.msrb.mxu1 %v11329_v11  ;;  %v13196_v31 = vld [vmem:[%s14301_s6 + $0xadc] sm:$0xf0]  ;;  %v7090_v27 = vadd.f32 %v15531_v30, %v7076_v21 }
 0x346   : > { %v12350_v3 = vld [vmem:[%s14301_s6 + $0x1c58] sm:$0xf0]  ;;  %7382 = vmatmul.bf16.vlgmr.msrb.gmra.mxu0 %v14458_v39  ;;  %v10628_v57 = vld [vmem:[%s14301_s6 + $0xea0] sm:$0xf]  ;;  %v10117_v52 = vor.u32 %v13196_v31, %v10116_v22 }
 0x347   : > { %v12353_v16 = vor.u32 %v13747_v56, %v12350_v3  ;;  %7409 = vmatpush.bf16.msrb.mxu2 %v11841_v32  ;;  %7430 = vmatpush.bf16.msra.mxu0 %v9221_v63  ;;  %v13324_v56 = vld [vmem:[%s14301_s6 + $0xedc] sm:$0xf0]  ;;  %v7022_v3 = vadd.f32 %v15495_v51, %v7008_v50  ;;  %v7173_v46 = vpop.f32.mrf.mxu1  ;;  %v7134_v50 = vadd.f32 %v7133_v8, %v7120_v45  ;;  %v7201_v8 = vpop.f32.mrf.mxu3 }
 0x348   : > { %7396 = vmatmul.bf16.vlgmr.msrb.gmra.mxu1 %v14465_v44  ;;  %v9540_v4 = vld [vmem:[%s14301_s6 + $0x620] sm:$0xf]  ;;  %v10629_v51 = vor.u32 %v13324_v56, %v10628_v57 }
 0x349   : > { %7423 = vmatpush.bf16.msrb.mxu3 %v12353_v16  ;;  %7444 = vmatpush.bf16.msra.mxu1 %v9733_v23  ;;  %v10052_v11 = vld [vmem:[%s14301_s6 + $0xa20] sm:$0xf]  ;;  %v7036_v63 = vadd.f32 %v15497_v13, %v7022_v3  ;;  %v7160_v23 = vadd.f32 %v7159_v49, %v7146_v9  ;;  %v9541_v19 = vor.u32 %v13052_v5, %v9540_v4  ;;  %v7187_v31 = vpop.f32.mrf.mxu2 }
 0x34a   : > { %7410 = vmatmul.bf16.vlgmr.msrb.gmra.mxu2 %v14463_v43  ;;  %v13180_v32 = vld [vmem:[%s14301_s6 + $0xa5c] sm:$0xf0]  ;;  %v7148_v3 = vadd.f32 %v7147_v60, %v7134_v50 }
 0x34b   : > { %7458 = vmatpush.bf16.msra.mxu2 %v10245_v7  ;;  %7431 = vmatpush.bf16.msra.mxu0 %v9157_v37  ;;  %v10564_v2 = vld [vmem:[%s14301_s6 + $0xe20] sm:$0xf]  ;;  %v9029_v7 = vor.u32 %v12924_v34, %v9028_v25  ;;  %v10053_v14 = vor.u32 %v13180_v32, %v10052_v11  ;;  %v7050_v26 = vadd.f32 %v15535_v40, %v7036_v63 }
 0x34c   : > { %7424 = vmatmul.bf16.vlgmr.msrb.gmra.mxu3 %v14469_v47  ;;  %v13308_v16 = vld [vmem:[%s14301_s6 + $0xe5c] sm:$0xf0]  ;;  %v7174_v42 = vadd.f32 %v7173_v46, %v7160_v23 }
 0x34d   : > { %7472 = vmatpush.bf16.msra.mxu3 %v10757_v15  ;;  %7445 = vmatpush.bf16.msra.mxu1 %v9669_v48  ;;  %v8964_v33 = vld [vmem:[%s14301_s6 + $0x1a0] sm:$0xf]  ;;  %v10565_v13 = vor.u32 %v13308_v16, %v10564_v2  ;;  %v7064_v0 = vadd.f32 %v15540_v54, %v7050_v26 }
 0x34e   : > { %v12908_v24 = vld [vmem:[%s14301_s6 + $0x1dc] sm:$0xf0]  ;;  %v7188_v9 = vadd.f32 %v7187_v31, %v7174_v42 }
 0x34f   : > { %7459 = vmatpush.bf16.msra.mxu2 %v10181_v38  ;;  %7432 = vmatpush.bf16.msra.mxu0 %v9093_v53  ;;  %v9476_v15 = vld [vmem:[%s14301_s6 + $0x5a0] sm:$0xf]  ;;  %v8965_v40 = vor.u32 %v12908_v24, %v8964_v33  ;;  %v7161_v53 = vpop.f32.mrf.mxu0  ;;  %v7078_v54 = vadd.f32 %v15555_v12, %v7064_v0  ;;  %v7175_v45 = vpop.f32.mrf.mxu1 }
 0x350   : > { %v13036_v36 = vld [vmem:[%s14301_s6 + $0x5dc] sm:$0xf0]  ;;  %v7162_v60 = vadd.f32 %v7161_v53, %v7148_v3 }
 0x351   : > { %7473 = vmatpush.bf16.msra.mxu3 %v10693_v41  ;;  %7446 = vmatpush.bf16.msra.mxu1 %v9605_v6  ;;  %v9988_v61 = vld [vmem:[%s14301_s6 + $0x9a0] sm:$0xf]  ;;  %v9477_v28 = vor.u32 %v13036_v36, %v9476_v15  ;;  %v7189_v50 = vpop.f32.mrf.mxu2 }
 0x352   : > { %v13164_v35 = vld [vmem:[%s14301_s6 + $0x9dc] sm:$0xf0] }
 0x353   : > { %7460 = vmatpush.bf16.msra.mxu2 %v10117_v52  ;;  %v15631_v29 = vld [vmem:[%s14945_s7] sm:$0xff]  ;;  %7433 = vmatpush.bf16.msra.mxu0 %v9029_v7  ;;  %v9989_v18 = vor.u32 %v13164_v35, %v9988_v61 }
 0x354   : > { %v8433_v62 = vperm.slane %v15631_v29, 4  ;;  %v10500_v37 = vld [vmem:[%s14301_s6 + $0xda0] sm:$0xf]  ;;  %v8434_v6 = vperm.slane %v15631_v29, 5 }
 0x355   : > { %7474 = vmatpush.bf16.msra.mxu3 %v10629_v51  ;;  %v13292_v48 = vld [vmem:[%s14301_s6 + $0xddc] sm:$0xf0]  ;;  %7447 = vmatpush.bf16.msra.mxu1 %v9541_v19  ;;  %v7202_v51 = vadd.f32 %v7201_v8, %v7188_v9  ;;  %v7092_v19 = vadd.f32 %v15559_v20, %v7078_v54 }
 0x356   : > { %v8900_v38 = vld [vmem:[%s14301_s6 + $0x120] sm:$0xf]  ;;  %v10501_v22 = vor.u32 %v13292_v48, %v10500_v37  ;;  %v8465_v56 = vadd.f32 %v8433_v62, %v7090_v27 }
 0x357   : > { %7461 = vmatpush.bf16.msra.mxu2 %v10053_v14  ;;  %v12892_v30 = vld [vmem:[%s14301_s6 + $0x15c] sm:$0xf0]  ;;  %7434 = vmatpush.bf16.msra.mxu0 %v8965_v40  ;;  %v8466_v23 = vadd.f32 %v8434_v6, %v7202_v51 }
 0x358   : > { %v9412_v59 = vld [vmem:[%s14301_s6 + $0x520] sm:$0xf]  ;;  %v8901_v34 = vor.u32 %v12892_v30, %v8900_v38  ;;  %v8497_v63 = vmax.f32 %v8465_v56, 0.0 }
 0x359   : > { %v13020_v41 = vld [vmem:[%s14301_s6 + $0x55c] sm:$0xf0]  ;;  %7475 = vmatpush.bf16.msra.mxu3 %v10565_v13  ;;  %7448 = vmatpush.bf16.msra.mxu1 %v9477_v28  ;;  %v8498_v26 = vmax.f32 %v8466_v23, 0.0  ;;  %v7176_v13 = vadd.f32 %v7175_v45, %v7162_v60  ;;  %v7203_v28 = vpop.f32.mrf.mxu3 }
 0x35a   : > { %v9924_v55 = vld [vmem:[%s14301_s6 + $0x920] sm:$0xf]  ;;  %v9413_v4 = vor.u32 %v13020_v41, %v9412_v59  ;;  %v8481_v41 = vadd.f32 %v8433_v62, %v7092_v19 }
 0x35b   : > { %v13148_v57 = vld [vmem:[%s14301_s6 + $0x95c] sm:$0xf0]  ;;  %7462 = vmatpush.bf16.msra.mxu2 %v9989_v18  ;;  %7435 = vmatpush.bf16.msra.mxu0 %v8901_v34  ;;  %v8527_v40 = vpack.c.bf16 %v8498_v26, %v8497_v63  ;;  %v7190_v38 = vadd.f32 %v7189_v50, %v7176_v13 }
 0x35c   : > { %v10436_v52 = vld [vmem:[%s14301_s6 + $0xd20] sm:$0xf]  ;;  %v9925_v5 = vor.u32 %v13148_v57, %v9924_v55 }
 0x35d   : > { %v13276_v25 = vld [vmem:[%s14301_s6 + $0xd5c] sm:$0xf0]  ;;  %7476 = vmatpush.bf16.msra.mxu3 %v10501_v22  ;;  %7449 = vmatpush.bf16.msra.mxu1 %v9413_v4  ;;  %8543 = vst [vmem:[%s15004_s20 + $0x10] sm:$0xff] %v8527_v40  ;;  %v7204_v57 = vadd.f32 %v7203_v28, %v7190_v38 }
 0x35e   : > { %v8836_v11 = vld [vmem:[%s14301_s6 + $0xa0] sm:$0xf]  ;;  %v10437_v12 = vor.u32 %v13276_v25, %v10436_v52 }
 0x35f   : > { %v12876_v32 = vld [vmem:[%s14301_s6 + $0xdc] sm:$0xf0]  ;;  %7463 = vmatpush.bf16.msra.mxu2 %v9925_v5  ;;  %v8482_v52 = vadd.f32 %v8434_v6, %v7204_v57 }
 0x360   : > { %v9348_v21 = vld [vmem:[%s14301_s6 + $0x4a0] sm:$0xf]  ;;  %v8837_v14 = vor.u32 %v12876_v32, %v8836_v11 }
 0x361   : > { %v13004_v49 = vld [vmem:[%s14301_s6 + $0x4dc] sm:$0xf0]  ;;  %7477 = vmatpush.bf16.msra.mxu3 %v10437_v12  ;;  %v8514_v12 = vmax.f32 %v8482_v52, 0.0 }
 0x362   : > { %v9860_v2 = vld [vmem:[%s14301_s6 + $0x8a0] sm:$0xf]  ;;  %v9349_v36 = vor.u32 %v13004_v49, %v9348_v21  ;;  %7436 = vmatpush.bf16.msra.mxu0 %v8837_v14  ;;  %v8513_v21 = vmax.f32 %v8481_v41, 0.0 }
 0x363   : > { %v13132_v16 = vld [vmem:[%s14301_s6 + $0x8dc] sm:$0xf0] }
 0x364   : > { %v10372_v7 = vld [vmem:[%s14301_s6 + $0xca0] sm:$0xf]  ;;  %v9861_v61 = vor.u32 %v13132_v16, %v9860_v2  ;;  %7450 = vmatpush.bf16.msra.mxu1 %v9349_v36  ;;  %v8535_v49 = vpack.c.bf16 %v8514_v12, %v8513_v21 }
 0x365   : > { %v13260_v46 = vld [vmem:[%s14301_s6 + $0xcdc] sm:$0xf0] }
 0x366   : > { %v8772_v33 = vld [vmem:[%s14301_s6 + $0x20] sm:$0xf]  ;;  %v10373_v20 = vor.u32 %v13260_v46, %v10372_v7  ;;  %7464 = vmatpush.bf16.msra.mxu2 %v9861_v61  ;;  %8551 = vst [vmem:[%s15004_s20 + $0x50] sm:$0xff] %v8535_v49 }
 0x367   : > { %v12860_v24 = vld [vmem:[%s14301_s6 + $0x5c] sm:$0xf0] }
 0x368   : > { %v9284_v15 = vld [vmem:[%s14301_s6 + $0x420] sm:$0xf]  ;;  %v8773_v0 = vor.u32 %v12860_v24, %v8772_v33  ;;  %7478 = vmatpush.bf16.msra.mxu3 %v10373_v20 }
 0x369   : > { %v12988_v35 = vld [vmem:[%s14301_s6 + $0x45c] sm:$0xf0] }
 0x36a   : > { %v9796_v27 = vld [vmem:[%s14301_s6 + $0x820] sm:$0xf]  ;;  %v9285_v56 = vor.u32 %v12988_v35, %v9284_v15  ;;  %7437 = vmatpush.bf16.msra.mxu0 %v8773_v0 }
 0x36b   : > { %v13116_v42 = vld [vmem:[%s14301_s6 + $0x85c] sm:$0xf0] }
 0x36c   : > { %v10308_v37 = vld [vmem:[%s14301_s6 + $0xc20] sm:$0xf]  ;;  %v9797_v3 = vor.u32 %v13116_v42, %v9796_v27  ;;  %7451 = vmatpush.bf16.msra.mxu1 %v9285_v56 }
 0x36d   : > { %v13244_v48 = vld [vmem:[%s14301_s6 + $0xc5c] sm:$0xf0]  ;;  %7438 = vmatmul.bf16.vlgmr.msra.gmra.mxu0 %v14389_v58 }
 0x36e   : > { %v11268_v18 = vld [vmem:[%s14301_s6 + $0x13a0] sm:$0xf]  ;;  %v10309_v62 = vor.u32 %v13244_v48, %v10308_v37  ;;  %7465 = vmatpush.bf16.msra.mxu2 %v9797_v3 }
 0x36f   : > { %v13484_v30 = vld [vmem:[%s14301_s6 + $0x13dc] sm:$0xf0]  ;;  %7452 = vmatmul.bf16.vlgmr.msra.gmra.mxu1 %v14401_v10 }
 0x370   : > { %v11780_v59 = vld [vmem:[%s14301_s6 + $0x17a0] sm:$0xf]  ;;  %v11269_v8 = vor.u32 %v13484_v30, %v11268_v18  ;;  %7479 = vmatpush.bf16.msra.mxu3 %v10309_v62 }
 0x371   : > { %v13612_v22 = vld [vmem:[%s14301_s6 + $0x17dc] sm:$0xf0]  ;;  %7466 = vmatmul.bf16.vlgmr.msra.gmra.mxu2 %v14394_v1 }
 0x372   : > { %v12292_v31 = vld [vmem:[%s14301_s6 + $0x1ba0] sm:$0xf]  ;;  %v11781_v25 = vor.u32 %v13612_v22, %v11780_v59  ;;  %7486 = vmatpush.bf16.msrb.mxu0 %v11269_v8 }
 0x373   : > { %v13740_v55 = vld [vmem:[%s14301_s6 + $0x1bdc] sm:$0xf0]  ;;  %7480 = vmatmul.bf16.vlgmr.msra.gmra.mxu3 %v14406_v17 }
 0x374   : > { %v12804_v9 = vld [vmem:[%s14301_s6 + $0x1fa0] sm:$0xf]  ;;  %v12293_v54 = vor.u32 %v13740_v55, %v12292_v31  ;;  %7500 = vmatpush.bf16.msrb.mxu1 %v11781_v25 }
 0x375   : > { %v13868_v53 = vld [vmem:[%s14301_s6 + $0x1fdc] sm:$0xf0] }
 0x376   : > { %v11204_v34 = vld [vmem:[%s14301_s6 + $0x1320] sm:$0xf]  ;;  %v12805_v51 = vor.u32 %v13868_v53, %v12804_v9  ;;  %7514 = vmatpush.bf16.msrb.mxu2 %v12293_v54 }
 0x377   : > { %v13468_v4 = vld [vmem:[%s14301_s6 + $0x135c] sm:$0xf0] }
 0x378   : > { %v11716_v60 = vld [vmem:[%s14301_s6 + $0x1720] sm:$0xf]  ;;  %v11205_v45 = vor.u32 %v13468_v4, %v11204_v34  ;;  %7528 = vmatpush.bf16.msrb.mxu3 %v12805_v51 }
 0x379   : > { %v13596_v5 = vld [vmem:[%s14301_s6 + $0x175c] sm:$0xf0] }
 0x37a   : > { %v12228_v11 = vld [vmem:[%s14301_s6 + $0x1b20] sm:$0xf]  ;;  %v11717_v2 = vor.u32 %v13596_v5, %v11716_v60  ;;  %7487 = vmatpush.bf16.msrb.mxu0 %v11205_v45 }
 0x37b   : > { %v13724_v32 = vld [vmem:[%s14301_s6 + $0x1b5c] sm:$0xf0] }
 0x37c   : > { %v12740_v29 = vld [vmem:[%s14301_s6 + $0x1f20] sm:$0xf]  ;;  %v12229_v16 = vor.u32 %v13724_v32, %v12228_v11  ;;  %7501 = vmatpush.bf16.msrb.mxu1 %v11717_v2 }
 0x37d   : > { %v13852_v6 = vld [vmem:[%s14301_s6 + $0x1f5c] sm:$0xf0] }
 0x37e   : > { %v11140_v63 = vld [vmem:[%s14301_s6 + $0x12a0] sm:$0xf]  ;;  %v12741_v46 = vor.u32 %v13852_v6, %v12740_v29  ;;  %7515 = vmatpush.bf16.msrb.mxu2 %v12229_v16 }
 0x37f   : > { %v13452_v23 = vld [vmem:[%s14301_s6 + $0x12dc] sm:$0xf0] }
 0x380   : > { %v11652_v7 = vld [vmem:[%s14301_s6 + $0x16a0] sm:$0xf]  ;;  %v11141_v26 = vor.u32 %v13452_v23, %v11140_v63  ;;  %7529 = vmatpush.bf16.msrb.mxu3 %v12741_v46 }
 0x381   : > { %v13580_v19 = vld [vmem:[%s14301_s6 + $0x16dc] sm:$0xf0] }
 0x382   : > { %v12164_v14 = vld [vmem:[%s14301_s6 + $0x1aa0] sm:$0xf]  ;;  %v11653_v13 = vor.u32 %v13580_v19, %v11652_v7  ;;  %7488 = vmatpush.bf16.msrb.mxu0 %v11141_v26 }
 0x383   : > { %v13708_v33 = vld [vmem:[%s14301_s6 + $0x1adc] sm:$0xf0] }
 0x384   : > { %v12676_v24 = vld [vmem:[%s14301_s6 + $0x1ea0] sm:$0xf]  ;;  %v12165_v36 = vor.u32 %v13708_v33, %v12164_v14  ;;  %7502 = vmatpush.bf16.msrb.mxu1 %v11653_v13 }
 0x385   : > { %v13836_v15 = vld [vmem:[%s14301_s6 + $0x1edc] sm:$0xf0] }
 0x386   : > { %v11076_v61 = vld [vmem:[%s14301_s6 + $0x1220] sm:$0xf]  ;;  %v12677_v20 = vor.u32 %v13836_v15, %v12676_v24  ;;  %7516 = vmatpush.bf16.msrb.mxu2 %v12165_v36 }
 0x387   : > { %v13436_v35 = vld [vmem:[%s14301_s6 + $0x125c] sm:$0xf0] }
 0x388   : > { %v11588_v27 = vld [vmem:[%s14301_s6 + $0x1620] sm:$0xf]  ;;  %v11077_v38 = vor.u32 %v13436_v35, %v11076_v61  ;;  %7530 = vmatpush.bf16.msrb.mxu3 %v12677_v20  ;;  %v12964_v35 = vld [vmem:[%s14301_s6 + $0x3a4] sm:$0xf] }
 0x389   : > { %v13564_v50 = vld [vmem:[%s14301_s6 + $0x165c] sm:$0xf0]  ;;  %v13092_v20 = vld [vmem:[%s14301_s6 + $0x7a4] sm:$0xf] }
 0x38a   : > { %v12100_v42 = vld [vmem:[%s14301_s6 + $0x1a20] sm:$0xf]  ;;  %v11589_v28 = vor.u32 %v13564_v50, %v11588_v27  ;;  %7489 = vmatpush.bf16.msrb.mxu0 %v11077_v38  ;;  %v9222_v27 = vld [vmem:[%s14301_s6 + $0x3e0] sm:$0xf0] }
 0x38b   : > { %v13692_v37 = vld [vmem:[%s14301_s6 + $0x1a5c] sm:$0xf0] }
 0x38c   : > { %v12612_v48 = vld [vmem:[%s14301_s6 + $0x1e20] sm:$0xf]  ;;  %v12101_v18 = vor.u32 %v13692_v37, %v12100_v42  ;;  %7503 = vmatpush.bf16.msrb.mxu1 %v11589_v28  ;;  %v9734_v42 = vld [vmem:[%s14301_s6 + $0x7e0] sm:$0xf0] }
 0x38d   : > { %v13820_v40 = vld [vmem:[%s14301_s6 + $0x1e5c] sm:$0xf0]  ;;  %v13220_v37 = vld [vmem:[%s14301_s6 + $0xba4] sm:$0xf] }
 0x38e   : > { %v11012_v30 = vld [vmem:[%s14301_s6 + $0x11a0] sm:$0xf]  ;;  %v12613_v0 = vor.u32 %v13820_v40, %v12612_v48  ;;  %7517 = vmatpush.bf16.msrb.mxu2 %v12101_v18  ;;  %v10246_v48 = vld [vmem:[%s14301_s6 + $0xbe0] sm:$0xf0] }
 0x38f   : > { %v13420_v59 = vld [vmem:[%s14301_s6 + $0x11dc] sm:$0xf0]  ;;  %v13348_v28 = vld [vmem:[%s14301_s6 + $0xfa4] sm:$0xf] }
 0x390   : > { %v11524_v41 = vld [vmem:[%s14301_s6 + $0x15a0] sm:$0xf]  ;;  %v11013_v3 = vor.u32 %v13420_v59, %v11012_v30  ;;  %7531 = vmatpush.bf16.msrb.mxu3 %v12613_v0  ;;  %v10758_v18 = vld [vmem:[%s14301_s6 + $0xfe0] sm:$0xf0]  ;;  %v9225_v59 = vor.u32 %v12964_v35, %v9222_v27  ;;  %v10249_v0 = vor.u32 %v13220_v37, %v10246_v48 }
 0x391   : > { %v13548_v22 = vld [vmem:[%s14301_s6 + $0x15dc] sm:$0xf0]  ;;  %v9478_v27 = vld [vmem:[%s14301_s6 + $0x5e0] sm:$0xf0] }
 0x392   : > { %v12036_v31 = vld [vmem:[%s14301_s6 + $0x19a0] sm:$0xf]  ;;  %v11525_v9 = vor.u32 %v13548_v22, %v11524_v41  ;;  %7490 = vmatpush.bf16.msrb.mxu0 %v11013_v3  ;;  %v9737_v41 = vor.u32 %v13092_v20, %v9734_v42  ;;  %v12948_v22 = vld [vmem:[%s14301_s6 + $0x324] sm:$0xf] }
 0x393   : > { %v13676_v55 = vld [vmem:[%s14301_s6 + $0x19dc] sm:$0xf0]  ;;  %v13204_v3 = vld [vmem:[%s14301_s6 + $0xb24] sm:$0xf] }
 0x394   : > { %v12548_v57 = vld [vmem:[%s14301_s6 + $0x1da0] sm:$0xf]  ;;  %v12037_v53 = vor.u32 %v13676_v55, %v12036_v31  ;;  %7504 = vmatpush.bf16.msrb.mxu1 %v11525_v9  ;;  %v9158_v31 = vld [vmem:[%s14301_s6 + $0x360] sm:$0xf0] }
 0x395   : > { %v13804_v56 = vld [vmem:[%s14301_s6 + $0x1ddc] sm:$0xf0]  ;;  %v13076_v55 = vld [vmem:[%s14301_s6 + $0x724] sm:$0xf] }
 0x396   : > { %v10948_v62 = vld [vmem:[%s14301_s6 + $0x1120] sm:$0xf]  ;;  %v12549_v25 = vor.u32 %v13804_v56, %v12548_v57  ;;  %7518 = vmatpush.bf16.msrb.mxu2 %v12037_v53  ;;  %v10761_v57 = vor.u32 %v13348_v28, %v10758_v18  ;;  %v9670_v56 = vld [vmem:[%s14301_s6 + $0x760] sm:$0xf0] }
 0x397   : > { %v13404_v8 = vld [vmem:[%s14301_s6 + $0x115c] sm:$0xf0]  ;;  %v10182_v9 = vld [vmem:[%s14301_s6 + $0xb60] sm:$0xf0] }
 0x398   : > { %v11460_v52 = vld [vmem:[%s14301_s6 + $0x1520] sm:$0xf]  ;;  %v10949_v5 = vor.u32 %v13404_v8, %v10948_v62  ;;  %7532 = vmatpush.bf16.msrb.mxu3 %v12549_v25  ;;  %v13332_v53 = vld [vmem:[%s14301_s6 + $0xf24] sm:$0xf]  ;;  %v9161_v8 = vor.u32 %v12948_v22, %v9158_v31  ;;  %v10185_v25 = vor.u32 %v13204_v3, %v10182_v9  ;;  %v15800_v3 = vpop.f32.mrf.mxu3 }
 0x399   : > { %v13532_v54 = vld [vmem:[%s14301_s6 + $0x155c] sm:$0xf0]  ;;  %v10694_v62 = vld [vmem:[%s14301_s6 + $0xf60] sm:$0xf0] }
 0x39a   : > { %v11972_v34 = vld [vmem:[%s14301_s6 + $0x1920] sm:$0xf]  ;;  %v11461_v11 = vor.u32 %v13532_v54, %v11460_v52  ;;  %7491 = vmatpush.bf16.msrb.mxu0 %v10949_v5  ;;  %v9673_v52 = vor.u32 %v13076_v55, %v9670_v56  ;;  %v12932_v54 = vld [vmem:[%s14301_s6 + $0x2a4] sm:$0xf] }
 0x39b   : > { %v13660_v4 = vld [vmem:[%s14301_s6 + $0x195c] sm:$0xf0]  ;;  %v13188_v5 = vld [vmem:[%s14301_s6 + $0xaa4] sm:$0xf] }
 0x39c   : > { %v12484_v60 = vld [vmem:[%s14301_s6 + $0x1d20] sm:$0xf]  ;;  %v11973_v32 = vor.u32 %v13660_v4, %v11972_v34  ;;  %7505 = vmatpush.bf16.msrb.mxu1 %v11461_v11  ;;  %v9094_v34 = vld [vmem:[%s14301_s6 + $0x2e0] sm:$0xf0] }
 0x39d   : > { %v13788_v51 = vld [vmem:[%s14301_s6 + $0x1d5c] sm:$0xf0]  ;;  %v13060_v4 = vld [vmem:[%s14301_s6 + $0x6a4] sm:$0xf] }
 0x39e   : > { %v10884_v21 = vld [vmem:[%s14301_s6 + $0x10a0] sm:$0xf]  ;;  %v12485_v6 = vor.u32 %v13788_v51, %v12484_v60  ;;  %7519 = vmatpush.bf16.msrb.mxu2 %v11973_v32  ;;  %v10697_v60 = vor.u32 %v13332_v53, %v10694_v62  ;;  %v9606_v51 = vld [vmem:[%s14301_s6 + $0x6e0] sm:$0xf0] }
 0x39f   : > { %v13388_v12 = vld [vmem:[%s14301_s6 + $0x10dc] sm:$0xf0]  ;;  %v10118_v11 = vld [vmem:[%s14301_s6 + $0xae0] sm:$0xf0] }
 0x3a0   : > { %v11396_v29 = vld [vmem:[%s14301_s6 + $0x14a0] sm:$0xf]  ;;  %v10885_v23 = vor.u32 %v13388_v12, %v10884_v21  ;;  %7533 = vmatpush.bf16.msrb.mxu3 %v12485_v6  ;;  %v13316_v32 = vld [vmem:[%s14301_s6 + $0xea4] sm:$0xf]  ;;  %v9097_v12 = vor.u32 %v12932_v54, %v9094_v34  ;;  %v10121_v6 = vor.u32 %v13188_v5, %v10118_v11 }
 0x3a1   : > { %v13516_v45 = vld [vmem:[%s14301_s6 + $0x14dc] sm:$0xf0]  ;;  %v10630_v21 = vld [vmem:[%s14301_s6 + $0xee0] sm:$0xf0] }
 0x3a2   : > { %v11908_v49 = vld [vmem:[%s14301_s6 + $0x18a0] sm:$0xf]  ;;  %v11397_v19 = vor.u32 %v13516_v45, %v11396_v29  ;;  %7492 = vmatpush.bf16.msrb.mxu0 %v10885_v23  ;;  %v9609_v29 = vor.u32 %v13060_v4, %v9606_v51  ;;  %v12916_v45 = vld [vmem:[%s14301_s6 + $0x224] sm:$0xf] }
 0x3a3   : > { %v13644_v2 = vld [vmem:[%s14301_s6 + $0x18dc] sm:$0xf0]  ;;  %v13172_v23 = vld [vmem:[%s14301_s6 + $0xa24] sm:$0xf] }
 0x3a4   : > { %v12420_v16 = vld [vmem:[%s14301_s6 + $0x1ca0] sm:$0xf]  ;;  %v11909_v14 = vor.u32 %v13644_v2, %v11908_v49  ;;  %7506 = vmatpush.bf16.msrb.mxu1 %v11397_v19  ;;  %v9030_v49 = vld [vmem:[%s14301_s6 + $0x260] sm:$0xf0] }
 0x3a5   : > { %v13772_v63 = vld [vmem:[%s14301_s6 + $0x1cdc] sm:$0xf0]  ;;  %v13044_v2 = vld [vmem:[%s14301_s6 + $0x624] sm:$0xf] }
 0x3a6   : > { %v10820_v7 = vld [vmem:[%s14301_s6 + $0x1020] sm:$0xf]  ;;  %v12421_v26 = vor.u32 %v13772_v63, %v12420_v16  ;;  %7520 = vmatpush.bf16.msrb.mxu2 %v11909_v14  ;;  %v10633_v16 = vor.u32 %v13316_v32, %v10630_v21  ;;  %v9542_v63 = vld [vmem:[%s14301_s6 + $0x660] sm:$0xf0]  ;;  %v9033_v14 = vor.u32 %v12916_v45, %v9030_v49 }
 0x3a7   : > { %v13372_v46 = vld [vmem:[%s14301_s6 + $0x105c] sm:$0xf0]  ;;  %v10566_v19 = vld [vmem:[%s14301_s6 + $0xe60] sm:$0xf0] }
 0x3a8   : > { %v11332_v33 = vld [vmem:[%s14301_s6 + $0x1420] sm:$0xf]  ;;  %v10821_v50 = vor.u32 %v13372_v46, %v10820_v7  ;;  %7534 = vmatpush.bf16.msrb.mxu3 %v12421_v26  ;;  %v10054_v7 = vld [vmem:[%s14301_s6 + $0xa60] sm:$0xf0] }
 0x3a9   : > { %v13500_v24 = vld [vmem:[%s14301_s6 + $0x145c] sm:$0xf0]  ;;  %v13300_v46 = vld [vmem:[%s14301_s6 + $0xe24] sm:$0xf] }
 0x3aa   : > { %v11844_v15 = vld [vmem:[%s14301_s6 + $0x1820] sm:$0xf]  ;;  %v11333_v40 = vor.u32 %v13500_v24, %v11332_v33  ;;  %7493 = vmatpush.bf16.msrb.mxu0 %v10821_v50  ;;  %v15778_v33 = vpop.f32.mrf.mxu0  ;;  %v9545_v24 = vor.u32 %v13044_v2, %v9542_v63  ;;  %v12900_v26 = vld [vmem:[%s14301_s6 + $0x1a4] sm:$0xf]  ;;  %v10569_v35 = vor.u32 %v13300_v46, %v10566_v19 }
 0x3ab   : > { %v13628_v13 = vld [vmem:[%s14301_s6 + $0x185c] sm:$0xf0]  ;;  %v13156_v20 = vld [vmem:[%s14301_s6 + $0x9a4] sm:$0xf] }
 0x3ac   : > { %v12356_v36 = vld [vmem:[%s14301_s6 + $0x1c20] sm:$0xf]  ;;  %v11845_v38 = vor.u32 %v13628_v13, %v11844_v15  ;;  %7507 = vmatpush.bf16.msrb.mxu1 %v11333_v40  ;;  %v10057_v15 = vor.u32 %v13172_v23, %v10054_v7  ;;  %v8966_v13 = vld [vmem:[%s14301_s6 + $0x1e0] sm:$0xf0] }
 0x3ad   : > { %v13756_v61 = vld [vmem:[%s14301_s6 + $0x1c5c] sm:$0xf0]  ;;  %7494 = vmatmul.bf16.vlgmr.msrb.gmra.mxu0 %v14458_v39  ;;  %v9990_v50 = vld [vmem:[%s14301_s6 + $0x9e0] sm:$0xf0]  ;;  %v8969_v48 = vor.u32 %v12900_v26, %v8966_v13 }
 0x3ae   : > { %v12357_v30 = vor.u32 %v13756_v61, %v12356_v36  ;;  %7521 = vmatpush.bf16.msrb.mxu2 %v11845_v38  ;;  %7542 = vmatpush.bf16.msra.mxu0 %v9225_v59  ;;  %v13028_v36 = vld [vmem:[%s14301_s6 + $0x5a4] sm:$0xf]  ;;  %v15783_v61 = vpop.f32.mrf.mxu1  ;;  %v9993_v38 = vor.u32 %v13156_v20, %v9990_v50 }
 0x3af   : > { %7508 = vmatmul.bf16.vlgmr.msrb.gmra.mxu1 %v14465_v44  ;;  %v13284_v42 = vld [vmem:[%s14301_s6 + $0xda4] sm:$0xf]  ;;  %v9481_v40 = vor.u32 %v13028_v36, %v9478_v27 }
 0x3b0   : > { %7535 = vmatpush.bf16.msrb.mxu3 %v12357_v30  ;;  %7556 = vmatpush.bf16.msra.mxu1 %v9737_v41  ;;  %v10502_v37 = vld [vmem:[%s14301_s6 + $0xde0] sm:$0xf0] }
 0x3b1   : > { %7522 = vmatmul.bf16.vlgmr.msrb.gmra.mxu2 %v14463_v43  ;;  %v12884_v28 = vld [vmem:[%s14301_s6 + $0x124] sm:$0xf]  ;;  %v10505_v59 = vor.u32 %v13284_v42, %v10502_v37 }
 0x3b2   : > { %7570 = vmatpush.bf16.msra.mxu2 %v10249_v0  ;;  %7543 = vmatpush.bf16.msra.mxu0 %v9161_v8  ;;  %v8902_v18 = vld [vmem:[%s14301_s6 + $0x160] sm:$0xf0] }
 0x3b3   : > { %7536 = vmatmul.bf16.vlgmr.msrb.gmra.mxu3 %v14469_v47  ;;  %v13012_v30 = vld [vmem:[%s14301_s6 + $0x524] sm:$0xf]  ;;  %v8905_v56 = vor.u32 %v12884_v28, %v8902_v18 }
 0x3b4   : > { %7584 = vmatpush.bf16.msra.mxu3 %v10761_v57  ;;  %7557 = vmatpush.bf16.msra.mxu1 %v9673_v52  ;;  %v9414_v41 = vld [vmem:[%s14301_s6 + $0x560] sm:$0xf0]  ;;  %v15798_v57 = vpop.f32.mrf.mxu2 }
 0x3b5   : > { %v13140_v0 = vld [vmem:[%s14301_s6 + $0x924] sm:$0xf]  ;;  %v9417_v9 = vor.u32 %v13012_v30, %v9414_v41 }
 0x3b6   : > { %7571 = vmatpush.bf16.msra.mxu2 %v10185_v25  ;;  %7544 = vmatpush.bf16.msra.mxu0 %v9097_v12  ;;  %v9926_v22 = vld [vmem:[%s14301_s6 + $0x960] sm:$0xf0]  ;;  %v15812_v11 = vpop.f32.mrf.mxu1 }
 0x3b7   : > { %v13268_v31 = vld [vmem:[%s14301_s6 + $0xd24] sm:$0xf]  ;;  %v9929_v53 = vor.u32 %v13140_v0, %v9926_v22 }
 0x3b8   : > { %7585 = vmatpush.bf16.msra.mxu3 %v10697_v60  ;;  %7558 = vmatpush.bf16.msra.mxu1 %v9609_v29  ;;  %v10438_v55 = vld [vmem:[%s14301_s6 + $0xd60] sm:$0xf0]  ;;  %v15808_v60 = vpop.f32.mrf.mxu0 }
 0x3b9   : > { %v12868_v62 = vld [vmem:[%s14301_s6 + $0xa4] sm:$0xf]  ;;  %v10441_v25 = vor.u32 %v13268_v31, %v10438_v55 }
 0x3ba   : > { %7572 = vmatpush.bf16.msra.mxu2 %v10121_v6  ;;  %7545 = vmatpush.bf16.msra.mxu0 %v9033_v14  ;;  %v8838_v8 = vld [vmem:[%s14301_s6 + $0xe0] sm:$0xf0] }
 0x3bb   : > { %v12996_v52 = vld [vmem:[%s14301_s6 + $0x4a4] sm:$0xf]  ;;  %v8841_v32 = vor.u32 %v12868_v62, %v8838_v8 }
 0x3bc   : > { %7586 = vmatpush.bf16.msra.mxu3 %v10633_v16  ;;  %7559 = vmatpush.bf16.msra.mxu1 %v9545_v24  ;;  %v9350_v54 = vld [vmem:[%s14301_s6 + $0x4e0] sm:$0xf0]  ;;  %v15830_v50 = vpop.f32.mrf.mxu2 }
 0x3bd   : > { %v13124_v34 = vld [vmem:[%s14301_s6 + $0x8a4] sm:$0xf]  ;;  %v9353_v29 = vor.u32 %v12996_v52, %v9350_v54 }
 0x3be   : > { %7573 = vmatpush.bf16.msra.mxu2 %v10057_v15  ;;  %7546 = vmatpush.bf16.msra.mxu0 %v8969_v48  ;;  %v9862_v4 = vld [vmem:[%s14301_s6 + $0x8e0] sm:$0xf0]  ;;  %v15832_v48 = vpop.f32.mrf.mxu3 }
 0x3bf   : > { %v13252_v51 = vld [vmem:[%s14301_s6 + $0xca4] sm:$0xf]  ;;  %v9865_v6 = vor.u32 %v13124_v34, %v9862_v4 }
 0x3c0   : > { %7587 = vmatpush.bf16.msra.mxu3 %v10569_v35  ;;  %7560 = vmatpush.bf16.msra.mxu1 %v9481_v40  ;;  %v10374_v5 = vld [vmem:[%s14301_s6 + $0xce0] sm:$0xf0]  ;;  %v15840_v31 = vpop.f32.mrf.mxu0 }
 0x3c1   : > { %v12852_v21 = vld [vmem:[%s14301_s6 + $0x24] sm:$0xf]  ;;  %v10377_v16 = vor.u32 %v13252_v51, %v10374_v5 }
 0x3c2   : > { %7574 = vmatpush.bf16.msra.mxu2 %v9993_v38  ;;  %7547 = vmatpush.bf16.msra.mxu0 %v8905_v56  ;;  %v8774_v12 = vld [vmem:[%s14301_s6 + $0x60] sm:$0xf0] }
 0x3c3   : > { %v12980_v45 = vld [vmem:[%s14301_s6 + $0x424] sm:$0xf]  ;;  %v8777_v24 = vor.u32 %v12852_v21, %v8774_v12 }
 0x3c4   : > { %7588 = vmatpush.bf16.msra.mxu3 %v10505_v59  ;;  %7561 = vmatpush.bf16.msra.mxu1 %v9417_v9  ;;  %v9286_v49 = vld [vmem:[%s14301_s6 + $0x460] sm:$0xf0]  ;;  %v15844_v9 = vpop.f32.mrf.mxu1 }
 0x3c5   : > { %v13108_v2 = vld [vmem:[%s14301_s6 + $0x824] sm:$0xf]  ;;  %v9289_v36 = vor.u32 %v12980_v45, %v9286_v49 }
 0x3c6   : > { %7575 = vmatpush.bf16.msra.mxu2 %v9929_v53  ;;  %v9798_v63 = vld [vmem:[%s14301_s6 + $0x860] sm:$0xf0]  ;;  %7548 = vmatpush.bf16.msra.mxu0 %v8841_v32 }
 0x3c7   : > { %v13236_v23 = vld [vmem:[%s14301_s6 + $0xc24] sm:$0xf]  ;;  %v9801_v35 = vor.u32 %v13108_v2, %v9798_v63 }
 0x3c8   : > { %7589 = vmatpush.bf16.msra.mxu3 %v10441_v25  ;;  %v10310_v7 = vld [vmem:[%s14301_s6 + $0xc60] sm:$0xf0]  ;;  %7562 = vmatpush.bf16.msra.mxu1 %v9353_v29 }
 0x3c9   : > { %v13476_v46 = vld [vmem:[%s14301_s6 + $0x13a4] sm:$0xf]  ;;  %v10313_v42 = vor.u32 %v13236_v23, %v10310_v7 }
 0x3ca   : > { %v11270_v19 = vld [vmem:[%s14301_s6 + $0x13e0] sm:$0xf0]  ;;  %7576 = vmatpush.bf16.msra.mxu2 %v9865_v6  ;;  %7549 = vmatpush.bf16.msra.mxu0 %v8777_v24 }
 0x3cb   : > { %v13604_v14 = vld [vmem:[%s14301_s6 + $0x17a4] sm:$0xf]  ;;  %v11273_v37 = vor.u32 %v13476_v46, %v11270_v19  ;;  %v15866_v19 = vpop.f32.mrf.mxu3 }
 0x3cc   : > { %v11782_v15 = vld [vmem:[%s14301_s6 + $0x17e0] sm:$0xf0]  ;;  %7590 = vmatpush.bf16.msra.mxu3 %v10377_v16  ;;  %7563 = vmatpush.bf16.msra.mxu1 %v9289_v36  ;;  %v15861_v16 = vpop.f32.mrf.mxu2 }
 0x3cd   : > { %v13732_v26 = vld [vmem:[%s14301_s6 + $0x1ba4] sm:$0xf]  ;;  %v11785_v40 = vor.u32 %v13604_v14, %v11782_v15  ;;  %7550 = vmatmul.bf16.vlgmr.msra.gmra.mxu0 %v14389_v58 }
 0x3ce   : > { %v12294_v13 = vld [vmem:[%s14301_s6 + $0x1be0] sm:$0xf0]  ;;  %7577 = vmatpush.bf16.msra.mxu2 %v9801_v35  ;;  %7598 = vmatpush.bf16.msrb.mxu0 %v11273_v37 }
 0x3cf   : > { %v13860_v27 = vld [vmem:[%s14301_s6 + $0x1fa4] sm:$0xf]  ;;  %v12297_v38 = vor.u32 %v13732_v26, %v12294_v13  ;;  %7564 = vmatmul.bf16.vlgmr.msra.gmra.mxu1 %v14401_v10  ;;  %v15870_v26 = vpop.f32.mrf.mxu0 }
 0x3d0   : > { %v12806_v20 = vld [vmem:[%s14301_s6 + $0x1fe0] sm:$0xf0]  ;;  %7591 = vmatpush.bf16.msra.mxu3 %v10313_v42  ;;  %7612 = vmatpush.bf16.msrb.mxu1 %v11785_v40  ;;  %v15875_v42 = vpop.f32.mrf.mxu1 }
 0x3d1   : > { %v13460_v28 = vld [vmem:[%s14301_s6 + $0x1324] sm:$0xf]  ;;  %v12809_v59 = vor.u32 %v13860_v27, %v12806_v20  ;;  %7578 = vmatmul.bf16.vlgmr.msra.gmra.mxu2 %v14394_v1 }
 0x3d2   : > { %v11206_v18 = vld [vmem:[%s14301_s6 + $0x1360] sm:$0xf0]  ;;  %7626 = vmatpush.bf16.msrb.mxu2 %v12297_v38 }
 0x3d3   : > { %v13588_v30 = vld [vmem:[%s14301_s6 + $0x1724] sm:$0xf]  ;;  %v11209_v53 = vor.u32 %v13460_v28, %v11206_v18  ;;  %7592 = vmatmul.bf16.vlgmr.msra.gmra.mxu3 %v14406_v17 }
 0x3d4   : > { %v11718_v41 = vld [vmem:[%s14301_s6 + $0x1760] sm:$0xf0]  ;;  %7640 = vmatpush.bf16.msrb.mxu3 %v12809_v59 }
 0x3d5   : > { %v13716_v0 = vld [vmem:[%s14301_s6 + $0x1b24] sm:$0xf]  ;;  %v11721_v62 = vor.u32 %v13588_v30, %v11718_v41  ;;  %7599 = vmatpush.bf16.msrb.mxu0 %v11209_v53 }
 0x3d6   : > { %v12230_v22 = vld [vmem:[%s14301_s6 + $0x1b60] sm:$0xf0] }
 0x3d7   : > { %v13844_v55 = vld [vmem:[%s14301_s6 + $0x1f24] sm:$0xf]  ;;  %v12233_v8 = vor.u32 %v13716_v0, %v12230_v22  ;;  %7613 = vmatpush.bf16.msrb.mxu1 %v11721_v62 }
 0x3d8   : > { %v12742_v56 = vld [vmem:[%s14301_s6 + $0x1f60] sm:$0xf0] }
 0x3d9   : > { %v13444_v52 = vld [vmem:[%s14301_s6 + $0x12a4] sm:$0xf]  ;;  %v12745_v34 = vor.u32 %v13844_v55, %v12742_v56  ;;  %7627 = vmatpush.bf16.msrb.mxu2 %v12233_v8 }
 0x3da   : > { %v11142_v25 = vld [vmem:[%s14301_s6 + $0x12e0] sm:$0xf0] }
 0x3db   : > { %v13572_v54 = vld [vmem:[%s14301_s6 + $0x16a4] sm:$0xf]  ;;  %v11145_v12 = vor.u32 %v13444_v52, %v11142_v25  ;;  %7641 = vmatpush.bf16.msrb.mxu3 %v12745_v34  ;;  %v15890_v34 = vpop.f32.mrf.mxu2 }
 0x3dc   : > { %v11654_v4 = vld [vmem:[%s14301_s6 + $0x16e0] sm:$0xf0] }
 0x3dd   : > { %v13700_v51 = vld [vmem:[%s14301_s6 + $0x1aa4] sm:$0xf]  ;;  %v11657_v29 = vor.u32 %v13572_v54, %v11654_v4  ;;  %7600 = vmatpush.bf16.msrb.mxu0 %v11145_v12  ;;  %v7327_v12 = vpop.f32.mrf.mxu0 }
 0x3de   : > { %v12166_v5 = vld [vmem:[%s14301_s6 + $0x1ae0] sm:$0xf0] }
 0x3df   : > { %v13828_v32 = vld [vmem:[%s14301_s6 + $0x1ea4] sm:$0xf]  ;;  %v12169_v6 = vor.u32 %v13700_v51, %v12166_v5  ;;  %7614 = vmatpush.bf16.msrb.mxu1 %v11657_v29  ;;  %v7230_v51 = vadd.f32 %v15783_v61, %v15778_v33  ;;  %v15894_v5 = vpop.f32.mrf.mxu3 }
 0x3e0   : > { %v12678_v21 = vld [vmem:[%s14301_s6 + $0x1ee0] sm:$0xf0] }
 0x3e1   : > { %v13428_v45 = vld [vmem:[%s14301_s6 + $0x1224] sm:$0xf]  ;;  %v12681_v63 = vor.u32 %v13828_v32, %v12678_v21  ;;  %7628 = vmatpush.bf16.msrb.mxu2 %v12169_v6 }
 0x3e2   : > { %v11078_v49 = vld [vmem:[%s14301_s6 + $0x1260] sm:$0xf0] }
 0x3e3   : > { %v13556_v2 = vld [vmem:[%s14301_s6 + $0x1624] sm:$0xf]  ;;  %v11081_v15 = vor.u32 %v13428_v45, %v11078_v49  ;;  %7642 = vmatpush.bf16.msrb.mxu3 %v12681_v63  ;;  %v7341_v63 = vpop.f32.mrf.mxu1 }
 0x3e4   : > { %v11590_v23 = vld [vmem:[%s14301_s6 + $0x1660] sm:$0xf0] }
 0x3e5   : > { %v13684_v7 = vld [vmem:[%s14301_s6 + $0x1a24] sm:$0xf]  ;;  %v11593_v13 = vor.u32 %v13556_v2, %v11590_v23  ;;  %7601 = vmatpush.bf16.msrb.mxu0 %v11081_v15  ;;  %v7244_v15 = vadd.f32 %v15798_v57, %v7230_v51  ;;  %v9740_v57 = vld [vmem:[%s14301_s6 + $0x7a8] sm:$0xf] }
 0x3e6   : > { %v12102_v46 = vld [vmem:[%s14301_s6 + $0x1a60] sm:$0xf0] }
 0x3e7   : > { %v13812_v14 = vld [vmem:[%s14301_s6 + $0x1e24] sm:$0xf]  ;;  %v12105_v36 = vor.u32 %v13684_v7, %v12102_v46  ;;  %7615 = vmatpush.bf16.msrb.mxu1 %v11593_v13 }
 0x3e8   : > { %v12614_v24 = vld [vmem:[%s14301_s6 + $0x1e60] sm:$0xf0] }
 0x3e9   : > { %v13412_v35 = vld [vmem:[%s14301_s6 + $0x11a4] sm:$0xf]  ;;  %v12617_v37 = vor.u32 %v13812_v14, %v12614_v24  ;;  %7629 = vmatpush.bf16.msrb.mxu2 %v12105_v36 }
 0x3ea   : > { %v11014_v27 = vld [vmem:[%s14301_s6 + $0x11e0] sm:$0xf0] }
 0x3eb   : > { %v13540_v20 = vld [vmem:[%s14301_s6 + $0x15a4] sm:$0xf]  ;;  %v11017_v59 = vor.u32 %v13412_v35, %v11014_v27  ;;  %7643 = vmatpush.bf16.msrb.mxu3 %v12617_v37 }
 0x3ec   : > { %v11526_v40 = vld [vmem:[%s14301_s6 + $0x15e0] sm:$0xf0] }
 0x3ed   : > { %v13668_v38 = vld [vmem:[%s14301_s6 + $0x19a4] sm:$0xf]  ;;  %v11529_v41 = vor.u32 %v13540_v20, %v11526_v40  ;;  %7602 = vmatpush.bf16.msrb.mxu0 %v11017_v59 }
 0x3ee   : > { %v12038_v28 = vld [vmem:[%s14301_s6 + $0x19e0] sm:$0xf0] }
 0x3ef   : > { %v13796_v18 = vld [vmem:[%s14301_s6 + $0x1da4] sm:$0xf]  ;;  %v12041_v0 = vor.u32 %v13668_v38, %v12038_v28  ;;  %7616 = vmatpush.bf16.msrb.mxu1 %v11529_v41  ;;  %v13101_v41 = vld [vmem:[%s14301_s6 + $0x7e4] sm:$0xf0] }
 0x3f0   : > { %v12550_v30 = vld [vmem:[%s14301_s6 + $0x1de0] sm:$0xf0] }
 0x3f1   : > { %v13396_v22 = vld [vmem:[%s14301_s6 + $0x1124] sm:$0xf]  ;;  %v12553_v53 = vor.u32 %v13796_v18, %v12550_v30  ;;  %7630 = vmatpush.bf16.msrb.mxu2 %v12041_v0  ;;  %v9228_v18 = vld [vmem:[%s14301_s6 + $0x3a8] sm:$0xf] }
 0x3f2   : > { %v10950_v55 = vld [vmem:[%s14301_s6 + $0x1160] sm:$0xf0]  ;;  %v12973_v30 = vld [vmem:[%s14301_s6 + $0x3e4] sm:$0xf0] }
 0x3f3   : > { %v13524_v56 = vld [vmem:[%s14301_s6 + $0x1524] sm:$0xf]  ;;  %v10953_v4 = vor.u32 %v13396_v22, %v10950_v55  ;;  %7644 = vmatpush.bf16.msrb.mxu3 %v12553_v53  ;;  %v10252_v0 = vld [vmem:[%s14301_s6 + $0xba8] sm:$0xf]  ;;  %v7355_v55 = vpop.f32.mrf.mxu2  ;;  %v9229_v51 = vor.u32 %v12973_v30, %v9228_v18 }
 0x3f4   : > { %v11462_v62 = vld [vmem:[%s14301_s6 + $0x1560] sm:$0xf0]  ;;  %v13229_v22 = vld [vmem:[%s14301_s6 + $0xbe4] sm:$0xf0] }
 0x3f5   : > { %v13652_v8 = vld [vmem:[%s14301_s6 + $0x1924] sm:$0xf]  ;;  %v11465_v32 = vor.u32 %v13524_v56, %v11462_v62  ;;  %7603 = vmatpush.bf16.msrb.mxu0 %v10953_v4  ;;  %v7258_v56 = vadd.f32 %v15800_v3, %v7244_v15  ;;  %v10253_v3 = vor.u32 %v13229_v22, %v10252_v0  ;;  %v9036_v0 = vld [vmem:[%s14301_s6 + $0x228] sm:$0xf] }
 0x3f6   : > { %v11974_v52 = vld [vmem:[%s14301_s6 + $0x1960] sm:$0xf0]  ;;  %v12925_v22 = vld [vmem:[%s14301_s6 + $0x264] sm:$0xf0] }
 0x3f7   : > { %v13780_v25 = vld [vmem:[%s14301_s6 + $0x1d24] sm:$0xf]  ;;  %v11977_v21 = vor.u32 %v13652_v8, %v11974_v52  ;;  %7617 = vmatpush.bf16.msrb.mxu1 %v11465_v32  ;;  %v10764_v8 = vld [vmem:[%s14301_s6 + $0xfa8] sm:$0xf]  ;;  %v9741_v32 = vor.u32 %v13101_v41, %v9740_v57 }
 0x3f8   : > { %v12486_v54 = vld [vmem:[%s14301_s6 + $0x1d60] sm:$0xf0]  ;;  %v13357_v52 = vld [vmem:[%s14301_s6 + $0xfe4] sm:$0xf0] }
 0x3f9   : > { %v13380_v29 = vld [vmem:[%s14301_s6 + $0x10a4] sm:$0xf]  ;;  %v12489_v49 = vor.u32 %v13780_v25, %v12486_v54  ;;  %7631 = vmatpush.bf16.msrb.mxu2 %v11977_v21  ;;  %v7369_v25 = vpop.f32.mrf.mxu3  ;;  %v7342_v54 = vadd.f32 %v7341_v63, %v7327_v12  ;;  %v7329_v21 = vpop.f32.mrf.mxu0  ;;  %v7272_v12 = vadd.f32 %v15840_v31, %v7258_v56  ;;  %v10700_v63 = vld [vmem:[%s14301_s6 + $0xf28] sm:$0xf] }
 0x3fa   : > { %v10886_v6 = vld [vmem:[%s14301_s6 + $0x10e0] sm:$0xf0]  ;;  %v13053_v56 = vld [vmem:[%s14301_s6 + $0x664] sm:$0xf0] }
 0x3fb   : > { %v13508_v45 = vld [vmem:[%s14301_s6 + $0x14a4] sm:$0xf]  ;;  %v10889_v46 = vor.u32 %v13380_v29, %v10886_v6  ;;  %7645 = vmatpush.bf16.msrb.mxu3 %v12489_v49  ;;  %v9164_v29 = vld [vmem:[%s14301_s6 + $0x328] sm:$0xf]  ;;  %v10765_v49 = vor.u32 %v13357_v52, %v10764_v8 }
 0x3fc   : > { %v11398_v2 = vld [vmem:[%s14301_s6 + $0x14e0] sm:$0xf0]  ;;  %v12957_v6 = vld [vmem:[%s14301_s6 + $0x364] sm:$0xf0] }
 0x3fd   : > { %v13636_v33 = vld [vmem:[%s14301_s6 + $0x18a4] sm:$0xf]  ;;  %v11401_v13 = vor.u32 %v13508_v45, %v11398_v2  ;;  %7604 = vmatpush.bf16.msrb.mxu0 %v10889_v46  ;;  %v9676_v45 = vld [vmem:[%s14301_s6 + $0x728] sm:$0xf]  ;;  %v7232_v46 = vadd.f32 %v15812_v11, %v15808_v60 }
 0x3fe   : > { %v11910_v61 = vld [vmem:[%s14301_s6 + $0x18e0] sm:$0xf0]  ;;  %v13085_v2 = vld [vmem:[%s14301_s6 + $0x764] sm:$0xf0] }
 0x3ff   : > { %v13764_v23 = vld [vmem:[%s14301_s6 + $0x1ca4] sm:$0xf]  ;;  %v11913_v36 = vor.u32 %v13636_v33, %v11910_v61  ;;  %7618 = vmatpush.bf16.msrb.mxu1 %v11401_v13  ;;  %v10188_v33 = vld [vmem:[%s14301_s6 + $0xb28] sm:$0xf]  ;;  %v9677_v31 = vor.u32 %v13085_v2, %v9676_v45 }
 0x400   : > { %v12422_v7 = vld [vmem:[%s14301_s6 + $0x1ce0] sm:$0xf0]  ;;  %v13213_v61 = vld [vmem:[%s14301_s6 + $0xb64] sm:$0xf0] }
 0x401   : > { %v13364_v14 = vld [vmem:[%s14301_s6 + $0x1024] sm:$0xf]  ;;  %v12425_v37 = vor.u32 %v13764_v23, %v12422_v7  ;;  %7632 = vmatpush.bf16.msrb.mxu2 %v11913_v36  ;;  %v7343_v23 = vpop.f32.mrf.mxu1  ;;  %v13341_v7 = vld [vmem:[%s14301_s6 + $0xf64] sm:$0xf0]  ;;  %v10189_v15 = vor.u32 %v13213_v61, %v10188_v33  ;;  %v7371_v41 = vpop.f32.mrf.mxu3 }
 0x402   : > { %v10822_v24 = vld [vmem:[%s14301_s6 + $0x1060] sm:$0xf0]  ;;  %v9100_v13 = vld [vmem:[%s14301_s6 + $0x2a8] sm:$0xf]  ;;  %v7344_v52 = vadd.f32 %v7343_v23, %v7329_v21 }
 0x403   : > { %v13492_v35 = vld [vmem:[%s14301_s6 + $0x1424] sm:$0xf]  ;;  %v10825_v59 = vor.u32 %v13364_v14, %v10822_v24  ;;  %7646 = vmatpush.bf16.msrb.mxu3 %v12425_v37  ;;  %v7356_v14 = vadd.f32 %v7355_v55, %v7342_v54  ;;  %v9165_v24 = vor.u32 %v12957_v6, %v9164_v29  ;;  %v12941_v36 = vld [vmem:[%s14301_s6 + $0x2e4] sm:$0xf0]  ;;  %v7286_v37 = vadd.f32 %v15844_v9, %v7272_v12  ;;  %v7357_v9 = vpop.f32.mrf.mxu2 }
 0x404   : > { %v11334_v27 = vld [vmem:[%s14301_s6 + $0x1460] sm:$0xf0]  ;;  %v13069_v60 = vld [vmem:[%s14301_s6 + $0x6e4] sm:$0xf0]  ;;  %v9101_v30 = vor.u32 %v12941_v36, %v9100_v13 }
 0x405   : > { %v13620_v20 = vld [vmem:[%s14301_s6 + $0x1824] sm:$0xf]  ;;  %v11337_v53 = vor.u32 %v13492_v35, %v11334_v27  ;;  %7605 = vmatpush.bf16.msrb.mxu0 %v10825_v59  ;;  %v9612_v35 = vld [vmem:[%s14301_s6 + $0x6a8] sm:$0xf]  ;;  %v10701_v27 = vor.u32 %v13341_v7, %v10700_v63  ;;  %v7370_v18 = vadd.f32 %v7369_v25, %v7356_v14  ;;  %v7300_v8 = vadd.f32 %v15861_v16, %v7286_v37  ;;  %v7383_v25 = vpop.f32.mrf.mxu0 }
 0x406   : > { %v11846_v40 = vld [vmem:[%s14301_s6 + $0x1860] sm:$0xf0]  ;;  %v10124_v11 = vld [vmem:[%s14301_s6 + $0xaa8] sm:$0xf]  ;;  %v9613_v57 = vor.u32 %v13069_v60, %v9612_v35 }
 0x407   : > { %v13748_v38 = vld [vmem:[%s14301_s6 + $0x1c24] sm:$0xf]  ;;  %v11849_v62 = vor.u32 %v13620_v20, %v11846_v40  ;;  %7619 = vmatpush.bf16.msrb.mxu1 %v11337_v53  ;;  %v13197_v20 = vld [vmem:[%s14301_s6 + $0xae4] sm:$0xf0]  ;;  %v7314_v12 = vadd.f32 %v15866_v19, %v7300_v8 }
 0x408   : > { %v12358_v28 = vld [vmem:[%s14301_s6 + $0x1c60] sm:$0xf0]  ;;  %7606 = vmatmul.bf16.vlgmr.msrb.gmra.mxu0 %v14458_v39  ;;  %v10636_v40 = vld [vmem:[%s14301_s6 + $0xea8] sm:$0xf]  ;;  %v10125_v59 = vor.u32 %v13197_v20, %v10124_v11 }
 0x409   : > { %v12361_v4 = vor.u32 %v13748_v38, %v12358_v28  ;;  %7633 = vmatpush.bf16.msrb.mxu2 %v11849_v62  ;;  %7654 = vmatpush.bf16.msra.mxu0 %v9229_v51  ;;  %v13325_v38 = vld [vmem:[%s14301_s6 + $0xee4] sm:$0xf0]  ;;  %v7246_v28 = vadd.f32 %v15830_v50, %v7232_v46  ;;  %v7397_v29 = vpop.f32.mrf.mxu1  ;;  %v15966_v63 = vld [vmem:[%s14945_s7] sm:$0xff]  ;;  %v7358_v46 = vadd.f32 %v7357_v9, %v7344_v52  ;;  %v7425_v9 = vpop.f32.mrf.mxu3 }
 0x40a   : > { %7620 = vmatmul.bf16.vlgmr.msrb.gmra.mxu1 %v14465_v44  ;;  %v9548_v55 = vld [vmem:[%s14301_s6 + $0x628] sm:$0xf]  ;;  %v10637_v50 = vor.u32 %v13325_v38, %v10636_v40  ;;  %v8435_v7 = vperm.slane %v15966_v63, 6 }
 0x40b   : > { %7647 = vmatpush.bf16.msrb.mxu3 %v12361_v4  ;;  %7668 = vmatpush.bf16.msra.mxu1 %v9741_v32  ;;  %v10060_v53 = vld [vmem:[%s14301_s6 + $0xa28] sm:$0xf]  ;;  %v7260_v51 = vadd.f32 %v15832_v48, %v7246_v28  ;;  %v7384_v32 = vadd.f32 %v7383_v25, %v7370_v18  ;;  %v9549_v6 = vor.u32 %v13053_v56, %v9548_v55  ;;  %v7411_v20 = vpop.f32.mrf.mxu2 }
 0x40c   : > { %7634 = vmatmul.bf16.vlgmr.msrb.gmra.mxu2 %v14463_v43  ;;  %v13181_v62 = vld [vmem:[%s14301_s6 + $0xa64] sm:$0xf0]  ;;  %v8467_v38 = vadd.f32 %v8435_v7, %v7314_v12  ;;  %v7372_v28 = vadd.f32 %v7371_v41, %v7358_v46 }
 0x40d   : > { %7682 = vmatpush.bf16.msra.mxu2 %v10253_v3  ;;  %7655 = vmatpush.bf16.msra.mxu0 %v9165_v24  ;;  %v10572_v54 = vld [vmem:[%s14301_s6 + $0xe28] sm:$0xf]  ;;  %v9037_v3 = vor.u32 %v12925_v22, %v9036_v0  ;;  %v10061_v16 = vor.u32 %v13181_v62, %v10060_v53  ;;  %v7274_v2 = vadd.f32 %v15870_v26, %v7260_v51 }
 0x40e   : > { %7648 = vmatmul.bf16.vlgmr.msrb.gmra.mxu3 %v14469_v47  ;;  %v13309_v4 = vld [vmem:[%s14301_s6 + $0xe64] sm:$0xf0]  ;;  %v7398_v14 = vadd.f32 %v7397_v29, %v7384_v32  ;;  %v8499_v51 = vmax.f32 %v8467_v38, 0.0 }
 0x40f   : > { %7696 = vmatpush.bf16.msra.mxu3 %v10765_v49  ;;  %7669 = vmatpush.bf16.msra.mxu1 %v9677_v31  ;;  %v8972_v21 = vld [vmem:[%s14301_s6 + $0x1a8] sm:$0xf]  ;;  %v10573_v48 = vor.u32 %v13309_v4, %v10572_v54  ;;  %v7288_v60 = vadd.f32 %v15875_v42, %v7274_v2 }
 0x410   : > { %v12909_v45 = vld [vmem:[%s14301_s6 + $0x1e4] sm:$0xf0]  ;;  %v7412_v18 = vadd.f32 %v7411_v20, %v7398_v14 }
 0x411   : > { %7683 = vmatpush.bf16.msra.mxu2 %v10189_v15  ;;  %7656 = vmatpush.bf16.msra.mxu0 %v9101_v30  ;;  %v9484_v49 = vld [vmem:[%s14301_s6 + $0x5a8] sm:$0xf]  ;;  %v8973_v26 = vor.u32 %v12909_v45, %v8972_v21  ;;  %v7385_v30 = vpop.f32.mrf.mxu0  ;;  %v7302_v42 = vadd.f32 %v15890_v34, %v7288_v60  ;;  %v7399_v52 = vpop.f32.mrf.mxu1 }
 0x412   : > { %v13037_v33 = vld [vmem:[%s14301_s6 + $0x5e4] sm:$0xf0]  ;;  %v7386_v41 = vadd.f32 %v7385_v30, %v7372_v28 }
 0x413   : > { %7697 = vmatpush.bf16.msra.mxu3 %v10701_v27  ;;  %7670 = vmatpush.bf16.msra.mxu1 %v9613_v57  ;;  %v9996_v61 = vld [vmem:[%s14301_s6 + $0x9a8] sm:$0xf]  ;;  %v9485_v13 = vor.u32 %v13037_v33, %v9484_v49  ;;  %v8436_v57 = vperm.slane %v15966_v63, 7  ;;  %v7413_v46 = vpop.f32.mrf.mxu2 }
 0x414   : > { %v13165_v23 = vld [vmem:[%s14301_s6 + $0x9e4] sm:$0xf0] }
 0x415   : > { %7684 = vmatpush.bf16.msra.mxu2 %v10125_v59  ;;  %v10508_v24 = vld [vmem:[%s14301_s6 + $0xda8] sm:$0xf]  ;;  %7657 = vmatpush.bf16.msra.mxu0 %v9037_v3  ;;  %v9997_v36 = vor.u32 %v13165_v23, %v9996_v61 }
 0x416   : > { %v13293_v31 = vld [vmem:[%s14301_s6 + $0xde4] sm:$0xf0] }
 0x417   : > { %7698 = vmatpush.bf16.msra.mxu3 %v10637_v50  ;;  %v8908_v15 = vld [vmem:[%s14301_s6 + $0x128] sm:$0xf]  ;;  %7671 = vmatpush.bf16.msra.mxu1 %v9549_v6  ;;  %v10509_v11 = vor.u32 %v13293_v31, %v10508_v24  ;;  %v7426_v50 = vadd.f32 %v7425_v9, %v7412_v18  ;;  %v7316_v6 = vadd.f32 %v15894_v5, %v7302_v42 }
 0x418   : > { %v12893_v19 = vld [vmem:[%s14301_s6 + $0x164] sm:$0xf0] }
 0x419   : > { %7685 = vmatpush.bf16.msra.mxu2 %v10061_v16  ;;  %v9420_v35 = vld [vmem:[%s14301_s6 + $0x528] sm:$0xf]  ;;  %7658 = vmatpush.bf16.msra.mxu0 %v8973_v26  ;;  %v8909_v22 = vor.u32 %v12893_v19, %v8908_v15  ;;  %v8468_v32 = vadd.f32 %v8436_v57, %v7426_v50 }
 0x41a   : > { %v13021_v27 = vld [vmem:[%s14301_s6 + $0x564] sm:$0xf0] }
 0x41b   : > { %7699 = vmatpush.bf16.msra.mxu3 %v10573_v48  ;;  %v9932_v37 = vld [vmem:[%s14301_s6 + $0x928] sm:$0xf]  ;;  %v9421_v55 = vor.u32 %v13021_v27, %v9420_v35  ;;  %7672 = vmatpush.bf16.msra.mxu1 %v9485_v13  ;;  %v8500_v2 = vmax.f32 %v8468_v32, 0.0  ;;  %v7400_v48 = vadd.f32 %v7399_v52, %v7386_v41  ;;  %v7427_v13 = vpop.f32.mrf.mxu3  ;;  %v8483_v27 = vadd.f32 %v8435_v7, %v7316_v6 }
 0x41c   : > { %v13149_v40 = vld [vmem:[%s14301_s6 + $0x964] sm:$0xf0] }
 0x41d   : > { %v10444_v59 = vld [vmem:[%s14301_s6 + $0xd28] sm:$0xf]  ;;  %7686 = vmatpush.bf16.msra.mxu2 %v9997_v36  ;;  %v9933_v56 = vor.u32 %v13149_v40, %v9932_v37  ;;  %7659 = vmatpush.bf16.msra.mxu0 %v8909_v22  ;;  %v8528_v26 = vpack.c.bf16 %v8500_v2, %v8499_v51  ;;  %v7414_v15 = vadd.f32 %v7413_v46, %v7400_v48 }
 0x41e   : > { %v13277_v0 = vld [vmem:[%s14301_s6 + $0xd64] sm:$0xf0] }
 0x41f   : > { %v8844_v53 = vld [vmem:[%s14301_s6 + $0xa8] sm:$0xf]  ;;  %7700 = vmatpush.bf16.msra.mxu3 %v10509_v11  ;;  %v10445_v34 = vor.u32 %v13277_v0, %v10444_v59  ;;  %7673 = vmatpush.bf16.msra.mxu1 %v9421_v55  ;;  %8544 = vst [vmem:[%s15004_s20 + $0x18] sm:$0xff] %v8528_v26  ;;  %v7428_v40 = vadd.f32 %v7427_v13, %v7414_v15 }
 0x420   : > { %v12877_v62 = vld [vmem:[%s14301_s6 + $0xe4] sm:$0xf0] }
 0x421   : > { %v9356_v8 = vld [vmem:[%s14301_s6 + $0x4a8] sm:$0xf]  ;;  %v8845_v16 = vor.u32 %v12877_v62, %v8844_v53  ;;  %7687 = vmatpush.bf16.msra.mxu2 %v9933_v56  ;;  %v8484_v59 = vadd.f32 %v8436_v57, %v7428_v40 }
 0x422   : > { %v13005_v25 = vld [vmem:[%s14301_s6 + $0x4e4] sm:$0xf0] }
 0x423   : > { %v9868_v54 = vld [vmem:[%s14301_s6 + $0x8a8] sm:$0xf]  ;;  %v9357_v33 = vor.u32 %v13005_v25, %v9356_v8  ;;  %7701 = vmatpush.bf16.msra.mxu3 %v10445_v34  ;;  %7660 = vmatpush.bf16.msra.mxu0 %v8845_v16  ;;  %v8515_v8 = vmax.f32 %v8483_v27, 0.0  ;;  %v8516_v34 = vmax.f32 %v8484_v59, 0.0 }
 0x424   : > { %v13133_v4 = vld [vmem:[%s14301_s6 + $0x8e4] sm:$0xf0] }
 0x425   : > { %v10380_v3 = vld [vmem:[%s14301_s6 + $0xca8] sm:$0xf]  ;;  %v9869_v61 = vor.u32 %v13133_v4, %v9868_v54  ;;  %7674 = vmatpush.bf16.msra.mxu1 %v9357_v33  ;;  %v8536_v25 = vpack.c.bf16 %v8516_v34, %v8515_v8 }
 0x426   : > { %v13261_v29 = vld [vmem:[%s14301_s6 + $0xce4] sm:$0xf0] }
 0x427   : > { %v8780_v21 = vld [vmem:[%s14301_s6 + $0x28] sm:$0xf]  ;;  %v10381_v5 = vor.u32 %v13261_v29, %v10380_v3  ;;  %7688 = vmatpush.bf16.msra.mxu2 %v9869_v61  ;;  %8552 = vst [vmem:[%s15004_s20 + $0x58] sm:$0xff] %v8536_v25 }
 0x428   : > { %v12861_v45 = vld [vmem:[%s14301_s6 + $0x64] sm:$0xf0] }
 0x429   : > { %v9292_v49 = vld [vmem:[%s14301_s6 + $0x428] sm:$0xf]  ;;  %v8781_v60 = vor.u32 %v12861_v45, %v8780_v21  ;;  %7702 = vmatpush.bf16.msra.mxu3 %v10381_v5 }
 0x42a   : > { %v12989_v23 = vld [vmem:[%s14301_s6 + $0x464] sm:$0xf0] }
 0x42b   : > { %v9804_v12 = vld [vmem:[%s14301_s6 + $0x828] sm:$0xf]  ;;  %v9293_v38 = vor.u32 %v12989_v23, %v9292_v49  ;;  %7661 = vmatpush.bf16.msra.mxu0 %v8781_v60 }
 0x42c   : > { %v13117_v14 = vld [vmem:[%s14301_s6 + $0x864] sm:$0xf0] }
 0x42d   : > { %v10316_v24 = vld [vmem:[%s14301_s6 + $0xc28] sm:$0xf]  ;;  %v9805_v28 = vor.u32 %v13117_v14, %v9804_v12  ;;  %7675 = vmatpush.bf16.msra.mxu1 %v9293_v38 }
 0x42e   : > { %v13245_v31 = vld [vmem:[%s14301_s6 + $0xc64] sm:$0xf0]  ;;  %7662 = vmatmul.bf16.vlgmr.msra.gmra.mxu0 %v14389_v58 }
 0x42f   : > { %v11276_v36 = vld [vmem:[%s14301_s6 + $0x13a8] sm:$0xf]  ;;  %v10317_v7 = vor.u32 %v13245_v31, %v10316_v24  ;;  %7689 = vmatpush.bf16.msra.mxu2 %v9805_v28 }
 0x430   : > { %v13485_v19 = vld [vmem:[%s14301_s6 + $0x13e4] sm:$0xf0]  ;;  %7676 = vmatmul.bf16.vlgmr.msra.gmra.mxu1 %v14401_v10 }
 0x431   : > { %v11788_v35 = vld [vmem:[%s14301_s6 + $0x17a8] sm:$0xf]  ;;  %v11277_v9 = vor.u32 %v13485_v19, %v11276_v36  ;;  %7703 = vmatpush.bf16.msra.mxu3 %v10317_v7 }
 0x432   : > { %v13613_v11 = vld [vmem:[%s14301_s6 + $0x17e4] sm:$0xf0]  ;;  %7690 = vmatmul.bf16.vlgmr.msra.gmra.mxu2 %v14394_v1 }
 0x433   : > { %v12300_v20 = vld [vmem:[%s14301_s6 + $0x1ba8] sm:$0xf]  ;;  %v11789_v0 = vor.u32 %v13613_v11, %v11788_v35  ;;  %7710 = vmatpush.bf16.msrb.mxu0 %v11277_v9 }
 0x434   : > { %v13741_v37 = vld [vmem:[%s14301_s6 + $0x1be4] sm:$0xf0]  ;;  %7704 = vmatmul.bf16.vlgmr.msra.gmra.mxu3 %v14406_v17 }
 0x435   : > { %v12812_v18 = vld [vmem:[%s14301_s6 + $0x1fa8] sm:$0xf]  ;;  %v12301_v42 = vor.u32 %v13741_v37, %v12300_v20  ;;  %7724 = vmatpush.bf16.msrb.mxu1 %v11789_v0 }
 0x436   : > { %v13869_v30 = vld [vmem:[%s14301_s6 + $0x1fe4] sm:$0xf0] }
 0x437   : > { %v11212_v22 = vld [vmem:[%s14301_s6 + $0x1328] sm:$0xf]  ;;  %v12813_v50 = vor.u32 %v13869_v30, %v12812_v18  ;;  %7738 = vmatpush.bf16.msrb.mxu2 %v12301_v42 }
 0x438   : > { %v13469_v55 = vld [vmem:[%s14301_s6 + $0x1364] sm:$0xf0] }
 0x439   : > { %v11724_v41 = vld [vmem:[%s14301_s6 + $0x1728] sm:$0xf]  ;;  %v11213_v52 = vor.u32 %v13469_v55, %v11212_v22  ;;  %7752 = vmatpush.bf16.msrb.mxu3 %v12813_v50 }
 0x43a   : > { %v13597_v56 = vld [vmem:[%s14301_s6 + $0x1764] sm:$0xf0] }
 0x43b   : > { %v12236_v53 = vld [vmem:[%s14301_s6 + $0x1b28] sm:$0xf]  ;;  %v11725_v54 = vor.u32 %v13597_v56, %v11724_v41  ;;  %7711 = vmatpush.bf16.msrb.mxu0 %v11213_v52 }
 0x43c   : > { %v13725_v62 = vld [vmem:[%s14301_s6 + $0x1b64] sm:$0xf0] }
 0x43d   : > { %v12748_v63 = vld [vmem:[%s14301_s6 + $0x1f28] sm:$0xf]  ;;  %v12237_v4 = vor.u32 %v13725_v62, %v12236_v53  ;;  %7725 = vmatpush.bf16.msrb.mxu1 %v11725_v54 }
 0x43e   : > { %v13853_v57 = vld [vmem:[%s14301_s6 + $0x1f64] sm:$0xf0] }
 0x43f   : > { %v11148_v51 = vld [vmem:[%s14301_s6 + $0x12a8] sm:$0xf]  ;;  %v12749_v29 = vor.u32 %v13853_v57, %v12748_v63  ;;  %7739 = vmatpush.bf16.msrb.mxu2 %v12237_v4 }
 0x440   : > { %v13453_v32 = vld [vmem:[%s14301_s6 + $0x12e4] sm:$0xf0] }
 0x441   : > { %v11660_v3 = vld [vmem:[%s14301_s6 + $0x16a8] sm:$0xf]  ;;  %v11149_v2 = vor.u32 %v13453_v32, %v11148_v51  ;;  %7753 = vmatpush.bf16.msrb.mxu3 %v12749_v29 }
 0x442   : > { %v13581_v6 = vld [vmem:[%s14301_s6 + $0x16e4] sm:$0xf0] }
 0x443   : > { %v12172_v16 = vld [vmem:[%s14301_s6 + $0x1aa8] sm:$0xf]  ;;  %v11661_v48 = vor.u32 %v13581_v6, %v11660_v3  ;;  %7712 = vmatpush.bf16.msrb.mxu0 %v11149_v2 }
 0x444   : > { %v13709_v21 = vld [vmem:[%s14301_s6 + $0x1ae4] sm:$0xf0] }
 0x445   : > { %v12684_v45 = vld [vmem:[%s14301_s6 + $0x1ea8] sm:$0xf]  ;;  %v12173_v33 = vor.u32 %v13709_v21, %v12172_v16  ;;  %7726 = vmatpush.bf16.msrb.mxu1 %v11661_v48 }
 0x446   : > { %v13837_v49 = vld [vmem:[%s14301_s6 + $0x1ee4] sm:$0xf0] }
 0x447   : > { %v11084_v61 = vld [vmem:[%s14301_s6 + $0x1228] sm:$0xf]  ;;  %v12685_v5 = vor.u32 %v13837_v49, %v12684_v45  ;;  %7740 = vmatpush.bf16.msrb.mxu2 %v12173_v33 }
 0x448   : > { %v13437_v23 = vld [vmem:[%s14301_s6 + $0x1264] sm:$0xf0] }
 0x449   : > { %v11596_v12 = vld [vmem:[%s14301_s6 + $0x1628] sm:$0xf]  ;;  %v11085_v15 = vor.u32 %v13437_v23, %v11084_v61  ;;  %7754 = vmatpush.bf16.msrb.mxu3 %v12685_v5  ;;  %v12965_v23 = vld [vmem:[%s14301_s6 + $0x3ac] sm:$0xf] }
 0x44a   : > { %v13565_v46 = vld [vmem:[%s14301_s6 + $0x1664] sm:$0xf0]  ;;  %v13093_v5 = vld [vmem:[%s14301_s6 + $0x7ac] sm:$0xf] }
 0x44b   : > { %v12108_v14 = vld [vmem:[%s14301_s6 + $0x1a28] sm:$0xf]  ;;  %v11597_v13 = vor.u32 %v13565_v46, %v11596_v12  ;;  %7713 = vmatpush.bf16.msrb.mxu0 %v11085_v15  ;;  %v9230_v12 = vld [vmem:[%s14301_s6 + $0x3e8] sm:$0xf0] }
 0x44c   : > { %v13693_v24 = vld [vmem:[%s14301_s6 + $0x1a64] sm:$0xf0] }
 0x44d   : > { %v12620_v31 = vld [vmem:[%s14301_s6 + $0x1e28] sm:$0xf]  ;;  %v12109_v36 = vor.u32 %v13693_v24, %v12108_v14  ;;  %7727 = vmatpush.bf16.msrb.mxu1 %v11597_v13  ;;  %v9742_v14 = vld [vmem:[%s14301_s6 + $0x7e8] sm:$0xf0] }
 0x44e   : > { %v13821_v26 = vld [vmem:[%s14301_s6 + $0x1e64] sm:$0xf0]  ;;  %v13221_v24 = vld [vmem:[%s14301_s6 + $0xbac] sm:$0xf] }
 0x44f   : > { %v11020_v19 = vld [vmem:[%s14301_s6 + $0x11a8] sm:$0xf]  ;;  %v12621_v60 = vor.u32 %v13821_v26, %v12620_v31  ;;  %7741 = vmatpush.bf16.msrb.mxu2 %v12109_v36  ;;  %v10254_v31 = vld [vmem:[%s14301_s6 + $0xbe8] sm:$0xf0] }
 0x450   : > { %v13421_v35 = vld [vmem:[%s14301_s6 + $0x11e4] sm:$0xf0]  ;;  %v13349_v13 = vld [vmem:[%s14301_s6 + $0xfac] sm:$0xf] }
 0x451   : > { %v11532_v27 = vld [vmem:[%s14301_s6 + $0x15a8] sm:$0xf]  ;;  %v11021_v28 = vor.u32 %v13421_v35, %v11020_v19  ;;  %7755 = vmatpush.bf16.msrb.mxu3 %v12621_v60  ;;  %v10766_v36 = vld [vmem:[%s14301_s6 + $0xfe8] sm:$0xf0]  ;;  %v9233_v35 = vor.u32 %v12965_v23, %v9230_v12  ;;  %v10257_v60 = vor.u32 %v13221_v24, %v10254_v31 }
 0x452   : > { %v13549_v11 = vld [vmem:[%s14301_s6 + $0x15e4] sm:$0xf0]  ;;  %v9486_v12 = vld [vmem:[%s14301_s6 + $0x5e8] sm:$0xf0] }
 0x453   : > { %v12044_v20 = vld [vmem:[%s14301_s6 + $0x19a8] sm:$0xf]  ;;  %v11533_v18 = vor.u32 %v13549_v11, %v11532_v27  ;;  %7714 = vmatpush.bf16.msrb.mxu0 %v11021_v28  ;;  %v9745_v27 = vor.u32 %v13093_v5, %v9742_v14  ;;  %v12949_v11 = vld [vmem:[%s14301_s6 + $0x32c] sm:$0xf] }
 0x454   : > { %v13677_v37 = vld [vmem:[%s14301_s6 + $0x19e4] sm:$0xf0]  ;;  %v13205_v28 = vld [vmem:[%s14301_s6 + $0xb2c] sm:$0xf] }
 0x455   : > { %v12556_v40 = vld [vmem:[%s14301_s6 + $0x1da8] sm:$0xf]  ;;  %v12045_v30 = vor.u32 %v13677_v37, %v12044_v20  ;;  %7728 = vmatpush.bf16.msrb.mxu1 %v11533_v18  ;;  %v9166_v20 = vld [vmem:[%s14301_s6 + $0x368] sm:$0xf0] }
 0x456   : > { %v13805_v38 = vld [vmem:[%s14301_s6 + $0x1de4] sm:$0xf0]  ;;  %v13077_v37 = vld [vmem:[%s14301_s6 + $0x72c] sm:$0xf] }
 0x457   : > { %v10956_v7 = vld [vmem:[%s14301_s6 + $0x1128] sm:$0xf]  ;;  %v12557_v0 = vor.u32 %v13805_v38, %v12556_v40  ;;  %7742 = vmatpush.bf16.msrb.mxu2 %v12045_v30  ;;  %v10769_v40 = vor.u32 %v13349_v13, %v10766_v36  ;;  %v9678_v38 = vld [vmem:[%s14301_s6 + $0x768] sm:$0xf0] }
 0x458   : > { %v13405_v9 = vld [vmem:[%s14301_s6 + $0x1164] sm:$0xf0]  ;;  %v10190_v18 = vld [vmem:[%s14301_s6 + $0xb68] sm:$0xf0] }
 0x459   : > { %v11468_v59 = vld [vmem:[%s14301_s6 + $0x1528] sm:$0xf]  ;;  %v10957_v56 = vor.u32 %v13405_v9, %v10956_v7  ;;  %7756 = vmatpush.bf16.msrb.mxu3 %v12557_v0  ;;  %v13333_v30 = vld [vmem:[%s14301_s6 + $0xf2c] sm:$0xf]  ;;  %v9169_v9 = vor.u32 %v12949_v11, %v9166_v20  ;;  %v10193_v0 = vor.u32 %v13205_v28, %v10190_v18  ;;  %v16135_v28 = vpop.f32.mrf.mxu3 }
 0x45a   : > { %v13533_v42 = vld [vmem:[%s14301_s6 + $0x1564] sm:$0xf0]  ;;  %v10702_v7 = vld [vmem:[%s14301_s6 + $0xf68] sm:$0xf0] }
 0x45b   : > { %v11980_v22 = vld [vmem:[%s14301_s6 + $0x1928] sm:$0xf]  ;;  %v11469_v53 = vor.u32 %v13533_v42, %v11468_v59  ;;  %7715 = vmatpush.bf16.msrb.mxu0 %v10957_v56  ;;  %v9681_v59 = vor.u32 %v13077_v37, %v9678_v38  ;;  %v12933_v42 = vld [vmem:[%s14301_s6 + $0x2ac] sm:$0xf] }
 0x45c   : > { %v13661_v55 = vld [vmem:[%s14301_s6 + $0x1964] sm:$0xf0]  ;;  %v13189_v56 = vld [vmem:[%s14301_s6 + $0xaac] sm:$0xf] }
 0x45d   : > { %v12492_v41 = vld [vmem:[%s14301_s6 + $0x1d28] sm:$0xf]  ;;  %v11981_v62 = vor.u32 %v13661_v55, %v11980_v22  ;;  %7729 = vmatpush.bf16.msrb.mxu1 %v11469_v53  ;;  %v9102_v22 = vld [vmem:[%s14301_s6 + $0x2e8] sm:$0xf0] }
 0x45e   : > { %v13789_v50 = vld [vmem:[%s14301_s6 + $0x1d64] sm:$0xf0]  ;;  %v13061_v55 = vld [vmem:[%s14301_s6 + $0x6ac] sm:$0xf] }
 0x45f   : > { %v10892_v8 = vld [vmem:[%s14301_s6 + $0x10a8] sm:$0xf]  ;;  %v12493_v57 = vor.u32 %v13789_v50, %v12492_v41  ;;  %7743 = vmatpush.bf16.msrb.mxu2 %v11981_v62  ;;  %v10705_v41 = vor.u32 %v13333_v30, %v10702_v7  ;;  %v9614_v50 = vld [vmem:[%s14301_s6 + $0x6e8] sm:$0xf0] }
 0x460   : > { %v13389_v34 = vld [vmem:[%s14301_s6 + $0x10e4] sm:$0xf0]  ;;  %v10126_v53 = vld [vmem:[%s14301_s6 + $0xae8] sm:$0xf0] }
 0x461   : > { %v11404_v63 = vld [vmem:[%s14301_s6 + $0x14a8] sm:$0xf]  ;;  %v10893_v32 = vor.u32 %v13389_v34, %v10892_v8  ;;  %7757 = vmatpush.bf16.msrb.mxu3 %v12493_v57  ;;  %v13317_v62 = vld [vmem:[%s14301_s6 + $0xeac] sm:$0xf]  ;;  %v9105_v34 = vor.u32 %v12933_v42, %v9102_v22  ;;  %v10129_v57 = vor.u32 %v13189_v56, %v10126_v53 }
 0x462   : > { %v13517_v52 = vld [vmem:[%s14301_s6 + $0x14e4] sm:$0xf0]  ;;  %v10638_v8 = vld [vmem:[%s14301_s6 + $0xee8] sm:$0xf0] }
 0x463   : > { %v11916_v25 = vld [vmem:[%s14301_s6 + $0x18a8] sm:$0xf]  ;;  %v11405_v6 = vor.u32 %v13517_v52, %v11404_v63  ;;  %7716 = vmatpush.bf16.msrb.mxu0 %v10893_v32  ;;  %v9617_v63 = vor.u32 %v13061_v55, %v9614_v50  ;;  %v12917_v52 = vld [vmem:[%s14301_s6 + $0x22c] sm:$0xf] }
 0x464   : > { %v13645_v54 = vld [vmem:[%s14301_s6 + $0x18e4] sm:$0xf0]  ;;  %v13173_v32 = vld [vmem:[%s14301_s6 + $0xa2c] sm:$0xf] }
 0x465   : > { %v12428_v4 = vld [vmem:[%s14301_s6 + $0x1ca8] sm:$0xf]  ;;  %v11917_v16 = vor.u32 %v13645_v54, %v11916_v25  ;;  %7730 = vmatpush.bf16.msrb.mxu1 %v11405_v6  ;;  %v9038_v25 = vld [vmem:[%s14301_s6 + $0x268] sm:$0xf0] }
 0x466   : > { %v13773_v51 = vld [vmem:[%s14301_s6 + $0x1ce4] sm:$0xf0]  ;;  %v13045_v54 = vld [vmem:[%s14301_s6 + $0x62c] sm:$0xf] }
 0x467   : > { %v10828_v3 = vld [vmem:[%s14301_s6 + $0x1028] sm:$0xf]  ;;  %v12429_v2 = vor.u32 %v13773_v51, %v12428_v4  ;;  %7744 = vmatpush.bf16.msrb.mxu2 %v11917_v16  ;;  %v10641_v4 = vor.u32 %v13317_v62, %v10638_v8  ;;  %v9550_v51 = vld [vmem:[%s14301_s6 + $0x668] sm:$0xf0]  ;;  %v9041_v16 = vor.u32 %v12917_v52, %v9038_v25 }
 0x468   : > { %v13373_v29 = vld [vmem:[%s14301_s6 + $0x1064] sm:$0xf0]  ;;  %v10574_v6 = vld [vmem:[%s14301_s6 + $0xe68] sm:$0xf0] }
 0x469   : > { %v11340_v21 = vld [vmem:[%s14301_s6 + $0x1428] sm:$0xf]  ;;  %v10829_v46 = vor.u32 %v13373_v29, %v10828_v3  ;;  %7758 = vmatpush.bf16.msrb.mxu3 %v12429_v2  ;;  %v10062_v3 = vld [vmem:[%s14301_s6 + $0xa68] sm:$0xf0] }
 0x46a   : > { %v13501_v45 = vld [vmem:[%s14301_s6 + $0x1464] sm:$0xf0]  ;;  %v13301_v29 = vld [vmem:[%s14301_s6 + $0xe2c] sm:$0xf] }
 0x46b   : > { %v11852_v49 = vld [vmem:[%s14301_s6 + $0x1828] sm:$0xf]  ;;  %v11341_v26 = vor.u32 %v13501_v45, %v11340_v21  ;;  %7717 = vmatpush.bf16.msrb.mxu0 %v10829_v46  ;;  %v16113_v21 = vpop.f32.mrf.mxu0  ;;  %v9553_v45 = vor.u32 %v13045_v54, %v9550_v51  ;;  %v12901_v2 = vld [vmem:[%s14301_s6 + $0x1ac] sm:$0xf]  ;;  %v10577_v23 = vor.u32 %v13301_v29, %v10574_v6 }
 0x46c   : > { %v13629_v48 = vld [vmem:[%s14301_s6 + $0x1864] sm:$0xf0]  ;;  %v13157_v5 = vld [vmem:[%s14301_s6 + $0x9ac] sm:$0xf] }
 0x46d   : > { %v12364_v33 = vld [vmem:[%s14301_s6 + $0x1c28] sm:$0xf]  ;;  %v11853_v15 = vor.u32 %v13629_v48, %v11852_v49  ;;  %7731 = vmatpush.bf16.msrb.mxu1 %v11341_v26  ;;  %v10065_v49 = vor.u32 %v13173_v32, %v10062_v3  ;;  %v8974_v48 = vld [vmem:[%s14301_s6 + $0x1e8] sm:$0xf0] }
 0x46e   : > { %v13757_v61 = vld [vmem:[%s14301_s6 + $0x1c64] sm:$0xf0]  ;;  %7718 = vmatmul.bf16.vlgmr.msrb.gmra.mxu0 %v14458_v39  ;;  %v9998_v46 = vld [vmem:[%s14301_s6 + $0x9e8] sm:$0xf0]  ;;  %v8977_v31 = vor.u32 %v12901_v2, %v8974_v48 }
 0x46f   : > { %v12365_v19 = vor.u32 %v13757_v61, %v12364_v33  ;;  %7745 = vmatpush.bf16.msrb.mxu2 %v11853_v15  ;;  %7766 = vmatpush.bf16.msra.mxu0 %v9233_v35  ;;  %v13029_v33 = vld [vmem:[%s14301_s6 + $0x5ac] sm:$0xf]  ;;  %v16118_v61 = vpop.f32.mrf.mxu1  ;;  %v10001_v15 = vor.u32 %v13157_v5, %v9998_v46 }
 0x470   : > { %7732 = vmatmul.bf16.vlgmr.msrb.gmra.mxu1 %v14465_v44  ;;  %v13285_v14 = vld [vmem:[%s14301_s6 + $0xdac] sm:$0xf]  ;;  %v9489_v26 = vor.u32 %v13029_v33, %v9486_v12 }
 0x471   : > { %7759 = vmatpush.bf16.msrb.mxu3 %v12365_v19  ;;  %7780 = vmatpush.bf16.msra.mxu1 %v9745_v27  ;;  %v10510_v24 = vld [vmem:[%s14301_s6 + $0xde8] sm:$0xf0] }
 0x472   : > { %7746 = vmatmul.bf16.vlgmr.msrb.gmra.mxu2 %v14463_v43  ;;  %v12885_v13 = vld [vmem:[%s14301_s6 + $0x12c] sm:$0xf]  ;;  %v10513_v35 = vor.u32 %v13285_v14, %v10510_v24 }
 0x473   : > { %7794 = vmatpush.bf16.msra.mxu2 %v10257_v60  ;;  %7767 = vmatpush.bf16.msra.mxu0 %v9169_v9  ;;  %v8910_v36 = vld [vmem:[%s14301_s6 + $0x168] sm:$0xf0] }
 0x474   : > { %7760 = vmatmul.bf16.vlgmr.msrb.gmra.mxu3 %v14469_v47  ;;  %v13013_v19 = vld [vmem:[%s14301_s6 + $0x52c] sm:$0xf]  ;;  %v8913_v38 = vor.u32 %v12885_v13, %v8910_v36 }
 0x475   : > { %7808 = vmatpush.bf16.msra.mxu3 %v10769_v40  ;;  %7781 = vmatpush.bf16.msra.mxu1 %v9681_v59  ;;  %v9422_v27 = vld [vmem:[%s14301_s6 + $0x568] sm:$0xf0]  ;;  %v16133_v40 = vpop.f32.mrf.mxu2 }
 0x476   : > { %v13141_v60 = vld [vmem:[%s14301_s6 + $0x92c] sm:$0xf]  ;;  %v9425_v18 = vor.u32 %v13013_v19, %v9422_v27 }
 0x477   : > { %7795 = vmatpush.bf16.msra.mxu2 %v10193_v0  ;;  %7768 = vmatpush.bf16.msra.mxu0 %v9105_v34  ;;  %v9934_v11 = vld [vmem:[%s14301_s6 + $0x968] sm:$0xf0]  ;;  %v16147_v53 = vpop.f32.mrf.mxu1 }
 0x478   : > { %v13269_v20 = vld [vmem:[%s14301_s6 + $0xd2c] sm:$0xf]  ;;  %v9937_v30 = vor.u32 %v13141_v60, %v9934_v11 }
 0x479   : > { %7809 = vmatpush.bf16.msra.mxu3 %v10705_v41  ;;  %7782 = vmatpush.bf16.msra.mxu1 %v9617_v63  ;;  %v10446_v37 = vld [vmem:[%s14301_s6 + $0xd68] sm:$0xf0]  ;;  %v16143_v41 = vpop.f32.mrf.mxu0 }
 0x47a   : > { %v12869_v7 = vld [vmem:[%s14301_s6 + $0xac] sm:$0xf]  ;;  %v10449_v0 = vor.u32 %v13269_v20, %v10446_v37 }
 0x47b   : > { %7796 = vmatpush.bf16.msra.mxu2 %v10129_v57  ;;  %7769 = vmatpush.bf16.msra.mxu0 %v9041_v16  ;;  %v8846_v9 = vld [vmem:[%s14301_s6 + $0xe8] sm:$0xf0] }
 0x47c   : > { %v12997_v59 = vld [vmem:[%s14301_s6 + $0x4ac] sm:$0xf]  ;;  %v8849_v62 = vor.u32 %v12869_v7, %v8846_v9 }
 0x47d   : > { %7810 = vmatpush.bf16.msra.mxu3 %v10641_v4  ;;  %7783 = vmatpush.bf16.msra.mxu1 %v9553_v45  ;;  %v9358_v42 = vld [vmem:[%s14301_s6 + $0x4e8] sm:$0xf0]  ;;  %v16165_v46 = vpop.f32.mrf.mxu2 }
 0x47e   : > { %v13125_v22 = vld [vmem:[%s14301_s6 + $0x8ac] sm:$0xf]  ;;  %v9361_v63 = vor.u32 %v12997_v59, %v9358_v42 }
 0x47f   : > { %7797 = vmatpush.bf16.msra.mxu2 %v10065_v49  ;;  %7770 = vmatpush.bf16.msra.mxu0 %v8977_v31  ;;  %v9870_v55 = vld [vmem:[%s14301_s6 + $0x8e8] sm:$0xf0]  ;;  %v16167_v31 = vpop.f32.mrf.mxu3 }
 0x480   : > { %v13253_v50 = vld [vmem:[%s14301_s6 + $0xcac] sm:$0xf]  ;;  %v9873_v57 = vor.u32 %v13125_v22, %v9870_v55 }
 0x481   : > { %7811 = vmatpush.bf16.msra.mxu3 %v10577_v23  ;;  %7784 = vmatpush.bf16.msra.mxu1 %v9489_v26  ;;  %v10382_v56 = vld [vmem:[%s14301_s6 + $0xce8] sm:$0xf0]  ;;  %v16175_v20 = vpop.f32.mrf.mxu0 }
 0x482   : > { %v12853_v8 = vld [vmem:[%s14301_s6 + $0x2c] sm:$0xf]  ;;  %v10385_v4 = vor.u32 %v13253_v50, %v10382_v56 }
 0x483   : > { %7798 = vmatpush.bf16.msra.mxu2 %v10001_v15  ;;  %7771 = vmatpush.bf16.msra.mxu0 %v8913_v38  ;;  %v8782_v34 = vld [vmem:[%s14301_s6 + $0x68] sm:$0xf0] }
 0x484   : > { %v12981_v52 = vld [vmem:[%s14301_s6 + $0x42c] sm:$0xf]  ;;  %v8785_v45 = vor.u32 %v12853_v8, %v8782_v34 }
 0x485   : > { %7812 = vmatpush.bf16.msra.mxu3 %v10513_v35  ;;  %7785 = vmatpush.bf16.msra.mxu1 %v9425_v18  ;;  %v9294_v25 = vld [vmem:[%s14301_s6 + $0x468] sm:$0xf0]  ;;  %v16179_v18 = vpop.f32.mrf.mxu1 }
 0x486   : > { %v13109_v54 = vld [vmem:[%s14301_s6 + $0x82c] sm:$0xf]  ;;  %v9297_v33 = vor.u32 %v12981_v52, %v9294_v25 }
 0x487   : > { %7799 = vmatpush.bf16.msra.mxu2 %v9937_v30  ;;  %v9806_v51 = vld [vmem:[%s14301_s6 + $0x868] sm:$0xf0]  ;;  %7772 = vmatpush.bf16.msra.mxu0 %v8849_v62 }
 0x488   : > { %v13237_v32 = vld [vmem:[%s14301_s6 + $0xc2c] sm:$0xf]  ;;  %v9809_v23 = vor.u32 %v13109_v54, %v9806_v51 }
 0x489   : > { %7813 = vmatpush.bf16.msra.mxu3 %v10449_v0  ;;  %v10318_v3 = vld [vmem:[%s14301_s6 + $0xc68] sm:$0xf0]  ;;  %7786 = vmatpush.bf16.msra.mxu1 %v9361_v63 }
 0x48a   : > { %v13477_v29 = vld [vmem:[%s14301_s6 + $0x13ac] sm:$0xf]  ;;  %v10321_v14 = vor.u32 %v13237_v32, %v10318_v3 }
 0x48b   : > { %v11278_v6 = vld [vmem:[%s14301_s6 + $0x13e8] sm:$0xf0]  ;;  %7800 = vmatpush.bf16.msra.mxu2 %v9873_v57  ;;  %7773 = vmatpush.bf16.msra.mxu0 %v8785_v45 }
 0x48c   : > { %v13605_v16 = vld [vmem:[%s14301_s6 + $0x17ac] sm:$0xf]  ;;  %v11281_v24 = vor.u32 %v13477_v29, %v11278_v6  ;;  %v16201_v6 = vpop.f32.mrf.mxu3 }
 0x48d   : > { %v11790_v49 = vld [vmem:[%s14301_s6 + $0x17e8] sm:$0xf0]  ;;  %7814 = vmatpush.bf16.msra.mxu3 %v10385_v4  ;;  %7787 = vmatpush.bf16.msra.mxu1 %v9297_v33  ;;  %v16196_v4 = vpop.f32.mrf.mxu2 }
 0x48e   : > { %v13733_v2 = vld [vmem:[%s14301_s6 + $0x1bac] sm:$0xf]  ;;  %v11793_v26 = vor.u32 %v13605_v16, %v11790_v49  ;;  %7774 = vmatmul.bf16.vlgmr.msra.gmra.mxu0 %v14389_v58 }
 0x48f   : > { %v12302_v48 = vld [vmem:[%s14301_s6 + $0x1be8] sm:$0xf0]  ;;  %7801 = vmatpush.bf16.msra.mxu2 %v9809_v23  ;;  %7822 = vmatpush.bf16.msrb.mxu0 %v11281_v24 }
 0x490   : > { %v13861_v12 = vld [vmem:[%s14301_s6 + $0x1fac] sm:$0xf]  ;;  %v12305_v15 = vor.u32 %v13733_v2, %v12302_v48  ;;  %7788 = vmatmul.bf16.vlgmr.msra.gmra.mxu1 %v14401_v10  ;;  %v16205_v2 = vpop.f32.mrf.mxu0 }
 0x491   : > { %v12814_v5 = vld [vmem:[%s14301_s6 + $0x1fe8] sm:$0xf0]  ;;  %7815 = vmatpush.bf16.msra.mxu3 %v10321_v14  ;;  %7836 = vmatpush.bf16.msrb.mxu1 %v11793_v26  ;;  %v16210_v14 = vpop.f32.mrf.mxu1 }
 0x492   : > { %v13461_v13 = vld [vmem:[%s14301_s6 + $0x132c] sm:$0xf]  ;;  %v12817_v35 = vor.u32 %v13861_v12, %v12814_v5  ;;  %7802 = vmatmul.bf16.vlgmr.msra.gmra.mxu2 %v14394_v1 }
 0x493   : > { %v11214_v36 = vld [vmem:[%s14301_s6 + $0x1368] sm:$0xf0]  ;;  %7850 = vmatpush.bf16.msrb.mxu2 %v12305_v15 }
 0x494   : > { %v13589_v19 = vld [vmem:[%s14301_s6 + $0x172c] sm:$0xf]  ;;  %v11217_v30 = vor.u32 %v13461_v13, %v11214_v36  ;;  %7816 = vmatmul.bf16.vlgmr.msra.gmra.mxu3 %v14406_v17 }
 0x495   : > { %v11726_v27 = vld [vmem:[%s14301_s6 + $0x1768] sm:$0xf0]  ;;  %7864 = vmatpush.bf16.msrb.mxu3 %v12817_v35 }
 0x496   : > { %v13717_v60 = vld [vmem:[%s14301_s6 + $0x1b2c] sm:$0xf]  ;;  %v11729_v7 = vor.u32 %v13589_v19, %v11726_v27  ;;  %7823 = vmatpush.bf16.msrb.mxu0 %v11217_v30 }
 0x497   : > { %v12238_v11 = vld [vmem:[%s14301_s6 + $0x1b68] sm:$0xf0] }
 0x498   : > { %v13845_v37 = vld [vmem:[%s14301_s6 + $0x1f2c] sm:$0xf]  ;;  %v12241_v9 = vor.u32 %v13717_v60, %v12238_v11  ;;  %7837 = vmatpush.bf16.msrb.mxu1 %v11729_v7 }
 0x499   : > { %v12750_v38 = vld [vmem:[%s14301_s6 + $0x1f68] sm:$0xf0] }
 0x49a   : > { %v13445_v59 = vld [vmem:[%s14301_s6 + $0x12ac] sm:$0xf]  ;;  %v12753_v22 = vor.u32 %v13845_v37, %v12750_v38  ;;  %7851 = vmatpush.bf16.msrb.mxu2 %v12241_v9 }
 0x49b   : > { %v11150_v0 = vld [vmem:[%s14301_s6 + $0x12e8] sm:$0xf0] }
 0x49c   : > { %v13573_v42 = vld [vmem:[%s14301_s6 + $0x16ac] sm:$0xf]  ;;  %v11153_v34 = vor.u32 %v13445_v59, %v11150_v0  ;;  %7865 = vmatpush.bf16.msrb.mxu3 %v12753_v22  ;;  %v16225_v22 = vpop.f32.mrf.mxu2 }
 0x49d   : > { %v11662_v55 = vld [vmem:[%s14301_s6 + $0x16e8] sm:$0xf0] }
 0x49e   : > { %v13701_v50 = vld [vmem:[%s14301_s6 + $0x1aac] sm:$0xf]  ;;  %v11665_v63 = vor.u32 %v13573_v42, %v11662_v55  ;;  %7824 = vmatpush.bf16.msrb.mxu0 %v11153_v34  ;;  %v7551_v34 = vpop.f32.mrf.mxu0 }
 0x49f   : > { %v12174_v56 = vld [vmem:[%s14301_s6 + $0x1ae8] sm:$0xf0] }
 0x4a0   : > { %v13829_v62 = vld [vmem:[%s14301_s6 + $0x1eac] sm:$0xf]  ;;  %v12177_v57 = vor.u32 %v13701_v50, %v12174_v56  ;;  %7838 = vmatpush.bf16.msrb.mxu1 %v11665_v63  ;;  %v7454_v50 = vadd.f32 %v16118_v61, %v16113_v21  ;;  %v16229_v56 = vpop.f32.mrf.mxu3 }
 0x4a1   : > { %v12686_v8 = vld [vmem:[%s14301_s6 + $0x1ee8] sm:$0xf0] }
 0x4a2   : > { %v13429_v52 = vld [vmem:[%s14301_s6 + $0x122c] sm:$0xf]  ;;  %v12689_v51 = vor.u32 %v13829_v62, %v12686_v8  ;;  %7852 = vmatpush.bf16.msrb.mxu2 %v12177_v57 }
 0x4a3   : > { %v11086_v25 = vld [vmem:[%s14301_s6 + $0x1268] sm:$0xf0] }
 0x4a4   : > { %v13557_v54 = vld [vmem:[%s14301_s6 + $0x162c] sm:$0xf]  ;;  %v11089_v49 = vor.u32 %v13429_v52, %v11086_v25  ;;  %7866 = vmatpush.bf16.msrb.mxu3 %v12689_v51  ;;  %v7565_v51 = vpop.f32.mrf.mxu1 }
 0x4a5   : > { %v11598_v32 = vld [vmem:[%s14301_s6 + $0x1668] sm:$0xf0] }
 0x4a6   : > { %v13685_v3 = vld [vmem:[%s14301_s6 + $0x1a2c] sm:$0xf]  ;;  %v11601_v48 = vor.u32 %v13557_v54, %v11598_v32  ;;  %7825 = vmatpush.bf16.msrb.mxu0 %v11089_v49  ;;  %v7468_v49 = vadd.f32 %v16133_v40, %v7454_v50  ;;  %v9748_v40 = vld [vmem:[%s14301_s6 + $0x7b0] sm:$0xf] }
 0x4a7   : > { %v12110_v29 = vld [vmem:[%s14301_s6 + $0x1a68] sm:$0xf0] }
 0x4a8   : > { %v13813_v16 = vld [vmem:[%s14301_s6 + $0x1e2c] sm:$0xf]  ;;  %v12113_v33 = vor.u32 %v13685_v3, %v12110_v29  ;;  %7839 = vmatpush.bf16.msrb.mxu1 %v11601_v48 }
 0x4a9   : > { %v12622_v45 = vld [vmem:[%s14301_s6 + $0x1e68] sm:$0xf0] }
 0x4aa   : > { %v13413_v23 = vld [vmem:[%s14301_s6 + $0x11ac] sm:$0xf]  ;;  %v12625_v24 = vor.u32 %v13813_v16, %v12622_v45  ;;  %7853 = vmatpush.bf16.msrb.mxu2 %v12113_v33 }
 0x4ab   : > { %v11022_v12 = vld [vmem:[%s14301_s6 + $0x11e8] sm:$0xf0] }
 0x4ac   : > { %v13541_v5 = vld [vmem:[%s14301_s6 + $0x15ac] sm:$0xf]  ;;  %v11025_v35 = vor.u32 %v13413_v23, %v11022_v12  ;;  %7867 = vmatpush.bf16.msrb.mxu3 %v12625_v24 }
 0x4ad   : > { %v11534_v26 = vld [vmem:[%s14301_s6 + $0x15e8] sm:$0xf0] }
 0x4ae   : > { %v13669_v15 = vld [vmem:[%s14301_s6 + $0x19ac] sm:$0xf]  ;;  %v11537_v27 = vor.u32 %v13541_v5, %v11534_v26  ;;  %7826 = vmatpush.bf16.msrb.mxu0 %v11025_v35 }
 0x4af   : > { %v12046_v13 = vld [vmem:[%s14301_s6 + $0x19e8] sm:$0xf0] }
 0x4b0   : > { %v13797_v36 = vld [vmem:[%s14301_s6 + $0x1dac] sm:$0xf]  ;;  %v12049_v60 = vor.u32 %v13669_v15, %v12046_v13  ;;  %7840 = vmatpush.bf16.msrb.mxu1 %v11537_v27  ;;  %v13102_v27 = vld [vmem:[%s14301_s6 + $0x7ec] sm:$0xf0] }
 0x4b1   : > { %v12558_v19 = vld [vmem:[%s14301_s6 + $0x1de8] sm:$0xf0] }
 0x4b2   : > { %v13397_v11 = vld [vmem:[%s14301_s6 + $0x112c] sm:$0xf]  ;;  %v12561_v30 = vor.u32 %v13797_v36, %v12558_v19  ;;  %7854 = vmatpush.bf16.msrb.mxu2 %v12049_v60  ;;  %v9236_v36 = vld [vmem:[%s14301_s6 + $0x3b0] sm:$0xf] }
 0x4b3   : > { %v10958_v37 = vld [vmem:[%s14301_s6 + $0x1168] sm:$0xf0]  ;;  %v12974_v19 = vld [vmem:[%s14301_s6 + $0x3ec] sm:$0xf0] }
 0x4b4   : > { %v13525_v38 = vld [vmem:[%s14301_s6 + $0x152c] sm:$0xf]  ;;  %v10961_v55 = vor.u32 %v13397_v11, %v10958_v37  ;;  %7868 = vmatpush.bf16.msrb.mxu3 %v12561_v30  ;;  %v10260_v60 = vld [vmem:[%s14301_s6 + $0xbb0] sm:$0xf]  ;;  %v7579_v37 = vpop.f32.mrf.mxu2  ;;  %v9237_v50 = vor.u32 %v12974_v19, %v9236_v36 }
 0x4b5   : > { %v11470_v7 = vld [vmem:[%s14301_s6 + $0x1568] sm:$0xf0]  ;;  %v13230_v11 = vld [vmem:[%s14301_s6 + $0xbec] sm:$0xf0] }
 0x4b6   : > { %v13653_v9 = vld [vmem:[%s14301_s6 + $0x192c] sm:$0xf]  ;;  %v11473_v62 = vor.u32 %v13525_v38, %v11470_v7  ;;  %7827 = vmatpush.bf16.msrb.mxu0 %v10961_v55  ;;  %v7482_v38 = vadd.f32 %v16135_v28, %v7468_v49  ;;  %v10261_v28 = vor.u32 %v13230_v11, %v10260_v60  ;;  %v9044_v60 = vld [vmem:[%s14301_s6 + $0x230] sm:$0xf] }
 0x4b7   : > { %v11982_v59 = vld [vmem:[%s14301_s6 + $0x1968] sm:$0xf0]  ;;  %v12926_v11 = vld [vmem:[%s14301_s6 + $0x26c] sm:$0xf0] }
 0x4b8   : > { %v13781_v0 = vld [vmem:[%s14301_s6 + $0x1d2c] sm:$0xf]  ;;  %v11985_v8 = vor.u32 %v13653_v9, %v11982_v59  ;;  %7841 = vmatpush.bf16.msrb.mxu1 %v11473_v62  ;;  %v10772_v9 = vld [vmem:[%s14301_s6 + $0xfb0] sm:$0xf]  ;;  %v9749_v62 = vor.u32 %v13102_v27, %v9748_v40 }
 0x4b9   : > { %v12494_v42 = vld [vmem:[%s14301_s6 + $0x1d68] sm:$0xf0]  ;;  %v13358_v59 = vld [vmem:[%s14301_s6 + $0xfec] sm:$0xf0] }
 0x4ba   : > { %v13381_v63 = vld [vmem:[%s14301_s6 + $0x10ac] sm:$0xf]  ;;  %v12497_v25 = vor.u32 %v13781_v0, %v12494_v42  ;;  %7855 = vmatpush.bf16.msrb.mxu2 %v11985_v8  ;;  %v7593_v0 = vpop.f32.mrf.mxu3  ;;  %v7566_v42 = vadd.f32 %v7565_v51, %v7551_v34  ;;  %v7553_v8 = vpop.f32.mrf.mxu0  ;;  %v7496_v34 = vadd.f32 %v16175_v20, %v7482_v38  ;;  %v10708_v51 = vld [vmem:[%s14301_s6 + $0xf30] sm:$0xf] }
 0x4bb   : > { %v10894_v57 = vld [vmem:[%s14301_s6 + $0x10e8] sm:$0xf0]  ;;  %v13054_v38 = vld [vmem:[%s14301_s6 + $0x66c] sm:$0xf0] }
 0x4bc   : > { %v13509_v52 = vld [vmem:[%s14301_s6 + $0x14ac] sm:$0xf]  ;;  %v10897_v29 = vor.u32 %v13381_v63, %v10894_v57  ;;  %7869 = vmatpush.bf16.msrb.mxu3 %v12497_v25  ;;  %v9172_v63 = vld [vmem:[%s14301_s6 + $0x330] sm:$0xf]  ;;  %v10773_v25 = vor.u32 %v13358_v59, %v10772_v9 }
 0x4bd   : > { %v11406_v54 = vld [vmem:[%s14301_s6 + $0x14e8] sm:$0xf0]  ;;  %v12958_v57 = vld [vmem:[%s14301_s6 + $0x36c] sm:$0xf0] }
 0x4be   : > { %v13637_v21 = vld [vmem:[%s14301_s6 + $0x18ac] sm:$0xf]  ;;  %v11409_v48 = vor.u32 %v13509_v52, %v11406_v54  ;;  %7828 = vmatpush.bf16.msrb.mxu0 %v10897_v29  ;;  %v9684_v52 = vld [vmem:[%s14301_s6 + $0x730] sm:$0xf]  ;;  %v7456_v29 = vadd.f32 %v16147_v53, %v16143_v41 }
 0x4bf   : > { %v11918_v61 = vld [vmem:[%s14301_s6 + $0x18e8] sm:$0xf0]  ;;  %v13086_v54 = vld [vmem:[%s14301_s6 + $0x76c] sm:$0xf0] }
 0x4c0   : > { %v13765_v32 = vld [vmem:[%s14301_s6 + $0x1cac] sm:$0xf]  ;;  %v11921_v33 = vor.u32 %v13637_v21, %v11918_v61  ;;  %7842 = vmatpush.bf16.msrb.mxu1 %v11409_v48  ;;  %v10196_v21 = vld [vmem:[%s14301_s6 + $0xb30] sm:$0xf]  ;;  %v9685_v20 = vor.u32 %v13086_v54, %v9684_v52 }
 0x4c1   : > { %v12430_v3 = vld [vmem:[%s14301_s6 + $0x1ce8] sm:$0xf0]  ;;  %v13214_v61 = vld [vmem:[%s14301_s6 + $0xb6c] sm:$0xf0] }
 0x4c2   : > { %v13365_v16 = vld [vmem:[%s14301_s6 + $0x102c] sm:$0xf]  ;;  %v12433_v24 = vor.u32 %v13765_v32, %v12430_v3  ;;  %7856 = vmatpush.bf16.msrb.mxu2 %v11921_v33  ;;  %v7567_v32 = vpop.f32.mrf.mxu1  ;;  %v13342_v3 = vld [vmem:[%s14301_s6 + $0xf6c] sm:$0xf0]  ;;  %v10197_v49 = vor.u32 %v13214_v61, %v10196_v21  ;;  %v7595_v27 = vpop.f32.mrf.mxu3 }
 0x4c3   : > { %v10830_v45 = vld [vmem:[%s14301_s6 + $0x1068] sm:$0xf0]  ;;  %v9108_v48 = vld [vmem:[%s14301_s6 + $0x2b0] sm:$0xf]  ;;  %v7568_v59 = vadd.f32 %v7567_v32, %v7553_v8 }
 0x4c4   : > { %v13493_v23 = vld [vmem:[%s14301_s6 + $0x142c] sm:$0xf]  ;;  %v10833_v35 = vor.u32 %v13365_v16, %v10830_v45  ;;  %7870 = vmatpush.bf16.msrb.mxu3 %v12433_v24  ;;  %v7580_v16 = vadd.f32 %v7579_v37, %v7566_v42  ;;  %v9173_v45 = vor.u32 %v12958_v57, %v9172_v63  ;;  %v12942_v33 = vld [vmem:[%s14301_s6 + $0x2ec] sm:$0xf0]  ;;  %v7510_v24 = vadd.f32 %v16179_v18, %v7496_v34  ;;  %v7581_v18 = vpop.f32.mrf.mxu2 }
 0x4c5   : > { %v11342_v12 = vld [vmem:[%s14301_s6 + $0x1468] sm:$0xf0]  ;;  %v13070_v41 = vld [vmem:[%s14301_s6 + $0x6ec] sm:$0xf0]  ;;  %v9109_v19 = vor.u32 %v12942_v33, %v9108_v48  ;;  %v9045_v63 = vor.u32 %v12926_v11, %v9044_v60 }
 0x4c6   : > { %v13621_v5 = vld [vmem:[%s14301_s6 + $0x182c] sm:$0xf]  ;;  %v11345_v30 = vor.u32 %v13493_v23, %v11342_v12  ;;  %7829 = vmatpush.bf16.msrb.mxu0 %v10833_v35  ;;  %v9620_v23 = vld [vmem:[%s14301_s6 + $0x6b0] sm:$0xf]  ;;  %v10709_v12 = vor.u32 %v13342_v3, %v10708_v51  ;;  %v7594_v36 = vadd.f32 %v7593_v0, %v7580_v16  ;;  %v7524_v9 = vadd.f32 %v16196_v4, %v7510_v24  ;;  %v7607_v0 = vpop.f32.mrf.mxu0 }
 0x4c7   : > { %v11854_v26 = vld [vmem:[%s14301_s6 + $0x1868] sm:$0xf0]  ;;  %v10132_v53 = vld [vmem:[%s14301_s6 + $0xab0] sm:$0xf]  ;;  %v9621_v40 = vor.u32 %v13070_v41, %v9620_v23 }
 0x4c8   : > { %v13749_v15 = vld [vmem:[%s14301_s6 + $0x1c2c] sm:$0xf]  ;;  %v11857_v7 = vor.u32 %v13621_v5, %v11854_v26  ;;  %7843 = vmatpush.bf16.msrb.mxu1 %v11345_v30  ;;  %v13198_v5 = vld [vmem:[%s14301_s6 + $0xaec] sm:$0xf0]  ;;  %v7538_v51 = vadd.f32 %v16201_v6, %v7524_v9 }
 0x4c9   : > { %v12366_v13 = vld [vmem:[%s14301_s6 + $0x1c68] sm:$0xf0]  ;;  %7830 = vmatmul.bf16.vlgmr.msrb.gmra.mxu0 %v14458_v39  ;;  %v10644_v26 = vld [vmem:[%s14301_s6 + $0xeb0] sm:$0xf]  ;;  %v10133_v35 = vor.u32 %v13198_v5, %v10132_v53 }
 0x4ca   : > { %v12369_v55 = vor.u32 %v13749_v15, %v12366_v13  ;;  %7857 = vmatpush.bf16.msrb.mxu2 %v11857_v7  ;;  %7878 = vmatpush.bf16.msra.mxu0 %v9237_v50  ;;  %v13326_v15 = vld [vmem:[%s14301_s6 + $0xeec] sm:$0xf0]  ;;  %v7470_v13 = vadd.f32 %v16165_v46, %v7456_v29  ;;  %v7621_v57 = vpop.f32.mrf.mxu1  ;;  %v7582_v29 = vadd.f32 %v7581_v18, %v7568_v59  ;;  %v7649_v18 = vpop.f32.mrf.mxu3 }
 0x4cb   : > { %7844 = vmatmul.bf16.vlgmr.msrb.gmra.mxu1 %v14465_v44  ;;  %v9556_v46 = vld [vmem:[%s14301_s6 + $0x630] sm:$0xf]  ;;  %v10645_v37 = vor.u32 %v13326_v15, %v10644_v26 }
 0x4cc   : > { %7871 = vmatpush.bf16.msrb.mxu3 %v12369_v55  ;;  %7892 = vmatpush.bf16.msra.mxu1 %v9749_v62  ;;  %v10068_v30 = vld [vmem:[%s14301_s6 + $0xa30] sm:$0xf]  ;;  %v7484_v50 = vadd.f32 %v16167_v31, %v7470_v13  ;;  %v16293_v62 = vld [vmem:[%s14945_s7 + $0x8] sm:$0xff]  ;;  %v9557_v4 = vor.u32 %v13054_v38, %v9556_v46  ;;  %v7635_v5 = vpop.f32.mrf.mxu2  ;;  %v7596_v13 = vadd.f32 %v7595_v27, %v7582_v29 }
 0x4cd   : > { %7858 = vmatmul.bf16.vlgmr.msrb.gmra.mxu2 %v14463_v43  ;;  %v13182_v7 = vld [vmem:[%s14301_s6 + $0xa6c] sm:$0xf0]  ;;  %v8437_v3 = vperm.slane %v16293_v62, 0 }
 0x4ce   : > { %7906 = vmatpush.bf16.msra.mxu2 %v10261_v28  ;;  %7879 = vmatpush.bf16.msra.mxu0 %v9173_v45  ;;  %v10580_v42 = vld [vmem:[%s14301_s6 + $0xe30] sm:$0xf]  ;;  %v7608_v28 = vadd.f32 %v7607_v0, %v7594_v36  ;;  %v10069_v8 = vor.u32 %v13182_v7, %v10068_v30  ;;  %v7498_v31 = vadd.f32 %v16205_v2, %v7484_v50 }
 0x4cf   : > { %7872 = vmatmul.bf16.vlgmr.msrb.gmra.mxu3 %v14469_v47  ;;  %v13310_v55 = vld [vmem:[%s14301_s6 + $0xe6c] sm:$0xf0]  ;;  %v8469_v15 = vadd.f32 %v8437_v3, %v7538_v51 }
 0x4d0   : > { %7920 = vmatpush.bf16.msra.mxu3 %v10773_v25  ;;  %7893 = vmatpush.bf16.msra.mxu1 %v9685_v20  ;;  %v8980_v52 = vld [vmem:[%s14301_s6 + $0x1b0] sm:$0xf]  ;;  %v10581_v21 = vor.u32 %v13310_v55, %v10580_v42  ;;  %v7622_v16 = vadd.f32 %v7621_v57, %v7608_v28  ;;  %v7512_v41 = vadd.f32 %v16210_v14, %v7498_v31 }
 0x4d1   : > { %v12910_v25 = vld [vmem:[%s14301_s6 + $0x1ec] sm:$0xf0]  ;;  %v8501_v50 = vmax.f32 %v8469_v15, 0.0 }
 0x4d2   : > { %7907 = vmatpush.bf16.msra.mxu2 %v10197_v49  ;;  %7880 = vmatpush.bf16.msra.mxu0 %v9109_v19  ;;  %v9492_v54 = vld [vmem:[%s14301_s6 + $0x5b0] sm:$0xf]  ;;  %v8981_v2 = vor.u32 %v12910_v25, %v8980_v52  ;;  %v7636_v36 = vadd.f32 %v7635_v5, %v7622_v16  ;;  %v7609_v19 = vpop.f32.mrf.mxu0  ;;  %v7526_v14 = vadd.f32 %v16225_v22, %v7512_v41  ;;  %v7623_v59 = vpop.f32.mrf.mxu1 }
 0x4d3   : > { %v13038_v61 = vld [vmem:[%s14301_s6 + $0x5ec] sm:$0xf0]  ;;  %v7610_v27 = vadd.f32 %v7609_v19, %v7596_v13 }
 0x4d4   : > { %7921 = vmatpush.bf16.msra.mxu3 %v10709_v12  ;;  %7894 = vmatpush.bf16.msra.mxu1 %v9621_v40  ;;  %v10004_v32 = vld [vmem:[%s14301_s6 + $0x9b0] sm:$0xf]  ;;  %v9493_v48 = vor.u32 %v13038_v61, %v9492_v54  ;;  %v8438_v40 = vperm.slane %v16293_v62, 1  ;;  %v7637_v29 = vpop.f32.mrf.mxu2 }
 0x4d5   : > { %v13166_v34 = vld [vmem:[%s14301_s6 + $0x9ec] sm:$0xf0] }
 0x4d6   : > { %7908 = vmatpush.bf16.msra.mxu2 %v10133_v35  ;;  %v10516_v45 = vld [vmem:[%s14301_s6 + $0xdb0] sm:$0xf]  ;;  %7881 = vmatpush.bf16.msra.mxu0 %v9045_v63  ;;  %v10005_v33 = vor.u32 %v13166_v34, %v10004_v32 }
 0x4d7   : > { %v13294_v20 = vld [vmem:[%s14301_s6 + $0xdec] sm:$0xf0] }
 0x4d8   : > { %7922 = vmatpush.bf16.msra.mxu3 %v10645_v37  ;;  %v8916_v49 = vld [vmem:[%s14301_s6 + $0x130] sm:$0xf]  ;;  %7895 = vmatpush.bf16.msra.mxu1 %v9557_v4  ;;  %v10517_v53 = vor.u32 %v13294_v20, %v10516_v45  ;;  %v7650_v37 = vadd.f32 %v7649_v18, %v7636_v36  ;;  %v7540_v4 = vadd.f32 %v16229_v56, %v7526_v14 }
 0x4d9   : > { %v12894_v23 = vld [vmem:[%s14301_s6 + $0x16c] sm:$0xf0] }
 0x4da   : > { %7909 = vmatpush.bf16.msra.mxu2 %v10069_v8  ;;  %v9428_v12 = vld [vmem:[%s14301_s6 + $0x530] sm:$0xf]  ;;  %7882 = vmatpush.bf16.msra.mxu0 %v8981_v2  ;;  %v8917_v11 = vor.u32 %v12894_v23, %v8916_v49  ;;  %v8470_v28 = vadd.f32 %v8438_v40, %v7650_v37 }
 0x4db   : > { %v13022_v6 = vld [vmem:[%s14301_s6 + $0x56c] sm:$0xf0] }
 0x4dc   : > { %7923 = vmatpush.bf16.msra.mxu3 %v10581_v21  ;;  %v9940_v24 = vld [vmem:[%s14301_s6 + $0x930] sm:$0xf]  ;;  %v9429_v46 = vor.u32 %v13022_v6, %v9428_v12  ;;  %7896 = vmatpush.bf16.msra.mxu1 %v9493_v48  ;;  %v8502_v31 = vmax.f32 %v8470_v28, 0.0  ;;  %v7624_v21 = vadd.f32 %v7623_v59, %v7610_v27  ;;  %v7651_v48 = vpop.f32.mrf.mxu3  ;;  %v8485_v6 = vadd.f32 %v8437_v3, %v7540_v4 }
 0x4dd   : > { %v13150_v26 = vld [vmem:[%s14301_s6 + $0x96c] sm:$0xf0] }
 0x4de   : > { %v10452_v35 = vld [vmem:[%s14301_s6 + $0xd30] sm:$0xf]  ;;  %7910 = vmatpush.bf16.msra.mxu2 %v10005_v33  ;;  %v9941_v38 = vor.u32 %v13150_v26, %v9940_v24  ;;  %7883 = vmatpush.bf16.msra.mxu0 %v8917_v11  ;;  %v8529_v2 = vpack.c.bf16 %v8502_v31, %v8501_v50  ;;  %v7638_v49 = vadd.f32 %v7637_v29, %v7624_v21 }
 0x4df   : > { %v13278_v60 = vld [vmem:[%s14301_s6 + $0xd6c] sm:$0xf0] }
 0x4e0   : > { %v8852_v30 = vld [vmem:[%s14301_s6 + $0xb0] sm:$0xf]  ;;  %7924 = vmatpush.bf16.msra.mxu3 %v10517_v53  ;;  %v10453_v22 = vor.u32 %v13278_v60, %v10452_v35  ;;  %7897 = vmatpush.bf16.msra.mxu1 %v9429_v46  ;;  %8545 = vst [vmem:[%s15004_s20 + $0x20] sm:$0xff] %v8529_v2  ;;  %v7652_v26 = vadd.f32 %v7651_v48, %v7638_v49 }
 0x4e1   : > { %v12878_v7 = vld [vmem:[%s14301_s6 + $0xec] sm:$0xf0] }
 0x4e2   : > { %v9364_v9 = vld [vmem:[%s14301_s6 + $0x4b0] sm:$0xf]  ;;  %v8853_v8 = vor.u32 %v12878_v7, %v8852_v30  ;;  %7911 = vmatpush.bf16.msra.mxu2 %v9941_v38  ;;  %v8486_v35 = vadd.f32 %v8438_v40, %v7652_v26 }
 0x4e3   : > { %v13006_v0 = vld [vmem:[%s14301_s6 + $0x4ec] sm:$0xf0] }
 0x4e4   : > { %v9876_v42 = vld [vmem:[%s14301_s6 + $0x8b0] sm:$0xf]  ;;  %v9365_v61 = vor.u32 %v13006_v0, %v9364_v9  ;;  %7925 = vmatpush.bf16.msra.mxu3 %v10453_v22  ;;  %7884 = vmatpush.bf16.msra.mxu0 %v8853_v8  ;;  %v8517_v9 = vmax.f32 %v8485_v6, 0.0  ;;  %v8518_v22 = vmax.f32 %v8486_v35, 0.0 }
 0x4e5   : > { %v13134_v55 = vld [vmem:[%s14301_s6 + $0x8ec] sm:$0xf0] }
 0x4e6   : > { %v10388_v63 = vld [vmem:[%s14301_s6 + $0xcb0] sm:$0xf]  ;;  %v9877_v32 = vor.u32 %v13134_v55, %v9876_v42  ;;  %7898 = vmatpush.bf16.msra.mxu1 %v9365_v61  ;;  %v8537_v0 = vpack.c.bf16 %v8518_v22, %v8517_v9 }
 0x4e7   : > { %v13262_v57 = vld [vmem:[%s14301_s6 + $0xcec] sm:$0xf0] }
 0x4e8   : > { %v8788_v52 = vld [vmem:[%s14301_s6 + $0x30] sm:$0xf]  ;;  %v10389_v56 = vor.u32 %v13262_v57, %v10388_v63  ;;  %7912 = vmatpush.bf16.msra.mxu2 %v9877_v32  ;;  %8553 = vst [vmem:[%s15004_s20 + $0x60] sm:$0xff] %v8537_v0 }
 0x4e9   : > { %v12862_v25 = vld [vmem:[%s14301_s6 + $0x6c] sm:$0xf0] }
 0x4ea   : > { %v9300_v54 = vld [vmem:[%s14301_s6 + $0x430] sm:$0xf]  ;;  %v8789_v41 = vor.u32 %v12862_v25, %v8788_v52  ;;  %7926 = vmatpush.bf16.msra.mxu3 %v10389_v56 }
 0x4eb   : > { %v12990_v34 = vld [vmem:[%s14301_s6 + $0x46c] sm:$0xf0] }
 0x4ec   : > { %v9812_v51 = vld [vmem:[%s14301_s6 + $0x830] sm:$0xf]  ;;  %v9301_v15 = vor.u32 %v12990_v34, %v9300_v54  ;;  %7885 = vmatpush.bf16.msra.mxu0 %v8789_v41 }
 0x4ed   : > { %v13118_v16 = vld [vmem:[%s14301_s6 + $0x86c] sm:$0xf0] }
 0x4ee   : > { %v10324_v45 = vld [vmem:[%s14301_s6 + $0xc30] sm:$0xf]  ;;  %v9813_v13 = vor.u32 %v13118_v16, %v9812_v51  ;;  %7899 = vmatpush.bf16.msra.mxu1 %v9301_v15 }
 0x4ef   : > { %v13246_v20 = vld [vmem:[%s14301_s6 + $0xc6c] sm:$0xf0]  ;;  %7886 = vmatmul.bf16.vlgmr.msra.gmra.mxu0 %v14389_v58 }
 0x4f0   : > { %v11284_v33 = vld [vmem:[%s14301_s6 + $0x13b0] sm:$0xf]  ;;  %v10325_v3 = vor.u32 %v13246_v20, %v10324_v45  ;;  %7913 = vmatpush.bf16.msra.mxu2 %v9813_v13 }
 0x4f1   : > { %v13486_v23 = vld [vmem:[%s14301_s6 + $0x13ec] sm:$0xf0]  ;;  %7900 = vmatmul.bf16.vlgmr.msra.gmra.mxu1 %v14401_v10 }
 0x4f2   : > { %v11796_v12 = vld [vmem:[%s14301_s6 + $0x17b0] sm:$0xf]  ;;  %v11285_v18 = vor.u32 %v13486_v23, %v11284_v33  ;;  %7927 = vmatpush.bf16.msra.mxu3 %v10325_v3 }
 0x4f3   : > { %v13614_v53 = vld [vmem:[%s14301_s6 + $0x17ec] sm:$0xf0]  ;;  %7914 = vmatmul.bf16.vlgmr.msra.gmra.mxu2 %v14394_v1 }
 0x4f4   : > { %v12308_v5 = vld [vmem:[%s14301_s6 + $0x1bb0] sm:$0xf]  ;;  %v11797_v60 = vor.u32 %v13614_v53, %v11796_v12  ;;  %7934 = vmatpush.bf16.msrb.mxu0 %v11285_v18 }
 0x4f5   : > { %v13742_v24 = vld [vmem:[%s14301_s6 + $0x1bec] sm:$0xf0]  ;;  %7928 = vmatmul.bf16.vlgmr.msra.gmra.mxu3 %v14406_v17 }
 0x4f6   : > { %v12820_v36 = vld [vmem:[%s14301_s6 + $0x1fb0] sm:$0xf]  ;;  %v12309_v14 = vor.u32 %v13742_v24, %v12308_v5  ;;  %7948 = vmatpush.bf16.msrb.mxu1 %v11797_v60 }
 0x4f7   : > { %v13870_v19 = vld [vmem:[%s14301_s6 + $0x1fec] sm:$0xf0] }
 0x4f8   : > { %v11220_v11 = vld [vmem:[%s14301_s6 + $0x1330] sm:$0xf]  ;;  %v12821_v37 = vor.u32 %v13870_v19, %v12820_v36  ;;  %7962 = vmatpush.bf16.msrb.mxu2 %v12309_v14 }
 0x4f9   : > { %v13470_v46 = vld [vmem:[%s14301_s6 + $0x136c] sm:$0xf0] }
 0x4fa   : > { %v11732_v27 = vld [vmem:[%s14301_s6 + $0x1730] sm:$0xf]  ;;  %v11221_v59 = vor.u32 %v13470_v46, %v11220_v11  ;;  %7976 = vmatpush.bf16.msrb.mxu3 %v12821_v37 }
 0x4fb   : > { %v13598_v38 = vld [vmem:[%s14301_s6 + $0x176c] sm:$0xf0] }
 0x4fc   : > { %v12244_v30 = vld [vmem:[%s14301_s6 + $0x1b30] sm:$0xf]  ;;  %v11733_v42 = vor.u32 %v13598_v38, %v11732_v27  ;;  %7935 = vmatpush.bf16.msrb.mxu0 %v11221_v59 }
 0x4fd   : > { %v13726_v7 = vld [vmem:[%s14301_s6 + $0x1b6c] sm:$0xf0] }
 0x4fe   : > { %v12756_v62 = vld [vmem:[%s14301_s6 + $0x1f30] sm:$0xf]  ;;  %v12245_v55 = vor.u32 %v13726_v7, %v12244_v30  ;;  %7949 = vmatpush.bf16.msrb.mxu1 %v11733_v42 }
 0x4ff   : > { %v13854_v40 = vld [vmem:[%s14301_s6 + $0x1f6c] sm:$0xf0] }
 0x500   : > { %v11156_v50 = vld [vmem:[%s14301_s6 + $0x12b0] sm:$0xf]  ;;  %v12757_v57 = vor.u32 %v13854_v40, %v12756_v62  ;;  %7963 = vmatpush.bf16.msrb.mxu2 %v12245_v55 }
 0x501   : > { %v13454_v28 = vld [vmem:[%s14301_s6 + $0x12ec] sm:$0xf0] }
 0x502   : > { %v11668_v63 = vld [vmem:[%s14301_s6 + $0x16b0] sm:$0xf]  ;;  %v11157_v31 = vor.u32 %v13454_v28, %v11156_v50  ;;  %7977 = vmatpush.bf16.msrb.mxu3 %v12757_v57 }
 0x503   : > { %v13582_v4 = vld [vmem:[%s14301_s6 + $0x16ec] sm:$0xf0] }
 0x504   : > { %v12180_v8 = vld [vmem:[%s14301_s6 + $0x1ab0] sm:$0xf]  ;;  %v11669_v21 = vor.u32 %v13582_v4, %v11668_v63  ;;  %7936 = vmatpush.bf16.msrb.mxu0 %v11157_v31 }
 0x505   : > { %v13710_v52 = vld [vmem:[%s14301_s6 + $0x1aec] sm:$0xf0] }
 0x506   : > { %v12692_v25 = vld [vmem:[%s14301_s6 + $0x1eb0] sm:$0xf]  ;;  %v12181_v61 = vor.u32 %v13710_v52, %v12180_v8  ;;  %7950 = vmatpush.bf16.msrb.mxu1 %v11669_v21 }
 0x507   : > { %v13838_v54 = vld [vmem:[%s14301_s6 + $0x1eec] sm:$0xf0] }
 0x508   : > { %v11092_v32 = vld [vmem:[%s14301_s6 + $0x1230] sm:$0xf]  ;;  %v12693_v56 = vor.u32 %v13838_v54, %v12692_v25  ;;  %7964 = vmatpush.bf16.msrb.mxu2 %v12181_v61 }
 0x509   : > { %v13438_v34 = vld [vmem:[%s14301_s6 + $0x126c] sm:$0xf0] }
 0x50a   : > { %v11604_v51 = vld [vmem:[%s14301_s6 + $0x1630] sm:$0xf]  ;;  %v11093_v49 = vor.u32 %v13438_v34, %v11092_v32  ;;  %7978 = vmatpush.bf16.msrb.mxu3 %v12693_v56  ;;  %v12966_v34 = vld [vmem:[%s14301_s6 + $0x3b4] sm:$0xf] }
 0x50b   : > { %v13566_v29 = vld [vmem:[%s14301_s6 + $0x166c] sm:$0xf0]  ;;  %v13094_v56 = vld [vmem:[%s14301_s6 + $0x7b4] sm:$0xf] }
 0x50c   : > { %v12116_v16 = vld [vmem:[%s14301_s6 + $0x1a30] sm:$0xf]  ;;  %v11605_v48 = vor.u32 %v13566_v29, %v11604_v51  ;;  %7937 = vmatpush.bf16.msrb.mxu0 %v11093_v49  ;;  %v9238_v51 = vld [vmem:[%s14301_s6 + $0x3f0] sm:$0xf0] }
 0x50d   : > { %v13694_v45 = vld [vmem:[%s14301_s6 + $0x1a6c] sm:$0xf0] }
 0x50e   : > { %v12628_v20 = vld [vmem:[%s14301_s6 + $0x1e30] sm:$0xf]  ;;  %v12117_v33 = vor.u32 %v13694_v45, %v12116_v16  ;;  %7951 = vmatpush.bf16.msrb.mxu1 %v11605_v48  ;;  %v9750_v16 = vld [vmem:[%s14301_s6 + $0x7f0] sm:$0xf0] }
 0x50f   : > { %v13822_v2 = vld [vmem:[%s14301_s6 + $0x1e6c] sm:$0xf0]  ;;  %v13222_v45 = vld [vmem:[%s14301_s6 + $0xbb4] sm:$0xf] }
 0x510   : > { %v11028_v23 = vld [vmem:[%s14301_s6 + $0x11b0] sm:$0xf]  ;;  %v12629_v41 = vor.u32 %v13822_v2, %v12628_v20  ;;  %7965 = vmatpush.bf16.msrb.mxu2 %v12117_v33  ;;  %v10262_v20 = vld [vmem:[%s14301_s6 + $0xbf0] sm:$0xf0] }
 0x511   : > { %v13422_v12 = vld [vmem:[%s14301_s6 + $0x11ec] sm:$0xf0]  ;;  %v13350_v48 = vld [vmem:[%s14301_s6 + $0xfb4] sm:$0xf] }
 0x512   : > { %v11540_v6 = vld [vmem:[%s14301_s6 + $0x15b0] sm:$0xf]  ;;  %v11029_v13 = vor.u32 %v13422_v12, %v11028_v23  ;;  %7979 = vmatpush.bf16.msrb.mxu3 %v12629_v41  ;;  %v10774_v33 = vld [vmem:[%s14301_s6 + $0xff0] sm:$0xf0]  ;;  %v9241_v12 = vor.u32 %v12966_v34, %v9238_v51  ;;  %v10265_v41 = vor.u32 %v13222_v45, %v10262_v20 }
 0x513   : > { %v13550_v53 = vld [vmem:[%s14301_s6 + $0x15ec] sm:$0xf0]  ;;  %v9494_v51 = vld [vmem:[%s14301_s6 + $0x5f0] sm:$0xf0] }
 0x514   : > { %v12052_v5 = vld [vmem:[%s14301_s6 + $0x19b0] sm:$0xf]  ;;  %v11541_v36 = vor.u32 %v13550_v53, %v11540_v6  ;;  %7938 = vmatpush.bf16.msrb.mxu0 %v11029_v13  ;;  %v9753_v6 = vor.u32 %v13094_v56, %v9750_v16  ;;  %v12950_v53 = vld [vmem:[%s14301_s6 + $0x334] sm:$0xf] }
 0x515   : > { %v13678_v24 = vld [vmem:[%s14301_s6 + $0x19ec] sm:$0xf0]  ;;  %v13206_v13 = vld [vmem:[%s14301_s6 + $0xb34] sm:$0xf] }
 0x516   : > { %v12564_v26 = vld [vmem:[%s14301_s6 + $0x1db0] sm:$0xf]  ;;  %v12053_v19 = vor.u32 %v13678_v24, %v12052_v5  ;;  %7952 = vmatpush.bf16.msrb.mxu1 %v11541_v36  ;;  %v9174_v5 = vld [vmem:[%s14301_s6 + $0x370] sm:$0xf0] }
 0x517   : > { %v13806_v15 = vld [vmem:[%s14301_s6 + $0x1dec] sm:$0xf0]  ;;  %v13078_v24 = vld [vmem:[%s14301_s6 + $0x734] sm:$0xf] }
 0x518   : > { %v10964_v3 = vld [vmem:[%s14301_s6 + $0x1130] sm:$0xf]  ;;  %v12565_v60 = vor.u32 %v13806_v15, %v12564_v26  ;;  %7966 = vmatpush.bf16.msrb.mxu2 %v12053_v19  ;;  %v10777_v26 = vor.u32 %v13350_v48, %v10774_v33  ;;  %v9686_v15 = vld [vmem:[%s14301_s6 + $0x770] sm:$0xf0] }
 0x519   : > { %v13406_v18 = vld [vmem:[%s14301_s6 + $0x116c] sm:$0xf0]  ;;  %v10198_v36 = vld [vmem:[%s14301_s6 + $0xb70] sm:$0xf0] }
 0x51a   : > { %v11476_v35 = vld [vmem:[%s14301_s6 + $0x1530] sm:$0xf]  ;;  %v10965_v38 = vor.u32 %v13406_v18, %v10964_v3  ;;  %7980 = vmatpush.bf16.msrb.mxu3 %v12565_v60  ;;  %v13334_v19 = vld [vmem:[%s14301_s6 + $0xf34] sm:$0xf]  ;;  %v9177_v18 = vor.u32 %v12950_v53, %v9174_v5  ;;  %v10201_v60 = vor.u32 %v13206_v13, %v10198_v36  ;;  %v16470_v13 = vpop.f32.mrf.mxu3 }
 0x51b   : > { %v13534_v14 = vld [vmem:[%s14301_s6 + $0x156c] sm:$0xf0]  ;;  %v10710_v3 = vld [vmem:[%s14301_s6 + $0xf70] sm:$0xf0] }
 0x51c   : > { %v11988_v11 = vld [vmem:[%s14301_s6 + $0x1930] sm:$0xf]  ;;  %v11477_v30 = vor.u32 %v13534_v14, %v11476_v35  ;;  %7939 = vmatpush.bf16.msrb.mxu0 %v10965_v38  ;;  %v9689_v35 = vor.u32 %v13078_v24, %v9686_v15  ;;  %v12934_v14 = vld [vmem:[%s14301_s6 + $0x2b4] sm:$0xf] }
 0x51d   : > { %v13662_v46 = vld [vmem:[%s14301_s6 + $0x196c] sm:$0xf0]  ;;  %v13190_v38 = vld [vmem:[%s14301_s6 + $0xab4] sm:$0xf] }
 0x51e   : > { %v12500_v27 = vld [vmem:[%s14301_s6 + $0x1d30] sm:$0xf]  ;;  %v11989_v7 = vor.u32 %v13662_v46, %v11988_v11  ;;  %7953 = vmatpush.bf16.msrb.mxu1 %v11477_v30  ;;  %v9110_v11 = vld [vmem:[%s14301_s6 + $0x2f0] sm:$0xf0] }
 0x51f   : > { %v13790_v37 = vld [vmem:[%s14301_s6 + $0x1d6c] sm:$0xf0]  ;;  %v13062_v46 = vld [vmem:[%s14301_s6 + $0x6b4] sm:$0xf] }
 0x520   : > { %v10900_v9 = vld [vmem:[%s14301_s6 + $0x10b0] sm:$0xf]  ;;  %v12501_v40 = vor.u32 %v13790_v37, %v12500_v27  ;;  %7967 = vmatpush.bf16.msrb.mxu2 %v11989_v7  ;;  %v10713_v27 = vor.u32 %v13334_v19, %v10710_v3  ;;  %v9622_v37 = vld [vmem:[%s14301_s6 + $0x6f0] sm:$0xf0] }
 0x521   : > { %v13390_v22 = vld [vmem:[%s14301_s6 + $0x10ec] sm:$0xf0]  ;;  %v10134_v30 = vld [vmem:[%s14301_s6 + $0xaf0] sm:$0xf0] }
 0x522   : > { %v11412_v62 = vld [vmem:[%s14301_s6 + $0x14b0] sm:$0xf]  ;;  %v10901_v28 = vor.u32 %v13390_v22, %v10900_v9  ;;  %7981 = vmatpush.bf16.msrb.mxu3 %v12501_v40  ;;  %v13318_v7 = vld [vmem:[%s14301_s6 + $0xeb4] sm:$0xf]  ;;  %v9113_v22 = vor.u32 %v12934_v14, %v9110_v11  ;;  %v10137_v40 = vor.u32 %v13190_v38, %v10134_v30 }
 0x523   : > { %v13518_v59 = vld [vmem:[%s14301_s6 + $0x14ec] sm:$0xf0]  ;;  %v10646_v9 = vld [vmem:[%s14301_s6 + $0xef0] sm:$0xf0] }
 0x524   : > { %v11924_v0 = vld [vmem:[%s14301_s6 + $0x18b0] sm:$0xf]  ;;  %v11413_v4 = vor.u32 %v13518_v59, %v11412_v62  ;;  %7940 = vmatpush.bf16.msrb.mxu0 %v10901_v28  ;;  %v9625_v62 = vor.u32 %v13062_v46, %v9622_v37  ;;  %v12918_v59 = vld [vmem:[%s14301_s6 + $0x234] sm:$0xf] }
 0x525   : > { %v13646_v42 = vld [vmem:[%s14301_s6 + $0x18ec] sm:$0xf0]  ;;  %v13174_v28 = vld [vmem:[%s14301_s6 + $0xa34] sm:$0xf] }
 0x526   : > { %v12436_v55 = vld [vmem:[%s14301_s6 + $0x1cb0] sm:$0xf]  ;;  %v11925_v8 = vor.u32 %v13646_v42, %v11924_v0  ;;  %7954 = vmatpush.bf16.msrb.mxu1 %v11413_v4  ;;  %v9046_v0 = vld [vmem:[%s14301_s6 + $0x270] sm:$0xf0] }
 0x527   : > { %v13774_v50 = vld [vmem:[%s14301_s6 + $0x1cec] sm:$0xf0]  ;;  %v13046_v42 = vld [vmem:[%s14301_s6 + $0x634] sm:$0xf] }
 0x528   : > { %v10836_v63 = vld [vmem:[%s14301_s6 + $0x1030] sm:$0xf]  ;;  %v12437_v31 = vor.u32 %v13774_v50, %v12436_v55  ;;  %7968 = vmatpush.bf16.msrb.mxu2 %v11925_v8  ;;  %v10649_v55 = vor.u32 %v13318_v7, %v10646_v9  ;;  %v9558_v50 = vld [vmem:[%s14301_s6 + $0x670] sm:$0xf0]  ;;  %v9049_v8 = vor.u32 %v12918_v59, %v9046_v0 }
 0x529   : > { %v13374_v57 = vld [vmem:[%s14301_s6 + $0x106c] sm:$0xf0]  ;;  %v10582_v4 = vld [vmem:[%s14301_s6 + $0xe70] sm:$0xf0] }
 0x52a   : > { %v11348_v52 = vld [vmem:[%s14301_s6 + $0x1430] sm:$0xf]  ;;  %v10837_v29 = vor.u32 %v13374_v57, %v10836_v63  ;;  %7982 = vmatpush.bf16.msrb.mxu3 %v12437_v31  ;;  %v10070_v63 = vld [vmem:[%s14301_s6 + $0xa70] sm:$0xf0] }
 0x52b   : > { %v13502_v25 = vld [vmem:[%s14301_s6 + $0x146c] sm:$0xf0]  ;;  %v13302_v57 = vld [vmem:[%s14301_s6 + $0xe34] sm:$0xf] }
 0x52c   : > { %v11860_v54 = vld [vmem:[%s14301_s6 + $0x1830] sm:$0xf]  ;;  %v11349_v2 = vor.u32 %v13502_v25, %v11348_v52  ;;  %7941 = vmatpush.bf16.msrb.mxu0 %v10837_v29  ;;  %v16448_v52 = vpop.f32.mrf.mxu0  ;;  %v9561_v25 = vor.u32 %v13046_v42, %v9558_v50  ;;  %v12902_v31 = vld [vmem:[%s14301_s6 + $0x1b4] sm:$0xf]  ;;  %v10585_v34 = vor.u32 %v13302_v57, %v10582_v4 }
 0x52d   : > { %v13630_v21 = vld [vmem:[%s14301_s6 + $0x186c] sm:$0xf0]  ;;  %v13158_v56 = vld [vmem:[%s14301_s6 + $0x9b4] sm:$0xf] }
 0x52e   : > { %v12372_v61 = vld [vmem:[%s14301_s6 + $0x1c30] sm:$0xf]  ;;  %v11861_v49 = vor.u32 %v13630_v21, %v11860_v54  ;;  %7955 = vmatpush.bf16.msrb.mxu1 %v11349_v2  ;;  %v10073_v54 = vor.u32 %v13174_v28, %v10070_v63  ;;  %v8982_v21 = vld [vmem:[%s14301_s6 + $0x1f0] sm:$0xf0] }
 0x52f   : > { %v13758_v32 = vld [vmem:[%s14301_s6 + $0x1c6c] sm:$0xf0]  ;;  %7942 = vmatmul.bf16.vlgmr.msrb.gmra.mxu0 %v14458_v39  ;;  %v10006_v29 = vld [vmem:[%s14301_s6 + $0x9f0] sm:$0xf0]  ;;  %v8985_v20 = vor.u32 %v12902_v31, %v8982_v21 }
 0x530   : > { %v12373_v23 = vor.u32 %v13758_v32, %v12372_v61  ;;  %7969 = vmatpush.bf16.msrb.mxu2 %v11861_v49  ;;  %7990 = vmatpush.bf16.msra.mxu0 %v9241_v12  ;;  %v13030_v61 = vld [vmem:[%s14301_s6 + $0x5b4] sm:$0xf]  ;;  %v16453_v32 = vpop.f32.mrf.mxu1  ;;  %v10009_v49 = vor.u32 %v13158_v56, %v10006_v29 }
 0x531   : > { %7956 = vmatmul.bf16.vlgmr.msrb.gmra.mxu1 %v14465_v44  ;;  %v13286_v16 = vld [vmem:[%s14301_s6 + $0xdb4] sm:$0xf]  ;;  %v9497_v2 = vor.u32 %v13030_v61, %v9494_v51 }
 0x532   : > { %7983 = vmatpush.bf16.msrb.mxu3 %v12373_v23  ;;  %8004 = vmatpush.bf16.msra.mxu1 %v9753_v6  ;;  %v10518_v45 = vld [vmem:[%s14301_s6 + $0xdf0] sm:$0xf0] }
 0x533   : > { %7970 = vmatmul.bf16.vlgmr.msrb.gmra.mxu2 %v14463_v43  ;;  %v12886_v48 = vld [vmem:[%s14301_s6 + $0x134] sm:$0xf]  ;;  %v10521_v12 = vor.u32 %v13286_v16, %v10518_v45 }
 0x534   : > { %8018 = vmatpush.bf16.msra.mxu2 %v10265_v41  ;;  %7991 = vmatpush.bf16.msra.mxu0 %v9177_v18  ;;  %v8918_v33 = vld [vmem:[%s14301_s6 + $0x170] sm:$0xf0] }
 0x535   : > { %7984 = vmatmul.bf16.vlgmr.msrb.gmra.mxu3 %v14469_v47  ;;  %v13014_v23 = vld [vmem:[%s14301_s6 + $0x534] sm:$0xf]  ;;  %v8921_v15 = vor.u32 %v12886_v48, %v8918_v33 }
 0x536   : > { %8032 = vmatpush.bf16.msra.mxu3 %v10777_v26  ;;  %8005 = vmatpush.bf16.msra.mxu1 %v9689_v35  ;;  %v9430_v6 = vld [vmem:[%s14301_s6 + $0x570] sm:$0xf0]  ;;  %v16468_v26 = vpop.f32.mrf.mxu2 }
 0x537   : > { %v13142_v41 = vld [vmem:[%s14301_s6 + $0x934] sm:$0xf]  ;;  %v9433_v36 = vor.u32 %v13014_v23, %v9430_v6 }
 0x538   : > { %8019 = vmatpush.bf16.msra.mxu2 %v10201_v60  ;;  %7992 = vmatpush.bf16.msra.mxu0 %v9113_v22  ;;  %v9942_v53 = vld [vmem:[%s14301_s6 + $0x970] sm:$0xf0]  ;;  %v16482_v30 = vpop.f32.mrf.mxu1 }
 0x539   : > { %v13270_v5 = vld [vmem:[%s14301_s6 + $0xd34] sm:$0xf]  ;;  %v9945_v19 = vor.u32 %v13142_v41, %v9942_v53 }
 0x53a   : > { %8033 = vmatpush.bf16.msra.mxu3 %v10713_v27  ;;  %8006 = vmatpush.bf16.msra.mxu1 %v9625_v62  ;;  %v10454_v24 = vld [vmem:[%s14301_s6 + $0xd70] sm:$0xf0]  ;;  %v16478_v27 = vpop.f32.mrf.mxu0 }
 0x53b   : > { %v12870_v3 = vld [vmem:[%s14301_s6 + $0xb4] sm:$0xf]  ;;  %v10457_v60 = vor.u32 %v13270_v5, %v10454_v24 }
 0x53c   : > { %8020 = vmatpush.bf16.msra.mxu2 %v10137_v40  ;;  %7993 = vmatpush.bf16.msra.mxu0 %v9049_v8  ;;  %v8854_v18 = vld [vmem:[%s14301_s6 + $0xf0] sm:$0xf0] }
 0x53d   : > { %v12998_v35 = vld [vmem:[%s14301_s6 + $0x4b4] sm:$0xf]  ;;  %v8857_v7 = vor.u32 %v12870_v3, %v8854_v18 }
 0x53e   : > { %8034 = vmatpush.bf16.msra.mxu3 %v10649_v55  ;;  %8007 = vmatpush.bf16.msra.mxu1 %v9561_v25  ;;  %v9366_v14 = vld [vmem:[%s14301_s6 + $0x4f0] sm:$0xf0]  ;;  %v16500_v29 = vpop.f32.mrf.mxu2 }
 0x53f   : > { %v13126_v11 = vld [vmem:[%s14301_s6 + $0x8b4] sm:$0xf]  ;;  %v9369_v62 = vor.u32 %v12998_v35, %v9366_v14 }
 0x540   : > { %8021 = vmatpush.bf16.msra.mxu2 %v10073_v54  ;;  %7994 = vmatpush.bf16.msra.mxu0 %v8985_v20  ;;  %v9878_v46 = vld [vmem:[%s14301_s6 + $0x8f0] sm:$0xf0]  ;;  %v16502_v20 = vpop.f32.mrf.mxu3 }
 0x541   : > { %v13254_v37 = vld [vmem:[%s14301_s6 + $0xcb4] sm:$0xf]  ;;  %v9881_v40 = vor.u32 %v13126_v11, %v9878_v46 }
 0x542   : > { %8035 = vmatpush.bf16.msra.mxu3 %v10585_v34  ;;  %8008 = vmatpush.bf16.msra.mxu1 %v9497_v2  ;;  %v10390_v38 = vld [vmem:[%s14301_s6 + $0xcf0] sm:$0xf0]  ;;  %v16510_v5 = vpop.f32.mrf.mxu0 }
 0x543   : > { %v12854_v9 = vld [vmem:[%s14301_s6 + $0x34] sm:$0xf]  ;;  %v10393_v55 = vor.u32 %v13254_v37, %v10390_v38 }
 0x544   : > { %8022 = vmatpush.bf16.msra.mxu2 %v10009_v49  ;;  %7995 = vmatpush.bf16.msra.mxu0 %v8921_v15  ;;  %v8790_v22 = vld [vmem:[%s14301_s6 + $0x70] sm:$0xf0] }
 0x545   : > { %v12982_v59 = vld [vmem:[%s14301_s6 + $0x434] sm:$0xf]  ;;  %v8793_v25 = vor.u32 %v12854_v9, %v8790_v22 }
 0x546   : > { %8036 = vmatpush.bf16.msra.mxu3 %v10521_v12  ;;  %8009 = vmatpush.bf16.msra.mxu1 %v9433_v36  ;;  %v9302_v0 = vld [vmem:[%s14301_s6 + $0x470] sm:$0xf0]  ;;  %v16514_v36 = vpop.f32.mrf.mxu1 }
 0x547   : > { %v13110_v42 = vld [vmem:[%s14301_s6 + $0x834] sm:$0xf]  ;;  %v9305_v61 = vor.u32 %v12982_v59, %v9302_v0 }
 0x548   : > { %8023 = vmatpush.bf16.msra.mxu2 %v9945_v19  ;;  %v9814_v50 = vld [vmem:[%s14301_s6 + $0x870] sm:$0xf0]  ;;  %7996 = vmatpush.bf16.msra.mxu0 %v8857_v7 }
 0x549   : > { %v13238_v28 = vld [vmem:[%s14301_s6 + $0xc34] sm:$0xf]  ;;  %v9817_v34 = vor.u32 %v13110_v42, %v9814_v50 }
 0x54a   : > { %8037 = vmatpush.bf16.msra.mxu3 %v10457_v60  ;;  %v10326_v63 = vld [vmem:[%s14301_s6 + $0xc70] sm:$0xf0]  ;;  %8010 = vmatpush.bf16.msra.mxu1 %v9369_v62 }
 0x54b   : > { %v13478_v57 = vld [vmem:[%s14301_s6 + $0x13b4] sm:$0xf]  ;;  %v10329_v16 = vor.u32 %v13238_v28, %v10326_v63 }
 0x54c   : > { %v11286_v4 = vld [vmem:[%s14301_s6 + $0x13f0] sm:$0xf0]  ;;  %8024 = vmatpush.bf16.msra.mxu2 %v9881_v40  ;;  %7997 = vmatpush.bf16.msra.mxu0 %v8793_v25 }
 0x54d   : > { %v13606_v8 = vld [vmem:[%s14301_s6 + $0x17b4] sm:$0xf]  ;;  %v11289_v45 = vor.u32 %v13478_v57, %v11286_v4  ;;  %v16536_v4 = vpop.f32.mrf.mxu3 }
 0x54e   : > { %v11798_v54 = vld [vmem:[%s14301_s6 + $0x17f0] sm:$0xf0]  ;;  %8038 = vmatpush.bf16.msra.mxu3 %v10393_v55  ;;  %8011 = vmatpush.bf16.msra.mxu1 %v9305_v61  ;;  %v16531_v55 = vpop.f32.mrf.mxu2 }
 0x54f   : > { %v13734_v31 = vld [vmem:[%s14301_s6 + $0x1bb4] sm:$0xf]  ;;  %v11801_v2 = vor.u32 %v13606_v8, %v11798_v54  ;;  %7998 = vmatmul.bf16.vlgmr.msra.gmra.mxu0 %v14389_v58 }
 0x550   : > { %v12310_v21 = vld [vmem:[%s14301_s6 + $0x1bf0] sm:$0xf0]  ;;  %8025 = vmatpush.bf16.msra.mxu2 %v9817_v34  ;;  %8046 = vmatpush.bf16.msrb.mxu0 %v11289_v45 }
 0x551   : > { %v13862_v51 = vld [vmem:[%s14301_s6 + $0x1fb4] sm:$0xf]  ;;  %v12313_v49 = vor.u32 %v13734_v31, %v12310_v21  ;;  %8012 = vmatmul.bf16.vlgmr.msra.gmra.mxu1 %v14401_v10  ;;  %v16540_v31 = vpop.f32.mrf.mxu0 }
 0x552   : > { %v12822_v56 = vld [vmem:[%s14301_s6 + $0x1ff0] sm:$0xf0]  ;;  %8039 = vmatpush.bf16.msra.mxu3 %v10329_v16  ;;  %8060 = vmatpush.bf16.msrb.mxu1 %v11801_v2  ;;  %v16545_v16 = vpop.f32.mrf.mxu1 }
 0x553   : > { %v13462_v48 = vld [vmem:[%s14301_s6 + $0x1334] sm:$0xf]  ;;  %v12825_v12 = vor.u32 %v13862_v51, %v12822_v56  ;;  %8026 = vmatmul.bf16.vlgmr.msra.gmra.mxu2 %v14394_v1 }
 0x554   : > { %v11222_v33 = vld [vmem:[%s14301_s6 + $0x1370] sm:$0xf0]  ;;  %8074 = vmatpush.bf16.msrb.mxu2 %v12313_v49 }
 0x555   : > { %v13590_v23 = vld [vmem:[%s14301_s6 + $0x1734] sm:$0xf]  ;;  %v11225_v19 = vor.u32 %v13462_v48, %v11222_v33  ;;  %8040 = vmatmul.bf16.vlgmr.msra.gmra.mxu3 %v14406_v17 }
 0x556   : > { %v11734_v6 = vld [vmem:[%s14301_s6 + $0x1770] sm:$0xf0]  ;;  %8088 = vmatpush.bf16.msrb.mxu3 %v12825_v12 }
 0x557   : > { %v13718_v41 = vld [vmem:[%s14301_s6 + $0x1b34] sm:$0xf]  ;;  %v11737_v3 = vor.u32 %v13590_v23, %v11734_v6  ;;  %8047 = vmatpush.bf16.msrb.mxu0 %v11225_v19 }
 0x558   : > { %v12246_v53 = vld [vmem:[%s14301_s6 + $0x1b70] sm:$0xf0] }
 0x559   : > { %v13846_v24 = vld [vmem:[%s14301_s6 + $0x1f34] sm:$0xf]  ;;  %v12249_v18 = vor.u32 %v13718_v41, %v12246_v53  ;;  %8061 = vmatpush.bf16.msrb.mxu1 %v11737_v3 }
 0x55a   : > { %v12758_v15 = vld [vmem:[%s14301_s6 + $0x1f70] sm:$0xf0] }
 0x55b   : > { %v13446_v35 = vld [vmem:[%s14301_s6 + $0x12b4] sm:$0xf]  ;;  %v12761_v11 = vor.u32 %v13846_v24, %v12758_v15  ;;  %8075 = vmatpush.bf16.msrb.mxu2 %v12249_v18 }
 0x55c   : > { %v11158_v60 = vld [vmem:[%s14301_s6 + $0x12f0] sm:$0xf0] }
 0x55d   : > { %v13574_v14 = vld [vmem:[%s14301_s6 + $0x16b4] sm:$0xf]  ;;  %v11161_v22 = vor.u32 %v13446_v35, %v11158_v60  ;;  %8089 = vmatpush.bf16.msrb.mxu3 %v12761_v11  ;;  %v16560_v11 = vpop.f32.mrf.mxu2 }
 0x55e   : > { %v11670_v46 = vld [vmem:[%s14301_s6 + $0x16f0] sm:$0xf0] }
 0x55f   : > { %v13702_v37 = vld [vmem:[%s14301_s6 + $0x1ab4] sm:$0xf]  ;;  %v11673_v62 = vor.u32 %v13574_v14, %v11670_v46  ;;  %8048 = vmatpush.bf16.msrb.mxu0 %v11161_v22  ;;  %v7775_v22 = vpop.f32.mrf.mxu0 }
 0x560   : > { %v12182_v38 = vld [vmem:[%s14301_s6 + $0x1af0] sm:$0xf0] }
 0x561   : > { %v13830_v7 = vld [vmem:[%s14301_s6 + $0x1eb4] sm:$0xf]  ;;  %v12185_v40 = vor.u32 %v13702_v37, %v12182_v38  ;;  %8062 = vmatpush.bf16.msrb.mxu1 %v11673_v62  ;;  %v7678_v37 = vadd.f32 %v16453_v32, %v16448_v52  ;;  %v16564_v38 = vpop.f32.mrf.mxu3 }
 0x562   : > { %v12694_v9 = vld [vmem:[%s14301_s6 + $0x1ef0] sm:$0xf0] }
 0x563   : > { %v13430_v59 = vld [vmem:[%s14301_s6 + $0x1234] sm:$0xf]  ;;  %v12697_v50 = vor.u32 %v13830_v7, %v12694_v9  ;;  %8076 = vmatpush.bf16.msrb.mxu2 %v12185_v40 }
 0x564   : > { %v11094_v0 = vld [vmem:[%s14301_s6 + $0x1270] sm:$0xf0] }
 0x565   : > { %v13558_v42 = vld [vmem:[%s14301_s6 + $0x1634] sm:$0xf]  ;;  %v11097_v54 = vor.u32 %v13430_v59, %v11094_v0  ;;  %8090 = vmatpush.bf16.msrb.mxu3 %v12697_v50  ;;  %v7789_v50 = vpop.f32.mrf.mxu1 }
 0x566   : > { %v11606_v28 = vld [vmem:[%s14301_s6 + $0x1670] sm:$0xf0] }
 0x567   : > { %v13686_v63 = vld [vmem:[%s14301_s6 + $0x1a34] sm:$0xf]  ;;  %v11609_v21 = vor.u32 %v13558_v42, %v11606_v28  ;;  %8049 = vmatpush.bf16.msrb.mxu0 %v11097_v54  ;;  %v7692_v54 = vadd.f32 %v16468_v26, %v7678_v37  ;;  %v9756_v26 = vld [vmem:[%s14301_s6 + $0x7b8] sm:$0xf] }
 0x568   : > { %v12118_v57 = vld [vmem:[%s14301_s6 + $0x1a70] sm:$0xf0] }
 0x569   : > { %v13814_v8 = vld [vmem:[%s14301_s6 + $0x1e34] sm:$0xf]  ;;  %v12121_v61 = vor.u32 %v13686_v63, %v12118_v57  ;;  %8063 = vmatpush.bf16.msrb.mxu1 %v11609_v21 }
 0x56a   : > { %v12630_v25 = vld [vmem:[%s14301_s6 + $0x1e70] sm:$0xf0] }
 0x56b   : > { %v13414_v34 = vld [vmem:[%s14301_s6 + $0x11b4] sm:$0xf]  ;;  %v12633_v45 = vor.u32 %v13814_v8, %v12630_v25  ;;  %8077 = vmatpush.bf16.msrb.mxu2 %v12121_v61 }
 0x56c   : > { %v11030_v51 = vld [vmem:[%s14301_s6 + $0x11f0] sm:$0xf0] }
 0x56d   : > { %v13542_v56 = vld [vmem:[%s14301_s6 + $0x15b4] sm:$0xf]  ;;  %v11033_v12 = vor.u32 %v13414_v34, %v11030_v51  ;;  %8091 = vmatpush.bf16.msrb.mxu3 %v12633_v45 }
 0x56e   : > { %v11542_v2 = vld [vmem:[%s14301_s6 + $0x15f0] sm:$0xf0] }
 0x56f   : > { %v13670_v49 = vld [vmem:[%s14301_s6 + $0x19b4] sm:$0xf]  ;;  %v11545_v6 = vor.u32 %v13542_v56, %v11542_v2  ;;  %8050 = vmatpush.bf16.msrb.mxu0 %v11033_v12 }
 0x570   : > { %v12054_v48 = vld [vmem:[%s14301_s6 + $0x19f0] sm:$0xf0] }
 0x571   : > { %v13798_v33 = vld [vmem:[%s14301_s6 + $0x1db4] sm:$0xf]  ;;  %v12057_v41 = vor.u32 %v13670_v49, %v12054_v48  ;;  %8064 = vmatpush.bf16.msrb.mxu1 %v11545_v6  ;;  %v13103_v6 = vld [vmem:[%s14301_s6 + $0x7f4] sm:$0xf0] }
 0x572   : > { %v12566_v23 = vld [vmem:[%s14301_s6 + $0x1df0] sm:$0xf0] }
 0x573   : > { %v13398_v53 = vld [vmem:[%s14301_s6 + $0x1134] sm:$0xf]  ;;  %v12569_v19 = vor.u32 %v13798_v33, %v12566_v23  ;;  %8078 = vmatpush.bf16.msrb.mxu2 %v12057_v41  ;;  %v9244_v33 = vld [vmem:[%s14301_s6 + $0x3b8] sm:$0xf] }
 0x574   : > { %v10966_v24 = vld [vmem:[%s14301_s6 + $0x1170] sm:$0xf0]  ;;  %v12975_v23 = vld [vmem:[%s14301_s6 + $0x3f4] sm:$0xf0] }
 0x575   : > { %v13526_v15 = vld [vmem:[%s14301_s6 + $0x1534] sm:$0xf]  ;;  %v10969_v46 = vor.u32 %v13398_v53, %v10966_v24  ;;  %8092 = vmatpush.bf16.msrb.mxu3 %v12569_v19  ;;  %v10268_v41 = vld [vmem:[%s14301_s6 + $0xbb8] sm:$0xf]  ;;  %v7803_v24 = vpop.f32.mrf.mxu2  ;;  %v9245_v37 = vor.u32 %v12975_v23, %v9244_v33 }
 0x576   : > { %v11478_v3 = vld [vmem:[%s14301_s6 + $0x1570] sm:$0xf0]  ;;  %v13231_v53 = vld [vmem:[%s14301_s6 + $0xbf4] sm:$0xf0] }
 0x577   : > { %v13654_v18 = vld [vmem:[%s14301_s6 + $0x1934] sm:$0xf]  ;;  %v11481_v7 = vor.u32 %v13526_v15, %v11478_v3  ;;  %8051 = vmatpush.bf16.msrb.mxu0 %v10969_v46  ;;  %v7706_v15 = vadd.f32 %v16470_v13, %v7692_v54  ;;  %v10269_v13 = vor.u32 %v13231_v53, %v10268_v41  ;;  %v9052_v41 = vld [vmem:[%s14301_s6 + $0x238] sm:$0xf] }
 0x578   : > { %v11990_v35 = vld [vmem:[%s14301_s6 + $0x1970] sm:$0xf0]  ;;  %v12927_v53 = vld [vmem:[%s14301_s6 + $0x274] sm:$0xf0] }
 0x579   : > { %v13782_v60 = vld [vmem:[%s14301_s6 + $0x1d34] sm:$0xf]  ;;  %v11993_v9 = vor.u32 %v13654_v18, %v11990_v35  ;;  %8065 = vmatpush.bf16.msrb.mxu1 %v11481_v7  ;;  %v10780_v18 = vld [vmem:[%s14301_s6 + $0xfb8] sm:$0xf]  ;;  %v9757_v7 = vor.u32 %v13103_v6, %v9756_v26 }
 0x57a   : > { %v12502_v14 = vld [vmem:[%s14301_s6 + $0x1d70] sm:$0xf0]  ;;  %v13359_v35 = vld [vmem:[%s14301_s6 + $0xff4] sm:$0xf0] }
 0x57b   : > { %v13382_v62 = vld [vmem:[%s14301_s6 + $0x10b4] sm:$0xf]  ;;  %v12505_v0 = vor.u32 %v13782_v60, %v12502_v14  ;;  %8079 = vmatpush.bf16.msrb.mxu2 %v11993_v9  ;;  %v7817_v60 = vpop.f32.mrf.mxu3  ;;  %v7790_v14 = vadd.f32 %v7789_v50, %v7775_v22  ;;  %v7777_v9 = vpop.f32.mrf.mxu0  ;;  %v7720_v22 = vadd.f32 %v16510_v5, %v7706_v15  ;;  %v10716_v50 = vld [vmem:[%s14301_s6 + $0xf38] sm:$0xf] }
 0x57c   : > { %v10902_v40 = vld [vmem:[%s14301_s6 + $0x10f0] sm:$0xf0]  ;;  %v13055_v15 = vld [vmem:[%s14301_s6 + $0x674] sm:$0xf0] }
 0x57d   : > { %v13510_v59 = vld [vmem:[%s14301_s6 + $0x14b4] sm:$0xf]  ;;  %v10905_v57 = vor.u32 %v13382_v62, %v10902_v40  ;;  %8093 = vmatpush.bf16.msrb.mxu3 %v12505_v0  ;;  %v9180_v62 = vld [vmem:[%s14301_s6 + $0x338] sm:$0xf]  ;;  %v10781_v0 = vor.u32 %v13359_v35, %v10780_v18 }
 0x57e   : > { %v11414_v42 = vld [vmem:[%s14301_s6 + $0x14f0] sm:$0xf0]  ;;  %v12959_v40 = vld [vmem:[%s14301_s6 + $0x374] sm:$0xf0] }
 0x57f   : > { %v13638_v52 = vld [vmem:[%s14301_s6 + $0x18b4] sm:$0xf]  ;;  %v11417_v21 = vor.u32 %v13510_v59, %v11414_v42  ;;  %8052 = vmatpush.bf16.msrb.mxu0 %v10905_v57  ;;  %v9692_v59 = vld [vmem:[%s14301_s6 + $0x738] sm:$0xf]  ;;  %v7680_v57 = vadd.f32 %v16482_v30, %v16478_v27 }
 0x580   : > { %v11926_v32 = vld [vmem:[%s14301_s6 + $0x18f0] sm:$0xf0]  ;;  %v13087_v42 = vld [vmem:[%s14301_s6 + $0x774] sm:$0xf0] }
 0x581   : > { %v13766_v28 = vld [vmem:[%s14301_s6 + $0x1cb4] sm:$0xf]  ;;  %v11929_v61 = vor.u32 %v13638_v52, %v11926_v32  ;;  %8066 = vmatpush.bf16.msrb.mxu1 %v11417_v21  ;;  %v10204_v52 = vld [vmem:[%s14301_s6 + $0xb38] sm:$0xf]  ;;  %v9693_v5 = vor.u32 %v13087_v42, %v9692_v59 }
 0x582   : > { %v12438_v63 = vld [vmem:[%s14301_s6 + $0x1cf0] sm:$0xf0]  ;;  %v13215_v32 = vld [vmem:[%s14301_s6 + $0xb74] sm:$0xf0] }
 0x583   : > { %v13366_v8 = vld [vmem:[%s14301_s6 + $0x1034] sm:$0xf]  ;;  %v12441_v45 = vor.u32 %v13766_v28, %v12438_v63  ;;  %8080 = vmatpush.bf16.msrb.mxu2 %v11929_v61  ;;  %v7791_v28 = vpop.f32.mrf.mxu1  ;;  %v13343_v63 = vld [vmem:[%s14301_s6 + $0xf74] sm:$0xf0]  ;;  %v10205_v54 = vor.u32 %v13215_v32, %v10204_v52  ;;  %v7819_v6 = vpop.f32.mrf.mxu3 }
 0x584   : > { %v10838_v25 = vld [vmem:[%s14301_s6 + $0x1070] sm:$0xf0]  ;;  %v9116_v21 = vld [vmem:[%s14301_s6 + $0x2b8] sm:$0xf]  ;;  %v7792_v35 = vadd.f32 %v7791_v28, %v7777_v9 }
 0x585   : > { %v13494_v34 = vld [vmem:[%s14301_s6 + $0x1434] sm:$0xf]  ;;  %v10841_v12 = vor.u32 %v13366_v8, %v10838_v25  ;;  %8094 = vmatpush.bf16.msrb.mxu3 %v12441_v45  ;;  %v7804_v8 = vadd.f32 %v7803_v24, %v7790_v14  ;;  %v9181_v25 = vor.u32 %v12959_v40, %v9180_v62  ;;  %v12943_v61 = vld [vmem:[%s14301_s6 + $0x2f4] sm:$0xf0]  ;;  %v7734_v45 = vadd.f32 %v16514_v36, %v7720_v22  ;;  %v7805_v36 = vpop.f32.mrf.mxu2 }
 0x586   : > { %v11350_v51 = vld [vmem:[%s14301_s6 + $0x1470] sm:$0xf0]  ;;  %v13071_v27 = vld [vmem:[%s14301_s6 + $0x6f4] sm:$0xf0]  ;;  %v9117_v23 = vor.u32 %v12943_v61, %v9116_v21 }
 0x587   : > { %v13622_v56 = vld [vmem:[%s14301_s6 + $0x1834] sm:$0xf]  ;;  %v11353_v19 = vor.u32 %v13494_v34, %v11350_v51  ;;  %8053 = vmatpush.bf16.msrb.mxu0 %v10841_v12  ;;  %v9628_v34 = vld [vmem:[%s14301_s6 + $0x6b8] sm:$0xf]  ;;  %v10717_v51 = vor.u32 %v13343_v63, %v10716_v50  ;;  %v7818_v33 = vadd.f32 %v7817_v60, %v7804_v8  ;;  %v7748_v18 = vadd.f32 %v16531_v55, %v7734_v45  ;;  %v7831_v60 = vpop.f32.mrf.mxu0 }
 0x588   : > { %v11862_v2 = vld [vmem:[%s14301_s6 + $0x1870] sm:$0xf0]  ;;  %v10140_v30 = vld [vmem:[%s14301_s6 + $0xab8] sm:$0xf]  ;;  %v9629_v26 = vor.u32 %v13071_v27, %v9628_v34 }
 0x589   : > { %v13750_v49 = vld [vmem:[%s14301_s6 + $0x1c34] sm:$0xf]  ;;  %v11865_v3 = vor.u32 %v13622_v56, %v11862_v2  ;;  %8067 = vmatpush.bf16.msrb.mxu1 %v11353_v19  ;;  %v13199_v56 = vld [vmem:[%s14301_s6 + $0xaf4] sm:$0xf0]  ;;  %v7762_v22 = vadd.f32 %v16536_v4, %v7748_v18 }
 0x58a   : > { %v12374_v48 = vld [vmem:[%s14301_s6 + $0x1c70] sm:$0xf0]  ;;  %8054 = vmatmul.bf16.vlgmr.msrb.gmra.mxu0 %v14458_v39  ;;  %v10652_v2 = vld [vmem:[%s14301_s6 + $0xeb8] sm:$0xf]  ;;  %v10141_v12 = vor.u32 %v13199_v56, %v10140_v30 }
 0x58b   : > { %v12377_v46 = vor.u32 %v13750_v49, %v12374_v48  ;;  %8081 = vmatpush.bf16.msrb.mxu2 %v11865_v3  ;;  %8102 = vmatpush.bf16.msra.mxu0 %v9245_v37  ;;  %v13327_v49 = vld [vmem:[%s14301_s6 + $0xef4] sm:$0xf0]  ;;  %v7694_v48 = vadd.f32 %v16500_v29, %v7680_v57  ;;  %v7845_v62 = vpop.f32.mrf.mxu1  ;;  %v7806_v57 = vadd.f32 %v7805_v36, %v7792_v35  ;;  %v7873_v36 = vpop.f32.mrf.mxu3 }
 0x58c   : > { %8068 = vmatmul.bf16.vlgmr.msrb.gmra.mxu1 %v14465_v44  ;;  %v9564_v24 = vld [vmem:[%s14301_s6 + $0x638] sm:$0xf]  ;;  %v10653_v29 = vor.u32 %v13327_v49, %v10652_v2 }
 0x58d   : > { %8095 = vmatpush.bf16.msrb.mxu3 %v12377_v46  ;;  %8116 = vmatpush.bf16.msra.mxu1 %v9757_v7  ;;  %v10076_v19 = vld [vmem:[%s14301_s6 + $0xa38] sm:$0xf]  ;;  %v7708_v37 = vadd.f32 %v16502_v20, %v7694_v48  ;;  %v7832_v7 = vadd.f32 %v7831_v60, %v7818_v33  ;;  %v9565_v40 = vor.u32 %v13055_v15, %v9564_v24  ;;  %v7859_v56 = vpop.f32.mrf.mxu2 }
 0x58e   : > { %8082 = vmatmul.bf16.vlgmr.msrb.gmra.mxu2 %v14463_v43  ;;  %v13183_v3 = vld [vmem:[%s14301_s6 + $0xa74] sm:$0xf0]  ;;  %v7820_v48 = vadd.f32 %v7819_v6, %v7806_v57 }
 0x58f   : > { %8130 = vmatpush.bf16.msra.mxu2 %v10269_v13  ;;  %8103 = vmatpush.bf16.msra.mxu0 %v9181_v25  ;;  %v10588_v14 = vld [vmem:[%s14301_s6 + $0xe38] sm:$0xf]  ;;  %v9053_v13 = vor.u32 %v12927_v53, %v9052_v41  ;;  %v10077_v55 = vor.u32 %v13183_v3, %v10076_v19  ;;  %v7722_v42 = vadd.f32 %v16540_v31, %v7708_v37 }
 0x590   : > { %8096 = vmatmul.bf16.vlgmr.msrb.gmra.mxu3 %v14469_v47  ;;  %v13311_v46 = vld [vmem:[%s14301_s6 + $0xe74] sm:$0xf0]  ;;  %v7846_v8 = vadd.f32 %v7845_v62, %v7832_v7 }
 0x591   : > { %8144 = vmatpush.bf16.msra.mxu3 %v10781_v0  ;;  %8117 = vmatpush.bf16.msra.mxu1 %v9693_v5  ;;  %v8988_v9 = vld [vmem:[%s14301_s6 + $0x1b8] sm:$0xf]  ;;  %v10589_v20 = vor.u32 %v13311_v46, %v10588_v14  ;;  %v7736_v27 = vadd.f32 %v16545_v16, %v7722_v42 }
 0x592   : > { %v12911_v59 = vld [vmem:[%s14301_s6 + $0x1f4] sm:$0xf0]  ;;  %v7860_v33 = vadd.f32 %v7859_v56, %v7846_v8 }
 0x593   : > { %8131 = vmatpush.bf16.msra.mxu2 %v10205_v54  ;;  %8104 = vmatpush.bf16.msra.mxu0 %v9117_v23  ;;  %v9500_v0 = vld [vmem:[%s14301_s6 + $0x5b8] sm:$0xf]  ;;  %v8989_v31 = vor.u32 %v12911_v59, %v8988_v9  ;;  %v7833_v23 = vpop.f32.mrf.mxu0  ;;  %v7750_v16 = vadd.f32 %v16560_v11, %v7736_v27  ;;  %v7847_v35 = vpop.f32.mrf.mxu1 }
 0x594   : > { %v13039_v52 = vld [vmem:[%s14301_s6 + $0x5f4] sm:$0xf0]  ;;  %v7834_v6 = vadd.f32 %v7833_v23, %v7820_v48 }
 0x595   : > { %8145 = vmatpush.bf16.msra.mxu3 %v10717_v51  ;;  %8118 = vmatpush.bf16.msra.mxu1 %v9629_v26  ;;  %v10012_v32 = vld [vmem:[%s14301_s6 + $0x9b8] sm:$0xf]  ;;  %v9501_v21 = vor.u32 %v13039_v52, %v9500_v0  ;;  %v7861_v57 = vpop.f32.mrf.mxu2 }
 0x596   : > { %v13167_v28 = vld [vmem:[%s14301_s6 + $0x9f4] sm:$0xf0] }
 0x597   : > { %8132 = vmatpush.bf16.msra.mxu2 %v10141_v12  ;;  %v16636_v50 = vld [vmem:[%s14945_s7 + $0x8] sm:$0xff]  ;;  %8105 = vmatpush.bf16.msra.mxu0 %v9053_v13  ;;  %v10013_v61 = vor.u32 %v13167_v28, %v10012_v32 }
 0x598   : > { %v8439_v63 = vperm.slane %v16636_v50, 2  ;;  %v10524_v25 = vld [vmem:[%s14301_s6 + $0xdb8] sm:$0xf]  ;;  %v8440_v26 = vperm.slane %v16636_v50, 3 }
 0x599   : > { %8146 = vmatpush.bf16.msra.mxu3 %v10653_v29  ;;  %v13295_v5 = vld [vmem:[%s14301_s6 + $0xdf4] sm:$0xf0]  ;;  %8119 = vmatpush.bf16.msra.mxu1 %v9565_v40  ;;  %v7874_v29 = vadd.f32 %v7873_v36, %v7860_v33  ;;  %v7764_v40 = vadd.f32 %v16564_v38, %v7750_v16 }
 0x59a   : > { %v8924_v54 = vld [vmem:[%s14301_s6 + $0x138] sm:$0xf]  ;;  %v10525_v30 = vor.u32 %v13295_v5, %v10524_v25  ;;  %v8471_v49 = vadd.f32 %v8439_v63, %v7762_v22 }
 0x59b   : > { %8133 = vmatpush.bf16.msra.mxu2 %v10077_v55  ;;  %v12895_v4 = vld [vmem:[%s14301_s6 + $0x174] sm:$0xf0]  ;;  %8106 = vmatpush.bf16.msra.mxu0 %v8989_v31  ;;  %v8472_v7 = vadd.f32 %v8440_v26, %v7874_v29 }
 0x59c   : > { %v9436_v34 = vld [vmem:[%s14301_s6 + $0x538] sm:$0xf]  ;;  %v8925_v53 = vor.u32 %v12895_v4, %v8924_v54  ;;  %v8503_v37 = vmax.f32 %v8471_v49, 0.0 }
 0x59d   : > { %v13023_v51 = vld [vmem:[%s14301_s6 + $0x574] sm:$0xf0]  ;;  %8147 = vmatpush.bf16.msra.mxu3 %v10589_v20  ;;  %8120 = vmatpush.bf16.msra.mxu1 %v9501_v21  ;;  %v8504_v42 = vmax.f32 %v8472_v7, 0.0  ;;  %v7848_v20 = vadd.f32 %v7847_v35, %v7834_v6  ;;  %v7875_v21 = vpop.f32.mrf.mxu3 }
 0x59e   : > { %v9948_v45 = vld [vmem:[%s14301_s6 + $0x938] sm:$0xf]  ;;  %v9437_v24 = vor.u32 %v13023_v51, %v9436_v34  ;;  %v8487_v51 = vadd.f32 %v8439_v63, %v7764_v40 }
 0x59f   : > { %v13151_v2 = vld [vmem:[%s14301_s6 + $0x974] sm:$0xf0]  ;;  %8134 = vmatpush.bf16.msra.mxu2 %v10013_v61  ;;  %8107 = vmatpush.bf16.msra.mxu0 %v8925_v53  ;;  %v8530_v31 = vpack.c.bf16 %v8504_v42, %v8503_v37  ;;  %v7862_v54 = vadd.f32 %v7861_v57, %v7848_v20 }
 0x5a0   : > { %v10460_v12 = vld [vmem:[%s14301_s6 + $0xd38] sm:$0xf]  ;;  %v9949_v15 = vor.u32 %v13151_v2, %v9948_v45 }
 0x5a1   : > { %v13279_v41 = vld [vmem:[%s14301_s6 + $0xd74] sm:$0xf0]  ;;  %8148 = vmatpush.bf16.msra.mxu3 %v10525_v30  ;;  %8121 = vmatpush.bf16.msra.mxu1 %v9437_v24  ;;  %8546 = vst [vmem:[%s15004_s20 + $0x28] sm:$0xff] %v8530_v31  ;;  %v7876_v2 = vadd.f32 %v7875_v21, %v7862_v54 }
 0x5a2   : > { %v8860_v19 = vld [vmem:[%s14301_s6 + $0xb8] sm:$0xf]  ;;  %v10461_v11 = vor.u32 %v13279_v41, %v10460_v12 }
 0x5a3   : > { %v12879_v3 = vld [vmem:[%s14301_s6 + $0xf4] sm:$0xf0]  ;;  %8135 = vmatpush.bf16.msra.mxu2 %v9949_v15  ;;  %v8488_v12 = vadd.f32 %v8440_v26, %v7876_v2 }
 0x5a4   : > { %v9372_v18 = vld [vmem:[%s14301_s6 + $0x4b8] sm:$0xf]  ;;  %v8861_v55 = vor.u32 %v12879_v3, %v8860_v19 }
 0x5a5   : > { %v13007_v60 = vld [vmem:[%s14301_s6 + $0x4f4] sm:$0xf0]  ;;  %8149 = vmatpush.bf16.msra.mxu3 %v10461_v11  ;;  %v8520_v11 = vmax.f32 %v8488_v12, 0.0 }
 0x5a6   : > { %v9884_v14 = vld [vmem:[%s14301_s6 + $0x8b8] sm:$0xf]  ;;  %v9373_v52 = vor.u32 %v13007_v60, %v9372_v18  ;;  %8108 = vmatpush.bf16.msra.mxu0 %v8861_v55  ;;  %v8519_v18 = vmax.f32 %v8487_v51, 0.0 }
 0x5a7   : > { %v13135_v46 = vld [vmem:[%s14301_s6 + $0x8f4] sm:$0xf0] }
 0x5a8   : > { %v10396_v13 = vld [vmem:[%s14301_s6 + $0xcb8] sm:$0xf]  ;;  %v9885_v32 = vor.u32 %v13135_v46, %v9884_v14  ;;  %8122 = vmatpush.bf16.msra.mxu1 %v9373_v52  ;;  %v8538_v60 = vpack.c.bf16 %v8520_v11, %v8519_v18 }
 0x5a9   : > { %v13263_v62 = vld [vmem:[%s14301_s6 + $0xcf4] sm:$0xf0] }
 0x5aa   : > { %v8796_v9 = vld [vmem:[%s14301_s6 + $0x38] sm:$0xf]  ;;  %v10397_v38 = vor.u32 %v13263_v62, %v10396_v13  ;;  %8136 = vmatpush.bf16.msra.mxu2 %v9885_v32  ;;  %8554 = vst [vmem:[%s15004_s20 + $0x68] sm:$0xff] %v8538_v60 }
 0x5ab   : > { %v12863_v59 = vld [vmem:[%s14301_s6 + $0x74] sm:$0xf0] }
 0x5ac   : > { %v9308_v0 = vld [vmem:[%s14301_s6 + $0x438] sm:$0xf]  ;;  %v8797_v27 = vor.u32 %v12863_v59, %v8796_v9  ;;  %8150 = vmatpush.bf16.msra.mxu3 %v10397_v38 }
 0x5ad   : > { %v12991_v28 = vld [vmem:[%s14301_s6 + $0x474] sm:$0xf0] }
 0x5ae   : > { %v9820_v22 = vld [vmem:[%s14301_s6 + $0x838] sm:$0xf]  ;;  %v9309_v49 = vor.u32 %v12991_v28, %v9308_v0  ;;  %8109 = vmatpush.bf16.msra.mxu0 %v8797_v27 }
 0x5af   : > { %v13119_v8 = vld [vmem:[%s14301_s6 + $0x874] sm:$0xf0] }
 0x5b0   : > { %v10332_v25 = vld [vmem:[%s14301_s6 + $0xc38] sm:$0xf]  ;;  %v9821_v48 = vor.u32 %v13119_v8, %v9820_v22  ;;  %8123 = vmatpush.bf16.msra.mxu1 %v9309_v49 }
 0x5b1   : > { %v13247_v5 = vld [vmem:[%s14301_s6 + $0xc74] sm:$0xf0]  ;;  %8110 = vmatmul.bf16.vlgmr.msra.gmra.mxu0 %v14389_v58 }
 0x5b2   : > { %v11292_v61 = vld [vmem:[%s14301_s6 + $0x13b8] sm:$0xf]  ;;  %v10333_v63 = vor.u32 %v13247_v5, %v10332_v25  ;;  %8137 = vmatpush.bf16.msra.mxu2 %v9821_v48 }
 0x5b3   : > { %v13487_v4 = vld [vmem:[%s14301_s6 + $0x13f4] sm:$0xf0]  ;;  %8124 = vmatmul.bf16.vlgmr.msra.gmra.mxu1 %v14401_v10 }
 0x5b4   : > { %v11804_v34 = vld [vmem:[%s14301_s6 + $0x17b8] sm:$0xf]  ;;  %v11293_v36 = vor.u32 %v13487_v4, %v11292_v61  ;;  %8151 = vmatpush.bf16.msra.mxu3 %v10333_v63 }
 0x5b5   : > { %v13615_v30 = vld [vmem:[%s14301_s6 + $0x17f4] sm:$0xf0]  ;;  %8138 = vmatmul.bf16.vlgmr.msra.gmra.mxu2 %v14394_v1 }
 0x5b6   : > { %v12316_v56 = vld [vmem:[%s14301_s6 + $0x1bb8] sm:$0xf]  ;;  %v11805_v41 = vor.u32 %v13615_v30, %v11804_v34  ;;  %8158 = vmatpush.bf16.msrb.mxu0 %v11293_v36 }
 0x5b7   : > { %v13743_v45 = vld [vmem:[%s14301_s6 + $0x1bf4] sm:$0xf0]  ;;  %8152 = vmatmul.bf16.vlgmr.msra.gmra.mxu3 %v14406_v17 }
 0x5b8   : > { %v12828_v33 = vld [vmem:[%s14301_s6 + $0x1fb8] sm:$0xf]  ;;  %v12317_v16 = vor.u32 %v13743_v45, %v12316_v56  ;;  %8172 = vmatpush.bf16.msrb.mxu1 %v11805_v41 }
 0x5b9   : > { %v13871_v23 = vld [vmem:[%s14301_s6 + $0x1ff4] sm:$0xf0] }
 0x5ba   : > { %v11228_v53 = vld [vmem:[%s14301_s6 + $0x1338] sm:$0xf]  ;;  %v12829_v29 = vor.u32 %v13871_v23, %v12828_v33  ;;  %8186 = vmatpush.bf16.msrb.mxu2 %v12317_v16 }
 0x5bb   : > { %v13471_v24 = vld [vmem:[%s14301_s6 + $0x1374] sm:$0xf0] }
 0x5bc   : > { %v11740_v6 = vld [vmem:[%s14301_s6 + $0x1738] sm:$0xf]  ;;  %v11229_v35 = vor.u32 %v13471_v24, %v11228_v53  ;;  %8200 = vmatpush.bf16.msrb.mxu3 %v12829_v29 }
 0x5bd   : > { %v13599_v15 = vld [vmem:[%s14301_s6 + $0x1774] sm:$0xf0] }
 0x5be   : > { %v12252_v19 = vld [vmem:[%s14301_s6 + $0x1b38] sm:$0xf]  ;;  %v11741_v14 = vor.u32 %v13599_v15, %v11740_v6  ;;  %8159 = vmatpush.bf16.msrb.mxu0 %v11229_v35 }
 0x5bf   : > { %v13727_v3 = vld [vmem:[%s14301_s6 + $0x1b74] sm:$0xf0] }
 0x5c0   : > { %v12764_v50 = vld [vmem:[%s14301_s6 + $0x1f38] sm:$0xf]  ;;  %v12253_v46 = vor.u32 %v13727_v3, %v12252_v19  ;;  %8173 = vmatpush.bf16.msrb.mxu1 %v11741_v14 }
 0x5c1   : > { %v13855_v26 = vld [vmem:[%s14301_s6 + $0x1f74] sm:$0xf0] }
 0x5c2   : > { %v11164_v37 = vld [vmem:[%s14301_s6 + $0x12b8] sm:$0xf]  ;;  %v12765_v62 = vor.u32 %v13855_v26, %v12764_v50  ;;  %8187 = vmatpush.bf16.msrb.mxu2 %v12253_v46 }
 0x5c3   : > { %v13455_v7 = vld [vmem:[%s14301_s6 + $0x12f4] sm:$0xf0] }
 0x5c4   : > { %v11676_v13 = vld [vmem:[%s14301_s6 + $0x16b8] sm:$0xf]  ;;  %v11165_v42 = vor.u32 %v13455_v7, %v11164_v37  ;;  %8201 = vmatpush.bf16.msrb.mxu3 %v12765_v62 }
 0x5c5   : > { %v13583_v40 = vld [vmem:[%s14301_s6 + $0x16f4] sm:$0xf0] }
 0x5c6   : > { %v12188_v55 = vld [vmem:[%s14301_s6 + $0x1ab8] sm:$0xf]  ;;  %v11677_v20 = vor.u32 %v13583_v40, %v11676_v13  ;;  %8160 = vmatpush.bf16.msrb.mxu0 %v11165_v42 }
 0x5c7   : > { %v13711_v9 = vld [vmem:[%s14301_s6 + $0x1af4] sm:$0xf0] }
 0x5c8   : > { %v12700_v59 = vld [vmem:[%s14301_s6 + $0x1eb8] sm:$0xf]  ;;  %v12189_v52 = vor.u32 %v13711_v9, %v12188_v55  ;;  %8174 = vmatpush.bf16.msrb.mxu1 %v11677_v20 }
 0x5c9   : > { %v13839_v0 = vld [vmem:[%s14301_s6 + $0x1ef4] sm:$0xf0] }
 0x5ca   : > { %v11100_v32 = vld [vmem:[%s14301_s6 + $0x1238] sm:$0xf]  ;;  %v12701_v38 = vor.u32 %v13839_v0, %v12700_v59  ;;  %8188 = vmatpush.bf16.msrb.mxu2 %v12189_v52 }
 0x5cb   : > { %v13439_v28 = vld [vmem:[%s14301_s6 + $0x1274] sm:$0xf0] }
 0x5cc   : > { %v11612_v22 = vld [vmem:[%s14301_s6 + $0x1638] sm:$0xf]  ;;  %v11101_v54 = vor.u32 %v13439_v28, %v11100_v32  ;;  %8202 = vmatpush.bf16.msrb.mxu3 %v12701_v38  ;;  %v12967_v28 = vld [vmem:[%s14301_s6 + $0x3bc] sm:$0xf] }
 0x5cd   : > { %v13567_v57 = vld [vmem:[%s14301_s6 + $0x1674] sm:$0xf0]  ;;  %v13095_v38 = vld [vmem:[%s14301_s6 + $0x7bc] sm:$0xf] }
 0x5ce   : > { %v12124_v8 = vld [vmem:[%s14301_s6 + $0x1a38] sm:$0xf]  ;;  %v11613_v21 = vor.u32 %v13567_v57, %v11612_v22  ;;  %8161 = vmatpush.bf16.msrb.mxu0 %v11101_v54  ;;  %v9246_v22 = vld [vmem:[%s14301_s6 + $0x3f8] sm:$0xf0] }
 0x5cf   : > { %v13695_v25 = vld [vmem:[%s14301_s6 + $0x1a74] sm:$0xf0] }
 0x5d0   : > { %v12636_v5 = vld [vmem:[%s14301_s6 + $0x1e38] sm:$0xf]  ;;  %v12125_v61 = vor.u32 %v13695_v25, %v12124_v8  ;;  %8175 = vmatpush.bf16.msrb.mxu1 %v11613_v21  ;;  %v9758_v8 = vld [vmem:[%s14301_s6 + $0x7f8] sm:$0xf0] }
 0x5d1   : > { %v13823_v31 = vld [vmem:[%s14301_s6 + $0x1e74] sm:$0xf0]  ;;  %v13223_v25 = vld [vmem:[%s14301_s6 + $0xbbc] sm:$0xf] }
 0x5d2   : > { %v11036_v4 = vld [vmem:[%s14301_s6 + $0x11b8] sm:$0xf]  ;;  %v12637_v27 = vor.u32 %v13823_v31, %v12636_v5  ;;  %8189 = vmatpush.bf16.msrb.mxu2 %v12125_v61  ;;  %v10270_v5 = vld [vmem:[%s14301_s6 + $0xbf8] sm:$0xf0] }
 0x5d3   : > { %v13423_v34 = vld [vmem:[%s14301_s6 + $0x11f4] sm:$0xf0]  ;;  %v13351_v21 = vld [vmem:[%s14301_s6 + $0xfbc] sm:$0xf] }
 0x5d4   : > { %v11548_v51 = vld [vmem:[%s14301_s6 + $0x15b8] sm:$0xf]  ;;  %v11037_v48 = vor.u32 %v13423_v34, %v11036_v4  ;;  %8203 = vmatpush.bf16.msrb.mxu3 %v12637_v27  ;;  %v10782_v61 = vld [vmem:[%s14301_s6 + $0xff8] sm:$0xf0]  ;;  %v9249_v34 = vor.u32 %v12967_v28, %v9246_v22  ;;  %v10273_v27 = vor.u32 %v13223_v25, %v10270_v5 }
 0x5d5   : > { %v13551_v30 = vld [vmem:[%s14301_s6 + $0x15f4] sm:$0xf0]  ;;  %v9502_v22 = vld [vmem:[%s14301_s6 + $0x5f8] sm:$0xf0] }
 0x5d6   : > { %v12060_v56 = vld [vmem:[%s14301_s6 + $0x19b8] sm:$0xf]  ;;  %v11549_v33 = vor.u32 %v13551_v30, %v11548_v51  ;;  %8162 = vmatpush.bf16.msrb.mxu0 %v11037_v48  ;;  %v9761_v51 = vor.u32 %v13095_v38, %v9758_v8  ;;  %v12951_v30 = vld [vmem:[%s14301_s6 + $0x33c] sm:$0xf] }
 0x5d7   : > { %v13679_v45 = vld [vmem:[%s14301_s6 + $0x19f4] sm:$0xf0]  ;;  %v13207_v48 = vld [vmem:[%s14301_s6 + $0xb3c] sm:$0xf] }
 0x5d8   : > { %v12572_v2 = vld [vmem:[%s14301_s6 + $0x1db8] sm:$0xf]  ;;  %v12061_v23 = vor.u32 %v13679_v45, %v12060_v56  ;;  %8176 = vmatpush.bf16.msrb.mxu1 %v11549_v33  ;;  %v9182_v56 = vld [vmem:[%s14301_s6 + $0x378] sm:$0xf0] }
 0x5d9   : > { %v13807_v49 = vld [vmem:[%s14301_s6 + $0x1df4] sm:$0xf0]  ;;  %v13079_v45 = vld [vmem:[%s14301_s6 + $0x73c] sm:$0xf] }
 0x5da   : > { %v10972_v63 = vld [vmem:[%s14301_s6 + $0x1138] sm:$0xf]  ;;  %v12573_v41 = vor.u32 %v13807_v49, %v12572_v2  ;;  %8190 = vmatpush.bf16.msrb.mxu2 %v12061_v23  ;;  %v10785_v2 = vor.u32 %v13351_v21, %v10782_v61  ;;  %v9694_v49 = vld [vmem:[%s14301_s6 + $0x778] sm:$0xf0] }
 0x5db   : > { %v13407_v36 = vld [vmem:[%s14301_s6 + $0x1174] sm:$0xf0]  ;;  %v10206_v33 = vld [vmem:[%s14301_s6 + $0xb78] sm:$0xf0] }
 0x5dc   : > { %v11484_v12 = vld [vmem:[%s14301_s6 + $0x1538] sm:$0xf]  ;;  %v10973_v15 = vor.u32 %v13407_v36, %v10972_v63  ;;  %8204 = vmatpush.bf16.msrb.mxu3 %v12573_v41  ;;  %v13335_v23 = vld [vmem:[%s14301_s6 + $0xf3c] sm:$0xf]  ;;  %v9185_v36 = vor.u32 %v12951_v30, %v9182_v56  ;;  %v10209_v41 = vor.u32 %v13207_v48, %v10206_v33  ;;  %v16805_v48 = vpop.f32.mrf.mxu3 }
 0x5dd   : > { %v13535_v16 = vld [vmem:[%s14301_s6 + $0x1574] sm:$0xf0]  ;;  %v10718_v63 = vld [vmem:[%s14301_s6 + $0xf78] sm:$0xf0] }
 0x5de   : > { %v11996_v53 = vld [vmem:[%s14301_s6 + $0x1938] sm:$0xf]  ;;  %v11485_v19 = vor.u32 %v13535_v16, %v11484_v12  ;;  %8163 = vmatpush.bf16.msrb.mxu0 %v10973_v15  ;;  %v9697_v12 = vor.u32 %v13079_v45, %v9694_v49  ;;  %v12935_v16 = vld [vmem:[%s14301_s6 + $0x2bc] sm:$0xf] }
 0x5df   : > { %v13663_v24 = vld [vmem:[%s14301_s6 + $0x1974] sm:$0xf0]  ;;  %v13191_v15 = vld [vmem:[%s14301_s6 + $0xabc] sm:$0xf] }
 0x5e0   : > { %v12508_v6 = vld [vmem:[%s14301_s6 + $0x1d38] sm:$0xf]  ;;  %v11997_v3 = vor.u32 %v13663_v24, %v11996_v53  ;;  %8177 = vmatpush.bf16.msrb.mxu1 %v11485_v19  ;;  %v9118_v53 = vld [vmem:[%s14301_s6 + $0x2f8] sm:$0xf0] }
 0x5e1   : > { %v13791_v29 = vld [vmem:[%s14301_s6 + $0x1d74] sm:$0xf0]  ;;  %v13063_v24 = vld [vmem:[%s14301_s6 + $0x6bc] sm:$0xf] }
 0x5e2   : > { %v10908_v18 = vld [vmem:[%s14301_s6 + $0x10b8] sm:$0xf]  ;;  %v12509_v26 = vor.u32 %v13791_v29, %v12508_v6  ;;  %8191 = vmatpush.bf16.msrb.mxu2 %v11997_v3  ;;  %v10721_v6 = vor.u32 %v13335_v23, %v10718_v63  ;;  %v9630_v29 = vld [vmem:[%s14301_s6 + $0x6f8] sm:$0xf0] }
 0x5e3   : > { %v13391_v11 = vld [vmem:[%s14301_s6 + $0x10f4] sm:$0xf0]  ;;  %v10142_v19 = vld [vmem:[%s14301_s6 + $0xaf8] sm:$0xf0] }
 0x5e4   : > { %v11420_v50 = vld [vmem:[%s14301_s6 + $0x14b8] sm:$0xf]  ;;  %v10909_v7 = vor.u32 %v13391_v11, %v10908_v18  ;;  %8205 = vmatpush.bf16.msrb.mxu3 %v12509_v26  ;;  %v13319_v3 = vld [vmem:[%s14301_s6 + $0xebc] sm:$0xf]  ;;  %v9121_v11 = vor.u32 %v12935_v16, %v9118_v53  ;;  %v10145_v26 = vor.u32 %v13191_v15, %v10142_v19 }
 0x5e5   : > { %v13519_v35 = vld [vmem:[%s14301_s6 + $0x14f4] sm:$0xf0]  ;;  %v10654_v18 = vld [vmem:[%s14301_s6 + $0xef8] sm:$0xf0] }
 0x5e6   : > { %v11932_v60 = vld [vmem:[%s14301_s6 + $0x18b8] sm:$0xf]  ;;  %v11421_v40 = vor.u32 %v13519_v35, %v11420_v50  ;;  %8164 = vmatpush.bf16.msrb.mxu0 %v10909_v7  ;;  %v9633_v50 = vor.u32 %v13063_v24, %v9630_v29  ;;  %v12919_v35 = vld [vmem:[%s14301_s6 + $0x23c] sm:$0xf] }
 0x5e7   : > { %v13647_v14 = vld [vmem:[%s14301_s6 + $0x18f4] sm:$0xf0]  ;;  %v13175_v7 = vld [vmem:[%s14301_s6 + $0xa3c] sm:$0xf] }
 0x5e8   : > { %v12444_v46 = vld [vmem:[%s14301_s6 + $0x1cb8] sm:$0xf]  ;;  %v11933_v55 = vor.u32 %v13647_v14, %v11932_v60  ;;  %8178 = vmatpush.bf16.msrb.mxu1 %v11421_v40  ;;  %v9054_v60 = vld [vmem:[%s14301_s6 + $0x278] sm:$0xf0] }
 0x5e9   : > { %v13775_v37 = vld [vmem:[%s14301_s6 + $0x1cf4] sm:$0xf0]  ;;  %v13047_v14 = vld [vmem:[%s14301_s6 + $0x63c] sm:$0xf] }
 0x5ea   : > { %v10844_v13 = vld [vmem:[%s14301_s6 + $0x1038] sm:$0xf]  ;;  %v12445_v42 = vor.u32 %v13775_v37, %v12444_v46  ;;  %8192 = vmatpush.bf16.msrb.mxu2 %v11933_v55  ;;  %v10657_v46 = vor.u32 %v13319_v3, %v10654_v18  ;;  %v9566_v37 = vld [vmem:[%s14301_s6 + $0x678] sm:$0xf0]  ;;  %v9057_v55 = vor.u32 %v12919_v35, %v9054_v60 }
 0x5eb   : > { %v13375_v62 = vld [vmem:[%s14301_s6 + $0x1074] sm:$0xf0]  ;;  %v10590_v40 = vld [vmem:[%s14301_s6 + $0xe78] sm:$0xf0] }
 0x5ec   : > { %v11356_v9 = vld [vmem:[%s14301_s6 + $0x1438] sm:$0xf]  ;;  %v10845_v57 = vor.u32 %v13375_v62, %v10844_v13  ;;  %8206 = vmatpush.bf16.msrb.mxu3 %v12445_v42  ;;  %v10078_v13 = vld [vmem:[%s14301_s6 + $0xa78] sm:$0xf0] }
 0x5ed   : > { %v13503_v59 = vld [vmem:[%s14301_s6 + $0x1474] sm:$0xf0]  ;;  %v13303_v62 = vld [vmem:[%s14301_s6 + $0xe3c] sm:$0xf] }
 0x5ee   : > { %v11868_v0 = vld [vmem:[%s14301_s6 + $0x1838] sm:$0xf]  ;;  %v11357_v31 = vor.u32 %v13503_v59, %v11356_v9  ;;  %8165 = vmatpush.bf16.msrb.mxu0 %v10845_v57  ;;  %v16783_v9 = vpop.f32.mrf.mxu0  ;;  %v9569_v59 = vor.u32 %v13047_v14, %v9566_v37  ;;  %v12903_v42 = vld [vmem:[%s14301_s6 + $0x1bc] sm:$0xf]  ;;  %v10593_v28 = vor.u32 %v13303_v62, %v10590_v40 }
 0x5ef   : > { %v13631_v20 = vld [vmem:[%s14301_s6 + $0x1874] sm:$0xf0]  ;;  %v13159_v38 = vld [vmem:[%s14301_s6 + $0x9bc] sm:$0xf] }
 0x5f0   : > { %v12380_v52 = vld [vmem:[%s14301_s6 + $0x1c38] sm:$0xf]  ;;  %v11869_v54 = vor.u32 %v13631_v20, %v11868_v0  ;;  %8179 = vmatpush.bf16.msrb.mxu1 %v11357_v31  ;;  %v10081_v0 = vor.u32 %v13175_v7, %v10078_v13  ;;  %v8990_v20 = vld [vmem:[%s14301_s6 + $0x1f8] sm:$0xf0] }
 0x5f1   : > { %v13759_v32 = vld [vmem:[%s14301_s6 + $0x1c74] sm:$0xf0]  ;;  %8166 = vmatmul.bf16.vlgmr.msrb.gmra.mxu0 %v14458_v39  ;;  %v10014_v57 = vld [vmem:[%s14301_s6 + $0x9f8] sm:$0xf0]  ;;  %v8993_v5 = vor.u32 %v12903_v42, %v8990_v20 }
 0x5f2   : > { %v12381_v4 = vor.u32 %v13759_v32, %v12380_v52  ;;  %8193 = vmatpush.bf16.msrb.mxu2 %v11869_v54  ;;  %8214 = vmatpush.bf16.msra.mxu0 %v9249_v34  ;;  %v13031_v52 = vld [vmem:[%s14301_s6 + $0x5bc] sm:$0xf]  ;;  %v16788_v32 = vpop.f32.mrf.mxu1  ;;  %v10017_v54 = vor.u32 %v13159_v38, %v10014_v57 }
 0x5f3   : > { %8180 = vmatmul.bf16.vlgmr.msrb.gmra.mxu1 %v14465_v44  ;;  %v13287_v8 = vld [vmem:[%s14301_s6 + $0xdbc] sm:$0xf]  ;;  %v9505_v31 = vor.u32 %v13031_v52, %v9502_v22 }
 0x5f4   : > { %8207 = vmatpush.bf16.msrb.mxu3 %v12381_v4  ;;  %8228 = vmatpush.bf16.msra.mxu1 %v9761_v51  ;;  %v10526_v25 = vld [vmem:[%s14301_s6 + $0xdf8] sm:$0xf0] }
 0x5f5   : > { %8194 = vmatmul.bf16.vlgmr.msrb.gmra.mxu2 %v14463_v43  ;;  %v12887_v21 = vld [vmem:[%s14301_s6 + $0x13c] sm:$0xf]  ;;  %v10529_v34 = vor.u32 %v13287_v8, %v10526_v25 }
 0x5f6   : > { %8242 = vmatpush.bf16.msra.mxu2 %v10273_v27  ;;  %8215 = vmatpush.bf16.msra.mxu0 %v9185_v36  ;;  %v8926_v61 = vld [vmem:[%s14301_s6 + $0x178] sm:$0xf0] }
 0x5f7   : > { %8208 = vmatmul.bf16.vlgmr.msrb.gmra.mxu3 %v14469_v47  ;;  %v13015_v4 = vld [vmem:[%s14301_s6 + $0x53c] sm:$0xf]  ;;  %v8929_v49 = vor.u32 %v12887_v21, %v8926_v61 }
 0x5f8   : > { %8256 = vmatpush.bf16.msra.mxu3 %v10785_v2  ;;  %8229 = vmatpush.bf16.msra.mxu1 %v9697_v12  ;;  %v9438_v51 = vld [vmem:[%s14301_s6 + $0x578] sm:$0xf0]  ;;  %v16803_v2 = vpop.f32.mrf.mxu2 }
 0x5f9   : > { %v13143_v27 = vld [vmem:[%s14301_s6 + $0x93c] sm:$0xf]  ;;  %v9441_v33 = vor.u32 %v13015_v4, %v9438_v51 }
 0x5fa   : > { %8243 = vmatpush.bf16.msra.mxu2 %v10209_v41  ;;  %8216 = vmatpush.bf16.msra.mxu0 %v9121_v11  ;;  %v9950_v30 = vld [vmem:[%s14301_s6 + $0x978] sm:$0xf0]  ;;  %v16817_v19 = vpop.f32.mrf.mxu1 }
 0x5fb   : > { %v13271_v56 = vld [vmem:[%s14301_s6 + $0xd3c] sm:$0xf]  ;;  %v9953_v23 = vor.u32 %v13143_v27, %v9950_v30 }
 0x5fc   : > { %8257 = vmatpush.bf16.msra.mxu3 %v10721_v6  ;;  %8230 = vmatpush.bf16.msra.mxu1 %v9633_v50  ;;  %v10462_v45 = vld [vmem:[%s14301_s6 + $0xd78] sm:$0xf0]  ;;  %v16813_v6 = vpop.f32.mrf.mxu0 }
 0x5fd   : > { %v12871_v63 = vld [vmem:[%s14301_s6 + $0xbc] sm:$0xf]  ;;  %v10465_v41 = vor.u32 %v13271_v56, %v10462_v45 }
 0x5fe   : > { %8244 = vmatpush.bf16.msra.mxu2 %v10145_v26  ;;  %8217 = vmatpush.bf16.msra.mxu0 %v9057_v55  ;;  %v8862_v36 = vld [vmem:[%s14301_s6 + $0xf8] sm:$0xf0] }
 0x5ff   : > { %v12999_v12 = vld [vmem:[%s14301_s6 + $0x4bc] sm:$0xf]  ;;  %v8865_v3 = vor.u32 %v12871_v63, %v8862_v36 }
 0x600   : > { %8258 = vmatpush.bf16.msra.mxu3 %v10657_v46  ;;  %8231 = vmatpush.bf16.msra.mxu1 %v9569_v59  ;;  %v9374_v16 = vld [vmem:[%s14301_s6 + $0x4f8] sm:$0xf0]  ;;  %v16835_v57 = vpop.f32.mrf.mxu2 }
 0x601   : > { %v13127_v53 = vld [vmem:[%s14301_s6 + $0x8bc] sm:$0xf]  ;;  %v9377_v50 = vor.u32 %v12999_v12, %v9374_v16 }
 0x602   : > { %8245 = vmatpush.bf16.msra.mxu2 %v10081_v0  ;;  %8218 = vmatpush.bf16.msra.mxu0 %v8993_v5  ;;  %v9886_v24 = vld [vmem:[%s14301_s6 + $0x8f8] sm:$0xf0]  ;;  %v16837_v5 = vpop.f32.mrf.mxu3 }
 0x603   : > { %v13255_v29 = vld [vmem:[%s14301_s6 + $0xcbc] sm:$0xf]  ;;  %v9889_v26 = vor.u32 %v13127_v53, %v9886_v24 }
 0x604   : > { %8259 = vmatpush.bf16.msra.mxu3 %v10593_v28  ;;  %8232 = vmatpush.bf16.msra.mxu1 %v9505_v31  ;;  %v10398_v15 = vld [vmem:[%s14301_s6 + $0xcf8] sm:$0xf0]  ;;  %v16845_v56 = vpop.f32.mrf.mxu0 }
 0x605   : > { %v12855_v18 = vld [vmem:[%s14301_s6 + $0x3c] sm:$0xf]  ;;  %v10401_v46 = vor.u32 %v13255_v29, %v10398_v15 }
 0x606   : > { %8246 = vmatpush.bf16.msra.mxu2 %v10017_v54  ;;  %8219 = vmatpush.bf16.msra.mxu0 %v8929_v49  ;;  %v8798_v11 = vld [vmem:[%s14301_s6 + $0x78] sm:$0xf0] }
 0x607   : > { %v12983_v35 = vld [vmem:[%s14301_s6 + $0x43c] sm:$0xf]  ;;  %v8801_v59 = vor.u32 %v12855_v18, %v8798_v11 }
 0x608   : > { %8260 = vmatpush.bf16.msra.mxu3 %v10529_v34  ;;  %8233 = vmatpush.bf16.msra.mxu1 %v9441_v33  ;;  %v9310_v60 = vld [vmem:[%s14301_s6 + $0x478] sm:$0xf0]  ;;  %v16849_v33 = vpop.f32.mrf.mxu1 }
 0x609   : > { %v13111_v14 = vld [vmem:[%s14301_s6 + $0x83c] sm:$0xf]  ;;  %v9313_v52 = vor.u32 %v12983_v35, %v9310_v60  ;;  %v16866_v60 = vpop.f32.mrf.mxu2 }
 0x60a   : > { %8247 = vmatpush.bf16.msra.mxu2 %v9953_v23  ;;  %v9822_v37 = vld [vmem:[%s14301_s6 + $0x878] sm:$0xf0]  ;;  %8220 = vmatpush.bf16.msra.mxu0 %v8865_v3 }
 0x60b   : > { %v13239_v7 = vld [vmem:[%s14301_s6 + $0xc3c] sm:$0xf]  ;;  %v9825_v28 = vor.u32 %v13111_v14, %v9822_v37 }
 0x60c   : > { %8261 = vmatpush.bf16.msra.mxu3 %v10465_v41  ;;  %v10334_v13 = vld [vmem:[%s14301_s6 + $0xc78] sm:$0xf0]  ;;  %8234 = vmatpush.bf16.msra.mxu1 %v9377_v50 }
 0x60d   : > { %v13479_v62 = vld [vmem:[%s14301_s6 + $0x13bc] sm:$0xf]  ;;  %v10337_v8 = vor.u32 %v13239_v7, %v10334_v13  ;;  %v16871_v7 = vpop.f32.mrf.mxu3 }
 0x60e   : > { %v11294_v40 = vld [vmem:[%s14301_s6 + $0x13f8] sm:$0xf0]  ;;  %8248 = vmatpush.bf16.msra.mxu2 %v9889_v26  ;;  %8221 = vmatpush.bf16.msra.mxu0 %v8801_v59 }
 0x60f   : > { %v13607_v55 = vld [vmem:[%s14301_s6 + $0x17bc] sm:$0xf]  ;;  %v11297_v25 = vor.u32 %v13479_v62, %v11294_v40  ;;  %v16875_v40 = vpop.f32.mrf.mxu0 }
 0x610   : > { %v11806_v0 = vld [vmem:[%s14301_s6 + $0x17f8] sm:$0xf0]  ;;  %8262 = vmatpush.bf16.msra.mxu3 %v10401_v46  ;;  %8235 = vmatpush.bf16.msra.mxu1 %v9313_v52  ;;  %v16880_v52 = vpop.f32.mrf.mxu1 }
 0x611   : > { %v13735_v42 = vld [vmem:[%s14301_s6 + $0x1bbc] sm:$0xf]  ;;  %v11809_v31 = vor.u32 %v13607_v55, %v11806_v0  ;;  %8222 = vmatmul.bf16.vlgmr.msra.gmra.mxu0 %v14389_v58 }
 0x612   : > { %v12318_v20 = vld [vmem:[%s14301_s6 + $0x1bf8] sm:$0xf0]  ;;  %8249 = vmatpush.bf16.msra.mxu2 %v9825_v28  ;;  %8270 = vmatpush.bf16.msrb.mxu0 %v11297_v25 }
 0x613   : > { %v13863_v22 = vld [vmem:[%s14301_s6 + $0x1fbc] sm:$0xf]  ;;  %v12321_v54 = vor.u32 %v13735_v42, %v12318_v20  ;;  %8236 = vmatmul.bf16.vlgmr.msra.gmra.mxu1 %v14401_v10 }
 0x614   : > { %v12830_v38 = vld [vmem:[%s14301_s6 + $0x1ff8] sm:$0xf0]  ;;  %8263 = vmatpush.bf16.msra.mxu3 %v10337_v8  ;;  %8284 = vmatpush.bf16.msrb.mxu1 %v11809_v31 }
 0x615   : > { %v13463_v21 = vld [vmem:[%s14301_s6 + $0x133c] sm:$0xf]  ;;  %v12833_v34 = vor.u32 %v13863_v22, %v12830_v38  ;;  %8250 = vmatmul.bf16.vlgmr.msra.gmra.mxu2 %v14394_v1 }
 0x616   : > { %v11230_v61 = vld [vmem:[%s14301_s6 + $0x1378] sm:$0xf0]  ;;  %8298 = vmatpush.bf16.msrb.mxu2 %v12321_v54 }
 0x617   : > { %v13591_v4 = vld [vmem:[%s14301_s6 + $0x173c] sm:$0xf]  ;;  %v11233_v23 = vor.u32 %v13463_v21, %v11230_v61  ;;  %8264 = vmatmul.bf16.vlgmr.msra.gmra.mxu3 %v14406_v17 }
 0x618   : > { %v11742_v51 = vld [vmem:[%s14301_s6 + $0x1778] sm:$0xf0]  ;;  %8312 = vmatpush.bf16.msrb.mxu3 %v12833_v34 }
 0x619   : > { %v13719_v27 = vld [vmem:[%s14301_s6 + $0x1b3c] sm:$0xf]  ;;  %v11745_v63 = vor.u32 %v13591_v4, %v11742_v51  ;;  %8271 = vmatpush.bf16.msrb.mxu0 %v11233_v23 }
 0x61a   : > { %v12254_v30 = vld [vmem:[%s14301_s6 + $0x1b78] sm:$0xf0] }
 0x61b   : > { %v13847_v45 = vld [vmem:[%s14301_s6 + $0x1f3c] sm:$0xf]  ;;  %v12257_v36 = vor.u32 %v13719_v27, %v12254_v30  ;;  %8285 = vmatpush.bf16.msrb.mxu1 %v11745_v63 }
 0x61c   : > { %v12766_v49 = vld [vmem:[%s14301_s6 + $0x1f78] sm:$0xf0] }
 0x61d   : > { %v13447_v12 = vld [vmem:[%s14301_s6 + $0x12bc] sm:$0xf]  ;;  %v12769_v53 = vor.u32 %v13847_v45, %v12766_v49  ;;  %8299 = vmatpush.bf16.msrb.mxu2 %v12257_v36  ;;  %v16895_v36 = vpop.f32.mrf.mxu2 }
 0x61e   : > { %v11166_v41 = vld [vmem:[%s14301_s6 + $0x12f8] sm:$0xf0] }
 0x61f   : > { %v13575_v16 = vld [vmem:[%s14301_s6 + $0x16bc] sm:$0xf]  ;;  %v11169_v11 = vor.u32 %v13447_v12, %v11166_v41  ;;  %8313 = vmatpush.bf16.msrb.mxu3 %v12769_v53  ;;  %v16897_v41 = vpop.f32.mrf.mxu3 }
 0x620   : > { %v11678_v24 = vld [vmem:[%s14301_s6 + $0x16f8] sm:$0xf0] }
 0x621   : > { %v13703_v29 = vld [vmem:[%s14301_s6 + $0x1abc] sm:$0xf]  ;;  %v11681_v1 = vor.u32 %v13575_v16, %v11678_v24  ;;  %8272 = vmatpush.bf16.msrb.mxu0 %v11169_v11  ;;  %v7999_v24 = vpop.f32.mrf.mxu0 }
 0x622   : > { %v12190_v15 = vld [vmem:[%s14301_s6 + $0x1af8] sm:$0xf0] }
 0x623   : > { %v13831_v3 = vld [vmem:[%s14301_s6 + $0x1ebc] sm:$0xf]  ;;  %v12193_v50 = vor.u32 %v13703_v29, %v12190_v15  ;;  %8286 = vmatpush.bf16.msrb.mxu1 %v11681_v1 }
 0x624   : > { %v12702_v18 = vld [vmem:[%s14301_s6 + $0x1ef8] sm:$0xf0] }
 0x625   : > { %v13431_v26 = vld [vmem:[%s14301_s6 + $0x123c] sm:$0xf]  ;;  %v12705_v58 = vor.u32 %v13831_v3, %v12702_v18  ;;  %8300 = vmatpush.bf16.msrb.mxu2 %v12193_v50 }
 0x626   : > { %v11102_v35 = vld [vmem:[%s14301_s6 + $0x1278] sm:$0xf0] }
 0x627   : > { %v13559_v17 = vld [vmem:[%s14301_s6 + $0x163c] sm:$0xf]  ;;  %v11105_v62 = vor.u32 %v13431_v26, %v11102_v35  ;;  %8314 = vmatpush.bf16.msrb.mxu3 %v12705_v58  ;;  %v8013_v26 = vpop.f32.mrf.mxu1  ;;  %v7902_v35 = vadd.f32 %v16788_v32, %v16783_v9 }
 0x628   : > { %v11614_v14 = vld [vmem:[%s14301_s6 + $0x1678] sm:$0xf0] }
 0x629   : > { %v13687_v46 = vld [vmem:[%s14301_s6 + $0x1a3c] sm:$0xf]  ;;  %v11617_v55 = vor.u32 %v13559_v17, %v11614_v14  ;;  %8273 = vmatpush.bf16.msrb.mxu0 %v11105_v62  ;;  %v7916_v9 = vadd.f32 %v16803_v2, %v7902_v35 }
 0x62a   : > { %v12126_v37 = vld [vmem:[%s14301_s6 + $0x1a78] sm:$0xf0] }
 0x62b   : > { %v13815_v10 = vld [vmem:[%s14301_s6 + $0x1e3c] sm:$0xf]  ;;  %v12129_v59 = vor.u32 %v13687_v46, %v12126_v37  ;;  %8287 = vmatpush.bf16.msrb.mxu1 %v11617_v55 }
 0x62c   : > { %v12638_v13 = vld [vmem:[%s14301_s6 + $0x1e78] sm:$0xf0] }
 0x62d   : > { %v13415_v0 = vld [vmem:[%s14301_s6 + $0x11bc] sm:$0xf]  ;;  %v12641_v28 = vor.u32 %v13815_v10, %v12638_v13  ;;  %8301 = vmatpush.bf16.msrb.mxu2 %v12129_v59 }
 0x62e   : > { %v11038_v42 = vld [vmem:[%s14301_s6 + $0x11f8] sm:$0xf0] }
 0x62f   : > { %v13543_v20 = vld [vmem:[%s14301_s6 + $0x15bc] sm:$0xf]  ;;  %v11041_v54 = vor.u32 %v13415_v0, %v11038_v42  ;;  %8315 = vmatpush.bf16.msrb.mxu3 %v12641_v28 }
 0x630   : > { %v11550_v22 = vld [vmem:[%s14301_s6 + $0x15f8] sm:$0xf0] }
 0x631   : > { %v13671_v38 = vld [vmem:[%s14301_s6 + $0x19bc] sm:$0xf]  ;;  %v11553_v21 = vor.u32 %v13543_v20, %v11550_v22  ;;  %8274 = vmatpush.bf16.msrb.mxu0 %v11041_v54  ;;  %v8027_v22 = vpop.f32.mrf.mxu2 }
 0x632   : > { %v12062_v8 = vld [vmem:[%s14301_s6 + $0x19f8] sm:$0xf0] }
 0x633   : > { %v13799_v25 = vld [vmem:[%s14301_s6 + $0x1dbc] sm:$0xf]  ;;  %v12065_v61 = vor.u32 %v13671_v38, %v12062_v8  ;;  %8288 = vmatpush.bf16.msrb.mxu1 %v11553_v21  ;;  %v7930_v21 = vadd.f32 %v16805_v48, %v7916_v9 }
 0x634   : > { %v12574_v31 = vld [vmem:[%s14301_s6 + $0x1df8] sm:$0xf0] }
 0x635   : > { %v13399_v4 = vld [vmem:[%s14301_s6 + $0x113c] sm:$0xf]  ;;  %v12577_v27 = vor.u32 %v13799_v25, %v12574_v31  ;;  %8302 = vmatpush.bf16.msrb.mxu2 %v12065_v61  ;;  %v8041_v25 = vpop.f32.mrf.mxu3  ;;  %v8014_v31 = vadd.f32 %v8013_v26, %v7999_v24  ;;  %v8001_v61 = vpop.f32.mrf.mxu0 }
 0x636   : > { %v10974_v34 = vld [vmem:[%s14301_s6 + $0x1178] sm:$0xf0] }
 0x637   : > { %v13527_v51 = vld [vmem:[%s14301_s6 + $0x153c] sm:$0xf]  ;;  %v10977_v12 = vor.u32 %v13399_v4, %v10974_v34  ;;  %8316 = vmatpush.bf16.msrb.mxu3 %v12577_v27  ;;  %v8015_v4 = vpop.f32.mrf.mxu1  ;;  %v8028_v2 = vadd.f32 %v8027_v22, %v8014_v31  ;;  %v7904_v34 = vadd.f32 %v16817_v19, %v16813_v6 }
 0x638   : > { %v11486_v30 = vld [vmem:[%s14301_s6 + $0x1578] sm:$0xf0] }
 0x639   : > { %v13655_v45 = vld [vmem:[%s14301_s6 + $0x193c] sm:$0xf]  ;;  %v11489_v16 = vor.u32 %v13527_v51, %v11486_v30  ;;  %8275 = vmatpush.bf16.msrb.mxu0 %v10977_v12  ;;  %v7944_v51 = vadd.f32 %v16845_v56, %v7930_v21  ;;  %v8042_v48 = vadd.f32 %v8041_v25, %v8028_v2  ;;  %v8029_v27 = vpop.f32.mrf.mxu2  ;;  %v7918_v30 = vadd.f32 %v16835_v57, %v7904_v34 }
 0x63a   : > { %v11998_v49 = vld [vmem:[%s14301_s6 + $0x1978] sm:$0xf0] }
 0x63b   : > { %v13783_v23 = vld [vmem:[%s14301_s6 + $0x1d3c] sm:$0xf]  ;;  %v12001_v53 = vor.u32 %v13655_v45, %v11998_v49  ;;  %8289 = vmatpush.bf16.msrb.mxu1 %v11489_v16  ;;  %v7958_v45 = vadd.f32 %v16849_v33, %v7944_v51 }
 0x63c   : > { %v12510_v63 = vld [vmem:[%s14301_s6 + $0x1d78] sm:$0xf0] }
 0x63d   : > { %v13383_v29 = vld [vmem:[%s14301_s6 + $0x10bc] sm:$0xf]  ;;  %v12513_v18 = vor.u32 %v13783_v23, %v12510_v63  ;;  %8303 = vmatpush.bf16.msrb.mxu2 %v12001_v53  ;;  %v8043_v49 = vpop.f32.mrf.mxu3  ;;  %v8016_v23 = vadd.f32 %v8015_v4, %v8001_v61  ;;  %v8055_v6 = vpop.f32.mrf.mxu0 }
 0x63e   : > { %v10910_v15 = vld [vmem:[%s14301_s6 + $0x10f8] sm:$0xf0]  ;;  %v8056_v19 = vadd.f32 %v8055_v6, %v8042_v48 }
 0x63f   : > { %v13511_v3 = vld [vmem:[%s14301_s6 + $0x14bc] sm:$0xf]  ;;  %v10913_v14 = vor.u32 %v13383_v29, %v10910_v15  ;;  %8317 = vmatpush.bf16.msrb.mxu3 %v12513_v18  ;;  %v8069_v56 = vpop.f32.mrf.mxu1  ;;  %v8030_v63 = vadd.f32 %v8029_v27, %v8016_v23 }
 0x640   : > { %v11422_v11 = vld [vmem:[%s14301_s6 + $0x14f8] sm:$0xf0] }
 0x641   : > { %v13639_v1 = vld [vmem:[%s14301_s6 + $0x18bc] sm:$0xf]  ;;  %v11425_v46 = vor.u32 %v13511_v3, %v11422_v11  ;;  %8276 = vmatpush.bf16.msrb.mxu0 %v10913_v14  ;;  %v8083_v33 = vpop.f32.mrf.mxu2  ;;  %v8044_v24 = vadd.f32 %v8043_v49, %v8030_v63 }
 0x642   : > { %v11934_v50 = vld [vmem:[%s14301_s6 + $0x18f8] sm:$0xf0] }
 0x643   : > { %v13767_v17 = vld [vmem:[%s14301_s6 + $0x1cbc] sm:$0xf]  ;;  %v11937_v37 = vor.u32 %v13639_v1, %v11934_v50  ;;  %8290 = vmatpush.bf16.msrb.mxu1 %v11425_v46 }
 0x644   : > { %v12446_v58 = vld [vmem:[%s14301_s6 + $0x1cf8] sm:$0xf0] }
 0x645   : > { %v13367_v10 = vld [vmem:[%s14301_s6 + $0x103c] sm:$0xf]  ;;  %v12449_v55 = vor.u32 %v13767_v17, %v12446_v58  ;;  %8304 = vmatpush.bf16.msrb.mxu2 %v11937_v37  ;;  %v8057_v15 = vpop.f32.mrf.mxu0  ;;  %v8097_v3 = vpop.f32.mrf.mxu3 }
 0x646   : > { %v10846_v13 = vld [vmem:[%s14301_s6 + $0x1078] sm:$0xf0]  ;;  %v8058_v18 = vadd.f32 %v8057_v15, %v8044_v24 }
 0x647   : > { %v13495_v62 = vld [vmem:[%s14301_s6 + $0x143c] sm:$0xf]  ;;  %v10849_v28 = vor.u32 %v13367_v10, %v10846_v13  ;;  %8318 = vmatpush.bf16.msrb.mxu3 %v12449_v55 }
 0x648   : > { %v11358_v59 = vld [vmem:[%s14301_s6 + $0x1478] sm:$0xf0] }
 0x649   : > { %v13623_v0 = vld [vmem:[%s14301_s6 + $0x183c] sm:$0xf]  ;;  %v11361_v38 = vor.u32 %v13495_v62, %v11358_v59  ;;  %8277 = vmatpush.bf16.msrb.mxu0 %v10849_v28  ;;  %v8085_v17 = vpop.f32.mrf.mxu2 }
 0x64a   : > { %v11870_v42 = vld [vmem:[%s14301_s6 + $0x1878] sm:$0xf0] }
 0x64b   : > { %v13751_v32 = vld [vmem:[%s14301_s6 + $0x1c3c] sm:$0xf]  ;;  %v11873_v8 = vor.u32 %v13623_v0, %v11870_v42  ;;  %8291 = vmatpush.bf16.msrb.mxu1 %v11361_v38 }
 0x64c   : > { %v12382_v20 = vld [vmem:[%s14301_s6 + $0x1c78] sm:$0xf0]  ;;  %8278 = vmatmul.bf16.vlgmr.msrb.gmra.mxu0 %v14458_v39  ;;  %v7932_v39 = vadd.f32 %v16837_v5, %v7918_v30 }
 0x64d   : > { %v12385_v54 = vor.u32 %v13751_v32, %v12382_v20  ;;  %8305 = vmatpush.bf16.msrb.mxu2 %v11873_v8  ;;  %v16933_v16 = vld [vmem:[%s14945_s7 + $0x8] sm:$0xff]  ;;  %v8099_v46 = vpop.f32.mrf.mxu3  ;;  %v8111_v59 = vpop.f32.mrf.mxu0 }
 0x64e   : > { %8292 = vmatmul.bf16.vlgmr.msrb.gmra.mxu1 %v14465_v44  ;;  %v7972_v44 = vadd.f32 %v16866_v60, %v7958_v45  ;;  %v8441_v57 = vperm.slane %v16933_v16, 4  ;;  %v8442_v5 = vperm.slane %v16933_v16, 5 }
 0x64f   : > { %8319 = vmatpush.bf16.msrb.mxu3 %v12385_v54 }
 0x650   : > { %8306 = vmatmul.bf16.vlgmr.msrb.gmra.mxu2 %v14463_v43  ;;  %v7946_v43 = vadd.f32 %v16875_v40, %v7932_v39  ;;  %v7986_v12 = vadd.f32 %v16871_v7, %v7972_v44  ;;  %v8071_v7 = vpop.f32.mrf.mxu1 }
 0x651   : > { %v8139_v42 = vpop.f32.mrf.mxu2 }
 0x652   : > { %8320 = vmatmul.bf16.vlgmr.msrb.gmra.mxu3 %v14469_v47  ;;  %v8070_v47 = vadd.f32 %v8069_v56, %v8056_v19  ;;  %v7960_v53 = vadd.f32 %v16880_v52, %v7946_v43  ;;  %v8473_v60 = vadd.f32 %v8441_v57, %v7986_v12  ;;  %v8072_v52 = vadd.f32 %v8071_v7, %v8058_v18 }
 0x654   : > { %v8084_v29 = vadd.f32 %v8083_v33, %v8070_v47  ;;  %v7974_v40 = vadd.f32 %v16895_v36, %v7960_v53  ;;  %v8505_v50 = vmax.f32 %v8473_v60, 0.0  ;;  %v8086_v14 = vadd.f32 %v8085_v17, %v8072_v52 }
 0x655   : > { %v8153_v9 = vpop.f32.mrf.mxu3  ;;  %v8113_v32 = vpop.f32.mrf.mxu0  ;;  %v8443_v60 = vperm.slane %v16933_v16, 6 }
 0x656   : > { %v8098_v11 = vadd.f32 %v8097_v3, %v8084_v29  ;;  %v7988_v26 = vadd.f32 %v16897_v41, %v7974_v40  ;;  %v8100_v10 = vadd.f32 %v8099_v46, %v8086_v14 }
 0x658   : > { %v8474_v1 = vadd.f32 %v8442_v5, %v8098_v11  ;;  %v8489_v37 = vadd.f32 %v8441_v57, %v7988_v26  ;;  %v8490_v13 = vadd.f32 %v8442_v5, %v8100_v10  ;;  %v8125_v0 = vpop.f32.mrf.mxu1  ;;  %v8444_v26 = vperm.slane %v16933_v16, 7 }
 0x659   : > { %v8141_v20 = vpop.f32.mrf.mxu2  ;;  %v8126_v61 = vadd.f32 %v8125_v0, %v8111_v59 }
 0x65a   : > { %v8506_v35 = vmax.f32 %v8474_v1, 0.0  ;;  %v8521_v62 = vmax.f32 %v8489_v37, 0.0  ;;  %v8522_v36 = vmax.f32 %v8490_v13, 0.0 }
 0x65b   : > { %v8140_v51 = vadd.f32 %v8139_v42, %v8126_v61 }
 0x65c   : > { %v8531_v58 = vpack.c.bf16 %v8506_v35, %v8505_v50  ;;  %v8539_v55 = vpack.c.bf16 %v8522_v36, %v8521_v62 }
 0x65d   : > { %v8155_v28 = vpop.f32.mrf.mxu3  ;;  %v8154_v27 = vadd.f32 %v8153_v9, %v8140_v51 }
 0x65e   : > { %8547 = vst [vmem:[%s15004_s20 + $0x30] sm:$0xff] %v8531_v58 }
 0x65f   : > { %8555 = vst [vmem:[%s15004_s20 + $0x70] sm:$0xff] %v8539_v55 }
 0x660   : > { %v8127_v41 = vpop.f32.mrf.mxu1 }
 0x661   : > { %v8128_v23 = vadd.f32 %v8127_v41, %v8113_v32 }
 0x663   : > { %v8142_v39 = vadd.f32 %v8141_v20, %v8128_v23 }
 0x665   : > { %v8156_v33 = vadd.f32 %v8155_v28, %v8142_v39 }
 0x66e   : > { %v8167_v22 = vpop.f32.mrf.mxu0 }
 0x66f   : > { %v8168_v6 = vadd.f32 %v8167_v22, %v8154_v27 }
 0x670   : > { %v8181_v38 = vpop.f32.mrf.mxu1 }
 0x671   : > { %v8182_v44 = vadd.f32 %v8181_v38, %v8168_v6 }
 0x676   : > { %v8169_v31 = vpop.f32.mrf.mxu0 }
 0x677   : > { %v8170_v15 = vadd.f32 %v8169_v31, %v8156_v33 }
 0x678   : > { %v8195_v8 = vpop.f32.mrf.mxu2  ;;  %v8183_v54 = vpop.f32.mrf.mxu1 }
 0x679   : > { %v8196_v53 = vadd.f32 %v8195_v8, %v8182_v44  ;;  %v8184_v11 = vadd.f32 %v8183_v54, %v8170_v15 }
 0x67a   : > { %v8209_v25 = vpop.f32.mrf.mxu3 }
 0x67b   : > { %v8210_v5 = vadd.f32 %v8209_v25, %v8196_v53 }
 0x67d   : > { %v8475_v52 = vadd.f32 %v8443_v60, %v8210_v5 }
 0x67f   : > { %v8507_v10 = vmax.f32 %v8475_v52, 0.0 }
 0x680   : > { %v8197_v21 = vpop.f32.mrf.mxu2 }
 0x681   : > { %v8198_v17 = vadd.f32 %v8197_v21, %v8184_v11 }
 0x682   : > { %v8211_v4 = vpop.f32.mrf.mxu3 }
 0x683   : > { %v8212_v13 = vadd.f32 %v8211_v4, %v8198_v17 }
 0x685   : > { %v8491_v42 = vadd.f32 %v8443_v60, %v8212_v13 }
 0x687   : > { %v8523_v41 = vmax.f32 %v8491_v42, 0.0 }
 0x68e   : > { %v8223_v2 = vpop.f32.mrf.mxu0 }
 0x690   : > { %v8237_v34 = vpop.f32.mrf.mxu1 }
 0x691   : > { %v8238_v45 = vadd.f32 %v8237_v34, %v8223_v2 }
 0x696   : > { %v8225_v49 = vpop.f32.mrf.mxu0 }
 0x698   : > { %v8251_v48 = vpop.f32.mrf.mxu2  ;;  %v8239_v19 = vpop.f32.mrf.mxu1 }
 0x699   : > { %v8252_v56 = vadd.f32 %v8251_v48, %v8238_v45  ;;  %v8240_v47 = vadd.f32 %v8239_v19, %v8225_v49 }
 0x69a   : > { %v8265_v30 = vpop.f32.mrf.mxu3 }
 0x69b   : > { %v8266_v63 = vadd.f32 %v8265_v30, %v8252_v56 }
 0x6a0   : > { %v8253_v43 = vpop.f32.mrf.mxu2 }
 0x6a1   : > { %v8254_v3 = vadd.f32 %v8253_v43, %v8240_v47 }
 0x6a2   : > { %v8267_v12 = vpop.f32.mrf.mxu3 }
 0x6a3   : > { %v8268_v7 = vadd.f32 %v8267_v12, %v8254_v3 }
 0x6c9   : > { %v8279_v57 = vpop.f32.mrf.mxu0 }
 0x6ca   : > { %v8280_v24 = vadd.f32 %v8279_v57, %v8266_v63 }
 0x6cb   : > { %v8293_v29 = vpop.f32.mrf.mxu1 }
 0x6cc   : > { %v8294_v40 = vadd.f32 %v8293_v29, %v8280_v24 }
 0x6d1   : > { %v8281_v35 = vpop.f32.mrf.mxu0 }
 0x6d2   : > { %v8282_v14 = vadd.f32 %v8281_v35, %v8268_v7 }
 0x6d3   : > { %v8307_v18 = vpop.f32.mrf.mxu2  ;;  %v8295_v37 = vpop.f32.mrf.mxu1 }
 0x6d4   : > { %v8308_v1 = vadd.f32 %v8307_v18, %v8294_v40  ;;  %v8296_v36 = vadd.f32 %v8295_v37, %v8282_v14 }
 0x6d5   : > { %v8321_v50 = vpop.f32.mrf.mxu3 }
 0x6d6   : > { %v8322_v58 = vadd.f32 %v8321_v50, %v8308_v1 }
 0x6d8   : > { %v8476_v46 = vadd.f32 %v8444_v26, %v8322_v58 }
 0x6da   : > { %v8508_v62 = vmax.f32 %v8476_v46, 0.0 }
 0x6db   : > { %v8309_v55 = vpop.f32.mrf.mxu2 }
 0x6dc   : > { %v8532_v59 = vpack.c.bf16 %v8508_v62, %v8507_v10  ;;  %v8310_v0 = vadd.f32 %v8309_v55, %v8296_v36 }
 0x6dd   : > { %v8323_v16 = vpop.f32.mrf.mxu3 }
 0x6de   : > { %8548 = vst [vmem:[%s15004_s20 + $0x38] sm:$0xff] %v8532_v59  ;;  %v8324_v9 = vadd.f32 %v8323_v16, %v8310_v0 }
 0x6e0   : > { %v8492_v32 = vadd.f32 %v8444_v26, %v8324_v9 }
 0x6e2   : > { %v8524_v20 = vmax.f32 %v8492_v32, 0.0 }
 0x6e4   : > { %v8540_v28 = vpack.c.bf16 %v8524_v20, %v8523_v41 }
 0x6e6   : > { %8556 = vst [vmem:[%s15004_s20 + $0x78] sm:$0xff] %v8540_v28 }
 0x6e7   : > { %14081 = shalt.err (!%p14078_p13)
}
 0x6e8   : > { %s14148_s29 = smov 1024   ;;  %s14149_s6 = smov 2048  }
 0x6e9   : > { %s14150_s1 = smov 64  }
 0x6ea   : > { %13881 = dma.vmem_to_hbm [thread:$0]  (%p14261_p0), %s8571_s8, 2048, %s8573_s9, %s8558_s15, %s14148_s29, %s14149_s6, %s14150_s1  }
 0x6eb PF: > { %s8587_s7 = sand.u32 1, %s14120_s12   ;;  %p13895_p4 = pnand %p8695_p3, %p14265_p2 }
 0x6ec   : > { %s8588_s11 = scalar_lea.sflag [#allocation5], %s8587_s7 }
 0x6ed   : > { %p13896_p5 = pneg %p13895_p4 }
 0x6ef   : > { %14115 = dma.done.wait (%p13896_p5), %s8588_s11, 2048  }
 0x6f0   : > { %14117 = vsyncadd (%p13896_p5), %s8588_s11, 4294965248  ;;  %s20_s17 = sadd.s32 1, %s14140_s17   ;;  %s16999_s12 = smov %s14124_s13 }
 0x6f1   : > { %p17_p1 = scmp.ge.s32.totalorder %s20_s17, 4   ;;  %s17000_s13 = smov %s14128_s14 }
 0x6f2   : > { %s17001_s14 = smov %s14223_s25  ;;  %s17002_s15 = smov %s14136_s16 }
 0x6f3   : > { %s17003_s16 = smov %s17005_s18  ;;  %19 = sbr.rel (!%p17_p1) target bundleno = 10 (0xa), region = 102 }
 0x6f8   :  { %8594 = vsyncpa [#allocation4], 1 }
 0x6f9   :  { %8596 = vsyncpa [#allocation4 + $0x1], 1 }
 0x6fa   :  { %8597 = vsyncpa [#allocation7], 1 }
 0x6fb   :  { %8599 = vsyncpa [#allocation7 + $0x1], 1 }
 0x6fc   :  { %8600 = vsyncpa [#allocation5], 1 }
 0x6fd   :  { %8602 = vsyncpa [#allocation5 + $0x1], 1 }

</bundles_post_ra>
